<compile_context>
chip_gen: v7x
topology: tpu7x:2x2x1
jax: 0.10.0
libtpu: 0.0.40
codegen_flags: <defaults>
</compile_context>

<pallas_src>
import functools
import math

import jax
import jax.numpy as jnp
import numpy as np
from jax.experimental import pallas as pl
from jax.experimental.pallas import tpu as pltpu

LN_EPS = 1e-5


# ---------------------------------------------------------------------------
# Compiler params helpers
# ---------------------------------------------------------------------------
@functools.lru_cache(maxsize=None)
def _vmem_limit_bytes():
    """Per-generation scoped-VMEM limit: ~3/4 of physical VMEM, capped.

    v5e/v6e (128 MiB) -> 96 MiB, v7x (64 MiB) -> 48 MiB.  Falls back to a
    conservative 48 MiB if the hardware query is unavailable.
    """
    cap = None
    try:
        info_fn = getattr(pltpu, "get_tpu_info", None)
        if info_fn is not None:
            cap = int(getattr(info_fn(), "vmem_capacity_bytes", 0)) or None
    except Exception:
        cap = None
    if cap is None:
        return 48 * 1024 * 1024
    return int(min(cap - cap // 4, 100 * 1024 * 1024))


def _compiler_params(semantics):
    return pltpu.CompilerParams(dimension_semantics=semantics,
                                vmem_limit_bytes=_vmem_limit_bytes())


def _row_tile(rows, block_rows):
    """Row-tile size: multiple of 8 sublanes and, when possible, at least two
    grid steps so a 2-TensorCore chip (v7x) can shard the 'parallel' axis."""
    if rows <= 8:
        return rows
    tm = min(block_rows, rows)
    half = ((pl.cdiv(rows, 2) + 7) // 8) * 8
    return max(8, min(tm, half))


# ---------------------------------------------------------------------------
# Kernels
# ---------------------------------------------------------------------------
def _ln_qkv_kernel(x_ref, g_ref, b_ref, w_ref, bias_ref, o_ref):
    # LayerNorm statistics in f32; MXU operands stay in the input dtype.
    x = x_ref[...].astype(jnp.float32)
    mu = jnp.mean(x, axis=-1, keepdims=True)
    xc = x - mu
    var = jnp.mean(xc * xc, axis=-1, keepdims=True)
    xn = xc * jax.lax.rsqrt(var + LN_EPS)
    xn = xn * g_ref[...].astype(jnp.float32) + b_ref[...].astype(jnp.float32)
    xn = xn.astype(x_ref.dtype)
    # Single fused (D, 3D) QKV matmul (one weight latch / DMA per tile).
    y = jnp.dot(xn, w_ref[...], preferred_element_type=jnp.float32)
    o_ref[...] = (y + bias_ref[...].astype(jnp.float32)).astype(o_ref.dtype)


def _linear_kernel(x_ref, w_ref, b_ref, o_ref):
    y = jnp.dot(x_ref[...], w_ref[...], preferred_element_type=jnp.float32)
    o_ref[...] = (y + b_ref[...].astype(jnp.float32)).astype(o_ref.dtype)


def _relative_shift(pos_sc, row, col):
    """Exact Transformer-XL relative shift (identical to the PyTorch
    pad + view trick) in O(S^2):
      rolled[i, j]    = pos_sc[i, (j - i - 1) mod S]   (strided lane roll)
      rolled_up[i, :] = rolled[(i + 1) mod S, :]       (sublane roll)
      out[i, j] = rolled[i, j]      for j <= i
                = 0                 for j == i + 1
                = rolled_up[i, j]   for j >  i + 1
    Both rolls run on the XLU (separate VLIW slot) -> effectively free.
    """
    s = pos_sc.shape[-1]
    rolled = pltpu.roll(pos_sc, shift=1, axis=1, stride=1, stride_axis=0)
    rolled_up = pltpu.roll(rolled, shift=s - 1, axis=0)
    zero = jnp.zeros((), pos_sc.dtype)
    return jnp.where(col <= row, rolled,
                     jnp.where(col == row + 1, zero, rolled_up))


def _rel_attn_kernel(q_ref, k_ref, v_ref, p_ref, u_ref, vb_ref, o_ref, *,
                     scale, heads, dh):
    s = q_ref.shape[1]
    # scale folded into q / u / vb (S x dh multiplies instead of S x S).
    qf = q_ref[0].astype(jnp.float32) * scale        # (S, heads*dh)
    k = k_ref[0]                                     # (S, heads*dh), in dtype
    v = v_ref[0]
    p = p_ref[...]
    u = u_ref[0].astype(jnp.float32) * scale         # (heads, dh)
    vb = vb_ref[0].astype(jnp.float32) * scale

    row = jax.lax.broadcasted_iota(jnp.int32, (s, s), 0)
    col = jax.lax.broadcasted_iota(jnp.int32, (s, s), 1)
    nt = (((1,), (1,)), ((), ()))                    # A @ B^T (contract dh)

    parts = []
    for h in range(heads):                           # tiny static unroll
        lo, hi = h * dh, (h + 1) * dh
        q_h = qf[:, lo:hi]
        k_h = k[:, lo:hi]
        v_h = v[:, lo:hi]
        p_h = p[:, lo:hi]
        qu = (q_h + u[h:h + 1, :]).astype(k_h.dtype)
        qv = (q_h + vb[h:h + 1, :]).astype(p_h.dtype)

        content = jax.lax.dot_general(qu, k_h, nt,
                                      preferred_element_type=jnp.float32)
        pos_sc = jax.lax.dot_general(qv, p_h, nt,
                                     preferred_element_type=jnp.float32)
        pos_sc = _relative_shift(pos_sc, row, col)

        score = content + pos_sc                     # already scaled
        score = score - jnp.max(score, axis=-1, keepdims=True)
        e = jnp.exp(score)
        denom = jnp.sum(e, axis=-1, keepdims=True)
        attn = e * pl.reciprocal(denom, approx=True)   # EUP divide
        # TODO(synk): training-mode attention dropout and the optional boolean
        # mask argument are not emitted (eval path, mask=None).
        parts.append(jnp.dot(attn.astype(v_h.dtype), v_h,
                             preferred_element_type=jnp.float32))
    ctx = parts[0] if len(parts) == 1 else jnp.concatenate(parts, axis=-1)
    o_ref[0] = ctx.astype(o_ref.dtype)               # lane-dense (S, >=128)


# ---------------------------------------------------------------------------
# pallas_call wrappers
# ---------------------------------------------------------------------------
def _ln_qkv(x2d, gamma, beta, w_qkv, b_qkv, block_rows):
    rows, d = x2d.shape
    d3 = w_qkv.shape[1]
    tm = _row_tile(rows, block_rows)
    grid = (pl.cdiv(rows, tm),)
    isz = x2d.dtype.itemsize
    cost = pl.CostEstimate(
        flops=int(2 * rows * d * d3 + 10 * rows * d),
        transcendentals=int(rows),
        bytes_accessed=int(isz * (rows * d + rows * d3) + 4 * (d * d3 + d3 + 2 * d)))
    return pl.pallas_call(
        _ln_qkv_kernel,
        out_shape=jax.ShapeDtypeStruct((rows, d3), x2d.dtype),
        grid_spec=pltpu.PrefetchScalarGridSpec(
            num_scalar_prefetch=0,
            grid=grid,
            in_specs=[
                pl.BlockSpec((tm, d), lambda i: (i, 0)),
                pl.BlockSpec((1, d), lambda i: (0, 0)),
                pl.BlockSpec((1, d), lambda i: (0, 0)),
                pl.BlockSpec((d, d3), lambda i: (0, 0)),
                pl.BlockSpec((1, d3), lambda i: (0, 0)),
            ],
            out_specs=pl.BlockSpec((tm, d3), lambda i: (i, 0)),
        ),
        compiler_params=_compiler_params(("parallel",)),
        cost_estimate=cost,
    )(x2d, gamma, beta, w_qkv, b_qkv)


def _linear(x2d, w, b, block_rows):
    rows, din = x2d.shape
    dout = w.shape[1]
    tm = _row_tile(rows, block_rows)
    grid = (pl.cdiv(rows, tm),)
    isz = x2d.dtype.itemsize
    cost = pl.CostEstimate(
        flops=int(2 * rows * din * dout),
        transcendentals=0,
        bytes_accessed=int(isz * (rows * din + rows * dout) + 4 * (din * dout + dout)))
    return pl.pallas_call(
        _linear_kernel,
        out_shape=jax.ShapeDtypeStruct((rows, dout), x2d.dtype),
        grid_spec=pltpu.PrefetchScalarGridSpec(
            num_scalar_prefetch=0,
            grid=grid,
            in_specs=[
                pl.BlockSpec((tm, din), lambda i: (i, 0)),
                pl.BlockSpec((din, dout), lambda i: (0, 0)),
                pl.BlockSpec((1, dout), lambda i: (0, 0)),
            ],
            out_specs=pl.BlockSpec((tm, dout), lambda i: (i, 0)),
        ),
        compiler_params=_compiler_params(("parallel",)),
        cost_estimate=cost,
    )(x2d, w, b)


def _rel_attention(qkv3d, p2d, u3, vb3, *, scale, hb, dh):
    b, s, d3 = qkv3d.shape
    d = d3 // 3
    slab = hb * dh
    ng = d // slab                 # number of head groups
    h = ng * hb
    isz = qkv3d.dtype.itemsize
    cost = pl.CostEstimate(
        flops=int(b * h * (6 * s * s * dh + 8 * s * s)),
        transcendentals=int(b * h * (s * s + s)),
        bytes_accessed=int(isz * (4 * b * s * d + s * d) + 4 * 2 * h * dh))
    kernel = functools.partial(_rel_attn_kernel, scale=scale, heads=hb, dh=dh)
    # TODO(synk): for long sequences, tile over the KV axis with an online
    # softmax (flash style) so the (S, S) score never materializes in VMEM.
    return pl.pallas_call(
        kernel,
        out_shape=jax.ShapeDtypeStruct((b, s, d), qkv3d.dtype),
        grid_spec=pltpu.PrefetchScalarGridSpec(
            num_scalar_prefetch=0,
            # head-group outermost, batch innermost: the per-group positional
            # slab and u/v bias blocks keep the same block index across the
            # inner batch loop, so Pallas elides their re-DMA.
            grid=(ng, b),
            in_specs=[
                pl.BlockSpec((1, s, slab), lambda g, bi: (bi, 0, g)),
                pl.BlockSpec((1, s, slab), lambda g, bi: (bi, 0, ng + g)),
                pl.BlockSpec((1, s, slab), lambda g, bi: (bi, 0, 2 * ng + g)),
                pl.BlockSpec((s, slab), lambda g, bi: (0, g)),
                pl.BlockSpec((1, hb, dh), lambda g, bi: (g, 0, 0)),
                pl.BlockSpec((1, hb, dh), lambda g, bi: (g, 0, 0)),
            ],
            out_specs=pl.BlockSpec((1, s, slab), lambda g, bi: (bi, 0, g)),
        ),
        compiler_params=_compiler_params(("parallel", "parallel")),
        cost_estimate=cost,
    )(qkv3d, qkv3d, qkv3d, p2d, u3, vb3)


@functools.partial(jax.jit, static_argnames=("num_heads", "block_rows"))
def multi_headed_self_attention(x, pos_table, params, *, num_heads,
                                block_rows=512):
    """x: (B, S, D).  pos_table: (1, max_seq_len, D) sinusoid table."""
    b, s, d = x.shape
    assert d % num_heads == 0
    dh = d // num_heads
    rows = b * s

    # Heads per attention grid step: hb*dh must be a multiple of 128 so every
    # attention block (and the context store) is lane-dense.
    hb = 1
    if dh < 128 and 128 % dh == 0:
        hb = min(num_heads, 128 // dh)
        while num_heads % hb:
            hb -= 1
    if (hb * dh) % 128 != 0:
        # TODO(synk): support head dims whose slabs are not 128-lane multiples
        # (needs per-head masked stores like the previous version).
        raise ValueError(f"unsupported head_dim={dh} / num_heads={num_heads}")

    x2d = x.reshape(rows, d)
    pos = pos_table[0, :s, :].astype(x.dtype)

    # Fused (D, 3D) QKV weight/bias: one MXU weight latch, one weight DMA.
    w_qkv = jnp.concatenate([params["wq"], params["wk"], params["wv"]], axis=1)
    b_qkv = jnp.concatenate([params["bq"], params["bk"], params["bv"]], axis=1)

    # 1) fused LayerNorm + QKV projection (row-tiled, lane-dense output).
    qkv2d = _ln_qkv(x2d, params["ln_gamma"], params["ln_beta"],
                    w_qkv, b_qkv, block_rows)
    qkv3d = qkv2d.reshape(b, s, 3 * d)          # free reshape, no transpose

    # 2) positional projection (bias-free Linear).
    p2d = _linear(pos, params["wp"], jnp.zeros((1, d), x.dtype), block_rows)

    u3 = params["u_bias"].reshape(num_heads // hb, hb, dh)
    vb3 = params["v_bias"].reshape(num_heads // hb, hb, dh)

    # 3) relative-position attention; heads are column slabs selected by
    #    BlockSpec, context comes back directly in (B, S, D) layout.
    ctx = _rel_attention(qkv3d, p2d, u3, vb3,
                         scale=1.0 / math.sqrt(d), hb=hb, dh=dh)

    # 4) output projection.
    out2d = _linear(ctx.reshape(rows, d), params["wo"], params["bo"], block_rows)

    # TODO(synk): final nn.Dropout is identity (eval / inference mode).
    return out2d.reshape(b, s, d)


# ---------------------------------------------------------------------------
# Reference (pure JAX, mirrors the PyTorch forward exactly) and demo
# ---------------------------------------------------------------------------
def get_sinusoid_encoding_table(n_position, d_model):
    pos = np.arange(n_position, dtype=np.float32)[:, None]
    idx = np.arange(d_model, dtype=np.float32)[None, :]
    angle = pos / np.power(10000.0, 2.0 * np.floor(idx / 2.0) / d_model)
    table = np.zeros((n_position, d_model), dtype=np.float32)
    table[:, 0::2] = np.sin(angle[:, 0::2])
    table[:, 1::2] = np.cos(angle[:, 1::2])
    return jnp.asarray(table)[None, :, :]


def _reference_relative_shift(ps):
    b, h, s1, s2 = ps.shape
    zeros = jnp.zeros((b, h, s1, 1), ps.dtype)
    padded = jnp.concatenate([zeros, ps], axis=-1).reshape(b, h, s2 + 1, s1)
    return padded[:, :, 1:].reshape(b, h, s1, s2)


def reference_forward(x, pos_table, params, num_heads):
    b, s, d = x.shape
    h, dh = num_heads, d // num_heads
    hi = jax.lax.Precision.HIGHEST
    xf = x.astype(jnp.float32)
    mu = jnp.mean(xf, -1, keepdims=True)
    var = jnp.mean((xf - mu) ** 2, -1, keepdims=True)
    xn = (xf - mu) * jax.lax.rsqrt(var + LN_EPS) * params["ln_gamma"] + params["ln_beta"]
    pos = pos_table[0, :s].astype(jnp.float32)

    q = jnp.dot(xn, params["wq"], precision=hi) + params["bq"]
    k = jnp.dot(xn, params["wk"], precision=hi) + params["bk"]
    v = jnp.dot(xn, params["wv"], precision=hi) + params["bv"]
    p = jnp.dot(pos, params["wp"], precision=hi)

    q4 = q.reshape(b, s, h, dh)
    k4 = k.reshape(b, s, h, dh).transpose(0, 2, 1, 3)
    v4 = v.reshape(b, s, h, dh).transpose(0, 2, 1, 3)
    p4 = jnp.broadcast_to(p.reshape(1, s, h, dh), (b, s, h, dh)).transpose(0, 2, 3, 1)

    content = jnp.einsum("bshd,bhtd->bhst", q4 + params["u_bias"], k4, precision=hi)
    pos_sc = jnp.einsum("bshd,bhdt->bhst", q4 + params["v_bias"], p4, precision=hi)
    pos_sc = _reference_relative_shift(pos_sc)
    score = (content + pos_sc) / math.sqrt(d)
    attn = jax.nn.softmax(score, axis=-1)
    ctx = jnp.einsum("bhst,bhtd->bshd", attn, v4, precision=hi).reshape(b, s, d)
    out = jnp.dot(ctx, params["wo"], precision=hi) + params["bo"]
    return out.astype(x.dtype)


if __name__ == "__main__":
    B, S, D, H = 2, 128, 256, 4
    MAX_SEQ = 256
    dh = D // H

    key = jax.random.PRNGKey(0)
    keys = jax.random.split(key, 13)

    def xavier(k, fan_in, fan_out, shape=None):
        bound = math.sqrt(6.0 / (fan_in + fan_out))
        shape = (fan_in, fan_out) if shape is None else shape
        return jax.random.uniform(k, shape, jnp.float32, -bound, bound)

    x = jax.random.normal(keys[0], (B, S, D), jnp.float32)
    pos_table = get_sinusoid_encoding_table(MAX_SEQ, D)

    params = {
        "ln_gamma": jnp.ones((1, D), jnp.float32),
        "ln_beta": jnp.zeros((1, D), jnp.float32),
        "wq": xavier(keys[1], D, D),
        "bq": 0.05 * jax.random.normal(keys[2], (1, D), jnp.float32),
        "wk": xavier(keys[3], D, D),
        "bk": 0.05 * jax.random.normal(keys[4], (1, D), jnp.float32),
        "wv": xavier(keys[5], D, D),
        "bv": 0.05 * jax.random.normal(keys[6], (1, D), jnp.float32),
        "wp": xavier(keys[7], D, D),
        "u_bias": xavier(keys[8], H, dh, shape=(H, dh)),
        "v_bias": xavier(keys[9], H, dh, shape=(H, dh)),
        "wo": xavier(keys[10], D, D),
        "bo": 0.05 * jax.random.normal(keys[11], (1, D), jnp.float32),
    }

    out = multi_headed_self_attention(x, pos_table, params, num_heads=H)
    out = jax.block_until_ready(out)

    ref = reference_forward(x, pos_table, params, H)
    assert out.shape == (B, S, D)
    err = float(jnp.max(jnp.abs(out.astype(jnp.float32) - ref.astype(jnp.float32))))
    assert err < 5e-3, f"max abs error {err}"
    print("KERNEL_OK")
</pallas_src>

<mosaic_0001>
module attributes {stable_mosaic.version = 11 : i64} {
  func.func @_ln_qkv_kernel(%arg0: i32, %arg1: memref<128x256xf32, #tpu.memory_space<vmem>>, %arg2: memref<1x256xf32, #tpu.memory_space<vmem>>, %arg3: memref<1x256xf32, #tpu.memory_space<vmem>>, %arg4: memref<256x768xf32, #tpu.memory_space<vmem>>, %arg5: memref<1x768xf32, #tpu.memory_space<vmem>>, %arg6: memref<128x768xf32, #tpu.memory_space<vmem>>) attributes {dimension_semantics = [#tpu.dimension_semantics<parallel>], iteration_bounds = array<i64: 2>, scalar_prefetch = 0 : i64, scratch_operands = 0 : i64, tpu.core_type = #tpu.core_type<tc>, window_params = [{transform_indices = @transform_0, window_bounds = array<i64: 128, 256>}, {pipeline_mode = #tpu.pipeline_mode<synchronous>, transform_indices = @transform_1, window_bounds = array<i64: 1, 256>}, {pipeline_mode = #tpu.pipeline_mode<synchronous>, transform_indices = @transform_2, window_bounds = array<i64: 1, 256>}, {pipeline_mode = #tpu.pipeline_mode<synchronous>, transform_indices = @transform_3, window_bounds = array<i64: 256, 768>}, {pipeline_mode = #tpu.pipeline_mode<synchronous>, transform_indices = @transform_4, window_bounds = array<i64: 1, 768>}, {transform_indices = @transform_5, window_bounds = array<i64: 128, 768>}]} {
    %c0 = arith.constant 0 : index
    %c0_0 = arith.constant 0 : index
    %0 = vector.load %arg1[%c0, %c0_0] : memref<128x256xf32, #tpu.memory_space<vmem>>, vector<128x256xf32>
    %cst = arith.constant dense<0.000000e+00> : vector<128xf32>
    %1 = vector.multi_reduction <add>, %0, %cst [1] : vector<128x256xf32> to vector<128xf32>
    %2 = vector.shape_cast %1 : vector<128xf32> to vector<128x1xf32>
    %cst_1 = arith.constant 2.560000e+02 : f32
    %3 = vector.broadcast %cst_1 : f32 to vector<128x1xf32>
    %4 = arith.divf %2, %3 : vector<128x1xf32>
    %5 = vector.broadcast %4 : vector<128x1xf32> to vector<128x256xf32>
    %6 = arith.subf %0, %5 : vector<128x256xf32>
    %7 = arith.mulf %6, %6 : vector<128x256xf32>
    %cst_2 = arith.constant dense<0.000000e+00> : vector<128xf32>
    %8 = vector.multi_reduction <add>, %7, %cst_2 [1] : vector<128x256xf32> to vector<128xf32>
    %9 = vector.shape_cast %8 : vector<128xf32> to vector<128x1xf32>
    %cst_3 = arith.constant 2.560000e+02 : f32
    %10 = vector.broadcast %cst_3 : f32 to vector<128x1xf32>
    %11 = arith.divf %9, %10 : vector<128x1xf32>
    %cst_4 = arith.constant 9.99999974E-6 : f32
    %12 = vector.broadcast %cst_4 : f32 to vector<128x1xf32>
    %13 = arith.addf %11, %12 : vector<128x1xf32>
    %14 = math.rsqrt %13 : vector<128x1xf32>
    %15 = vector.broadcast %14 : vector<128x1xf32> to vector<128x256xf32>
    %16 = arith.mulf %6, %15 : vector<128x256xf32>
    %c0_5 = arith.constant 0 : index
    %c0_6 = arith.constant 0 : index
    %17 = vector.load %arg2[%c0_5, %c0_6] : memref<1x256xf32, #tpu.memory_space<vmem>>, vector<1x256xf32>
    %18 = vector.broadcast %17 : vector<1x256xf32> to vector<128x256xf32>
    %19 = arith.mulf %16, %18 : vector<128x256xf32>
    %c0_7 = arith.constant 0 : index
    %c0_8 = arith.constant 0 : index
    %20 = vector.load %arg3[%c0_7, %c0_8] : memref<1x256xf32, #tpu.memory_space<vmem>>, vector<1x256xf32>
    %21 = vector.broadcast %20 : vector<1x256xf32> to vector<128x256xf32>
    %22 = arith.addf %19, %21 : vector<128x256xf32>
    %c0_9 = arith.constant 0 : index
    %c0_10 = arith.constant 0 : index
    %23 = vector.load %arg4[%c0_9, %c0_10] : memref<256x768xf32, #tpu.memory_space<vmem>>, vector<256x768xf32>
    %cst_11 = arith.constant dense<0.000000e+00> : vector<128x768xf32>
    %24 = tpu.matmul %22, %23, %cst_11 {dimension_numbers = #tpu.dot_dimension_numbers<[1], [0], [0], [1], [0, 0, 1, 1], [], []>} : vector<128x256xf32>, vector<256x768xf32>, vector<128x768xf32> -> vector<128x768xf32>
    %c0_12 = arith.constant 0 : index
    %c0_13 = arith.constant 0 : index
    %25 = vector.load %arg5[%c0_12, %c0_13] : memref<1x768xf32, #tpu.memory_space<vmem>>, vector<1x768xf32>
    %26 = vector.broadcast %25 : vector<1x768xf32> to vector<128x768xf32>
    %27 = arith.addf %24, %26 : vector<128x768xf32>
    %c0_14 = arith.constant 0 : index
    %c0_15 = arith.constant 0 : index
    %28 = vector.load %arg6[%c0_14, %c0_15] : memref<128x768xf32, #tpu.memory_space<vmem>>, vector<128x768xf32>
    tpu.vector_store %arg6[%c0_14, %c0_15], %27 {strides = array<i32>} : memref<128x768xf32, #tpu.memory_space<vmem>>, vector<128x768xf32>,
    return
  }
  func.func @transform_0(%arg0: i32) -> (i32, i32) {
    %c0_i32 = arith.constant 0 : i32
    %c0_i32_0 = arith.constant 0 : i32
    return %arg0, %c0_i32 : i32, i32
  }
  func.func @transform_1(%arg0: i32) -> (i32, i32) {
    %c0_i32 = arith.constant 0 : i32
    %c0_i32_0 = arith.constant 0 : i32
    %c0_i32_1 = arith.constant 0 : i32
    return %c0_i32, %c0_i32_0 : i32, i32
  }
  func.func @transform_2(%arg0: i32) -> (i32, i32) {
    %c0_i32 = arith.constant 0 : i32
    %c0_i32_0 = arith.constant 0 : i32
    %c0_i32_1 = arith.constant 0 : i32
    return %c0_i32, %c0_i32_0 : i32, i32
  }
  func.func @transform_3(%arg0: i32) -> (i32, i32) {
    %c0_i32 = arith.constant 0 : i32
    %c0_i32_0 = arith.constant 0 : i32
    %c0_i32_1 = arith.constant 0 : i32
    return %c0_i32, %c0_i32_0 : i32, i32
  }
  func.func @transform_4(%arg0: i32) -> (i32, i32) {
    %c0_i32 = arith.constant 0 : i32
    %c0_i32_0 = arith.constant 0 : i32
    %c0_i32_1 = arith.constant 0 : i32
    return %c0_i32, %c0_i32_0 : i32, i32
  }
  func.func @transform_5(%arg0: i32) -> (i32, i32) {
    %c0_i32 = arith.constant 0 : i32
    %c0_i32_0 = arith.constant 0 : i32
    return %arg0, %c0_i32 : i32, i32
  }
}

module attributes {stable_mosaic.version = 11 : i64} {
  func.func @_linear_kernel(%arg0: i32, %arg1: memref<64x256xf32, #tpu.memory_space<vmem>>, %arg2: memref<256x256xf32, #tpu.memory_space<vmem>>, %arg3: memref<1x256xf32, #tpu.memory_space<vmem>>, %arg4: memref<64x256xf32, #tpu.memory_space<vmem>>) attributes {dimension_semantics = [#tpu.dimension_semantics<parallel>], iteration_bounds = array<i64: 2>, scalar_prefetch = 0 : i64, scratch_operands = 0 : i64, tpu.core_type = #tpu.core_type<tc>, window_params = [{transform_indices = @transform_0, window_bounds = array<i64: 64, 256>}, {pipeline_mode = #tpu.pipeline_mode<synchronous>, transform_indices = @transform_1, window_bounds = array<i64: 256, 256>}, {pipeline_mode = #tpu.pipeline_mode<synchronous>, transform_indices = @transform_2, window_bounds = array<i64: 1, 256>}, {transform_indices = @transform_3, window_bounds = array<i64: 64, 256>}]} {
    %c0 = arith.constant 0 : index
    %c0_0 = arith.constant 0 : index
    %0 = vector.load %arg1[%c0, %c0_0] : memref<64x256xf32, #tpu.memory_space<vmem>>, vector<64x256xf32>
    %c0_1 = arith.constant 0 : index
    %c0_2 = arith.constant 0 : index
    %1 = vector.load %arg2[%c0_1, %c0_2] : memref<256x256xf32, #tpu.memory_space<vmem>>, vector<256x256xf32>
    %cst = arith.constant dense<0.000000e+00> : vector<64x256xf32>
    %2 = tpu.matmul %0, %1, %cst {dimension_numbers = #tpu.dot_dimension_numbers<[1], [0], [0], [1], [0, 0, 1, 1], [], []>} : vector<64x256xf32>, vector<256x256xf32>, vector<64x256xf32> -> vector<64x256xf32>
    %c0_3 = arith.constant 0 : index
    %c0_4 = arith.constant 0 : index
    %3 = vector.load %arg3[%c0_3, %c0_4] : memref<1x256xf32, #tpu.memory_space<vmem>>, vector<1x256xf32>
    %4 = vector.broadcast %3 : vector<1x256xf32> to vector<64x256xf32>
    %5 = arith.addf %2, %4 : vector<64x256xf32>
    %c0_5 = arith.constant 0 : index
    %c0_6 = arith.constant 0 : index
    %6 = vector.load %arg4[%c0_5, %c0_6] : memref<64x256xf32, #tpu.memory_space<vmem>>, vector<64x256xf32>
    tpu.vector_store %arg4[%c0_5, %c0_6], %5 {strides = array<i32>} : memref<64x256xf32, #tpu.memory_space<vmem>>, vector<64x256xf32>,
    return
  }
  func.func @transform_0(%arg0: i32) -> (i32, i32) {
    %c0_i32 = arith.constant 0 : i32
    %c0_i32_0 = arith.constant 0 : i32
    return %arg0, %c0_i32 : i32, i32
  }
  func.func @transform_1(%arg0: i32) -> (i32, i32) {
    %c0_i32 = arith.constant 0 : i32
    %c0_i32_0 = arith.constant 0 : i32
    %c0_i32_1 = arith.constant 0 : i32
    return %c0_i32, %c0_i32_0 : i32, i32
  }
  func.func @transform_2(%arg0: i32) -> (i32, i32) {
    %c0_i32 = arith.constant 0 : i32
    %c0_i32_0 = arith.constant 0 : i32
    %c0_i32_1 = arith.constant 0 : i32
    return %c0_i32, %c0_i32_0 : i32, i32
  }
  func.func @transform_3(%arg0: i32) -> (i32, i32) {
    %c0_i32 = arith.constant 0 : i32
    %c0_i32_0 = arith.constant 0 : i32
    return %arg0, %c0_i32 : i32, i32
  }
}

module attributes {stable_mosaic.version = 11 : i64} {
  func.func @_linear_kernel(%arg0: i32, %arg1: memref<128x256xf32, #tpu.memory_space<vmem>>, %arg2: memref<256x256xf32, #tpu.memory_space<vmem>>, %arg3: memref<1x256xf32, #tpu.memory_space<vmem>>, %arg4: memref<128x256xf32, #tpu.memory_space<vmem>>) attributes {dimension_semantics = [#tpu.dimension_semantics<parallel>], iteration_bounds = array<i64: 2>, scalar_prefetch = 0 : i64, scratch_operands = 0 : i64, tpu.core_type = #tpu.core_type<tc>, window_params = [{transform_indices = @transform_0, window_bounds = array<i64: 128, 256>}, {pipeline_mode = #tpu.pipeline_mode<synchronous>, transform_indices = @transform_1, window_bounds = array<i64: 256, 256>}, {pipeline_mode = #tpu.pipeline_mode<synchronous>, transform_indices = @transform_2, window_bounds = array<i64: 1, 256>}, {transform_indices = @transform_3, window_bounds = array<i64: 128, 256>}]} {
    %c0 = arith.constant 0 : index
    %c0_0 = arith.constant 0 : index
    %0 = vector.load %arg1[%c0, %c0_0] : memref<128x256xf32, #tpu.memory_space<vmem>>, vector<128x256xf32>
    %c0_1 = arith.constant 0 : index
    %c0_2 = arith.constant 0 : index
    %1 = vector.load %arg2[%c0_1, %c0_2] : memref<256x256xf32, #tpu.memory_space<vmem>>, vector<256x256xf32>
    %cst = arith.constant dense<0.000000e+00> : vector<128x256xf32>
    %2 = tpu.matmul %0, %1, %cst {dimension_numbers = #tpu.dot_dimension_numbers<[1], [0], [0], [1], [0, 0, 1, 1], [], []>} : vector<128x256xf32>, vector<256x256xf32>, vector<128x256xf32> -> vector<128x256xf32>
    %c0_3 = arith.constant 0 : index
    %c0_4 = arith.constant 0 : index
    %3 = vector.load %arg3[%c0_3, %c0_4] : memref<1x256xf32, #tpu.memory_space<vmem>>, vector<1x256xf32>
    %4 = vector.broadcast %3 : vector<1x256xf32> to vector<128x256xf32>
    %5 = arith.addf %2, %4 : vector<128x256xf32>
    %c0_5 = arith.constant 0 : index
    %c0_6 = arith.constant 0 : index
    %6 = vector.load %arg4[%c0_5, %c0_6] : memref<128x256xf32, #tpu.memory_space<vmem>>, vector<128x256xf32>
    tpu.vector_store %arg4[%c0_5, %c0_6], %5 {strides = array<i32>} : memref<128x256xf32, #tpu.memory_space<vmem>>, vector<128x256xf32>,
    return
  }
  func.func @transform_0(%arg0: i32) -> (i32, i32) {
    %c0_i32 = arith.constant 0 : i32
    %c0_i32_0 = arith.constant 0 : i32
    return %arg0, %c0_i32 : i32, i32
  }
  func.func @transform_1(%arg0: i32) -> (i32, i32) {
    %c0_i32 = arith.constant 0 : i32
    %c0_i32_0 = arith.constant 0 : i32
    %c0_i32_1 = arith.constant 0 : i32
    return %c0_i32, %c0_i32_0 : i32, i32
  }
  func.func @transform_2(%arg0: i32) -> (i32, i32) {
    %c0_i32 = arith.constant 0 : i32
    %c0_i32_0 = arith.constant 0 : i32
    %c0_i32_1 = arith.constant 0 : i32
    return %c0_i32, %c0_i32_0 : i32, i32
  }
  func.func @transform_3(%arg0: i32) -> (i32, i32) {
    %c0_i32 = arith.constant 0 : i32
    %c0_i32_0 = arith.constant 0 : i32
    return %arg0, %c0_i32 : i32, i32
  }
}

module attributes {stable_mosaic.version = 11 : i64} {
  func.func @_rel_attn_kernel(%arg0: i32, %arg1: i32, %arg2: memref<1x128x128xf32, #tpu.memory_space<vmem>>, %arg3: memref<1x128x128xf32, #tpu.memory_space<vmem>>, %arg4: memref<1x128x128xf32, #tpu.memory_space<vmem>>, %arg5: memref<128x128xf32, #tpu.memory_space<vmem>>, %arg6: memref<1x2x64xf32, #tpu.memory_space<vmem>>, %arg7: memref<1x2x64xf32, #tpu.memory_space<vmem>>, %arg8: memref<1x128x128xf32, #tpu.memory_space<vmem>>) attributes {dimension_semantics = [#tpu.dimension_semantics<parallel>, #tpu.dimension_semantics<parallel>], iteration_bounds = array<i64: 2, 2>, scalar_prefetch = 0 : i64, scratch_operands = 0 : i64, tpu.core_type = #tpu.core_type<tc>, window_params = [{transform_indices = @transform_0, window_bounds = array<i64: 1, 128, 128>}, {transform_indices = @transform_1, window_bounds = array<i64: 1, 128, 128>}, {transform_indices = @transform_2, window_bounds = array<i64: 1, 128, 128>}, {transform_indices = @transform_3, window_bounds = array<i64: 128, 128>}, {transform_indices = @transform_4, window_bounds = array<i64: 1, 2, 64>}, {transform_indices = @transform_5, window_bounds = array<i64: 1, 2, 64>}, {transform_indices = @transform_6, window_bounds = array<i64: 1, 128, 128>}]} {
    %c0 = arith.constant 0 : index
    %c0_0 = arith.constant 0 : index
    %c0_1 = arith.constant 0 : index
    %0 = vector.load %arg2[%c0, %c0_0, %c0_1] : memref<1x128x128xf32, #tpu.memory_space<vmem>>, vector<1x128x128xf32>
    %1 = vector.shape_cast %0 : vector<1x128x128xf32> to vector<128x128xf32>
    %cst = arith.constant 6.250000e-02 : f32
    %2 = vector.broadcast %cst : f32 to vector<128x128xf32>
    %3 = arith.mulf %1, %2 : vector<128x128xf32>
    %c0_2 = arith.constant 0 : index
    %c0_3 = arith.constant 0 : index
    %c0_4 = arith.constant 0 : index
    %4 = vector.load %arg3[%c0_2, %c0_3, %c0_4] : memref<1x128x128xf32, #tpu.memory_space<vmem>>, vector<1x128x128xf32>
    %5 = vector.shape_cast %4 : vector<1x128x128xf32> to vector<128x128xf32>
    %c0_5 = arith.constant 0 : index
    %c0_6 = arith.constant 0 : index
    %c0_7 = arith.constant 0 : index
    %6 = vector.load %arg4[%c0_5, %c0_6, %c0_7] : memref<1x128x128xf32, #tpu.memory_space<vmem>>, vector<1x128x128xf32>
    %7 = vector.shape_cast %6 : vector<1x128x128xf32> to vector<128x128xf32>
    %c0_8 = arith.constant 0 : index
    %c0_9 = arith.constant 0 : index
    %8 = vector.load %arg5[%c0_8, %c0_9] : memref<128x128xf32, #tpu.memory_space<vmem>>, vector<128x128xf32>
    %c0_10 = arith.constant 0 : index
    %c0_11 = arith.constant 0 : index
    %c0_12 = arith.constant 0 : index
    %9 = vector.load %arg6[%c0_10, %c0_11, %c0_12] : memref<1x2x64xf32, #tpu.memory_space<vmem>>, vector<1x2x64xf32>
    %10 = vector.shape_cast %9 : vector<1x2x64xf32> to vector<2x64xf32>
    %cst_13 = arith.constant 6.250000e-02 : f32
    %11 = vector.broadcast %cst_13 : f32 to vector<2x64xf32>
    %12 = arith.mulf %10, %11 : vector<2x64xf32>
    %c0_14 = arith.constant 0 : index
    %c0_15 = arith.constant 0 : index
    %c0_16 = arith.constant 0 : index
    %13 = vector.load %arg7[%c0_14, %c0_15, %c0_16] : memref<1x2x64xf32, #tpu.memory_space<vmem>>, vector<1x2x64xf32>
    %14 = vector.shape_cast %13 : vector<1x2x64xf32> to vector<2x64xf32>
    %cst_17 = arith.constant 6.250000e-02 : f32
    %15 = vector.broadcast %cst_17 : f32 to vector<2x64xf32>
    %16 = arith.mulf %14, %15 : vector<2x64xf32>
    %17 = tpu.iota {dimensions = array<i32: 0>} : vector<128x128xi32>
    %18 = tpu.iota {dimensions = array<i32: 1>} : vector<128x128xi32>
    %19 = vector.extract_strided_slice %3 {offsets = [0, 0], sizes = [128, 64], strides = [1, 1]} : vector<128x128xf32> to vector<128x64xf32>
    %20 = vector.extract_strided_slice %5 {offsets = [0, 0], sizes = [128, 64], strides = [1, 1]} : vector<128x128xf32> to vector<128x64xf32>
    %21 = vector.extract_strided_slice %7 {offsets = [0, 0], sizes = [128, 64], strides = [1, 1]} : vector<128x128xf32> to vector<128x64xf32>
    %22 = vector.extract_strided_slice %8 {offsets = [0, 0], sizes = [128, 64], strides = [1, 1]} : vector<128x128xf32> to vector<128x64xf32>
    %23 = vector.extract_strided_slice %12 {offsets = [0, 0], sizes = [1, 64], strides = [1, 1]} : vector<2x64xf32> to vector<1x64xf32>
    %24 = vector.broadcast %23 : vector<1x64xf32> to vector<128x64xf32>
    %25 = arith.addf %19, %24 : vector<128x64xf32>
    %26 = vector.extract_strided_slice %16 {offsets = [0, 0], sizes = [1, 64], strides = [1, 1]} : vector<2x64xf32> to vector<1x64xf32>
    %27 = vector.broadcast %26 : vector<1x64xf32> to vector<128x64xf32>
    %28 = arith.addf %19, %27 : vector<128x64xf32>
    %cst_18 = arith.constant dense<0.000000e+00> : vector<128x128xf32>
    %29 = tpu.matmul %25, %20, %cst_18 {dimension_numbers = #tpu.dot_dimension_numbers<[1], [1], [0], [0], [0, 0, 1, 0], [], []>} : vector<128x64xf32>, vector<128x64xf32>, vector<128x128xf32> -> vector<128x128xf32>
    %cst_19 = arith.constant dense<0.000000e+00> : vector<128x128xf32>
    %30 = tpu.matmul %28, %22, %cst_19 {dimension_numbers = #tpu.dot_dimension_numbers<[1], [1], [0], [0], [0, 0, 1, 0], [], []>} : vector<128x64xf32>, vector<128x64xf32>, vector<128x128xf32> -> vector<128x128xf32>
    %c1_i32 = arith.constant 1 : i32
    %31 = tpu.dynamic_rotate %30 by %c1_i32 dim 1 {stride = 1 : si32, stride_dimension = 0 : si32} : vector<128x128xf32>, i32 -> vector<128x128xf32>
    %c127_i32 = arith.constant 127 : i32
    %32 = tpu.dynamic_rotate %31 by %c127_i32 dim 0 : vector<128x128xf32>, i32 -> vector<128x128xf32>
    %33 = arith.cmpi sle, %18, %17 : vector<128x128xi32>
    %c1_i32_20 = arith.constant 1 : i32
    %34 = vector.broadcast %c1_i32_20 : i32 to vector<128x128xi32>
    %35 = arith.addi %17, %34 : vector<128x128xi32>
    %36 = arith.cmpi eq, %18, %35 : vector<128x128xi32>
    %cst_21 = arith.constant 0.000000e+00 : f32
    %37 = vector.broadcast %cst_21 : f32 to vector<128x128xf32>
    %38 = arith.select %36, %37, %32 : vector<128x128xi1>, vector<128x128xf32>
    %39 = arith.select %33, %31, %38 : vector<128x128xi1>, vector<128x128xf32>
    %40 = arith.addf %29, %39 : vector<128x128xf32>
    %cst_22 = arith.constant dense<0xFF800000> : vector<128xf32>
    %41 = vector.multi_reduction <maximumf>, %40, %cst_22 [1] : vector<128x128xf32> to vector<128xf32>
    %42 = vector.shape_cast %41 : vector<128xf32> to vector<128x1xf32>
    %43 = vector.broadcast %42 : vector<128x1xf32> to vector<128x128xf32>
    %44 = arith.subf %40, %43 : vector<128x128xf32>
    %45 = math.exp %44 : vector<128x128xf32>
    %cst_23 = arith.constant dense<0.000000e+00> : vector<128xf32>
    %46 = vector.multi_reduction <add>, %45, %cst_23 [1] : vector<128x128xf32> to vector<128xf32>
    %47 = vector.shape_cast %46 : vector<128xf32> to vector<128x1xf32>
    %48 = tpu.reciprocal %47 {approx = true} : vector<128x1xf32> -> vector<128x1xf32>
    %49 = vector.broadcast %48 : vector<128x1xf32> to vector<128x128xf32>
    %50 = arith.mulf %45, %49 : vector<128x128xf32>
    %cst_24 = arith.constant dense<0.000000e+00> : vector<128x64xf32>
    %51 = tpu.matmul %50, %21, %cst_24 {dimension_numbers = #tpu.dot_dimension_numbers<[1], [0], [0], [1], [0, 0, 1, 1], [], []>} : vector<128x128xf32>, vector<128x64xf32>, vector<128x64xf32> -> vector<128x64xf32>
    %52 = vector.extract_strided_slice %3 {offsets = [0, 64], sizes = [128, 64], strides = [1, 1]} : vector<128x128xf32> to vector<128x64xf32>
    %53 = vector.extract_strided_slice %5 {offsets = [0, 64], sizes = [128, 64], strides = [1, 1]} : vector<128x128xf32> to vector<128x64xf32>
    %54 = vector.extract_strided_slice %7 {offsets = [0, 64], sizes = [128, 64], strides = [1, 1]} : vector<128x128xf32> to vector<128x64xf32>
    %55 = vector.extract_strided_slice %8 {offsets = [0, 64], sizes = [128, 64], strides = [1, 1]} : vector<128x128xf32> to vector<128x64xf32>
    %56 = vector.extract_strided_slice %12 {offsets = [1, 0], sizes = [1, 64], strides = [1, 1]} : vector<2x64xf32> to vector<1x64xf32>
    %57 = vector.broadcast %56 : vector<1x64xf32> to vector<128x64xf32>
    %58 = arith.addf %52, %57 : vector<128x64xf32>
    %59 = vector.extract_strided_slice %16 {offsets = [1, 0], sizes = [1, 64], strides = [1, 1]} : vector<2x64xf32> to vector<1x64xf32>
    %60 = vector.broadcast %59 : vector<1x64xf32> to vector<128x64xf32>
    %61 = arith.addf %52, %60 : vector<128x64xf32>
    %cst_25 = arith.constant dense<0.000000e+00> : vector<128x128xf32>
    %62 = tpu.matmul %58, %53, %cst_25 {dimension_numbers = #tpu.dot_dimension_numbers<[1], [1], [0], [0], [0, 0, 1, 0], [], []>} : vector<128x64xf32>, vector<128x64xf32>, vector<128x128xf32> -> vector<128x128xf32>
    %cst_26 = arith.constant dense<0.000000e+00> : vector<128x128xf32>
    %63 = tpu.matmul %61, %55, %cst_26 {dimension_numbers = #tpu.dot_dimension_numbers<[1], [1], [0], [0], [0, 0, 1, 0], [], []>} : vector<128x64xf32>, vector<128x64xf32>, vector<128x128xf32> -> vector<128x128xf32>
    %c1_i32_27 = arith.constant 1 : i32
    %64 = tpu.dynamic_rotate %63 by %c1_i32_27 dim 1 {stride = 1 : si32, stride_dimension = 0 : si32} : vector<128x128xf32>, i32 -> vector<128x128xf32>
    %c127_i32_28 = arith.constant 127 : i32
    %65 = tpu.dynamic_rotate %64 by %c127_i32_28 dim 0 : vector<128x128xf32>, i32 -> vector<128x128xf32>
    %66 = arith.cmpi sle, %18, %17 : vector<128x128xi32>
    %c1_i32_29 = arith.constant 1 : i32
    %67 = vector.broadcast %c1_i32_29 : i32 to vector<128x128xi32>
    %68 = arith.addi %17, %67 : vector<128x128xi32>
    %69 = arith.cmpi eq, %18, %68 : vector<128x128xi32>
    %cst_30 = arith.constant 0.000000e+00 : f32
    %70 = vector.broadcast %cst_30 : f32 to vector<128x128xf32>
    %71 = arith.select %69, %70, %65 : vector<128x128xi1>, vector<128x128xf32>
    %72 = arith.select %66, %64, %71 : vector<128x128xi1>, vector<128x128xf32>
    %73 = arith.addf %62, %72 : vector<128x128xf32>
    %cst_31 = arith.constant dense<0xFF800000> : vector<128xf32>
    %74 = vector.multi_reduction <maximumf>, %73, %cst_31 [1] : vector<128x128xf32> to vector<128xf32>
    %75 = vector.shape_cast %74 : vector<128xf32> to vector<128x1xf32>
    %76 = vector.broadcast %75 : vector<128x1xf32> to vector<128x128xf32>
    %77 = arith.subf %73, %76 : vector<128x128xf32>
    %78 = math.exp %77 : vector<128x128xf32>
    %cst_32 = arith.constant dense<0.000000e+00> : vector<128xf32>
    %79 = vector.multi_reduction <add>, %78, %cst_32 [1] : vector<128x128xf32> to vector<128xf32>
    %80 = vector.shape_cast %79 : vector<128xf32> to vector<128x1xf32>
    %81 = tpu.reciprocal %80 {approx = true} : vector<128x1xf32> -> vector<128x1xf32>
    %82 = vector.broadcast %81 : vector<128x1xf32> to vector<128x128xf32>
    %83 = arith.mulf %78, %82 : vector<128x128xf32>
    %cst_33 = arith.constant dense<0.000000e+00> : vector<128x64xf32>
    %84 = tpu.matmul %83, %54, %cst_33 {dimension_numbers = #tpu.dot_dimension_numbers<[1], [0], [0], [1], [0, 0, 1, 1], [], []>} : vector<128x128xf32>, vector<128x64xf32>, vector<128x64xf32> -> vector<128x64xf32>
    %85 = tpu.concatenate %51, %84 in 1 : vector<128x64xf32>, vector<128x64xf32> -> vector<128x128xf32>
    %c0_34 = arith.constant 0 : index
    %c0_35 = arith.constant 0 : index
    %c0_36 = arith.constant 0 : index
    %86 = vector.load %arg8[%c0_34, %c0_35, %c0_36] : memref<1x128x128xf32, #tpu.memory_space<vmem>>, vector<1x128x128xf32>
    %87 = vector.shape_cast %86 : vector<1x128x128xf32> to vector<128x128xf32>
    %88 = vector.shape_cast %85 : vector<128x128xf32> to vector<1x128x128xf32>
    tpu.vector_store %arg8[%c0_34, %c0_35, %c0_36], %88 {strides = array<i32>} : memref<1x128x128xf32, #tpu.memory_space<vmem>>, vector<1x128x128xf32>,
    return
  }
  func.func @transform_0(%arg0: i32, %arg1: i32) -> (i32, i32, i32) {
    %c0_i32 = arith.constant 0 : i32
    %c0_i32_0 = arith.constant 0 : i32
    return %arg1, %c0_i32, %arg0 : i32, i32, i32
  }
  func.func @transform_1(%arg0: i32, %arg1: i32) -> (i32, i32, i32) {
    %c2_i32 = arith.constant 2 : i32
    %0 = arith.addi %c2_i32, %arg0 : i32
    %c0_i32 = arith.constant 0 : i32
    %c0_i32_0 = arith.constant 0 : i32
    return %arg1, %c0_i32, %0 : i32, i32, i32
  }
  func.func @transform_2(%arg0: i32, %arg1: i32) -> (i32, i32, i32) {
    %c4_i32 = arith.constant 4 : i32
    %0 = arith.addi %c4_i32, %arg0 : i32
    %c0_i32 = arith.constant 0 : i32
    %c0_i32_0 = arith.constant 0 : i32
    return %arg1, %c0_i32, %0 : i32, i32, i32
  }
  func.func @transform_3(%arg0: i32, %arg1: i32) -> (i32, i32) {
    %c0_i32 = arith.constant 0 : i32
    %c0_i32_0 = arith.constant 0 : i32
    return %c0_i32, %arg0 : i32, i32
  }
  func.func @transform_4(%arg0: i32, %arg1: i32) -> (i32, i32, i32) {
    %c0_i32 = arith.constant 0 : i32
    %c0_i32_0 = arith.constant 0 : i32
    %c0_i32_1 = arith.constant 0 : i32
    return %arg0, %c0_i32, %c0_i32_0 : i32, i32, i32
  }
  func.func @transform_5(%arg0: i32, %arg1: i32) -> (i32, i32, i32) {
    %c0_i32 = arith.constant 0 : i32
    %c0_i32_0 = arith.constant 0 : i32
    %c0_i32_1 = arith.constant 0 : i32
    return %arg0, %c0_i32, %c0_i32_0 : i32, i32, i32
  }
  func.func @transform_6(%arg0: i32, %arg1: i32) -> (i32, i32, i32) {
    %c0_i32 = arith.constant 0 : i32
    %c0_i32_0 = arith.constant 0 : i32
    return %arg1, %c0_i32, %arg0 : i32, i32, i32
  }
}

</mosaic_0001>

<bundles_post_ra>
// kernel: multi_headed_self_attention.5
= control target key start
LH: loop header
LB: loop body
LE: loop exit
PB: predicated region body
PF: predicated region fallthrough
CT: control target
= control target key end

     0   :  { %s605_s12 = smov 0   ;;  %s860_s0 = inlined_call_operand.vmem [shape: f32[128,256], index: 0, kind: input, shape index: {}]   ;;  %s861_s1 = inlined_call_operand.vmem [shape: f32[256,256], index: 1, kind: input, shape index: {}]   ;;  %s862_s2 = inlined_call_operand.vmem [shape: f32[1,256], index: 2, kind: input, shape index: {}]   ;;  %s863_s3 = inlined_call_operand.vmem [shape: f32[128,256], index: 3, kind: output, shape index: {}]  }
   0x1 LB: > { %s458_s13 = sadd.s32 4294967295, %s583_s12   ;;  %p462_p0 = scmp.ge.s32.totalorder %s583_s12, 1  ;;  %s583_s12 = sphi %s605_s12, %s13_s12  }
   0x2   : > { %p139_p1 = scmp.lt.s32.totalorder %s583_s12, 3 }
   0x4   : > { %p140_p2 = pnand %p462_p0, %p139_p1 }
   0x5   : > { %v196_v0 = vld [vmem:[%s861_s1 + $0x8] sm:$0xff] (!%p140_p2)  ;;  %v198_v1 = vld [vmem:[%s861_s1 + $0x18] sm:$0xff] (!%p140_p2)  ;;  %v195_v2 = vld [vmem:[%s861_s1] sm:$0xff] (!%p140_p2)  ;;  %s463_s7 = sshll.u32 (!%p140_p2), %s458_s13, 3 }
   0x6   : > { %143 = sbr.rel (%p140_p2) target bundleno = 300 (0x12c), region = 32  ;;  %v473_v3 = vpack.c.bf16 (!%p140_p2), %v198_v1, %v196_v0  ;;  %v197_v4 = vld [vmem:[%s861_s1 + $0x10] sm:$0xff] (!%p140_p2)  ;;  %v200_v5 = vld [vmem:[%s861_s1 + $0x28] sm:$0xff] (!%p140_p2)  ;;  %v202_v6 = vld [vmem:[%s861_s1 + $0x38] sm:$0xff] (!%p140_p2)  ;;  %p166_p3 = scmp.lt.s32.totalorder (!%p140_p2), %s463_s7, 15 }
   0x7   : > { %v475_v7 = vpack.c.bf16 (!%p140_p2), %v197_v4, %v195_v2  ;;  %v477_v8 = vpack.c.bf16 (!%p140_p2), %v202_v6, %v200_v5  ;;  %v199_v9 = vld [vmem:[%s861_s1 + $0x20] sm:$0xff] (!%p140_p2)  ;;  %v201_v10 = vld [vmem:[%s861_s1 + $0x30] sm:$0xff] (!%p140_p2)  ;;  %v204_v11 = vld [vmem:[%s861_s1 + $0x48] sm:$0xff] (!%p140_p2) }
   0x8   : > { %474 = vmatprep.subr.bf16.mxu0 (!%p140_p2), %v473_v3  ;;  %537 = vmatprep.subr.bf16.mxu1 (!%p140_p2), %v473_v3  ;;  %v206_v12 = vld [vmem:[%s861_s1 + $0x58] sm:$0xff] (!%p140_p2)  ;;  %v479_v13 = vpack.c.bf16 (!%p140_p2), %v201_v10, %v199_v9  ;;  %v203_v15 = vld [vmem:[%s861_s1 + $0x40] sm:$0xff] (!%p140_p2)  ;;  %v205_v16 = vld [vmem:[%s861_s1 + $0x50] sm:$0xff] (!%p140_p2) }
   0x9   : > { %476 = vmatpush1.bf16.msra.mxu0 (!%p140_p2), %v475_v7  ;;  %553 = vmatpush1.bf16.msra.mxu1 (!%p140_p2), %v475_v7  ;;  %v481_v14 = vpack.c.bf16 (!%p140_p2), %v206_v12, %v204_v11  ;;  %v208_v17 = vld [vmem:[%s861_s1 + $0x68] sm:$0xff] (!%p140_p2)  ;;  %v210_v18 = vld [vmem:[%s861_s1 + $0x78] sm:$0xff] (!%p140_p2)  ;;  %v483_v19 = vpack.c.bf16 (!%p140_p2), %v205_v16, %v203_v15  ;;  %v207_v21 = vld [vmem:[%s861_s1 + $0x60] sm:$0xff] (!%p140_p2) }
   0xa   : > { %478 = vmatprep.subr.bf16.mxu0 (!%p140_p2), %v477_v8  ;;  %538 = vmatprep.subr.bf16.mxu1 (!%p140_p2), %v477_v8  ;;  %v485_v20 = vpack.c.bf16 (!%p140_p2), %v210_v18, %v208_v17  ;;  %v209_v22 = vld [vmem:[%s861_s1 + $0x70] sm:$0xff] (!%p140_p2)  ;;  %v212_v23 = vld [vmem:[%s861_s1 + $0x88] sm:$0xff] (!%p140_p2)  ;;  %v214_v24 = vld [vmem:[%s861_s1 + $0x98] sm:$0xff] (!%p140_p2) }
   0xb   : > { %v487_v25 = vpack.c.bf16 (!%p140_p2), %v209_v22, %v207_v21  ;;  %v489_v26 = vpack.c.bf16 (!%p140_p2), %v214_v24, %v212_v23  ;;  %v211_v27 = vld [vmem:[%s861_s1 + $0x80] sm:$0xff] (!%p140_p2)  ;;  %v213_v28 = vld [vmem:[%s861_s1 + $0x90] sm:$0xff] (!%p140_p2)  ;;  %v216_v29 = vld [vmem:[%s861_s1 + $0xa8] sm:$0xff] (!%p140_p2) }
   0xc   : > { %v218_v30 = vld [vmem:[%s861_s1 + $0xb8] sm:$0xff] (!%p140_p2)  ;;  %v491_v31 = vpack.c.bf16 (!%p140_p2), %v213_v28, %v211_v27  ;;  %v215_v33 = vld [vmem:[%s861_s1 + $0xa0] sm:$0xff] (!%p140_p2)  ;;  %v217_v34 = vld [vmem:[%s861_s1 + $0xb0] sm:$0xff] (!%p140_p2) }
   0xd   : > { %480 = vmatpush1.bf16.msra.mxu0 %v479_v13  ;;  %554 = vmatpush1.bf16.msra.mxu1 %v479_v13  ;;  %s865_s7 = smov (!%p166_p3, %s463_s7), 15  ;;  %v493_v32 = vpack.c.bf16 %v218_v30, %v216_v29  ;;  %v220_v35 = vld [vmem:[%s861_s1 + $0xc8] sm:$0xff]  ;;  %v222_v36 = vld [vmem:[%s861_s1 + $0xd8] sm:$0xff]  ;;  %v495_v37 = vpack.c.bf16 %v217_v34, %v215_v33  ;;  %v219_v38 = vld [vmem:[%s861_s1 + $0xc0] sm:$0xff] }
   0xe   : > { %482 = vmatprep.subr.bf16.mxu0 %v481_v14  ;;  %539 = vmatprep.subr.bf16.mxu1 %v481_v14  ;;  %s471_s6 = sshll.u32 %s865_s7, 4  ;;  %v497_v39 = vpack.c.bf16 %v222_v36, %v220_v35  ;;  %v221_v40 = vld [vmem:[%s861_s1 + $0xd0] sm:$0xff]  ;;  %v224_v43 = vld [vmem:[%s861_s1 + $0xe8] sm:$0xff]  ;;  %v226_v44 = vld [vmem:[%s861_s1 + $0xf8] sm:$0xff] }
   0xf   : > { %s699_s19 = scalar_lea.vmem %s860_s0, %s471_s6  ;;  %v499_v45 = vpack.c.bf16 %v221_v40, %v219_v38  ;;  %v501_v46 = vpack.c.bf16 %v226_v44, %v224_v43  ;;  %v223_v47 = vld [vmem:[%s861_s1 + $0xe0] sm:$0xff]  ;;  %v225_v48 = vld [vmem:[%s861_s1 + $0xf0] sm:$0xff]  ;;  %v228_v49 = vld [vmem:[%s861_s1 + $0x108] sm:$0xff]  ;;  %s839_s4 = scalar_lea.vmem %s863_s3, %s471_s6 }
  0x10   : > { %v180_v41 = vld [vmem:[%s699_s19 + $0x8] sm:$0xff]  ;;  %v230_v50 = vld [vmem:[%s861_s1 + $0x118] sm:$0xff]  ;;  %v503_v51 = vpack.c.bf16 %v225_v48, %v223_v47  ;;  %v227_v53 = vld [vmem:[%s861_s1 + $0x100] sm:$0xff]  ;;  %v261_v48 = vlaneseq }
  0x11   : > { %484 = vmatpush1.bf16.msra.mxu0 %v483_v19  ;;  %555 = vmatpush1.bf16.msra.mxu1 %v483_v19  ;;  %v188_v42 = vld [vmem:[%s699_s19 + $0x48] sm:$0xff]  ;;  %v505_v52 = vpack.c.bf16 %v230_v50, %v228_v49  ;;  %v229_v54 = vld [vmem:[%s861_s1 + $0x110] sm:$0xff]  ;;  %v234_v56 = vld [vmem:[%s861_s1 + $0x138] sm:$0xff] }
  0x12   : > { %486 = vmatprep.subr.bf16.mxu0 %v485_v20  ;;  %540 = vmatprep.subr.bf16.mxu1 %v485_v20  ;;  %v232_v55 = vld [vmem:[%s861_s1 + $0x128] sm:$0xff]  ;;  %v507_v57 = vpack.c.bf16 %v229_v54, %v227_v53  ;;  %v231_v59 = vld [vmem:[%s861_s1 + $0x120] sm:$0xff]  ;;  %v233_v60 = vld [vmem:[%s861_s1 + $0x130] sm:$0xff]  ;;  %v262_v49 = vshrl.u32 %v261_v48, 7 }
  0x13   : > { %335 = vmatprep.mubr.f32.mxu0 %v180_v41  ;;  %359 = vmatprep.mubr.f32.mxu1 %v188_v42  ;;  %v509_v58 = vpack.c.bf16 %v234_v56, %v232_v55  ;;  %v236_v61 = vld [vmem:[%s861_s1 + $0x148] sm:$0xff]  ;;  %v238_v62 = vld [vmem:[%s861_s1 + $0x158] sm:$0xff]  ;;  %v511_v63 = vpack.c.bf16 %v233_v60, %v231_v59  ;;  %v235_v1 = vld [vmem:[%s861_s1 + $0x140] sm:$0xff] }
  0x14   : > { %v513_v0 = vpack.c.bf16 %v238_v62, %v236_v61  ;;  %v237_v2 = vld [vmem:[%s861_s1 + $0x150] sm:$0xff]  ;;  %v240_v3 = vld [vmem:[%s861_s1 + $0x168] sm:$0xff]  ;;  %v242_v4 = vld [vmem:[%s861_s1 + $0x178] sm:$0xff]  ;;  %v263_v50 = vsub.s32 0, %v262_v49 }
  0x15   : > { %488 = vmatpush1.bf16.msra.mxu0 %v487_v25  ;;  %556 = vmatpush1.bf16.msra.mxu1 %v487_v25  ;;  %v515_v5 = vpack.c.bf16 %v237_v2, %v235_v1  ;;  %v517_v6 = vpack.c.bf16 %v242_v4, %v240_v3  ;;  %v239_v7 = vld [vmem:[%s861_s1 + $0x160] sm:$0xff]  ;;  %v241_v8 = vld [vmem:[%s861_s1 + $0x170] sm:$0xff]  ;;  %v244_v9 = vld [vmem:[%s861_s1 + $0x188] sm:$0xff] }
  0x16   : > { %490 = vmatprep.subr.bf16.mxu0 %v489_v26  ;;  %541 = vmatprep.subr.bf16.mxu1 %v489_v26  ;;  %v246_v10 = vld [vmem:[%s861_s1 + $0x198] sm:$0xff]  ;;  %v519_v11 = vpack.c.bf16 %v241_v8, %v239_v7  ;;  %v243_v13 = vld [vmem:[%s861_s1 + $0x180] sm:$0xff]  ;;  %v245_v14 = vld [vmem:[%s861_s1 + $0x190] sm:$0xff] }
  0x17   : > { %v521_v12 = vpack.c.bf16 %v246_v10, %v244_v9  ;;  %v248_v15 = vld [vmem:[%s861_s1 + $0x1a8] sm:$0xff]  ;;  %v250_v16 = vld [vmem:[%s861_s1 + $0x1b8] sm:$0xff]  ;;  %v523_v17 = vpack.c.bf16 %v245_v14, %v243_v13  ;;  %v247_v19 = vld [vmem:[%s861_s1 + $0x1a0] sm:$0xff] }
  0x18   : > { %v525_v18 = vpack.c.bf16 %v250_v16, %v248_v15  ;;  %v249_v20 = vld [vmem:[%s861_s1 + $0x1b0] sm:$0xff]  ;;  %v252_v21 = vld [vmem:[%s861_s1 + $0x1c8] sm:$0xff]  ;;  %v254_v22 = vld [vmem:[%s861_s1 + $0x1d8] sm:$0xff] }
  0x19   : > { %492 = vmatpush1.bf16.msra.mxu0 %v491_v31  ;;  %557 = vmatpush1.bf16.msra.mxu1 %v491_v31  ;;  %v527_v23 = vpack.c.bf16 %v249_v20, %v247_v19  ;;  %v529_v24 = vpack.c.bf16 %v254_v22, %v252_v21  ;;  %v251_v25 = vld [vmem:[%s861_s1 + $0x1c0] sm:$0xff]  ;;  %v253_v26 = vld [vmem:[%s861_s1 + $0x1d0] sm:$0xff]  ;;  %v256_v27 = vld [vmem:[%s861_s1 + $0x1e8] sm:$0xff] }
  0x1a   : > { %494 = vmatprep.subr.bf16.mxu0 %v493_v32  ;;  %542 = vmatprep.subr.bf16.mxu1 %v493_v32  ;;  %v258_v28 = vld [vmem:[%s861_s1 + $0x1f8] sm:$0xff]  ;;  %v531_v29 = vpack.c.bf16 %v253_v26, %v251_v25  ;;  %v255_v31 = vld [vmem:[%s861_s1 + $0x1e0] sm:$0xff]  ;;  %v257_v32 = vld [vmem:[%s861_s1 + $0x1f0] sm:$0xff] }
  0x1b   : > { %v533_v30 = vpack.c.bf16 %v258_v28, %v256_v27  ;;  %v535_v33 = vpack.c.bf16 %v257_v32, %v255_v31  ;;  %v179_v34 = vld [vmem:[%s699_s19] sm:$0xff]  ;;  %v182_v36 = vld [vmem:[%s699_s19 + $0x18] sm:$0xff]  ;;  %v181_v38 = vld [vmem:[%s699_s19 + $0x10] sm:$0xff] }
  0x1c   : > { %v187_v35 = vld [vmem:[%s699_s19 + $0x40] sm:$0xff]  ;;  %v184_v40 = vld [vmem:[%s699_s19 + $0x28] sm:$0xff]  ;;  %v186_v44 = vld [vmem:[%s699_s19 + $0x38] sm:$0xff] }
  0x1d   : > { %496 = vmatpush1.bf16.msra.mxu0 %v495_v37  ;;  %558 = vmatpush1.bf16.msra.mxu1 %v495_v37  ;;  %v190_v37 = vld [vmem:[%s699_s19 + $0x58] sm:$0xff]  ;;  %v192_v41 = vld [vmem:[%s699_s19 + $0x68] sm:$0xff]  ;;  %v183_v42 = vld [vmem:[%s699_s19 + $0x20] sm:$0xff] }
  0x1e   : > { %498 = vmatprep.subr.bf16.mxu0 %v497_v39  ;;  %543 = vmatprep.subr.bf16.mxu1 %v497_v39  ;;  %v189_v39 = vld [vmem:[%s699_s19 + $0x50] sm:$0xff]  ;;  %v191_v43 = vld [vmem:[%s699_s19 + $0x60] sm:$0xff] }
  0x1f   : > { %v193_v47 = vld [vmem:[%s699_s19 + $0x70] sm:$0xff] }
  0x21   : > { %500 = vmatpush1.bf16.msra.mxu0 %v499_v45  ;;  %559 = vmatpush1.bf16.msra.mxu1 %v499_v45  ;;  %v194_v45 = vld [vmem:[%s699_s19 + $0x78] sm:$0xff] }
  0x22   : > { %502 = vmatprep.subr.bf16.mxu0 %v501_v46  ;;  %544 = vmatprep.subr.bf16.mxu1 %v501_v46  ;;  %v185_v46 = vld [vmem:[%s699_s19 + $0x30] sm:$0xff] }
  0x25   : > { %504 = vmatpush1.bf16.msra.mxu0 %v503_v51  ;;  %560 = vmatpush1.bf16.msra.mxu1 %v503_v51  ;;  %v259_v51 = vld [vmem:[%s862_s2] sm:$0x3] }
  0x26   : > { %506 = vmatprep.subr.bf16.mxu0 %v505_v52  ;;  %545 = vmatprep.subr.bf16.mxu1 %v505_v52  ;;  %v267_v52 = vsub.s32 1, %v262_v49  ;;  %v264_v53 = vrot.slane %v259_v51, %v263_v50 }
  0x28   : > { %v268_v54 = vrot.slane %v259_v51, %v267_v52 }
  0x29   : > { %508 = vmatpush1.bf16.msra.mxu0 %v507_v57  ;;  %561 = vmatpush1.bf16.msra.mxu1 %v507_v57 }
  0x2a   : > { %510 = vmatprep.subr.bf16.mxu0 %v509_v58  ;;  %546 = vmatprep.subr.bf16.mxu1 %v509_v58 }
  0x2d   : > { %512 = vmatpush1.bf16.msra.mxu0 %v511_v63  ;;  %562 = vmatpush1.bf16.msra.mxu1 %v511_v63 }
  0x2e   : > { %514 = vmatprep.subr.bf16.mxu0 %v513_v0  ;;  %547 = vmatprep.subr.bf16.mxu1 %v513_v0 }
  0x31   : > { %516 = vmatpush1.bf16.msra.mxu0 %v515_v5  ;;  %563 = vmatpush1.bf16.msra.mxu1 %v515_v5 }
  0x32   : > { %518 = vmatprep.subr.bf16.mxu0 %v517_v6  ;;  %548 = vmatprep.subr.bf16.mxu1 %v517_v6 }
  0x35   : > { %520 = vmatpush1.bf16.msra.mxu0 %v519_v11  ;;  %564 = vmatpush1.bf16.msra.mxu1 %v519_v11 }
  0x36   : > { %522 = vmatprep.subr.bf16.mxu0 %v521_v12  ;;  %549 = vmatprep.subr.bf16.mxu1 %v521_v12 }
  0x39   : > { %524 = vmatpush1.bf16.msra.mxu0 %v523_v17  ;;  %565 = vmatpush1.bf16.msra.mxu1 %v523_v17 }
  0x3a   : > { %526 = vmatprep.subr.bf16.mxu0 %v525_v18  ;;  %550 = vmatprep.subr.bf16.mxu1 %v525_v18 }
  0x3d   : > { %528 = vmatpush1.bf16.msra.mxu0 %v527_v23  ;;  %566 = vmatpush1.bf16.msra.mxu1 %v527_v23 }
  0x3e   : > { %530 = vmatprep.subr.bf16.mxu0 %v529_v24  ;;  %551 = vmatprep.subr.bf16.mxu1 %v529_v24 }
  0x41   : > { %532 = vmatpush1.bf16.msra.mxu0 %v531_v29  ;;  %567 = vmatpush1.bf16.msra.mxu1 %v531_v29 }
  0x42   : > { %534 = vmatprep.subr.bf16.mxu0 %v533_v30  ;;  %552 = vmatprep.subr.bf16.mxu1 %v533_v30 }
  0x45   : > { %536 = vmatpush1.bf16.msra.mxu0 %v535_v33  ;;  %568 = vmatpush1.bf16.msra.mxu1 %v535_v33 }
  0x48   : > { %336 = vmatmul.mubr.f32.vlgmr.msra.gmra.mrb[0].mxu0 %v179_v34  ;;  %360 = vmatmul.mubr.f32.vlgmr.msra.gmra.mrb[0].mxu1 %v187_v35 }
  0x49   : > { %341 = vmatprep.mubr.f32.mxu0 %v182_v36  ;;  %365 = vmatprep.mubr.f32.mxu1 %v190_v37 }
  0x4c   : > { %342 = vmatmul.mubr.f32.gmra.mrb[2].mxu0 %v181_v38  ;;  %366 = vmatmul.mubr.f32.gmra.mrb[2].mxu1 %v189_v39 }
  0x4d   : > { %347 = vmatprep.mubr.f32.mxu0 %v184_v40  ;;  %371 = vmatprep.mubr.f32.mxu1 %v192_v41 }
  0x50   : > { %348 = vmatmul.mubr.f32.gmra.mrb[4].mxu0 %v183_v42  ;;  %372 = vmatmul.mubr.f32.gmra.mrb[4].mxu1 %v191_v43 }
  0x51   : > { %353 = vmatprep.mubr.f32.mxu0 %v186_v44  ;;  %377 = vmatprep.mubr.f32.mxu1 %v194_v45 }
  0x54   : > { %354 = vmatmul.mubr.f32.gmra.mrb[6].mxu0 %v185_v46  ;;  %378 = vmatmul.mubr.f32.gmra.mrb[6].mxu1 %v193_v47 }
 0x11b   : > { %v337_v55 = vpop.f32.mrb[0].mxu0  ;;  %v361_v56 = vpop.f32.mrb[0].mxu1 }
 0x11c   : > { %v338_v57 = vadd.f32 %v337_v55, %v264_v53  ;;  %v362_v58 = vadd.f32 %v361_v56, %v264_v53  ;;  %v339_v59 = vpop.f32.mrb[1].mxu0  ;;  %v363_v60 = vpop.f32.mrb[1].mxu1 }
 0x11d   : > { %v340_v61 = vadd.f32 %v339_v59, %v268_v54  ;;  %v364_v62 = vadd.f32 %v363_v60, %v268_v54 }
 0x11e   : > { %384 = vst [vmem:[%s839_s4] sm:$0xff] %v338_v57  ;;  %392 = vst [vmem:[%s839_s4 + $0x40] sm:$0xff] %v362_v58 }
 0x11f   : > { %385 = vst [vmem:[%s839_s4 + $0x8] sm:$0xff] %v340_v61  ;;  %393 = vst [vmem:[%s839_s4 + $0x48] sm:$0xff] %v364_v62  ;;  %v343_v63 = vpop.f32.mrb[2].mxu0  ;;  %v367_v0 = vpop.f32.mrb[2].mxu1 }
 0x120   : > { %v344_v1 = vadd.f32 %v343_v63, %v264_v53  ;;  %v368_v2 = vadd.f32 %v367_v0, %v264_v53  ;;  %v345_v3 = vpop.f32.mrb[3].mxu0  ;;  %v369_v4 = vpop.f32.mrb[3].mxu1 }
 0x121   : > { %v346_v5 = vadd.f32 %v345_v3, %v268_v54  ;;  %v370_v6 = vadd.f32 %v369_v4, %v268_v54 }
 0x122   : > { %386 = vst [vmem:[%s839_s4 + $0x10] sm:$0xff] %v344_v1  ;;  %394 = vst [vmem:[%s839_s4 + $0x50] sm:$0xff] %v368_v2 }
 0x123   : > { %387 = vst [vmem:[%s839_s4 + $0x18] sm:$0xff] %v346_v5  ;;  %395 = vst [vmem:[%s839_s4 + $0x58] sm:$0xff] %v370_v6  ;;  %v349_v7 = vpop.f32.mrb[4].mxu0  ;;  %v373_v8 = vpop.f32.mrb[4].mxu1 }
 0x124   : > { %v350_v9 = vadd.f32 %v349_v7, %v264_v53  ;;  %v374_v10 = vadd.f32 %v373_v8, %v264_v53  ;;  %v351_v11 = vpop.f32.mrb[5].mxu0  ;;  %v375_v12 = vpop.f32.mrb[5].mxu1 }
 0x125   : > { %v352_v13 = vadd.f32 %v351_v11, %v268_v54  ;;  %v376_v14 = vadd.f32 %v375_v12, %v268_v54 }
 0x126   : > { %388 = vst [vmem:[%s839_s4 + $0x20] sm:$0xff] %v350_v9  ;;  %396 = vst [vmem:[%s839_s4 + $0x60] sm:$0xff] %v374_v10 }
 0x127   : > { %389 = vst [vmem:[%s839_s4 + $0x28] sm:$0xff] %v352_v13  ;;  %397 = vst [vmem:[%s839_s4 + $0x68] sm:$0xff] %v376_v14  ;;  %v355_v15 = vpop.f32.mrb[6].mxu0  ;;  %v379_v16 = vpop.f32.mrb[6].mxu1 }
 0x128   : > { %v356_v17 = vadd.f32 %v355_v15, %v264_v53  ;;  %v380_v18 = vadd.f32 %v379_v16, %v264_v53  ;;  %v357_v19 = vpop.f32.mrb[7].mxu0  ;;  %v381_v20 = vpop.f32.mrb[7].mxu1 }
 0x129   : > { %v358_v21 = vadd.f32 %v357_v19, %v268_v54  ;;  %v382_v22 = vadd.f32 %v381_v20, %v268_v54 }
 0x12a   : > { %390 = vst [vmem:[%s839_s4 + $0x30] sm:$0xff] %v356_v17  ;;  %398 = vst [vmem:[%s839_s4 + $0x70] sm:$0xff] %v380_v18 }
 0x12b   : > { %391 = vst [vmem:[%s839_s4 + $0x38] sm:$0xff] %v358_v21  ;;  %399 = vst [vmem:[%s839_s4 + $0x78] sm:$0xff] %v382_v22 }
 0x12c PF: > { %s13_s12 = sadd.s32 1, %s583_s12  }
 0x12d   : > { %p10_p4 = scmp.ge.s32.totalorder %s13_s12, 4  }
 0x12f   :  { %12 = sbr.rel (!%p10_p4) target bundleno = 1 (0x1), region = 62 }

// kernel: multi_headed_self_attention.7
= control target key start
LH: loop header
LB: loop body
LE: loop exit
PB: predicated region body
PF: predicated region fallthrough
CT: control target
= control target key end

     0   :  { %8 = vsyncpa [#allocation3], 0  ;;  %s1200_s0 = inlined_call_operand.vmem [shape: f32[256,256], index: 0, kind: input, shape index: {}]   ;;  %s1201_s1 = inlined_call_operand.vmem [shape: f32[256,256], index: 1, kind: input, shape index: {}]   ;;  %s1202_s2 = inlined_call_operand.vmem [shape: f32[1,256], index: 2, kind: input, shape index: {}]   ;;  %s1203_s3 = inlined_call_operand.hbm [shape: f32[256,256], index: 3, kind: output, shape index: {}]  }
   0x1   :  { %10 = vsyncpa [#allocation3 + $0x1], 0  ;;  %s794_s12 = smov 0   ;;  %s796_s13 = smov 0  }
   0x2   :  { %s798_s14 = smov 0   ;;  %s800_s15 = smov 0  }
   0x3 LB: > { %s815_s16 = sadd.s32 4294967295, %s769_s15   ;;  %s553_s17 = sadd.s32 4294967294, %s769_s15   ;;  %s769_s15 = sphi %s800_s15, %s1209_s15   ;;  %s765_s14 = sphi %s798_s14, %s1208_s14   ;;  %s761_s13 = sphi %s796_s13, %s1207_s13   ;;  %s757_s12 = sphi %s794_s12, %s1206_s12  }
   0x4   : > { %s819_s18 = sadd.s32 1, %s769_s15   ;;  %s91_s19 = sadd.s32 1, %s765_s14 }
   0x5   : > { %s88_s20 = ssub.s32 %s769_s15, %s819_s18  ;;  %p101_p0 = scmp.ne.s32.totalorder %s765_s14, %s761_s13 }
   0x6   : > { %p89_p1 = scmp.eq.s32.totalorder %s88_s20, 0  ;;  %p102_p2 = scmp.eq.s32.totalorder %s815_s16, 1 }
   0x7   : > { %p107_p3 = scmp.ne.s32.totalorder %s761_s13, %s757_s12  ;;  %p108_p4 = scmp.eq.s32.totalorder %s553_s17, 1 }
   0x8   : > { %s830_s21 = scalar_select %p89_p1, %s765_s14, %s91_s19  }
   0x9   : > { %p832_p5 = por %p102_p2, %p101_p0  ;;  %p836_p6 = por %p108_p4, %p107_p3 }
   0xa   : > { %p556_p7 = scmp.ge.s32.totalorder %s769_s15, 1  ;;  %p142_p8 = scmp.lt.s32.totalorder %s769_s15, 3 }
   0xc   : > { %p143_p9 = pnand %p556_p7, %p142_p8 }
   0xd   : > { %v208_v0 = vld [vmem:[%s1201_s1 + $0x8] sm:$0xff] (!%p143_p9)  ;;  %v210_v1 = vld [vmem:[%s1201_s1 + $0x18] sm:$0xff] (!%p143_p9)  ;;  %v207_v2 = vld [vmem:[%s1201_s1] sm:$0xff] (!%p143_p9)  ;;  %s558_s26 = sshll.u32 (!%p143_p9), %s815_s16, 4  ;;  %s164_s9 = sand.u32 (!%p143_p9), 1, %s761_s13  }
   0xe   : > { %146 = sbr.rel (%p143_p9) target bundleno = 338 (0x152), region = 32  ;;  %v570_v3 = vpack.c.bf16 (!%p143_p9), %v210_v1, %v208_v0  ;;  %v209_v4 = vld [vmem:[%s1201_s1 + $0x10] sm:$0xff] (!%p143_p9)  ;;  %v212_v5 = vld [vmem:[%s1201_s1 + $0x28] sm:$0xff] (!%p143_p9)  ;;  %v214_v6 = vld [vmem:[%s1201_s1 + $0x38] sm:$0xff] (!%p143_p9)  ;;  %p168_p10 = scmp.lt.s32.totalorder (!%p143_p9), %s558_s26, 31 }
   0xf   : > { %v572_v7 = vpack.c.bf16 (!%p143_p9), %v209_v4, %v207_v2  ;;  %v574_v8 = vpack.c.bf16 (!%p143_p9), %v214_v6, %v212_v5  ;;  %v211_v9 = vld [vmem:[%s1201_s1 + $0x20] sm:$0xff] (!%p143_p9)  ;;  %v213_v10 = vld [vmem:[%s1201_s1 + $0x30] sm:$0xff] (!%p143_p9)  ;;  %v216_v11 = vld [vmem:[%s1201_s1 + $0x48] sm:$0xff] (!%p143_p9)  ;;  %s557_s17 = sshll.u32 (!%p143_p9), %s164_s9, 8  ;;  %s569_s19 = sshll.u32 (!%p143_p9), %s815_s16, 12 }
  0x10   : > { %571 = vmatprep.subr.bf16.mxu0 (!%p143_p9), %v570_v3  ;;  %634 = vmatprep.subr.bf16.mxu1 (!%p143_p9), %v570_v3  ;;  %v218_v12 = vld [vmem:[%s1201_s1 + $0x58] sm:$0xff] (!%p143_p9)  ;;  %v576_v13 = vpack.c.bf16 (!%p143_p9), %v213_v10, %v211_v9  ;;  %v215_v15 = vld [vmem:[%s1201_s1 + $0x40] sm:$0xff] (!%p143_p9)  ;;  %v217_v16 = vld [vmem:[%s1201_s1 + $0x50] sm:$0xff] (!%p143_p9)  ;;  %s1147_s24 = scalar_lea.hbm (!%p143_p9), %s1203_s3, %s569_s19  ;;  %s1159_s25 = scalar_lea.sflag (!%p143_p9), [#allocation3], %s164_s9 }
  0x11   : > { %573 = vmatpush1.bf16.msra.mxu0 (!%p143_p9), %v572_v7  ;;  %650 = vmatpush1.bf16.msra.mxu1 (!%p143_p9), %v572_v7  ;;  %v578_v14 = vpack.c.bf16 (!%p143_p9), %v218_v12, %v216_v11  ;;  %v220_v17 = vld [vmem:[%s1201_s1 + $0x68] sm:$0xff] (!%p143_p9)  ;;  %v222_v18 = vld [vmem:[%s1201_s1 + $0x78] sm:$0xff] (!%p143_p9)  ;;  %v580_v19 = vpack.c.bf16 (!%p143_p9), %v217_v16, %v215_v15  ;;  %v219_v21 = vld [vmem:[%s1201_s1 + $0x60] sm:$0xff] (!%p143_p9)  ;;  %s771_s29 = smov (!%p143_p9), [#allocation2]  }
  0x12   : > { %575 = vmatprep.subr.bf16.mxu0 (!%p143_p9), %v574_v8  ;;  %635 = vmatprep.subr.bf16.mxu1 (!%p143_p9), %v574_v8  ;;  %v582_v20 = vpack.c.bf16 (!%p143_p9), %v222_v18, %v220_v17  ;;  %v221_v22 = vld [vmem:[%s1201_s1 + $0x70] sm:$0xff] (!%p143_p9)  ;;  %v224_v23 = vld [vmem:[%s1201_s1 + $0x88] sm:$0xff] (!%p143_p9)  ;;  %v226_v24 = vld [vmem:[%s1201_s1 + $0x98] sm:$0xff] (!%p143_p9)  ;;  %s711_s30 = sshll.u32 (!%p143_p9), %s771_s29, 4  ;;  %s712_s30 = int_to_ptr.vmem [resolvable:$false] %s711_s30 }
  0x13   : > { %v584_v25 = vpack.c.bf16 (!%p143_p9), %v221_v22, %v219_v21  ;;  %v586_v26 = vpack.c.bf16 (!%p143_p9), %v226_v24, %v224_v23  ;;  %v223_v27 = vld [vmem:[%s1201_s1 + $0x80] sm:$0xff] (!%p143_p9)  ;;  %v225_v28 = vld [vmem:[%s1201_s1 + $0x90] sm:$0xff] (!%p143_p9)  ;;  %v228_v29 = vld [vmem:[%s1201_s1 + $0xa8] sm:$0xff] (!%p143_p9)  ;;  %s713_s4 = scalar_lea.vmem (!%p143_p9), %s712_s30, 8192 }
  0x14   : > { %v230_v30 = vld [vmem:[%s1201_s1 + $0xb8] sm:$0xff] (!%p143_p9)  ;;  %v588_v31 = vpack.c.bf16 (!%p143_p9), %v225_v28, %v223_v27  ;;  %v227_v33 = vld [vmem:[%s1201_s1 + $0xa0] sm:$0xff] (!%p143_p9)  ;;  %v229_v34 = vld [vmem:[%s1201_s1 + $0xb0] sm:$0xff] (!%p143_p9) }
  0x15   : > { %577 = vmatpush1.bf16.msra.mxu0 %v576_v13  ;;  %651 = vmatpush1.bf16.msra.mxu1 %v576_v13  ;;  %s1211_s26 = smov (!%p168_p10, %s558_s26), 31  ;;  %v590_v32 = vpack.c.bf16 %v230_v30, %v228_v29  ;;  %v232_v35 = vld [vmem:[%s1201_s1 + $0xc8] sm:$0xff]  ;;  %v234_v36 = vld [vmem:[%s1201_s1 + $0xd8] sm:$0xff]  ;;  %v592_v37 = vpack.c.bf16 %v229_v34, %v227_v33  ;;  %v231_v38 = vld [vmem:[%s1201_s1 + $0xc0] sm:$0xff] }
  0x16   : > { %579 = vmatprep.subr.bf16.mxu0 %v578_v14  ;;  %636 = vmatprep.subr.bf16.mxu1 %v578_v14  ;;  %s567_s7 = sshll.u32 %s1211_s26, 4  ;;  %v594_v39 = vpack.c.bf16 %v234_v36, %v232_v35  ;;  %v233_v40 = vld [vmem:[%s1201_s1 + $0xd0] sm:$0xff]  ;;  %v236_v43 = vld [vmem:[%s1201_s1 + $0xe8] sm:$0xff]  ;;  %v238_v44 = vld [vmem:[%s1201_s1 + $0xf8] sm:$0xff] }
  0x17   : > { %s924_s27 = scalar_lea.vmem %s1200_s0, %s567_s7  ;;  %v596_v45 = vpack.c.bf16 %v233_v40, %v231_v38  ;;  %v598_v46 = vpack.c.bf16 %v238_v44, %v236_v43  ;;  %v235_v47 = vld [vmem:[%s1201_s1 + $0xe0] sm:$0xff]  ;;  %v237_v48 = vld [vmem:[%s1201_s1 + $0xf0] sm:$0xff]  ;;  %v240_v49 = vld [vmem:[%s1201_s1 + $0x108] sm:$0xff] }
  0x18   : > { %v176_v41 = vld [vmem:[%s924_s27 + $0x8] sm:$0xff]  ;;  %v242_v50 = vld [vmem:[%s1201_s1 + $0x118] sm:$0xff]  ;;  %v600_v51 = vpack.c.bf16 %v237_v48, %v235_v47  ;;  %v239_v53 = vld [vmem:[%s1201_s1 + $0x100] sm:$0xff] }
  0x19   : > { %581 = vmatpush1.bf16.msra.mxu0 %v580_v19  ;;  %652 = vmatpush1.bf16.msra.mxu1 %v580_v19  ;;  %v192_v42 = vld [vmem:[%s924_s27 + $0x88] sm:$0xff]  ;;  %v602_v52 = vpack.c.bf16 %v242_v50, %v240_v49  ;;  %v241_v54 = vld [vmem:[%s1201_s1 + $0x110] sm:$0xff]  ;;  %v246_v56 = vld [vmem:[%s1201_s1 + $0x138] sm:$0xff] }
  0x1a   : > { %583 = vmatprep.subr.bf16.mxu0 %v582_v20  ;;  %637 = vmatprep.subr.bf16.mxu1 %v582_v20  ;;  %v244_v55 = vld [vmem:[%s1201_s1 + $0x128] sm:$0xff]  ;;  %v604_v57 = vpack.c.bf16 %v241_v54, %v239_v53  ;;  %v243_v59 = vld [vmem:[%s1201_s1 + $0x120] sm:$0xff]  ;;  %v245_v60 = vld [vmem:[%s1201_s1 + $0x130] sm:$0xff] }
  0x1b   : > { %347 = vmatprep.mubr.f32.mxu0 %v176_v41  ;;  %395 = vmatprep.mubr.f32.mxu1 %v192_v42  ;;  %v606_v58 = vpack.c.bf16 %v246_v56, %v244_v55  ;;  %v248_v61 = vld [vmem:[%s1201_s1 + $0x148] sm:$0xff]  ;;  %v250_v62 = vld [vmem:[%s1201_s1 + $0x158] sm:$0xff]  ;;  %v608_v63 = vpack.c.bf16 %v245_v60, %v243_v59  ;;  %v247_v1 = vld [vmem:[%s1201_s1 + $0x140] sm:$0xff] }
  0x1c   : > { %v610_v0 = vpack.c.bf16 %v250_v62, %v248_v61  ;;  %v249_v2 = vld [vmem:[%s1201_s1 + $0x150] sm:$0xff]  ;;  %v252_v3 = vld [vmem:[%s1201_s1 + $0x168] sm:$0xff]  ;;  %v254_v4 = vld [vmem:[%s1201_s1 + $0x178] sm:$0xff] }
  0x1d   : > { %585 = vmatpush1.bf16.msra.mxu0 %v584_v25  ;;  %653 = vmatpush1.bf16.msra.mxu1 %v584_v25  ;;  %v612_v5 = vpack.c.bf16 %v249_v2, %v247_v1  ;;  %v614_v6 = vpack.c.bf16 %v254_v4, %v252_v3  ;;  %v251_v7 = vld [vmem:[%s1201_s1 + $0x160] sm:$0xff]  ;;  %v253_v8 = vld [vmem:[%s1201_s1 + $0x170] sm:$0xff]  ;;  %v256_v9 = vld [vmem:[%s1201_s1 + $0x188] sm:$0xff] }
  0x1e   : > { %587 = vmatprep.subr.bf16.mxu0 %v586_v26  ;;  %638 = vmatprep.subr.bf16.mxu1 %v586_v26  ;;  %v258_v10 = vld [vmem:[%s1201_s1 + $0x198] sm:$0xff]  ;;  %v616_v11 = vpack.c.bf16 %v253_v8, %v251_v7  ;;  %v255_v13 = vld [vmem:[%s1201_s1 + $0x180] sm:$0xff]  ;;  %v257_v14 = vld [vmem:[%s1201_s1 + $0x190] sm:$0xff] }
  0x1f   : > { %v618_v12 = vpack.c.bf16 %v258_v10, %v256_v9  ;;  %v260_v15 = vld [vmem:[%s1201_s1 + $0x1a8] sm:$0xff]  ;;  %v262_v16 = vld [vmem:[%s1201_s1 + $0x1b8] sm:$0xff]  ;;  %v620_v17 = vpack.c.bf16 %v257_v14, %v255_v13  ;;  %v259_v19 = vld [vmem:[%s1201_s1 + $0x1a0] sm:$0xff] }
  0x20   : > { %v622_v18 = vpack.c.bf16 %v262_v16, %v260_v15  ;;  %v261_v20 = vld [vmem:[%s1201_s1 + $0x1b0] sm:$0xff]  ;;  %v264_v21 = vld [vmem:[%s1201_s1 + $0x1c8] sm:$0xff]  ;;  %v266_v22 = vld [vmem:[%s1201_s1 + $0x1d8] sm:$0xff] }
  0x21   : > { %589 = vmatpush1.bf16.msra.mxu0 %v588_v31  ;;  %654 = vmatpush1.bf16.msra.mxu1 %v588_v31  ;;  %v624_v23 = vpack.c.bf16 %v261_v20, %v259_v19  ;;  %v626_v24 = vpack.c.bf16 %v266_v22, %v264_v21  ;;  %v263_v25 = vld [vmem:[%s1201_s1 + $0x1c0] sm:$0xff]  ;;  %v265_v26 = vld [vmem:[%s1201_s1 + $0x1d0] sm:$0xff]  ;;  %v268_v27 = vld [vmem:[%s1201_s1 + $0x1e8] sm:$0xff] }
  0x22   : > { %591 = vmatprep.subr.bf16.mxu0 %v590_v32  ;;  %639 = vmatprep.subr.bf16.mxu1 %v590_v32  ;;  %v270_v28 = vld [vmem:[%s1201_s1 + $0x1f8] sm:$0xff]  ;;  %v628_v29 = vpack.c.bf16 %v265_v26, %v263_v25  ;;  %v267_v31 = vld [vmem:[%s1201_s1 + $0x1e0] sm:$0xff]  ;;  %v269_v32 = vld [vmem:[%s1201_s1 + $0x1f0] sm:$0xff] }
  0x23   : > { %v630_v30 = vpack.c.bf16 %v270_v28, %v268_v27  ;;  %v632_v33 = vpack.c.bf16 %v269_v32, %v267_v31  ;;  %v175_v34 = vld [vmem:[%s924_s27] sm:$0xff]  ;;  %v178_v36 = vld [vmem:[%s924_s27 + $0x18] sm:$0xff]  ;;  %v177_v38 = vld [vmem:[%s924_s27 + $0x10] sm:$0xff] }
  0x24   : > { %v191_v35 = vld [vmem:[%s924_s27 + $0x80] sm:$0xff]  ;;  %v180_v40 = vld [vmem:[%s924_s27 + $0x28] sm:$0xff]  ;;  %v182_v44 = vld [vmem:[%s924_s27 + $0x38] sm:$0xff] }
  0x25   : > { %593 = vmatpush1.bf16.msra.mxu0 %v592_v37  ;;  %655 = vmatpush1.bf16.msra.mxu1 %v592_v37  ;;  %v194_v37 = vld [vmem:[%s924_s27 + $0x98] sm:$0xff]  ;;  %v196_v41 = vld [vmem:[%s924_s27 + $0xa8] sm:$0xff]  ;;  %v179_v42 = vld [vmem:[%s924_s27 + $0x20] sm:$0xff] }
  0x26   : > { %595 = vmatprep.subr.bf16.mxu0 %v594_v39  ;;  %640 = vmatprep.subr.bf16.mxu1 %v594_v39  ;;  %v193_v39 = vld [vmem:[%s924_s27 + $0x90] sm:$0xff]  ;;  %v195_v43 = vld [vmem:[%s924_s27 + $0xa0] sm:$0xff]  ;;  %v184_v48 = vld [vmem:[%s924_s27 + $0x48] sm:$0xff] }
  0x27   : > { %v197_v47 = vld [vmem:[%s924_s27 + $0xb0] sm:$0xff]  ;;  %v200_v49 = vld [vmem:[%s924_s27 + $0xc8] sm:$0xff]  ;;  %v183_v50 = vld [vmem:[%s924_s27 + $0x40] sm:$0xff] }
  0x28   : > { %v202_v53 = vld [vmem:[%s924_s27 + $0xd8] sm:$0xff]  ;;  %v185_v54 = vld [vmem:[%s924_s27 + $0x50] sm:$0xff]  ;;  %v188_v56 = vld [vmem:[%s924_s27 + $0x68] sm:$0xff] }
  0x29   : > { %597 = vmatpush1.bf16.msra.mxu0 %v596_v45  ;;  %656 = vmatpush1.bf16.msra.mxu1 %v596_v45  ;;  %v198_v45 = vld [vmem:[%s924_s27 + $0xb8] sm:$0xff]  ;;  %v201_v55 = vld [vmem:[%s924_s27 + $0xd0] sm:$0xff]  ;;  %v203_v59 = vld [vmem:[%s924_s27 + $0xe0] sm:$0xff] }
  0x2a   : > { %599 = vmatprep.subr.bf16.mxu0 %v598_v46  ;;  %641 = vmatprep.subr.bf16.mxu1 %v598_v46  ;;  %v181_v46 = vld [vmem:[%s924_s27 + $0x30] sm:$0xff]  ;;  %v190_v60 = vld [vmem:[%s924_s27 + $0x78] sm:$0xff]  ;;  %v271_v3 = vld [vmem:[%s1202_s2] sm:$0x3] }
  0x2b   : > { %v206_v61 = vld [vmem:[%s924_s27 + $0xf8] sm:$0xff]  ;;  %v189_v62 = vld [vmem:[%s924_s27 + $0x70] sm:$0xff] }
  0x2d   : > { %601 = vmatpush1.bf16.msra.mxu0 %v600_v51  ;;  %657 = vmatpush1.bf16.msra.mxu1 %v600_v51  ;;  %v199_v51 = vld [vmem:[%s924_s27 + $0xc0] sm:$0xff] }
  0x2e   : > { %603 = vmatprep.subr.bf16.mxu0 %v602_v52  ;;  %642 = vmatprep.subr.bf16.mxu1 %v602_v52  ;;  %v186_v52 = vld [vmem:[%s924_s27 + $0x58] sm:$0xff] }
  0x31   : > { %605 = vmatpush1.bf16.msra.mxu0 %v604_v57  ;;  %658 = vmatpush1.bf16.msra.mxu1 %v604_v57  ;;  %v204_v57 = vld [vmem:[%s924_s27 + $0xe8] sm:$0xff] }
  0x32   : > { %607 = vmatprep.subr.bf16.mxu0 %v606_v58  ;;  %643 = vmatprep.subr.bf16.mxu1 %v606_v58  ;;  %v187_v58 = vld [vmem:[%s924_s27 + $0x60] sm:$0xff] }
  0x35   : > { %609 = vmatpush1.bf16.msra.mxu0 %v608_v63  ;;  %659 = vmatpush1.bf16.msra.mxu1 %v608_v63  ;;  %v205_v63 = vld [vmem:[%s924_s27 + $0xf0] sm:$0xff]  ;;  %s1086_s27 = scalar_lea.vmem [#allocation2], %s557_s17 }
  0x36   : > { %611 = vmatprep.subr.bf16.mxu0 %v610_v0  ;;  %644 = vmatprep.subr.bf16.mxu1 %v610_v0  ;;  %v273_v0 = vlaneseq  ;;  %s491_s20 = sshll.u32 %s1086_s27, 4  ;;  %s1149_s20 = int_to_ptr.vmem [resolvable:$true] %s491_s20 }
  0x37   : > { %s707_s28 = scalar_lea.vmem %s1149_s20, 4096  ;;  %p714_p0 = scmp.lt.s32.totalorder %s1149_s20, %s712_s30 }
  0x38   : > { %v274_v1 = vshrl.u32 %v273_v0, 7  ;;  %p708_p11 = scmp.ne.s32.totalorder %s1149_s20, %s707_s28  ;;  %p715_p1 = scmp.lt.s32.totalorder %s713_s4, %s707_s28 }
  0x39   : > { %613 = vmatpush1.bf16.msra.mxu0 %v612_v5  ;;  %660 = vmatpush1.bf16.msra.mxu1 %v612_v5 }
  0x3a   : > { %615 = vmatprep.subr.bf16.mxu0 %v614_v6  ;;  %645 = vmatprep.subr.bf16.mxu1 %v614_v6  ;;  %v275_v2 = vsub.s32 0, %v274_v1  ;;  %v279_v4 = vsub.s32 1, %v274_v1  ;;  %p709_p12 = pnand %p708_p11, %p832_p5  ;;  %p716_p2 = por %p715_p1, %p714_p0 }
  0x3c   : > { %v1078_v5 = vrot.slane %v271_v3, %v275_v2  ;;  %v1080_v6 = vrot.slane %v271_v3, %v279_v4  ;;  %p710_p13 = pneg %p709_p12 }
  0x3d   : > { %617 = vmatpush1.bf16.msra.mxu0 %v616_v11  ;;  %661 = vmatpush1.bf16.msra.mxu1 %v616_v11 }
  0x3e   : > { %619 = vmatprep.subr.bf16.mxu0 %v618_v12  ;;  %646 = vmatprep.subr.bf16.mxu1 %v618_v12  ;;  %p717_p3 = pnand %p716_p2, %p710_p13 }
  0x41   : > { %621 = vmatpush1.bf16.msra.mxu0 %v620_v17  ;;  %662 = vmatpush1.bf16.msra.mxu1 %v620_v17 }
  0x42   : > { %623 = vmatprep.subr.bf16.mxu0 %v622_v18  ;;  %647 = vmatprep.subr.bf16.mxu1 %v622_v18 }
  0x45   : > { %625 = vmatpush1.bf16.msra.mxu0 %v624_v23  ;;  %663 = vmatpush1.bf16.msra.mxu1 %v624_v23 }
  0x46   : > { %627 = vmatprep.subr.bf16.mxu0 %v626_v24  ;;  %648 = vmatprep.subr.bf16.mxu1 %v626_v24 }
  0x49   : > { %629 = vmatpush1.bf16.msra.mxu0 %v628_v29  ;;  %664 = vmatpush1.bf16.msra.mxu1 %v628_v29 }
  0x4a   : > { %631 = vmatprep.subr.bf16.mxu0 %v630_v30  ;;  %649 = vmatprep.subr.bf16.mxu1 %v630_v30 }
  0x4d   : > { %633 = vmatpush1.bf16.msra.mxu0 %v632_v33  ;;  %665 = vmatpush1.bf16.msra.mxu1 %v632_v33 }
  0x50   : > { %348 = vmatmul.mubr.f32.vlgmr.msra.gmra.mrb[0].mxu0 %v175_v34  ;;  %396 = vmatmul.mubr.f32.vlgmr.msra.gmra.mrb[0].mxu1 %v191_v35 }
  0x51   : > { %353 = vmatprep.mubr.f32.mxu0 %v178_v36  ;;  %401 = vmatprep.mubr.f32.mxu1 %v194_v37 }
  0x54   : > { %354 = vmatmul.mubr.f32.gmra.mrb[2].mxu0 %v177_v38  ;;  %402 = vmatmul.mubr.f32.gmra.mrb[2].mxu1 %v193_v39 }
  0x55   : > { %359 = vmatprep.mubr.f32.mxu0 %v180_v40  ;;  %407 = vmatprep.mubr.f32.mxu1 %v196_v41 }
  0x58   : > { %360 = vmatmul.mubr.f32.gmra.mrb[4].mxu0 %v179_v42  ;;  %408 = vmatmul.mubr.f32.gmra.mrb[4].mxu1 %v195_v43 }
  0x59   : > { %365 = vmatprep.mubr.f32.mxu0 %v182_v44  ;;  %413 = vmatprep.mubr.f32.mxu1 %v198_v45 }
  0x5c   : > { %366 = vmatmul.mubr.f32.gmra.mrb[6].mxu0 %v181_v46  ;;  %414 = vmatmul.mubr.f32.gmra.mrb[6].mxu1 %v197_v47 }
  0x5d   : > { %371 = vmatprep.mubr.f32.mxu0 %v184_v48  ;;  %419 = vmatprep.mubr.f32.mxu1 %v200_v49 }
  0x60   : > { %372 = vmatmul.mubr.f32.gmra.mrb[8].mxu0 %v183_v50  ;;  %420 = vmatmul.mubr.f32.gmra.mrb[8].mxu1 %v199_v51 }
  0x61   : > { %377 = vmatprep.mubr.f32.mxu0 %v186_v52  ;;  %425 = vmatprep.mubr.f32.mxu1 %v202_v53 }
  0x64   : > { %378 = vmatmul.mubr.f32.gmra.mrb[10].mxu0 %v185_v54  ;;  %426 = vmatmul.mubr.f32.gmra.mrb[10].mxu1 %v201_v55 }
  0x65   : > { %383 = vmatprep.mubr.f32.mxu0 %v188_v56  ;;  %431 = vmatprep.mubr.f32.mxu1 %v204_v57 }
  0x68   : > { %384 = vmatmul.mubr.f32.gmra.mrb[12].mxu0 %v187_v58  ;;  %432 = vmatmul.mubr.f32.gmra.mrb[12].mxu1 %v203_v59 }
  0x69   : > { %389 = vmatprep.mubr.f32.mxu0 %v190_v60  ;;  %437 = vmatprep.mubr.f32.mxu1 %v206_v61 }
  0x6c   : > { %390 = vmatmul.mubr.f32.gmra.mrb[14].mxu0 %v189_v62  ;;  %438 = vmatmul.mubr.f32.gmra.mrb[14].mxu1 %v205_v63 }
 0x123   : > { %v349_v7 = vpop.f32.mrb[0].mxu0  ;;  %v397_v8 = vpop.f32.mrb[0].mxu1 }
 0x124   : > { %v350_v9 = vadd.f32 %v349_v7, %v1078_v5  ;;  %v398_v10 = vadd.f32 %v397_v8, %v1078_v5  ;;  %v351_v11 = vpop.f32.mrb[1].mxu0  ;;  %v399_v12 = vpop.f32.mrb[1].mxu1 }
 0x125   : > { %v352_v13 = vadd.f32 %v351_v11, %v1080_v6  ;;  %v400_v14 = vadd.f32 %v399_v12, %v1080_v6 }
 0x126   : > { %444 = vst [vmem:[%s1086_s27] sm:$0xff] %v350_v9  ;;  %460 = vst [vmem:[%s1086_s27 + $0x80] sm:$0xff] %v398_v10 }
 0x127   : > { %445 = vst [vmem:[%s1086_s27 + $0x8] sm:$0xff] %v352_v13  ;;  %461 = vst [vmem:[%s1086_s27 + $0x88] sm:$0xff] %v400_v14  ;;  %v355_v15 = vpop.f32.mrb[2].mxu0  ;;  %v403_v16 = vpop.f32.mrb[2].mxu1 }
 0x128   : > { %v356_v17 = vadd.f32 %v355_v15, %v1078_v5  ;;  %v404_v18 = vadd.f32 %v403_v16, %v1078_v5  ;;  %v357_v19 = vpop.f32.mrb[3].mxu0  ;;  %v405_v20 = vpop.f32.mrb[3].mxu1 }
 0x129   : > { %v358_v21 = vadd.f32 %v357_v19, %v1080_v6  ;;  %v406_v22 = vadd.f32 %v405_v20, %v1080_v6 }
 0x12a   : > { %446 = vst [vmem:[%s1086_s27 + $0x10] sm:$0xff] %v356_v17  ;;  %462 = vst [vmem:[%s1086_s27 + $0x90] sm:$0xff] %v404_v18 }
 0x12b   : > { %447 = vst [vmem:[%s1086_s27 + $0x18] sm:$0xff] %v358_v21  ;;  %463 = vst [vmem:[%s1086_s27 + $0x98] sm:$0xff] %v406_v22  ;;  %v361_v23 = vpop.f32.mrb[4].mxu0  ;;  %v409_v24 = vpop.f32.mrb[4].mxu1 }
 0x12c   : > { %v362_v25 = vadd.f32 %v361_v23, %v1078_v5  ;;  %v410_v26 = vadd.f32 %v409_v24, %v1078_v5  ;;  %v363_v27 = vpop.f32.mrb[5].mxu0  ;;  %v411_v28 = vpop.f32.mrb[5].mxu1 }
 0x12d   : > { %v364_v29 = vadd.f32 %v363_v27, %v1080_v6  ;;  %v412_v30 = vadd.f32 %v411_v28, %v1080_v6 }
 0x12e   : > { %448 = vst [vmem:[%s1086_s27 + $0x20] sm:$0xff] %v362_v25  ;;  %464 = vst [vmem:[%s1086_s27 + $0xa0] sm:$0xff] %v410_v26 }
 0x12f   : > { %449 = vst [vmem:[%s1086_s27 + $0x28] sm:$0xff] %v364_v29  ;;  %465 = vst [vmem:[%s1086_s27 + $0xa8] sm:$0xff] %v412_v30  ;;  %v367_v31 = vpop.f32.mrb[6].mxu0  ;;  %v415_v32 = vpop.f32.mrb[6].mxu1 }
 0x130   : > { %v368_v33 = vadd.f32 %v367_v31, %v1078_v5  ;;  %v416_v34 = vadd.f32 %v415_v32, %v1078_v5  ;;  %v369_v35 = vpop.f32.mrb[7].mxu0  ;;  %v417_v36 = vpop.f32.mrb[7].mxu1 }
 0x131   : > { %v370_v37 = vadd.f32 %v369_v35, %v1080_v6  ;;  %v418_v38 = vadd.f32 %v417_v36, %v1080_v6 }
 0x132   : > { %450 = vst [vmem:[%s1086_s27 + $0x30] sm:$0xff] %v368_v33  ;;  %466 = vst [vmem:[%s1086_s27 + $0xb0] sm:$0xff] %v416_v34 }
 0x133   : > { %451 = vst [vmem:[%s1086_s27 + $0x38] sm:$0xff] %v370_v37  ;;  %467 = vst [vmem:[%s1086_s27 + $0xb8] sm:$0xff] %v418_v38  ;;  %v373_v39 = vpop.f32.mrb[8].mxu0  ;;  %v421_v40 = vpop.f32.mrb[8].mxu1 }
 0x134   : > { %v374_v41 = vadd.f32 %v373_v39, %v1078_v5  ;;  %v422_v42 = vadd.f32 %v421_v40, %v1078_v5  ;;  %v375_v43 = vpop.f32.mrb[9].mxu0  ;;  %v423_v44 = vpop.f32.mrb[9].mxu1 }
 0x135   : > { %v376_v45 = vadd.f32 %v375_v43, %v1080_v6  ;;  %v424_v46 = vadd.f32 %v423_v44, %v1080_v6 }
 0x136   : > { %452 = vst [vmem:[%s1086_s27 + $0x40] sm:$0xff] %v374_v41  ;;  %468 = vst [vmem:[%s1086_s27 + $0xc0] sm:$0xff] %v422_v42 }
 0x137   : > { %453 = vst [vmem:[%s1086_s27 + $0x48] sm:$0xff] %v376_v45  ;;  %469 = vst [vmem:[%s1086_s27 + $0xc8] sm:$0xff] %v424_v46  ;;  %v379_v47 = vpop.f32.mrb[10].mxu0  ;;  %v427_v48 = vpop.f32.mrb[10].mxu1 }
 0x138   : > { %v380_v49 = vadd.f32 %v379_v47, %v1078_v5  ;;  %v428_v50 = vadd.f32 %v427_v48, %v1078_v5  ;;  %v381_v51 = vpop.f32.mrb[11].mxu0  ;;  %v429_v52 = vpop.f32.mrb[11].mxu1 }
 0x139   : > { %v382_v53 = vadd.f32 %v381_v51, %v1080_v6  ;;  %v430_v54 = vadd.f32 %v429_v52, %v1080_v6 }
 0x13a   : > { %454 = vst [vmem:[%s1086_s27 + $0x50] sm:$0xff] %v380_v49  ;;  %470 = vst [vmem:[%s1086_s27 + $0xd0] sm:$0xff] %v428_v50 }
 0x13b   : > { %455 = vst [vmem:[%s1086_s27 + $0x58] sm:$0xff] %v382_v53  ;;  %471 = vst [vmem:[%s1086_s27 + $0xd8] sm:$0xff] %v430_v54  ;;  %v385_v55 = vpop.f32.mrb[12].mxu0  ;;  %v433_v56 = vpop.f32.mrb[12].mxu1 }
 0x13c   : > { %v386_v57 = vadd.f32 %v385_v55, %v1078_v5  ;;  %v434_v58 = vadd.f32 %v433_v56, %v1078_v5  ;;  %v387_v59 = vpop.f32.mrb[13].mxu0  ;;  %v435_v60 = vpop.f32.mrb[13].mxu1 }
 0x13d   : > { %v388_v61 = vadd.f32 %v387_v59, %v1080_v6  ;;  %v436_v62 = vadd.f32 %v435_v60, %v1080_v6 }
 0x13e   : > { %456 = vst [vmem:[%s1086_s27 + $0x60] sm:$0xff] %v386_v57  ;;  %472 = vst [vmem:[%s1086_s27 + $0xe0] sm:$0xff] %v434_v58 }
 0x13f   : > { %457 = vst [vmem:[%s1086_s27 + $0x68] sm:$0xff] %v388_v61  ;;  %473 = vst [vmem:[%s1086_s27 + $0xe8] sm:$0xff] %v436_v62  ;;  %v391_v63 = vpop.f32.mrb[14].mxu0  ;;  %v439_v0 = vpop.f32.mrb[14].mxu1 }
 0x140   : > { %v392_v1 = vadd.f32 %v391_v63, %v1078_v5  ;;  %v440_v2 = vadd.f32 %v439_v0, %v1078_v5  ;;  %v393_v3 = vpop.f32.mrb[15].mxu0  ;;  %v441_v4 = vpop.f32.mrb[15].mxu1 }
 0x141   : > { %v394_v7 = vadd.f32 %v393_v3, %v1080_v6  ;;  %v442_v8 = vadd.f32 %v441_v4, %v1080_v6 }
 0x142   : > { %458 = vst [vmem:[%s1086_s27 + $0x70] sm:$0xff] %v392_v1  ;;  %474 = vst [vmem:[%s1086_s27 + $0xf0] sm:$0xff] %v440_v2 }
 0x143   : > { %459 = vst [vmem:[%s1086_s27 + $0x78] sm:$0xff] %v394_v7  ;;  %475 = vst [vmem:[%s1086_s27 + $0xf8] sm:$0xff] %v442_v8 }
 0x144   : > { %720 = shalt.err (!%p717_p3)
}
 0x145   : > { %s721_s5 = scalar_lea.hbm %s1147_s24, 4096  ;;  %s725_s8 = scalar_lea.hbm %s1203_s3, 8192 }
 0x146   : > { %p722_p4 = scmp.ne.s32.totalorder %s1147_s24, %s721_s5  ;;  %p726_p9 = scmp.lt.u32.totalorder %s1147_s24, %s1203_s3 }
 0x147   : > { %p727_p10 = scmp.lt.u32.totalorder %s725_s8, %s721_s5  ;;  %p729_p12 = scmp.lt.u32.totalorder %s721_s5, %s1147_s24 }
 0x148   : > { %p723_p7 = pnand %p722_p4, %p832_p5 }
 0x149   : > { %p728_p11 = por %p727_p10, %p726_p9 }
 0x14a   : > { %p724_p8 = pneg %p723_p7 }
 0x14b   : > { %p730_p13 = por %p729_p12, %p728_p11 }
 0x14d   : > { %p731_p0 = pnand %p730_p13, %p724_p8 }
 0x14f   : > { %734 = shalt.err (!%p731_p0)
}
 0x150   : > { %s772_s11 = smov 256   ;;  %s773_s17 = smov 16  }
 0x151   : > { %666 = dma.vmem_to_hbm [thread:$0]  (%p832_p5), %s1149_s20, 4096, %s1147_s24, %s1159_s25, %s772_s11, %s772_s11, %s773_s17  }
 0x152 PF: > { %p672_p1 = scmp.ge.s32.totalorder %s769_s15, 2  ;;  %s506_s27 = sand.u32 1, %s757_s12  }
 0x153   : > { %s507_s19 = scalar_lea.sflag [#allocation3], %s506_s27 }
 0x154   : > { %p669_p2 = pnand %p672_p1, %p836_p6 }
 0x156   : > { %752 = dma.done.wait (!%p669_p2), %s507_s19, 4096  }
 0x157   : > { %754 = vsyncadd (!%p669_p2), %s507_s19, 4294963200  ;;  %p13_p3 = scmp.ge.s32.totalorder %s819_s18, 4   ;;  %s1206_s12 = smov %s761_s13 }
 0x158   : > { %s1207_s13 = smov %s765_s14  ;;  %s1208_s14 = smov %s830_s21 }
 0x159   : > { %s1209_s15 = smov %s819_s18  ;;  %15 = sbr.rel (!%p13_p3) target bundleno = 3 (0x3), region = 67 }
 0x160   :  { %512 = vsyncpa [#allocation3], 1 }
 0x161   :  { %514 = vsyncpa [#allocation3 + $0x1], 1 }

// kernel: multi_headed_self_attention.4
= control target key start
LH: loop header
LB: loop body
LE: loop exit
PB: predicated region body
PF: predicated region fallthrough
CT: control target
= control target key end

     0   :  { %s1787_s18 = smov 0   ;;  %s3159_s0 = inlined_call_operand.vmem [shape: f32[256,256], index: 0, kind: input, shape index: {}]   ;;  %s3160_s1 = inlined_call_operand.vmem [shape: f32[1,256], index: 1, kind: input, shape index: {}]   ;;  %s3161_s2 = inlined_call_operand.vmem [shape: f32[1,256], index: 2, kind: input, shape index: {}]   ;;  %s3162_s3 = inlined_call_operand.vmem [shape: f32[256,768], index: 3, kind: input, shape index: {}]   ;;  %s3163_s4 = inlined_call_operand.vmem [shape: f32[1,768], index: 4, kind: input, shape index: {}]   ;;  %s3164_s5 = inlined_call_operand.vmem [shape: f32[256,768], index: 5, kind: output, shape index: {}]  }
   0x1 LB: > { %s1471_s19 = sadd.s32 4294967295, %s1755_s18   ;;  %p1475_p0 = scmp.ge.s32.totalorder %s1755_s18, 1  ;;  %s1755_s18 = sphi %s1787_s18, %s15_s18  }
   0x2   : > { %p189_p1 = scmp.lt.s32.totalorder %s1755_s18, 3 }
   0x4   : > { %p190_p2 = pnand %p1475_p0, %p189_p1 }
   0x5   : > { %s1476_s20 = sshll.u32 (!%p190_p2), %s1471_s19, 4  ;;  %v611_v48 = vld [vmem:[%s3162_s3 + $0x8] sm:$0xff] (!%p190_p2)  ;;  %v617_v49 = vld [vmem:[%s3162_s3 + $0x38] sm:$0xff] (!%p190_p2)  ;;  %v610_v53 = vld [vmem:[%s3162_s3] sm:$0xff] (!%p190_p2) }
   0x6   : > { %193 = sbr.rel (%p190_p2) target bundleno = 641 (0x281), region = 40  ;;  %p220_p3 = scmp.lt.s32.totalorder (!%p190_p2), %s1476_s20, 31  ;;  %v613_v50 = vld [vmem:[%s3162_s3 + $0x18] sm:$0xff] (!%p190_p2)  ;;  %v1484_v51 = vpack.c.bf16 (!%p190_p2), %v617_v49, %v611_v48  ;;  %v619_v52 = vld [vmem:[%s3162_s3 + $0x48] sm:$0xff] (!%p190_p2)  ;;  %v616_v54 = vld [vmem:[%s3162_s3 + $0x30] sm:$0xff] (!%p190_p2) }
   0x7   : > { %v1548_v55 = vpack.c.bf16 (!%p190_p2), %v619_v52, %v613_v50  ;;  %v1486_v56 = vpack.c.bf16 (!%p190_p2), %v616_v54, %v610_v53  ;;  %v612_v57 = vld [vmem:[%s3162_s3 + $0x10] sm:$0xff] (!%p190_p2)  ;;  %v618_v58 = vld [vmem:[%s3162_s3 + $0x40] sm:$0xff] (!%p190_p2)  ;;  %v623_v59 = vld [vmem:[%s3162_s3 + $0x68] sm:$0xff] (!%p190_p2) }
   0x8   : > { %1485 = vmatprep.subr.bf16.mxu0 (!%p190_p2), %v1484_v51  ;;  %v1550_v60 = vpack.c.bf16 (!%p190_p2), %v618_v58, %v612_v57  ;;  %v629_v61 = vld [vmem:[%s3162_s3 + $0x98] sm:$0xff] (!%p190_p2)  ;;  %v631_v63 = vld [vmem:[%s3162_s3 + $0xa8] sm:$0xff] (!%p190_p2)  ;;  %v636_v48 = vld [vmem:[%s3162_s3 + $0xd0] sm:$0xff] (!%p190_p2) }
   0x9   : > { %v625_v62 = vld [vmem:[%s3162_s3 + $0x78] sm:$0xff] (!%p190_p2)  ;;  %1549 = vmatprep.subr.bf16.mxu1 (!%p190_p2), %v1548_v55  ;;  %1487 = vmatpush1.bf16.msra.mxu0 (!%p190_p2), %v1486_v56  ;;  %v642_v49 = vld [vmem:[%s3162_s3 + $0x100] sm:$0xff] (!%p190_p2)  ;;  %v647_v51 = vld [vmem:[%s3162_s3 + $0x128] sm:$0xff] (!%p190_p2) }
   0xa   : > { %1551 = vmatpush1.bf16.msra.mxu1 (!%p190_p2), %v1550_v60  ;;  %v653_v52 = vld [vmem:[%s3162_s3 + $0x158] sm:$0xff] (!%p190_p2)  ;;  %v1558_v54 = vpack.c.bf16 (!%p190_p2), %v642_v49, %v636_v48  ;;  %v655_v56 = vld [vmem:[%s3162_s3 + $0x168] sm:$0xff] (!%p190_p2)  ;;  %v646_v57 = vld [vmem:[%s3162_s3 + $0x120] sm:$0xff] (!%p190_p2) }
   0xb   : > { %v649_v53 = vld [vmem:[%s3162_s3 + $0x138] sm:$0xff] (!%p190_p2)  ;;  %v1496_v55 = vpack.c.bf16 (!%p190_p2), %v653_v52, %v647_v51  ;;  %v652_v58 = vld [vmem:[%s3162_s3 + $0x150] sm:$0xff] (!%p190_p2)  ;;  %v670_v49 = vld [vmem:[%s3162_s3 + $0x1e0] sm:$0xff] (!%p190_p2) }
   0xc   : > { %v648_v60 = vld [vmem:[%s3162_s3 + $0x130] sm:$0xff] (!%p190_p2) }
   0xd   : > { %s3166_s20 = smov (!%p220_p3, %s1476_s20), 31  ;;  %v672_v51 = vld [vmem:[%s3162_s3 + $0x1f0] sm:$0xff] }
   0xe   : > { %s1483_s21 = sshll.u32 %s3166_s20, 4 }
   0xf   : > { %s1801_s24 = scalar_lea.vmem %s3159_s0, %s1483_s21 }
  0x10   : > { %v1804_v0 = vld [vmem:[%s1801_s24] sm:$0xff]  ;;  %v1807_v1 = vld [vmem:[%s1801_s24 + $0x8] sm:$0xff]  ;;  %v1818_v5 = vld [vmem:[%s1801_s24 + $0x10] sm:$0xff] }
  0x11   : > { %v1810_v2 = vld [vmem:[%s1801_s24 + $0x20] sm:$0xff]  ;;  %v265_v3 = vadd.f32 %v1807_v1, %v1804_v0  ;;  %v1815_v4 = vld [vmem:[%s1801_s24 + $0x28] sm:$0xff]  ;;  %v1821_v6 = vld [vmem:[%s1801_s24 + $0x18] sm:$0xff] }
  0x12   : > { %v271_v7 = vadd.f32 %v1815_v4, %v1810_v2  ;;  %v1826_v8 = vld [vmem:[%s1801_s24 + $0x30] sm:$0xff]  ;;  %v1829_v9 = vld [vmem:[%s1801_s24 + $0x38] sm:$0xff]  ;;  %v268_v10 = vadd.f32 %v1821_v6, %v1818_v5  ;;  %v1836_v12 = vld [vmem:[%s1801_s24 + $0x40] sm:$0xff] }
  0x13   : > { %266 = vadd.xlane.f32.xlu0 %v265_v3  ;;  %v274_v11 = vadd.f32 %v1829_v9, %v1826_v8  ;;  %v1839_v13 = vld [vmem:[%s1801_s24 + $0x48] sm:$0xff]  ;;  %v1842_v14 = vld [vmem:[%s1801_s24 + $0x50] sm:$0xff]  ;;  %v1845_v15 = vld [vmem:[%s1801_s24 + $0x58] sm:$0xff]  ;;  %v1488_v3 = vpack.c.bf16 %v629_v61, %v623_v59  ;;  %v1560_v59 = vpack.c.bf16 %v655_v56, %v649_v53 }
  0x14   : > { %272 = vadd.xlane.f32.xlu1 %v271_v7  ;;  %v277_v16 = vadd.f32 %v1839_v13, %v1836_v12  ;;  %v280_v17 = vadd.f32 %v1845_v15, %v1842_v14  ;;  %v1852_v18 = vld [vmem:[%s1801_s24 + $0x60] sm:$0xff]  ;;  %v1855_v19 = vld [vmem:[%s1801_s24 + $0x68] sm:$0xff]  ;;  %v1858_v20 = vld [vmem:[%s1801_s24 + $0x70] sm:$0xff]  ;;  %v1552_v7 = vpack.c.bf16 %v631_v63, %v625_v62 }
  0x15   : > { %v1861_v21 = vld [vmem:[%s1801_s24 + $0x78] sm:$0xff]  ;;  %v283_v22 = vadd.f32 %v1855_v19, %v1852_v18  ;;  %v1868_v24 = vld [vmem:[%s1801_s24 + $0x80] sm:$0xff]  ;;  %v1871_v25 = vld [vmem:[%s1801_s24 + $0x88] sm:$0xff]  ;;  %1489 = vmatprep.subr.bf16.mxu0 %v1488_v3 }
  0x16   : > { %v286_v23 = vadd.f32 %v1861_v21, %v1858_v20  ;;  %v1874_v26 = vld [vmem:[%s1801_s24 + $0x90] sm:$0xff]  ;;  %v1877_v27 = vld [vmem:[%s1801_s24 + $0x98] sm:$0xff]  ;;  %v289_v28 = vadd.f32 %v1871_v25, %v1868_v24  ;;  %v1884_v30 = vld [vmem:[%s1801_s24 + $0xa0] sm:$0xff]  ;;  %1553 = vmatprep.subr.bf16.mxu1 %v1552_v7 }
  0x17   : > { %269 = vadd.xlane.f32.xlu0 %v268_v10  ;;  %v292_v29 = vadd.f32 %v1877_v27, %v1874_v26  ;;  %v1887_v31 = vld [vmem:[%s1801_s24 + $0xa8] sm:$0xff]  ;;  %v1890_v32 = vld [vmem:[%s1801_s24 + $0xb0] sm:$0xff]  ;;  %v1893_v33 = vld [vmem:[%s1801_s24 + $0xb8] sm:$0xff] }
  0x18   : > { %275 = vadd.xlane.f32.xlu1 %v274_v11  ;;  %v295_v34 = vadd.f32 %v1887_v31, %v1884_v30  ;;  %v298_v35 = vadd.f32 %v1893_v33, %v1890_v32  ;;  %v1900_v36 = vld [vmem:[%s1801_s24 + $0xc0] sm:$0xff]  ;;  %v1903_v37 = vld [vmem:[%s1801_s24 + $0xc8] sm:$0xff]  ;;  %v1906_v38 = vld [vmem:[%s1801_s24 + $0xd0] sm:$0xff] }
  0x19   : > { %v1909_v39 = vld [vmem:[%s1801_s24 + $0xd8] sm:$0xff]  ;;  %v301_v40 = vadd.f32 %v1903_v37, %v1900_v36  ;;  %v1916_v42 = vld [vmem:[%s1801_s24 + $0xe0] sm:$0xff]  ;;  %v1919_v43 = vld [vmem:[%s1801_s24 + $0xe8] sm:$0xff] }
  0x1a   : > { %v304_v41 = vadd.f32 %v1909_v39, %v1906_v38  ;;  %v1922_v44 = vld [vmem:[%s1801_s24 + $0xf0] sm:$0xff]  ;;  %v1925_v45 = vld [vmem:[%s1801_s24 + $0xf8] sm:$0xff]  ;;  %v307_v46 = vadd.f32 %v1919_v43, %v1916_v42  ;;  %v622_v10 = vld [vmem:[%s3162_s3 + $0x60] sm:$0xff]  ;;  %s1708_s24 = smul.u32 48, %s3166_s20 }
  0x1b   : > { %278 = vadd.xlane.f32.xlu0 %v277_v16  ;;  %v310_v47 = vadd.f32 %v1925_v45, %v1922_v44  ;;  %v628_v11 = vld [vmem:[%s3162_s3 + $0x90] sm:$0xff]  ;;  %v654_v61 = vld [vmem:[%s3162_s3 + $0x160] sm:$0xff]  ;;  %v659_v62 = vld [vmem:[%s3162_s3 + $0x188] sm:$0xff] }
  0x1c   : > { %281 = vadd.xlane.f32.xlu1 %v280_v17  ;;  %v624_v16 = vld [vmem:[%s3162_s3 + $0x70] sm:$0xff]  ;;  %v1490_v17 = vpack.c.bf16 %v628_v11, %v622_v10  ;;  %v665_v63 = vld [vmem:[%s3162_s3 + $0x1b8] sm:$0xff]  ;;  %v667_v7 = vld [vmem:[%s3162_s3 + $0x1c8] sm:$0xff]  ;;  %v1498_v10 = vpack.c.bf16 %v652_v58, %v646_v57  ;;  %v1562_v11 = vpack.c.bf16 %v654_v61, %v648_v60  ;;  %s2954_s27 = scalar_lea.vmem %s3164_s5, %s1708_s24 }
  0x1d   : > { %v661_v3 = vld [vmem:[%s3162_s3 + $0x198] sm:$0xff]  ;;  %v678_v53 = vld [vmem:[%s3162_s3 + $0x220] sm:$0xff]  ;;  %v691_v57 = vld [vmem:[%s3162_s3 + $0x288] sm:$0xff] }
  0x1e   : > { %1491 = vmatpush1.bf16.msra.mxu0 %v1490_v17  ;;  %v658_v17 = vld [vmem:[%s3162_s3 + $0x180] sm:$0xff]  ;;  %v685_v56 = vld [vmem:[%s3162_s3 + $0x258] sm:$0xff] }
  0x1f   : > { %284 = vadd.xlane.f32.xlu0 %v283_v22  ;;  %v630_v22 = vld [vmem:[%s3162_s3 + $0xa0] sm:$0xff] }
  0x20   : > { %287 = vadd.xlane.f32.xlu1 %v286_v23  ;;  %v635_v23 = vld [vmem:[%s3162_s3 + $0xc8] sm:$0xff]  ;;  %v682_v61 = vld [vmem:[%s3162_s3 + $0x240] sm:$0xff] }
  0x23   : > { %290 = vadd.xlane.f32.xlu0 %v289_v28  ;;  %v641_v28 = vld [vmem:[%s3162_s3 + $0xf8] sm:$0xff] }
  0x24   : > { %293 = vadd.xlane.f32.xlu1 %v292_v29  ;;  %v1554_v29 = vpack.c.bf16 %v630_v22, %v624_v16  ;;  %v1500_v16 = vpack.c.bf16 %v665_v63, %v659_v62  ;;  %v664_v22 = vld [vmem:[%s3162_s3 + $0x1b0] sm:$0xff] }
  0x25   : > { %v688_v62 = vld [vmem:[%s3162_s3 + $0x270] sm:$0xff] }
  0x26   : > { %1555 = vmatpush1.bf16.msra.mxu1 %v1554_v29  ;;  %v666_v29 = vld [vmem:[%s3162_s3 + $0x1c0] sm:$0xff]  ;;  %v684_v63 = vld [vmem:[%s3162_s3 + $0x250] sm:$0xff] }
  0x27   : > { %296 = vadd.xlane.f32.xlu0 %v295_v34  ;;  %v1492_v34 = vpack.c.bf16 %v641_v28, %v635_v23  ;;  %v660_v23 = vld [vmem:[%s3162_s3 + $0x190] sm:$0xff]  ;;  %v1564_v28 = vpack.c.bf16 %v667_v7, %v661_v3  ;;  %v1572_v3 = vpack.c.bf16 %v691_v57, %v685_v56  ;;  %v690_v7 = vld [vmem:[%s3162_s3 + $0x280] sm:$0xff] }
  0x28   : > { %299 = vadd.xlane.f32.xlu1 %v298_v35  ;;  %v637_v35 = vld [vmem:[%s3162_s3 + $0xd8] sm:$0xff]  ;;  %v714_v57 = vld [vmem:[%s3162_s3 + $0x340] sm:$0xff] }
  0x29   : > { %1493 = vmatprep.subr.bf16.mxu0 %v1492_v34  ;;  %v671_v34 = vld [vmem:[%s3162_s3 + $0x1e8] sm:$0xff] }
  0x2b   : > { %302 = vadd.xlane.f32.xlu0 %v301_v40  ;;  %v643_v40 = vld [vmem:[%s3162_s3 + $0x108] sm:$0xff] }
  0x2c   : > { %305 = vadd.xlane.f32.xlu1 %v304_v41  ;;  %v634_v41 = vld [vmem:[%s3162_s3 + $0xc0] sm:$0xff] }
  0x2f   : > { %308 = vadd.xlane.f32.xlu0 %v307_v46  ;;  %v1556_v46 = vpack.c.bf16 %v643_v40, %v637_v35  ;;  %v677_v35 = vld [vmem:[%s3162_s3 + $0x218] sm:$0xff] }
  0x30   : > { %311 = vadd.xlane.f32.xlu1 %v310_v47  ;;  %v640_v47 = vld [vmem:[%s3162_s3 + $0xf0] sm:$0xff]  ;;  %v673_v40 = vld [vmem:[%s3162_s3 + $0x1f8] sm:$0xff]  ;;  %v1504_v48 = vpack.c.bf16 %v677_v35, %v671_v34 }
  0x31   : > { %v1494_v50 = vpack.c.bf16 %v640_v47, %v634_v41  ;;  %1557 = vmatprep.subr.bf16.mxu1 %v1556_v46  ;;  %v679_v41 = vld [vmem:[%s3162_s3 + $0x228] sm:$0xff]  ;;  %v1502_v46 = vpack.c.bf16 %v664_v22, %v658_v17  ;;  %v1566_v47 = vpack.c.bf16 %v666_v29, %v660_v23  ;;  %v1510_v22 = vpack.c.bf16 %v688_v62, %v682_v61  ;;  %v694_v29 = vld [vmem:[%s3162_s3 + $0x2a0] sm:$0xff]  ;;  %v700_v34 = vld [vmem:[%s3162_s3 + $0x2d0] sm:$0xff] }
  0x32   : > { %1559 = vmatpush1.bf16.msra.mxu1 %v1558_v54  ;;  %v1568_v52 = vpack.c.bf16 %v679_v41, %v673_v40  ;;  %v683_v54 = vld [vmem:[%s3162_s3 + $0x248] sm:$0xff]  ;;  %v1574_v23 = vpack.c.bf16 %v690_v7, %v684_v63  ;;  %v696_v35 = vld [vmem:[%s3162_s3 + $0x2b0] sm:$0xff]  ;;  %v702_v41 = vld [vmem:[%s3162_s3 + $0x2e0] sm:$0xff] }
  0x33   : > { %1495 = vmatpush1.bf16.msra.mxu0 %v1494_v50  ;;  %1561 = vmatprep.subr.bf16.mxu1 %v1560_v59  ;;  %v676_v50 = vld [vmem:[%s3162_s3 + $0x210] sm:$0xff]  ;;  %v1570_v59 = vpack.c.bf16 %v678_v53, %v672_v51  ;;  %v703_v17 = vld [vmem:[%s3162_s3 + $0x2e8] sm:$0xff]  ;;  %v1578_v51 = vpack.c.bf16 %v702_v41, %v696_v35  ;;  %v706_v53 = vld [vmem:[%s3162_s3 + $0x300] sm:$0xff] }
  0x34   : > { %1497 = vmatprep.subr.bf16.mxu0 %v1496_v55  ;;  %v689_v55 = vld [vmem:[%s3162_s3 + $0x278] sm:$0xff]  ;;  %v1506_v58 = vpack.c.bf16 %v676_v50, %v670_v49  ;;  %v715_v49 = vld [vmem:[%s3162_s3 + $0x348] sm:$0xff]  ;;  %v1514_v50 = vpack.c.bf16 %v700_v34, %v694_v29  ;;  %v718_v7 = vld [vmem:[%s3162_s3 + $0x360] sm:$0xff] }
  0x35   : > { %v1508_v60 = vpack.c.bf16 %v689_v55, %v683_v54  ;;  %v712_v54 = vld [vmem:[%s3162_s3 + $0x330] sm:$0xff]  ;;  %v727_v61 = vld [vmem:[%s3162_s3 + $0x3a8] sm:$0xff]  ;;  %v730_v41 = vld [vmem:[%s3162_s3 + $0x3c0] sm:$0xff] }
  0x36   : > { %1563 = vmatpush1.bf16.msra.mxu1 %v1562_v11  ;;  %v701_v11 = vld [vmem:[%s3162_s3 + $0x2d8] sm:$0xff]  ;;  %v708_v55 = vld [vmem:[%s3162_s3 + $0x310] sm:$0xff]  ;;  %v1518_v62 = vpack.c.bf16 %v712_v54, %v706_v53  ;;  %v739_v29 = vld [vmem:[%s3162_s3 + $0x408] sm:$0xff] }
  0x37   : > { %1499 = vmatpush1.bf16.msra.mxu0 %v1498_v10  ;;  %1565 = vmatprep.subr.bf16.mxu1 %v1564_v28  ;;  %v695_v10 = vld [vmem:[%s3162_s3 + $0x2a8] sm:$0xff]  ;;  %v1582_v63 = vpack.c.bf16 %v714_v57, %v708_v55 }
  0x38   : > { %1501 = vmatprep.subr.bf16.mxu0 %v1500_v16  ;;  %v697_v16 = vld [vmem:[%s3162_s3 + $0x2b8] sm:$0xff]  ;;  %v1512_v28 = vpack.c.bf16 %v701_v11, %v695_v10  ;;  %v724_v10 = vld [vmem:[%s3162_s3 + $0x390] sm:$0xff] }
  0x39   : > { %v1576_v40 = vpack.c.bf16 %v703_v17, %v697_v16  ;;  %v720_v11 = vld [vmem:[%s3162_s3 + $0x370] sm:$0xff]  ;;  %v726_v17 = vld [vmem:[%s3162_s3 + $0x3a0] sm:$0xff]  ;;  %v1522_v34 = vpack.c.bf16 %v724_v10, %v718_v7 }
  0x3a   : > { %1567 = vmatpush1.bf16.msra.mxu1 %v1566_v47  ;;  %v713_v47 = vld [vmem:[%s3162_s3 + $0x338] sm:$0xff]  ;;  %v1586_v35 = vpack.c.bf16 %v726_v17, %v720_v11 }
  0x3b   : > { %1503 = vmatpush1.bf16.msra.mxu0 %v1502_v46  ;;  %1569 = vmatprep.subr.bf16.mxu1 %v1568_v52  ;;  %v707_v46 = vld [vmem:[%s3162_s3 + $0x308] sm:$0xff] }
  0x3c   : > { %1505 = vmatprep.subr.bf16.mxu0 %v1504_v48  ;;  %v709_v48 = vld [vmem:[%s3162_s3 + $0x318] sm:$0xff]  ;;  %v1516_v52 = vpack.c.bf16 %v713_v47, %v707_v46  ;;  %v736_v46 = vld [vmem:[%s3162_s3 + $0x3f0] sm:$0xff] }
  0x3d   : > { %v1580_v56 = vpack.c.bf16 %v715_v49, %v709_v48  ;;  %v732_v48 = vld [vmem:[%s3162_s3 + $0x3d0] sm:$0xff]  ;;  %v738_v49 = vld [vmem:[%s3162_s3 + $0x400] sm:$0xff] }
  0x3e   : > { %1571 = vmatpush1.bf16.msra.mxu1 %v1570_v59  ;;  %v725_v59 = vld [vmem:[%s3162_s3 + $0x398] sm:$0xff] }
  0x3f   : > { %1507 = vmatpush1.bf16.msra.mxu0 %v1506_v58  ;;  %1573 = vmatprep.subr.bf16.mxu1 %v1572_v3  ;;  %v719_v58 = vld [vmem:[%s3162_s3 + $0x368] sm:$0xff] }
  0x40   : > { %1509 = vmatprep.subr.bf16.mxu0 %v1508_v60  ;;  %v721_v60 = vld [vmem:[%s3162_s3 + $0x378] sm:$0xff]  ;;  %v1520_v3 = vpack.c.bf16 %v725_v59, %v719_v58 }
  0x41   : > { %v1584_v16 = vpack.c.bf16 %v727_v61, %v721_v60 }
  0x42   : > { %1575 = vmatpush1.bf16.msra.mxu1 %v1574_v23  ;;  %v737_v23 = vld [vmem:[%s3162_s3 + $0x3f8] sm:$0xff] }
  0x43   : > { %1511 = vmatpush1.bf16.msra.mxu0 %v1510_v22  ;;  %1577 = vmatprep.subr.bf16.mxu1 %v1576_v40  ;;  %v731_v22 = vld [vmem:[%s3162_s3 + $0x3c8] sm:$0xff] }
  0x44   : > { %1513 = vmatprep.subr.bf16.mxu0 %v1512_v28  ;;  %v733_v28 = vld [vmem:[%s3162_s3 + $0x3d8] sm:$0xff]  ;;  %v1524_v40 = vpack.c.bf16 %v737_v23, %v731_v22 }
  0x45   : > { %v1588_v47 = vpack.c.bf16 %v739_v29, %v733_v28 }
  0x46   : > { %1579 = vmatpush1.bf16.msra.mxu1 %v1578_v51  ;;  %v1590_v51 = vpack.c.bf16 %v738_v49, %v732_v48 }
  0x47   : > { %1515 = vmatpush1.bf16.msra.mxu0 %v1514_v50  ;;  %1581 = vmatprep.subr.bf16.mxu1 %v1580_v56  ;;  %v1526_v50 = vpack.c.bf16 %v736_v46, %v730_v41 }
  0x48   : > { %1517 = vmatprep.subr.bf16.mxu0 %v1516_v52 }
  0x4a   : > { %1583 = vmatpush1.bf16.msra.mxu1 %v1582_v63 }
  0x4b   : > { %1519 = vmatpush1.bf16.msra.mxu0 %v1518_v62  ;;  %1585 = vmatprep.subr.bf16.mxu1 %v1584_v16 }
  0x4c   : > { %1521 = vmatprep.subr.bf16.mxu0 %v1520_v3 }
  0x4e   : > { %1587 = vmatpush1.bf16.msra.mxu1 %v1586_v35 }
  0x4f   : > { %1523 = vmatpush1.bf16.msra.mxu0 %v1522_v34  ;;  %1589 = vmatprep.subr.bf16.mxu1 %v1588_v47 }
  0x50   : > { %1525 = vmatprep.subr.bf16.mxu0 %v1524_v40 }
  0x52   : > { %1591 = vmatpush1.bf16.msra.mxu1 %v1590_v51 }
  0x53   : > { %1527 = vmatpush1.bf16.msra.mxu0 %v1526_v50 }
  0xa0   : > { %v267_v52 = vpop.xlane.xlu0 %266 }
  0xa1   : > { %v314_v53 = vmul.f32 0.00390625, %v267_v52  ;;  %v273_v54 = vpop.xlane.xlu1 %272 }
  0xa2   : > { %v316_v55 = vmul.f32 0.00390625, %v273_v54 }
  0xa3   : > { %v2196_v56 = vsub.f32 %v1804_v0, %v314_v53  ;;  %v2199_v57 = vsub.f32 %v1807_v1, %v314_v53 }
  0xa4   : > { %v2202_v58 = vsub.f32 %v1810_v2, %v316_v55  ;;  %v2205_v59 = vsub.f32 %v1815_v4, %v316_v55  ;;  %v270_v60 = vpop.xlane.xlu0 %269 }
  0xa5   : > { %v315_v61 = vmul.f32 0.00390625, %v270_v60  ;;  %v276_v62 = vpop.xlane.xlu1 %275  ;;  %v362_v63 = vmul.f32 %v2196_v56, %v2196_v56  ;;  %v363_v3 = vmul.f32 %v2199_v57, %v2199_v57 }
  0xa6   : > { %v317_v0 = vmul.f32 0.00390625, %v276_v62  ;;  %v366_v1 = vmul.f32 %v2202_v58, %v2202_v58  ;;  %v367_v2 = vmul.f32 %v2205_v59, %v2205_v59 }
  0xa7   : > { %v2216_v7 = vsub.f32 %v1818_v5, %v315_v61  ;;  %v2219_v4 = vsub.f32 %v1821_v6, %v315_v61  ;;  %v394_v10 = vadd.f32 %v363_v3, %v362_v63 }
  0xa8   : > { %v2222_v11 = vsub.f32 %v1826_v8, %v317_v0  ;;  %v2225_v16 = vsub.f32 %v1829_v9, %v317_v0  ;;  %v279_v17 = vpop.xlane.xlu0 %278  ;;  %v400_v28 = vadd.f32 %v367_v2, %v366_v1 }
  0xa9   : > { %v318_v22 = vmul.f32 0.00390625, %v279_v17  ;;  %395 = vadd.xlane.f32.xlu0 %v394_v10  ;;  %v282_v23 = vpop.xlane.xlu1 %281  ;;  %v364_v29 = vmul.f32 %v2216_v7, %v2216_v7  ;;  %v365_v5 = vmul.f32 %v2219_v4, %v2219_v4 }
  0xaa   : > { %v319_v6 = vmul.f32 0.00390625, %v282_v23  ;;  %v368_v34 = vmul.f32 %v2222_v11, %v2222_v11  ;;  %v369_v8 = vmul.f32 %v2225_v16, %v2225_v16 }
  0xab   : > { %v2236_v9 = vsub.f32 %v1836_v12, %v318_v22  ;;  %v2239_v35 = vsub.f32 %v1839_v13, %v318_v22  ;;  %v397_v40 = vadd.f32 %v365_v5, %v364_v29 }
  0xac   : > { %v2242_v41 = vsub.f32 %v1842_v14, %v319_v6  ;;  %v2245_v46 = vsub.f32 %v1845_v15, %v319_v6  ;;  %v285_v47 = vpop.xlane.xlu0 %284  ;;  %v403_v50 = vadd.f32 %v369_v8, %v368_v34  ;;  %v743_v34 = vld [vmem:[%s3162_s3 + $0x428] sm:$0xff]  ;;  %v749_v8 = vld [vmem:[%s3162_s3 + $0x458] sm:$0xff] }
  0xad   : > { %v320_v48 = vmul.f32 0.00390625, %v285_v47  ;;  %401 = vadd.xlane.f32.xlu0 %v400_v28  ;;  %398 = vadd.xlane.f32.xlu1 %v397_v40  ;;  %v288_v49 = vpop.xlane.xlu1 %287  ;;  %v370_v12 = vmul.f32 %v2236_v9, %v2236_v9  ;;  %v371_v13 = vmul.f32 %v2239_v35, %v2239_v35  ;;  %v745_v40 = vld [vmem:[%s3162_s3 + $0x438] sm:$0xff] }
  0xae   : > { %v321_v51 = vmul.f32 0.00390625, %v288_v49  ;;  %v372_v14 = vmul.f32 %v2242_v41, %v2242_v41  ;;  %v373_v15 = vmul.f32 %v2245_v46, %v2245_v46 }
  0xaf   : > { %v2256_v52 = vsub.f32 %v1852_v18, %v320_v48  ;;  %v2259_v53 = vsub.f32 %v1855_v19, %v320_v48  ;;  %v406_v54 = vadd.f32 %v371_v13, %v370_v12  ;;  %v751_v12 = vld [vmem:[%s3162_s3 + $0x468] sm:$0xff]  ;;  %v742_v13 = vld [vmem:[%s3162_s3 + $0x420] sm:$0xff] }
  0xb0   : > { %v2262_v55 = vsub.f32 %v1858_v20, %v321_v51  ;;  %v2265_v60 = vsub.f32 %v1861_v21, %v321_v51  ;;  %v291_v61 = vpop.xlane.xlu0 %290  ;;  %v409_v3 = vadd.f32 %v373_v15, %v372_v14  ;;  %v748_v51 = vld [vmem:[%s3162_s3 + $0x450] sm:$0xff] }
  0xb1   : > { %v322_v62 = vmul.f32 0.00390625, %v291_v61  ;;  %404 = vadd.xlane.f32.xlu1 %v403_v50  ;;  %407 = vadd.xlane.f32.xlu0 %v406_v54  ;;  %v294_v63 = vpop.xlane.xlu1 %293  ;;  %v374_v18 = vmul.f32 %v2256_v52, %v2256_v52  ;;  %v375_v19 = vmul.f32 %v2259_v53, %v2259_v53  ;;  %v1528_v50 = vpack.c.bf16 %v749_v8, %v743_v34  ;;  %v744_v61 = vld [vmem:[%s3162_s3 + $0x430] sm:$0xff]  ;;  %v754_v34 = vld [vmem:[%s3162_s3 + $0x480] sm:$0xff] }
  0xb2   : > { %v323_v0 = vmul.f32 0.00390625, %v294_v63  ;;  %v376_v20 = vmul.f32 %v2262_v55, %v2262_v55  ;;  %v377_v21 = vmul.f32 %v2265_v60, %v2265_v60  ;;  %v1592_v54 = vpack.c.bf16 %v751_v12, %v745_v40  ;;  %v756_v12 = vld [vmem:[%s3162_s3 + $0x490] sm:$0xff] }
  0xb3   : > { %v2276_v1 = vsub.f32 %v1868_v24, %v322_v62  ;;  %v2279_v2 = vsub.f32 %v1871_v25, %v322_v62  ;;  %v412_v10 = vadd.f32 %v375_v19, %v374_v18  ;;  %v750_v62 = vld [vmem:[%s3162_s3 + $0x460] sm:$0xff]  ;;  %v1530_v18 = vpack.c.bf16 %v748_v51, %v742_v13  ;;  %1529 = vmatprep.subr.bf16.mxu0 %v1528_v50 }
  0xb4   : > { %v2282_v17 = vsub.f32 %v1874_v26, %v323_v0  ;;  %v2285_v22 = vsub.f32 %v1877_v27, %v323_v0  ;;  %v297_v23 = vpop.xlane.xlu0 %296  ;;  %v415_v5 = vadd.f32 %v377_v21, %v376_v20  ;;  %1593 = vmatprep.subr.bf16.mxu1 %v1592_v54  ;;  %v1594_v21 = vpack.c.bf16 %v750_v62, %v744_v61  ;;  %v762_v13 = vld [vmem:[%s3162_s3 + $0x4c0] sm:$0xff] }
  0xb5   : > { %v324_v28 = vmul.f32 0.00390625, %v297_v23  ;;  %410 = vadd.xlane.f32.xlu1 %v409_v3  ;;  %413 = vadd.xlane.f32.xlu0 %v412_v10  ;;  %v300_v29 = vpop.xlane.xlu1 %299  ;;  %v378_v24 = vmul.f32 %v2276_v1, %v2276_v1  ;;  %v379_v25 = vmul.f32 %v2279_v2, %v2279_v2 }
  0xb6   : > { %v325_v6 = vmul.f32 0.00390625, %v300_v29  ;;  %v380_v26 = vmul.f32 %v2282_v17, %v2282_v17  ;;  %v381_v27 = vmul.f32 %v2285_v22, %v2285_v22  ;;  %1531 = vmatpush1.bf16.msra.mxu0 %v1530_v18  ;;  %v755_v29 = vld [vmem:[%s3162_s3 + $0x488] sm:$0xff]  ;;  %1595 = vmatpush1.bf16.msra.mxu1 %v1594_v21  ;;  %v769_v18 = vld [vmem:[%s3162_s3 + $0x4f8] sm:$0xff]  ;;  %v766_v21 = vld [vmem:[%s3162_s3 + $0x4e0] sm:$0xff] }
  0xb7   : > { %v2305_v47 = vsub.f32 %v1884_v30, %v324_v28  ;;  %v2308_v48 = vsub.f32 %v1887_v31, %v324_v28  ;;  %v418_v49 = vadd.f32 %v379_v25, %v378_v24  ;;  %v757_v24 = vld [vmem:[%s3162_s3 + $0x498] sm:$0xff] }
  0xb8   : > { %v2320_v30 = vsub.f32 %v1890_v32, %v325_v6  ;;  %v2323_v31 = vsub.f32 %v1893_v33, %v325_v6  ;;  %v303_v14 = vpop.xlane.xlu0 %302  ;;  %v421_v15 = vadd.f32 %v381_v27, %v380_v26  ;;  %v763_v27 = vld [vmem:[%s3162_s3 + $0x4c8] sm:$0xff] }
  0xb9   : > { %v326_v63 = vmul.f32 0.00390625, %v303_v14  ;;  %416 = vadd.xlane.f32.xlu1 %v415_v5  ;;  %419 = vadd.xlane.f32.xlu0 %v418_v49  ;;  %v306_v3 = vpop.xlane.xlu1 %305  ;;  %v382_v32 = vmul.f32 %v2305_v47, %v2305_v47  ;;  %v383_v33 = vmul.f32 %v2308_v48, %v2308_v48  ;;  %v761_v5 = vld [vmem:[%s3162_s3 + $0x4b8] sm:$0xff]  ;;  %v1596_v50 = vpack.c.bf16 %v763_v27, %v757_v24  ;;  %v774_v24 = vld [vmem:[%s3162_s3 + $0x520] sm:$0xff] }
  0xba   : > { %v327_v19 = vmul.f32 0.00390625, %v306_v3  ;;  %v384_v0 = vmul.f32 %v2320_v30, %v2320_v30  ;;  %v385_v20 = vmul.f32 %v2323_v31, %v2323_v31  ;;  %v1532_v26 = vpack.c.bf16 %v761_v5, %v755_v29  ;;  %v768_v5 = vld [vmem:[%s3162_s3 + $0x4f0] sm:$0xff] }
  0xbb   : > { %v2340_v10 = vsub.f32 %v1900_v36, %v326_v63  ;;  %v2343_v23 = vsub.f32 %v1903_v37, %v326_v63  ;;  %v424_v28 = vadd.f32 %v383_v33, %v382_v32  ;;  %1597 = vmatprep.subr.bf16.mxu1 %v1596_v50  ;;  %v1598_v3 = vpack.c.bf16 %v762_v13, %v756_v12  ;;  %v767_v32 = vld [vmem:[%s3162_s3 + $0x4e8] sm:$0xff]  ;;  %v773_v33 = vld [vmem:[%s3162_s3 + $0x518] sm:$0xff]  ;;  %v778_v50 = vld [vmem:[%s3162_s3 + $0x540] sm:$0xff] }
  0xbc   : > { %v2355_v36 = vsub.f32 %v1906_v38, %v327_v19  ;;  %v2358_v37 = vsub.f32 %v1909_v39, %v327_v19  ;;  %v309_v25 = vpop.xlane.xlu0 %308  ;;  %v427_v6 = vadd.f32 %v385_v20, %v384_v0  ;;  %v760_v38 = vld [vmem:[%s3162_s3 + $0x4b0] sm:$0xff]  ;;  %1533 = vmatprep.subr.bf16.mxu0 %v1532_v26  ;;  %v1536_v0 = vpack.c.bf16 %v773_v33, %v767_v32  ;;  %v775_v20 = vld [vmem:[%s3162_s3 + $0x528] sm:$0xff]  ;;  %v797_v32 = vld [vmem:[%s3162_s3 + $0x5d8] sm:$0xff] }
  0xbd   : > { %v328_v8 = vmul.f32 0.00390625, %v309_v25  ;;  %422 = vadd.xlane.f32.xlu1 %v421_v15  ;;  %425 = vadd.xlane.f32.xlu0 %v424_v28  ;;  %v312_v39 = vpop.xlane.xlu1 %311  ;;  %v386_v40 = vmul.f32 %v2340_v10, %v2340_v10  ;;  %v387_v49 = vmul.f32 %v2343_v23, %v2343_v23  ;;  %v1534_v54 = vpack.c.bf16 %v760_v38, %v754_v34  ;;  %v772_v28 = vld [vmem:[%s3162_s3 + $0x510] sm:$0xff]  ;;  %v779_v38 = vld [vmem:[%s3162_s3 + $0x548] sm:$0xff]  ;;  %v793_v33 = vld [vmem:[%s3162_s3 + $0x5b8] sm:$0xff] }
  0xbe   : > { %v329_v51 = vmul.f32 0.00390625, %v312_v39  ;;  %v388_v14 = vmul.f32 %v2355_v36, %v2355_v36  ;;  %v389_v15 = vmul.f32 %v2358_v37, %v2358_v37  ;;  %v1600_v29 = vpack.c.bf16 %v775_v20, %v769_v18  ;;  %1599 = vmatpush1.bf16.msra.mxu1 %v1598_v3  ;;  %v781_v39 = vld [vmem:[%s3162_s3 + $0x558] sm:$0xff]  ;;  %v784_v12 = vld [vmem:[%s3162_s3 + $0x570] sm:$0xff]  ;;  %v791_v3 = vld [vmem:[%s3162_s3 + $0x5a8] sm:$0xff] }
  0xbf   : > { %v2384_v61 = vsub.f32 %v1916_v42, %v328_v8  ;;  %v2387_v62 = vsub.f32 %v1919_v43, %v328_v8  ;;  %v430_v63 = vadd.f32 %v387_v49, %v386_v40  ;;  %1535 = vmatpush1.bf16.msra.mxu0 %v1534_v54  ;;  %v1538_v26 = vpack.c.bf16 %v772_v28, %v766_v21  ;;  %v785_v8 = vld [vmem:[%s3162_s3 + $0x578] sm:$0xff]  ;;  %v787_v49 = vld [vmem:[%s3162_s3 + $0x588] sm:$0xff]  ;;  %v786_v54 = vld [vmem:[%s3162_s3 + $0x580] sm:$0xff] }
  0xc0   : > { %v2399_v42 = vsub.f32 %v1922_v44, %v329_v51  ;;  %v2402_v43 = vsub.f32 %v1925_v45, %v329_v51  ;;  %v433_v19 = vadd.f32 %v389_v15, %v388_v14  ;;  %1537 = vmatprep.subr.bf16.mxu0 %v1536_v0  ;;  %1601 = vmatprep.subr.bf16.mxu1 %v1600_v29  ;;  %v780_v15 = vld [vmem:[%s3162_s3 + $0x550] sm:$0xff]  ;;  %v790_v0 = vld [vmem:[%s3162_s3 + $0x5a0] sm:$0xff] }
  0xc1   : > { %428 = vadd.xlane.f32.xlu1 %v427_v6  ;;  %431 = vadd.xlane.f32.xlu0 %v430_v63  ;;  %v390_v44 = vmul.f32 %v2384_v61, %v2384_v61  ;;  %v391_v45 = vmul.f32 %v2387_v62, %v2387_v62  ;;  %v1602_v34 = vpack.c.bf16 %v774_v24, %v768_v5  ;;  %v796_v20 = vld [vmem:[%s3162_s3 + $0x5d0] sm:$0xff]  ;;  %v615_v5 = vld [vmem:[%s3162_s3 + $0x28] sm:$0xff]  ;;  %v621_v24 = vld [vmem:[%s3162_s3 + $0x58] sm:$0xff] }
  0xc2   : > { %v392_v25 = vmul.f32 %v2399_v42, %v2399_v42  ;;  %v393_v6 = vmul.f32 %v2402_v43, %v2402_v43  ;;  %v1540_v40 = vpack.c.bf16 %v785_v8, %v779_v38  ;;  %v1604_v51 = vpack.c.bf16 %v787_v49, %v781_v39 }
  0xc3   : > { %v436_v27 = vadd.f32 %v391_v45, %v390_v44  ;;  %1539 = vmatpush1.bf16.msra.mxu0 %v1538_v26  ;;  %v1542_v14 = vpack.c.bf16 %v784_v12, %v778_v50  ;;  %1603 = vmatpush1.bf16.msra.mxu1 %v1602_v34  ;;  %v1606_v63 = vpack.c.bf16 %v786_v54, %v780_v15  ;;  %v792_v44 = vld [vmem:[%s3162_s3 + $0x5b0] sm:$0xff]  ;;  %v798_v45 = vld [vmem:[%s3162_s3 + $0x5e0] sm:$0xff] }
  0xc4   : > { %v439_v13 = vadd.f32 %v393_v6, %v392_v25  ;;  %1541 = vmatprep.subr.bf16.mxu0 %v1540_v40  ;;  %1605 = vmatprep.subr.bf16.mxu1 %v1604_v51  ;;  %v1544_v18 = vpack.c.bf16 %v797_v32, %v791_v3  ;;  %v1546_v28 = vpack.c.bf16 %v796_v20, %v790_v0 }
  0xc5   : > { %434 = vadd.xlane.f32.xlu1 %v433_v19  ;;  %437 = vadd.xlane.f32.xlu0 %v436_v27  ;;  %v799_v19 = vld [vmem:[%s3162_s3 + $0x5e8] sm:$0xff]  ;;  %v1610_v29 = vpack.c.bf16 %v798_v45, %v792_v44  ;;  %v1612_v25 = vpack.c.bf16 %v621_v24, %v615_v5  ;;  %v524_v27 = vlaneseq }
  0xc6   : > { %v1608_v21 = vpack.c.bf16 %v799_v19, %v793_v33  ;;  %v522_v33 = vld [vmem:[%s3160_s1] sm:$0x3] }
  0xc7   : > { %1543 = vmatpush1.bf16.msra.mxu0 %v1542_v14  ;;  %1607 = vmatpush1.bf16.msra.mxu1 %v1606_v63  ;;  %v2481_v49 = vshrl.u32 %v524_v27, 7  ;;  %v614_v27 = vld [vmem:[%s3162_s3 + $0x20] sm:$0xff] }
  0xc8   : > { %1545 = vmatprep.subr.bf16.mxu0 %v1544_v18  ;;  %1609 = vmatprep.subr.bf16.mxu1 %v1608_v21  ;;  %v566_v21 = vld [vmem:[%s3161_s2] sm:$0x3] }
  0xc9   : > { %440 = vadd.xlane.f32.xlu1 %v439_v13  ;;  %v2484_v54 = vsub.s32 1, %v2481_v49  ;;  %v2487_v63 = vsub.s32 0, %v2481_v49 }
  0xcb   : > { %1547 = vmatpush1.bf16.msra.mxu0 %v1546_v28  ;;  %1611 = vmatpush1.bf16.msra.mxu1 %v1610_v29  ;;  %v2496_v28 = vrot.slane %v522_v33, %v2484_v54  ;;  %v2499_v44 = vrot.slane %v522_v33, %v2487_v63 }
  0xcc   : > { %1613 = vmatprep.subr.bf16.mxu0 %v1612_v25  ;;  %1676 = vmatprep.subr.bf16.mxu1 %v1612_v25  ;;  %v2503_v25 = vrot.slane %v566_v21, %v2484_v54 }
 0x136   : > { %v396_v6 = vpop.xlane.xlu0 %395 }
 0x137   : > { %v442_v26 = vmul.f32 0.00390625, %v396_v6 }
 0x139   : > { %v458_v34 = vadd.f32 1e-05, %v442_v26  ;;  %v2507_v26 = vrot.slane %v566_v21, %v2487_v63 }
 0x13a   : > { %v399_v38 = vpop.xlane.xlu1 %398  ;;  %v402_v8 = vpop.xlane.xlu0 %401 }
 0x13b   : > { %1717 = vrsqrt.f32 %v458_v34  ;;  %v443_v39 = vmul.f32 0.00390625, %v399_v38  ;;  %v444_v40 = vmul.f32 0.00390625, %v402_v8  ;;  %v620_v34 = vld [vmem:[%s3162_s3 + $0x50] sm:$0xff] }
 0x13d   : > { %v459_v50 = vadd.f32 1e-05, %v443_v39  ;;  %v460_v12 = vadd.f32 1e-05, %v444_v40 }
 0x13e   : > { %v405_v13 = vpop.xlane.xlu1 %404  ;;  %v408_v51 = vpop.xlane.xlu0 %407 }
 0x13f   : > { %1719 = vrsqrt.f32 %v459_v50  ;;  %v445_v14 = vmul.f32 0.00390625, %v405_v13  ;;  %v446_v15 = vmul.f32 0.00390625, %v408_v51  ;;  %v633_v50 = vld [vmem:[%s3162_s3 + $0xb8] sm:$0xff]  ;;  %v1614_v13 = vpack.c.bf16 %v620_v34, %v614_v27 }
 0x140   : > { %1721 = vrsqrt.f32 %v460_v12 }
 0x141   : > { %v461_v3 = vadd.f32 1e-05, %v445_v14  ;;  %v462_v32 = vadd.f32 1e-05, %v446_v15 }
 0x142   : > { %v411_v18 = vpop.xlane.xlu1 %410  ;;  %v414_v19 = vpop.xlane.xlu0 %413 }
 0x143   : > { %1723 = vrsqrt.f32 %v461_v3  ;;  %v447_v0 = vmul.f32 0.00390625, %v411_v18  ;;  %v448_v20 = vmul.f32 0.00390625, %v414_v19  ;;  %v626_v19 = vld [vmem:[%s3162_s3 + $0x80] sm:$0xff] }
 0x144   : > { %1725 = vrsqrt.f32 %v462_v32 }
 0x145   : > { %v1718_v45 = vpop.eup %1717  ;;  %v463_v29 = vadd.f32 1e-05, %v447_v0  ;;  %v464_v38 = vadd.f32 1e-05, %v448_v20  ;;  %v632_v0 = vld [vmem:[%s3162_s3 + $0xb0] sm:$0xff] }
 0x146   : > { %v417_v5 = vpop.xlane.xlu1 %416  ;;  %v491_v24 = vmul.f32 %v1718_v45, %v2199_v57  ;;  %v490_v6 = vmul.f32 %v1718_v45, %v2196_v56  ;;  %v420_v57 = vpop.xlane.xlu0 %419  ;;  %v627_v56 = vld [vmem:[%s3162_s3 + $0x88] sm:$0xff] }
 0x147   : > { %1727 = vrsqrt.f32 %v463_v29  ;;  %v449_v8 = vmul.f32 0.00390625, %v417_v5  ;;  %v450_v33 = vmul.f32 0.00390625, %v420_v57  ;;  %v1616_v18 = vpack.c.bf16 %v633_v50, %v627_v56  ;;  %v639_v45 = vld [vmem:[%s3162_s3 + $0xe8] sm:$0xff]  ;;  %v645_v29 = vld [vmem:[%s3162_s3 + $0x118] sm:$0xff]  ;;  %v644_v56 = vld [vmem:[%s3162_s3 + $0x110] sm:$0xff] }
 0x148   : > { %v535_v39 = vmul.f32 %v2496_v28, %v491_v24  ;;  %v534_v40 = vmul.f32 %v2499_v44, %v490_v6  ;;  %1729 = vrsqrt.f32 %v464_v38 }
 0x149   : > { %v1720_v12 = vpop.eup %1719  ;;  %v465_v21 = vadd.f32 1e-05, %v449_v8  ;;  %v1618_v8 = vpack.c.bf16 %v632_v0, %v626_v19  ;;  %v466_v57 = vadd.f32 1e-05, %v450_v33  ;;  %v657_v33 = vld [vmem:[%s3162_s3 + $0x178] sm:$0xff] }
 0x14a   : > { %v1722_v51 = vpop.eup %1721  ;;  %v2524_v14 = vadd.f32 %v2503_v25, %v535_v39  ;;  %v2527_v15 = vadd.f32 %v2507_v26, %v534_v40  ;;  %v493_v3 = vmul.f32 %v1720_v12, %v2219_v4  ;;  %v492_v32 = vmul.f32 %v1720_v12, %v2216_v7  ;;  %v423_v24 = vpop.xlane.xlu1 %422  ;;  %v638_v40 = vld [vmem:[%s3162_s3 + $0xe0] sm:$0xff] }
 0x14b   : > { %v495_v20 = vmul.f32 %v1722_v51, %v2205_v59  ;;  %v494_v5 = vmul.f32 %v1722_v51, %v2202_v58  ;;  %v1620_v58 = vpack.c.bf16 %v645_v29, %v639_v45  ;;  %1731 = vrsqrt.f32 %v465_v21  ;;  %v426_v51 = vpop.xlane.xlu0 %425  ;;  %v650_v21 = vld [vmem:[%s3162_s3 + $0x140] sm:$0xff] }
 0x14c   : > { %898 = vmatprep.mubr.f32.mxu0 %v2524_v14  ;;  %1059 = vmatprep.mubr.f32.mxu1 %v2524_v14  ;;  %v537_v7 = vmul.f32 %v2496_v28, %v493_v3  ;;  %v536_v4 = vmul.f32 %v2499_v44, %v492_v32  ;;  %v451_v50 = vmul.f32 0.00390625, %v423_v24  ;;  %v651_v32 = vld [vmem:[%s3162_s3 + $0x148] sm:$0xff]  ;;  %1733 = vrsqrt.f32 %v466_v57 }
 0x14d   : > { %v1724_v59 = vpop.eup %1723  ;;  %899 = vmatmul.mubr.f32.vlgmr.msra.gmra.mrb[0].mxu0 %v2527_v15  ;;  %1060 = vmatmul.mubr.f32.vlgmr.msra.gmra.mrb[0].mxu1 %v2527_v15  ;;  %v539_v6 = vmul.f32 %v2496_v28, %v495_v20  ;;  %v538_v39 = vmul.f32 %v2499_v44, %v494_v5  ;;  %v452_v45 = vmul.f32 0.00390625, %v426_v51  ;;  %v1624_v29 = vpack.c.bf16 %v657_v33, %v651_v32 }
 0x14e   : > { %v1726_v27 = vpop.eup %1725  ;;  %1615 = vmatpush1.bf16.msra.mxu0 %v1614_v13  ;;  %1692 = vmatpush1.bf16.msra.mxu1 %v1614_v13  ;;  %v2553_v34 = vadd.f32 %v2503_v25, %v537_v7  ;;  %v2556_v38 = vadd.f32 %v2507_v26, %v536_v4  ;;  %v497_v12 = vmul.f32 %v1724_v59, %v2225_v16  ;;  %v467_v4 = vadd.f32 1e-05, %v451_v50 }
 0x14f   : > { %1617 = vmatprep.subr.bf16.mxu0 %v1616_v18  ;;  %1677 = vmatprep.subr.bf16.mxu1 %v1616_v18  ;;  %v496_v13 = vmul.f32 %v1724_v59, %v2222_v11  ;;  %v2572_v3 = vadd.f32 %v2503_v25, %v539_v6  ;;  %v499_v16 = vmul.f32 %v1726_v27, %v2239_v35  ;;  %v656_v35 = vld [vmem:[%s3162_s3 + $0x170] sm:$0xff]  ;;  %v429_v59 = vpop.xlane.xlu1 %428  ;;  %v468_v50 = vadd.f32 1e-05, %v452_v45  ;;  %v432_v51 = vpop.xlane.xlu0 %431 }
 0x150   : > { %904 = vmatprep.mubr.f32.mxu0 %v2553_v34  ;;  %1065 = vmatprep.mubr.f32.mxu1 %v2553_v34  ;;  %v1622_v11 = vpack.c.bf16 %v644_v56, %v638_v40  ;;  %v541_v19 = vmul.f32 %v2496_v28, %v497_v12  ;;  %v2585_v0 = vadd.f32 %v2507_v26, %v538_v39  ;;  %v662_v40 = vld [vmem:[%s3162_s3 + $0x1a0] sm:$0xff]  ;;  %1735 = vrsqrt.f32 %v467_v4 }
 0x151   : > { %905 = vmatmul.mubr.f32.gmra.mrb[2].mxu0 %v2556_v38  ;;  %1066 = vmatmul.mubr.f32.gmra.mrb[2].mxu1 %v2556_v38  ;;  %v1728_v18 = vpop.eup %1727  ;;  %v540_v20 = vmul.f32 %v2499_v44, %v496_v13  ;;  %v498_v7 = vmul.f32 %v1726_v27, %v2236_v9  ;;  %v543_v6 = vmul.f32 %v2496_v28, %v499_v16  ;;  %v663_v9 = vld [vmem:[%s3162_s3 + $0x1a8] sm:$0xff]  ;;  %v669_v27 = vld [vmem:[%s3162_s3 + $0x1d8] sm:$0xff]  ;;  %v453_v12 = vmul.f32 0.00390625, %v429_v59 }
 0x152   : > { %1619 = vmatpush1.bf16.msra.mxu0 %v1618_v8  ;;  %1693 = vmatpush1.bf16.msra.mxu1 %v1618_v8  ;;  %v1730_v5 = vpop.eup %1729  ;;  %v2598_v24 = vadd.f32 %v2503_v25, %v541_v19  ;;  %v501_v8 = vmul.f32 %v1728_v18, %v2245_v46  ;;  %v1626_v57 = vpack.c.bf16 %v656_v35, %v650_v21  ;;  %v668_v46 = vld [vmem:[%s3162_s3 + $0x1d0] sm:$0xff]  ;;  %v681_v16 = vld [vmem:[%s3162_s3 + $0x238] sm:$0xff]  ;;  %v674_v35 = vld [vmem:[%s3162_s3 + $0x200] sm:$0xff]  ;;  %1737 = vrsqrt.f32 %v468_v50 }
 0x153   : > { %910 = vmatprep.mubr.f32.mxu0 %v2572_v3  ;;  %1071 = vmatprep.mubr.f32.mxu1 %v2572_v3  ;;  %v542_v39 = vmul.f32 %v2499_v44, %v498_v7  ;;  %v500_v56 = vmul.f32 %v1728_v18, %v2242_v41  ;;  %v1628_v13 = vpack.c.bf16 %v669_v27, %v663_v9  ;;  %v675_v41 = vld [vmem:[%s3162_s3 + $0x208] sm:$0xff]  ;;  %v469_v4 = vadd.f32 1e-05, %v453_v12  ;;  %v435_v59 = vpop.xlane.xlu1 %434 }
 0x154   : > { %1621 = vmatprep.subr.bf16.mxu0 %v1620_v58  ;;  %1678 = vmatprep.subr.bf16.mxu1 %v1620_v58  ;;  %v2611_v58 = vadd.f32 %v2507_v26, %v540_v20  ;;  %v2624_v32 = vadd.f32 %v2503_v25, %v543_v6  ;;  %v545_v33 = vmul.f32 %v2496_v28, %v501_v8  ;;  %v454_v45 = vmul.f32 0.00390625, %v432_v51  ;;  %v438_v51 = vpop.xlane.xlu0 %437 }
 0x155   : > { %911 = vmatmul.mubr.f32.gmra.mrb[4].mxu0 %v2585_v0  ;;  %1072 = vmatmul.mubr.f32.gmra.mrb[4].mxu1 %v2585_v0  ;;  %v503_v18 = vmul.f32 %v1730_v5, %v2259_v53  ;;  %v1630_v19 = vpack.c.bf16 %v668_v46, %v662_v40  ;;  %v2637_v20 = vadd.f32 %v2507_v26, %v542_v39  ;;  %v680_v53 = vld [vmem:[%s3162_s3 + $0x230] sm:$0xff]  ;;  %v686_v46 = vld [vmem:[%s3162_s3 + $0x260] sm:$0xff]  ;;  %1739 = vrsqrt.f32 %v469_v4 }
 0x156   : > { %1623 = vmatpush1.bf16.msra.mxu0 %v1622_v11  ;;  %1694 = vmatpush1.bf16.msra.mxu1 %v1622_v11  ;;  %v1732_v11 = vpop.eup %1731  ;;  %v544_v21 = vmul.f32 %v2499_v44, %v500_v56  ;;  %v502_v7 = vmul.f32 %v1730_v5, %v2256_v52  ;;  %v2650_v6 = vadd.f32 %v2503_v25, %v545_v33  ;;  %v687_v52 = vld [vmem:[%s3162_s3 + $0x268] sm:$0xff]  ;;  %v693_v5 = vld [vmem:[%s3162_s3 + $0x298] sm:$0xff]  ;;  %v470_v50 = vadd.f32 1e-05, %v454_v45 }
 0x157   : > { %916 = vmatprep.mubr.f32.mxu0 %v2598_v24  ;;  %1077 = vmatprep.mubr.f32.mxu1 %v2598_v24  ;;  %v547_v9 = vmul.f32 %v2496_v28, %v503_v18  ;;  %v505_v27 = vmul.f32 %v1732_v11, %v2265_v60  ;;  %v1734_v8 = vpop.eup %1733  ;;  %v692_v60 = vld [vmem:[%s3162_s3 + $0x290] sm:$0xff]  ;;  %v504_v56 = vmul.f32 %v1732_v11, %v2262_v55  ;;  %v455_v12 = vmul.f32 0.00390625, %v435_v59  ;;  %v699_v55 = vld [vmem:[%s3162_s3 + $0x2c8] sm:$0xff]  ;;  %v441_v59 = vpop.xlane.xlu1 %440 }
 0x158   : > { %1625 = vmatprep.subr.bf16.mxu0 %v1624_v29  ;;  %1679 = vmatprep.subr.bf16.mxu1 %v1624_v29  ;;  %v1632_v29 = vpack.c.bf16 %v681_v16, %v675_v41  ;;  %v2663_v39 = vadd.f32 %v2507_v26, %v544_v21  ;;  %v546_v40 = vmul.f32 %v2499_v44, %v502_v7  ;;  %v705_v16 = vld [vmem:[%s3162_s3 + $0x2f8] sm:$0xff]  ;;  %1741 = vrsqrt.f32 %v470_v50 }
 0x159   : > { %917 = vmatmul.mubr.f32.gmra.mrb[6].mxu0 %v2611_v58  ;;  %1078 = vmatmul.mubr.f32.gmra.mrb[6].mxu1 %v2611_v58  ;;  %v2676_v33 = vadd.f32 %v2503_v25, %v547_v9  ;;  %v549_v41 = vmul.f32 %v2496_v28, %v505_v27  ;;  %v507_v18 = vmul.f32 %v1734_v8, %v2279_v2  ;;  %v704_v2 = vld [vmem:[%s3162_s3 + $0x2f0] sm:$0xff]  ;;  %v471_v4 = vadd.f32 1e-05, %v455_v12 }
 0x15a   : > { %1627 = vmatpush1.bf16.msra.mxu0 %v1626_v57  ;;  %1695 = vmatpush1.bf16.msra.mxu1 %v1626_v57  ;;  %v1634_v57 = vpack.c.bf16 %v680_v53, %v674_v35  ;;  %v1736_v11 = vpop.eup %1735  ;;  %v2689_v21 = vadd.f32 %v2507_v26, %v546_v40  ;;  %v548_v35 = vmul.f32 %v2499_v44, %v504_v56  ;;  %v698_v53 = vld [vmem:[%s3162_s3 + $0x2c0] sm:$0xff]  ;;  %v456_v45 = vmul.f32 0.00390625, %v438_v51 }
 0x15b   : > { %922 = vmatprep.mubr.f32.mxu0 %v2624_v32  ;;  %1083 = vmatprep.mubr.f32.mxu1 %v2624_v32  ;;  %v506_v7 = vmul.f32 %v1734_v8, %v2276_v1  ;;  %v2702_v9 = vadd.f32 %v2503_v25, %v549_v41  ;;  %v711_v1 = vld [vmem:[%s3162_s3 + $0x328] sm:$0xff]  ;;  %v509_v27 = vmul.f32 %v1736_v11, %v2285_v22  ;;  %v716_v22 = vld [vmem:[%s3162_s3 + $0x350] sm:$0xff]  ;;  %1743 = vrsqrt.f32 %v471_v4 }
 0x15c   : > { %1629 = vmatprep.subr.bf16.mxu0 %v1628_v13  ;;  %1680 = vmatprep.subr.bf16.mxu1 %v1628_v13  ;;  %v1636_v13 = vpack.c.bf16 %v693_v5, %v687_v52  ;;  %v551_v52 = vmul.f32 %v2496_v28, %v507_v18  ;;  %v717_v5 = vld [vmem:[%s3162_s3 + $0x358] sm:$0xff]  ;;  %v1738_v8 = vpop.eup %1737  ;;  %v2715_v40 = vadd.f32 %v2507_v26, %v548_v35  ;;  %v472_v50 = vadd.f32 1e-05, %v456_v45 }
 0x15d   : > { %923 = vmatmul.mubr.f32.gmra.mrb[8].mxu0 %v2637_v20  ;;  %1084 = vmatmul.mubr.f32.gmra.mrb[8].mxu1 %v2637_v20  ;;  %v508_v56 = vmul.f32 %v1736_v11, %v2282_v17  ;;  %v457_v12 = vmul.f32 0.00390625, %v441_v59  ;;  %v553_v41 = vmul.f32 %v2496_v28, %v509_v27  ;;  %v729_v17 = vld [vmem:[%s3162_s3 + $0x3b8] sm:$0xff]  ;;  %v735_v59 = vld [vmem:[%s3162_s3 + $0x3e8] sm:$0xff] }
 0x15e   : > { %1631 = vmatpush1.bf16.msra.mxu0 %v1630_v19  ;;  %1696 = vmatpush1.bf16.msra.mxu1 %v1630_v19  ;;  %v1638_v19 = vpack.c.bf16 %v692_v60, %v686_v46  ;;  %v550_v46 = vmul.f32 %v2499_v44, %v506_v7  ;;  %v710_v60 = vld [vmem:[%s3162_s3 + $0x320] sm:$0xff]  ;;  %v2728_v51 = vadd.f32 %v2503_v25, %v551_v52  ;;  %1745 = vrsqrt.f32 %v472_v50  ;;  %v747_v50 = vld [vmem:[%s3162_s3 + $0x448] sm:$0xff] }
 0x15f   : > { %928 = vmatprep.mubr.f32.mxu0 %v2650_v6  ;;  %1089 = vmatprep.mubr.f32.mxu1 %v2650_v6  ;;  %v1740_v18 = vpop.eup %1739  ;;  %v1646_v11 = vpack.c.bf16 %v716_v22, %v710_v60  ;;  %v552_v35 = vmul.f32 %v2499_v44, %v508_v56  ;;  %v473_v7 = vadd.f32 1e-05, %v457_v12  ;;  %v2754_v45 = vadd.f32 %v2503_v25, %v553_v41 }
 0x160   : > { %1633 = vmatprep.subr.bf16.mxu0 %v1632_v29  ;;  %1681 = vmatprep.subr.bf16.mxu1 %v1632_v29  ;;  %v1640_v29 = vpack.c.bf16 %v705_v16, %v699_v55  ;;  %v723_v55 = vld [vmem:[%s3162_s3 + $0x388] sm:$0xff]  ;;  %v511_v16 = vmul.f32 %v1738_v8, %v2308_v48  ;;  %v728_v48 = vld [vmem:[%s3162_s3 + $0x3b0] sm:$0xff]  ;;  %v513_v52 = vmul.f32 %v1740_v18, %v2323_v31 }
 0x161   : > { %929 = vmatmul.mubr.f32.gmra.mrb[10].mxu0 %v2663_v39  ;;  %1090 = vmatmul.mubr.f32.gmra.mrb[10].mxu1 %v2663_v39  ;;  %v1648_v4 = vpack.c.bf16 %v729_v17, %v723_v55  ;;  %v2767_v27 = vadd.f32 %v2507_v26, %v552_v35  ;;  %v740_v31 = vld [vmem:[%s3162_s3 + $0x410] sm:$0xff]  ;;  %1747 = vrsqrt.f32 %v473_v7 }
 0x162   : > { %1635 = vmatpush1.bf16.msra.mxu0 %v1634_v57  ;;  %1697 = vmatpush1.bf16.msra.mxu1 %v1634_v57  ;;  %v1642_v57 = vpack.c.bf16 %v704_v2, %v698_v53  ;;  %v722_v53 = vld [vmem:[%s3162_s3 + $0x380] sm:$0xff]  ;;  %v510_v2 = vmul.f32 %v1738_v8, %v2305_v47  ;;  %v741_v47 = vld [vmem:[%s3162_s3 + $0x418] sm:$0xff]  ;;  %v557_v56 = vmul.f32 %v2496_v28, %v513_v52 }
 0x163   : > { %934 = vmatprep.mubr.f32.mxu0 %v2676_v33  ;;  %1095 = vmatprep.mubr.f32.mxu1 %v2676_v33  ;;  %v1652_v60 = vpack.c.bf16 %v741_v47, %v735_v59  ;;  %v758_v47 = vld [vmem:[%s3162_s3 + $0x4a0] sm:$0xff] }
 0x164   : > { %1637 = vmatprep.subr.bf16.mxu0 %v1636_v13  ;;  %1682 = vmatprep.subr.bf16.mxu1 %v1636_v13  ;;  %v1644_v13 = vpack.c.bf16 %v717_v5, %v711_v1  ;;  %v1742_v1 = vpop.eup %1741  ;;  %v1650_v5 = vpack.c.bf16 %v728_v48, %v722_v53  ;;  %v554_v8 = vmul.f32 %v2499_v44, %v510_v2  ;;  %v759_v48 = vld [vmem:[%s3162_s3 + $0x4a8] sm:$0xff] }
 0x165   : > { %935 = vmatmul.mubr.f32.gmra.mrb[12].mxu0 %v2689_v21  ;;  %1096 = vmatmul.mubr.f32.gmra.mrb[12].mxu1 %v2689_v21  ;;  %v515_v12 = vmul.f32 %v1742_v1, %v2343_v23  ;;  %v752_v23 = vld [vmem:[%s3162_s3 + $0x470] sm:$0xff]  ;;  %v2806_v35 = vadd.f32 %v2503_v25, %v557_v56 }
 0x166   : > { %1639 = vmatpush1.bf16.msra.mxu0 %v1638_v19  ;;  %1698 = vmatpush1.bf16.msra.mxu1 %v1638_v19  ;;  %v2741_v19 = vadd.f32 %v2507_v26, %v550_v46  ;;  %v512_v46 = vmul.f32 %v1740_v18, %v2320_v30  ;;  %v753_v30 = vld [vmem:[%s3162_s3 + $0x478] sm:$0xff]  ;;  %v2793_v55 = vadd.f32 %v2507_v26, %v554_v8 }
 0x167   : > { %940 = vmatprep.mubr.f32.mxu0 %v2702_v9  ;;  %1101 = vmatprep.mubr.f32.mxu1 %v2702_v9  ;;  %v514_v18 = vmul.f32 %v1742_v1, %v2340_v10  ;;  %v559_v53 = vmul.f32 %v2496_v28, %v515_v12  ;;  %v765_v10 = vld [vmem:[%s3162_s3 + $0x4d8] sm:$0xff] }
 0x168   : > { %1641 = vmatprep.subr.bf16.mxu0 %v1640_v29  ;;  %1683 = vmatprep.subr.bf16.mxu1 %v1640_v29  ;;  %v555_v29 = vmul.f32 %v2496_v28, %v511_v16  ;;  %v556_v17 = vmul.f32 %v2499_v44, %v512_v46  ;;  %v746_v16 = vld [vmem:[%s3162_s3 + $0x440] sm:$0xff]  ;;  %v1660_v1 = vpack.c.bf16 %v765_v10, %v759_v48 }
 0x169   : > { %941 = vmatmul.mubr.f32.gmra.mrb[14].mxu0 %v2715_v40  ;;  %1102 = vmatmul.mubr.f32.gmra.mrb[14].mxu1 %v2715_v40  ;;  %v558_v59 = vmul.f32 %v2499_v44, %v514_v18  ;;  %v782_v48 = vld [vmem:[%s3162_s3 + $0x560] sm:$0xff] }
 0x16a   : > { %1643 = vmatpush1.bf16.msra.mxu0 %v1642_v57  ;;  %1699 = vmatpush1.bf16.msra.mxu1 %v1642_v57  ;;  %v734_v57 = vld [vmem:[%s3162_s3 + $0x3e0] sm:$0xff]  ;;  %v2780_v22 = vadd.f32 %v2503_v25, %v555_v29  ;;  %v2819_v29 = vadd.f32 %v2507_v26, %v556_v17 }
 0x16b   : > { %946 = vmatprep.mubr.f32.mxu0 %v2728_v51  ;;  %1107 = vmatprep.mubr.f32.mxu1 %v2728_v51  ;;  %v1654_v41 = vpack.c.bf16 %v740_v31, %v734_v57  ;;  %v771_v57 = vld [vmem:[%s3162_s3 + $0x508] sm:$0xff]  ;;  %v2845_v56 = vadd.f32 %v2507_v26, %v558_v59 }
 0x16c   : > { %1645 = vmatprep.subr.bf16.mxu0 %v1644_v13  ;;  %1684 = vmatprep.subr.bf16.mxu1 %v1644_v13  ;;  %v1744_v13 = vpop.eup %1743  ;;  %v795_v59 = vld [vmem:[%s3162_s3 + $0x5c8] sm:$0xff] }
 0x16d   : > { %947 = vmatmul.mubr.f32.gmra.mrb[16].mxu0 %v2741_v19  ;;  %1108 = vmatmul.mubr.f32.gmra.mrb[16].mxu1 %v2741_v19  ;;  %v517_v2 = vmul.f32 %v1744_v13, %v2358_v37  ;;  %v1746_v7 = vpop.eup %1745  ;;  %v764_v37 = vld [vmem:[%s3162_s3 + $0x4d0] sm:$0xff]  ;;  %v516_v52 = vmul.f32 %v1744_v13, %v2355_v36  ;;  %v777_v36 = vld [vmem:[%s3162_s3 + $0x538] sm:$0xff] }
 0x16e   : > { %1647 = vmatpush1.bf16.msra.mxu0 %v1646_v11  ;;  %1700 = vmatpush1.bf16.msra.mxu1 %v1646_v11  ;;  %v1656_v11 = vpack.c.bf16 %v753_v30, %v747_v50  ;;  %v519_v31 = vmul.f32 %v1746_v7, %v2387_v62  ;;  %v1748_v46 = vpop.eup %1747  ;;  %v770_v30 = vld [vmem:[%s3162_s3 + $0x500] sm:$0xff]  ;;  %v776_v62 = vld [vmem:[%s3162_s3 + $0x530] sm:$0xff]  ;;  %v518_v12 = vmul.f32 %v1746_v7, %v2384_v61  ;;  %v789_v61 = vld [vmem:[%s3162_s3 + $0x598] sm:$0xff] }
 0x16f   : > { %952 = vmatprep.mubr.f32.mxu0 %v2754_v45  ;;  %1113 = vmatprep.mubr.f32.mxu1 %v2754_v45  ;;  %v561_v8 = vmul.f32 %v2496_v28, %v517_v2  ;;  %v560_v50 = vmul.f32 %v2499_v44, %v516_v52  ;;  %v1664_v13 = vpack.c.bf16 %v777_v36, %v771_v57 }
 0x170   : > { %1649 = vmatprep.subr.bf16.mxu0 %v1648_v4  ;;  %1685 = vmatprep.subr.bf16.mxu1 %v1648_v4  ;;  %v1658_v4 = vpack.c.bf16 %v752_v23, %v746_v16  ;;  %v563_v17 = vmul.f32 %v2496_v28, %v519_v31  ;;  %v783_v16 = vld [vmem:[%s3162_s3 + $0x568] sm:$0xff]  ;;  %v521_v23 = vmul.f32 %v1748_v46, %v2402_v43  ;;  %v788_v43 = vld [vmem:[%s3162_s3 + $0x590] sm:$0xff] }
 0x171   : > { %953 = vmatmul.mubr.f32.gmra.mrb[18].mxu0 %v2767_v27  ;;  %1114 = vmatmul.mubr.f32.gmra.mrb[18].mxu1 %v2767_v27  ;;  %v1666_v18 = vpack.c.bf16 %v776_v62, %v770_v30  ;;  %v520_v10 = vmul.f32 %v1748_v46, %v2399_v42  ;;  %v1668_v2 = vpack.c.bf16 %v789_v61, %v783_v16 }
 0x172   : > { %1651 = vmatpush1.bf16.msra.mxu0 %v1650_v5  ;;  %1701 = vmatpush1.bf16.msra.mxu1 %v1650_v5  ;;  %v2832_v5 = vadd.f32 %v2503_v25, %v559_v53  ;;  %v562_v53 = vmul.f32 %v2499_v44, %v518_v12  ;;  %v607_v7 = vadd.f32 %v2503_v25, %v563_v17 }
 0x173   : > { %958 = vmatprep.mubr.f32.mxu0 %v2780_v22  ;;  %1119 = vmatprep.mubr.f32.mxu1 %v2780_v22  ;;  %v1670_v42 = vpack.c.bf16 %v788_v43, %v782_v48  ;;  %v564_v52 = vmul.f32 %v2499_v44, %v520_v10 }
 0x174   : > { %1653 = vmatprep.subr.bf16.mxu0 %v1652_v60  ;;  %1686 = vmatprep.subr.bf16.mxu1 %v1652_v60  ;;  %v1662_v60 = vpack.c.bf16 %v764_v37, %v758_v47  ;;  %v801_v47 = vld [vmem:[%s3162_s3 + $0x5f8] sm:$0xff]  ;;  %v606_v37 = vadd.f32 %v2507_v26, %v562_v53 }
 0x175   : > { %959 = vmatmul.mubr.f32.gmra.mrb[20].mxu0 %v2793_v55  ;;  %1120 = vmatmul.mubr.f32.gmra.mrb[20].mxu1 %v2793_v55  ;;  %v608_v44 = vadd.f32 %v2507_v26, %v564_v52 }
 0x176   : > { %1655 = vmatpush1.bf16.msra.mxu0 %v1654_v41  ;;  %1702 = vmatpush1.bf16.msra.mxu1 %v1654_v41  ;;  %v2858_v41 = vadd.f32 %v2503_v25, %v561_v8  ;;  %v1672_v8 = vpack.c.bf16 %v801_v47, %v795_v59 }
 0x177   : > { %964 = vmatprep.mubr.f32.mxu0 %v2806_v35  ;;  %1125 = vmatprep.mubr.f32.mxu1 %v2806_v35 }
 0x178   : > { %1657 = vmatprep.subr.bf16.mxu0 %v1656_v11  ;;  %1687 = vmatprep.subr.bf16.mxu1 %v1656_v11  ;;  %v2871_v11 = vadd.f32 %v2507_v26, %v560_v50  ;;  %v2933_v26 = vld [vmem:[%s3163_s4] sm:$0x3f] }
 0x179   : > { %965 = vmatmul.mubr.f32.gmra.mrb[22].mxu0 %v2819_v29  ;;  %1126 = vmatmul.mubr.f32.gmra.mrb[22].mxu1 %v2819_v29 }
 0x17a   : > { %1659 = vmatpush1.bf16.msra.mxu0 %v1658_v4  ;;  %1703 = vmatpush1.bf16.msra.mxu1 %v1658_v4  ;;  %v565_v4 = vmul.f32 %v2496_v28, %v521_v23  ;;  %v794_v28 = vld [vmem:[%s3162_s3 + $0x5c0] sm:$0xff] }
 0x17b   : > { %970 = vmatprep.mubr.f32.mxu0 %v2832_v5  ;;  %1131 = vmatprep.mubr.f32.mxu1 %v2832_v5 }
 0x17c   : > { %1661 = vmatprep.subr.bf16.mxu0 %v1660_v1  ;;  %1688 = vmatprep.subr.bf16.mxu1 %v1660_v1  ;;  %v800_v1 = vld [vmem:[%s3162_s3 + $0x5f0] sm:$0xff]  ;;  %v609_v57 = vadd.f32 %v2503_v25, %v565_v4  ;;  %v814_v25 = vsub.s32 2, %v2481_v49 }
 0x17d   : > { %971 = vmatmul.mubr.f32.gmra.mrb[24].mxu0 %v2845_v56  ;;  %1132 = vmatmul.mubr.f32.gmra.mrb[24].mxu1 %v2845_v56  ;;  %v1674_v36 = vpack.c.bf16 %v800_v1, %v794_v28 }
 0x17e   : > { %1663 = vmatpush1.bf16.msra.mxu0 %v1662_v60  ;;  %1704 = vmatpush1.bf16.msra.mxu1 %v1662_v60 }
 0x17f   : > { %976 = vmatprep.mubr.f32.mxu0 %v2858_v41  ;;  %1137 = vmatprep.mubr.f32.mxu1 %v2858_v41 }
 0x180   : > { %1665 = vmatprep.subr.bf16.mxu0 %v1664_v13  ;;  %1689 = vmatprep.subr.bf16.mxu1 %v1664_v13 }
 0x181   : > { %977 = vmatmul.mubr.f32.gmra.mrb[26].mxu0 %v2871_v11  ;;  %1138 = vmatmul.mubr.f32.gmra.mrb[26].mxu1 %v2871_v11 }
 0x182   : > { %1667 = vmatpush1.bf16.msra.mxu0 %v1666_v18  ;;  %1705 = vmatpush1.bf16.msra.mxu1 %v1666_v18 }
 0x183   : > { %982 = vmatprep.mubr.f32.mxu0 %v607_v7  ;;  %1143 = vmatprep.mubr.f32.mxu1 %v607_v7 }
 0x184   : > { %1669 = vmatprep.subr.bf16.mxu0 %v1668_v2  ;;  %1690 = vmatprep.subr.bf16.mxu1 %v1668_v2 }
 0x185   : > { %983 = vmatmul.mubr.f32.gmra.mrb[28].mxu0 %v606_v37  ;;  %1144 = vmatmul.mubr.f32.gmra.mrb[28].mxu1 %v606_v37 }
 0x186   : > { %1671 = vmatpush1.bf16.msra.mxu0 %v1670_v42  ;;  %1706 = vmatpush1.bf16.msra.mxu1 %v1670_v42 }
 0x187   : > { %988 = vmatprep.mubr.f32.mxu0 %v609_v57  ;;  %1149 = vmatprep.mubr.f32.mxu1 %v609_v57 }
 0x188   : > { %1673 = vmatprep.subr.bf16.mxu0 %v1672_v8  ;;  %1691 = vmatprep.subr.bf16.mxu1 %v1672_v8 }
 0x189   : > { %989 = vmatmul.mubr.f32.gmra.mrb[30].mxu0 %v608_v44  ;;  %1150 = vmatmul.mubr.f32.gmra.mrb[30].mxu1 %v608_v44 }
 0x18a   : > { %1675 = vmatpush1.bf16.msra.mxu0 %v1674_v36  ;;  %1707 = vmatpush1.bf16.msra.mxu1 %v1674_v36 }
 0x18b   : > { %1220 = vmatprep.mubr.f32.mxu0 %v2524_v14  ;;  %1268 = vmatprep.mubr.f32.mxu1 %v2728_v51  ;;  %v818_v14 = vsub.s32 3, %v2481_v49 }
 0x18d   : > { %1221 = vmatmul.mubr.f32.vlgmr.msra.gmra.mrb[32].mxu0 %v2527_v15  ;;  %1269 = vmatmul.mubr.f32.vlgmr.msra.gmra.mrb[32].mxu1 %v2741_v19  ;;  %v2939_v15 = vrot.slane %v2933_v26, %v2487_v63 }
 0x18e   : > { %1226 = vmatprep.mubr.f32.mxu0 %v2553_v34  ;;  %1274 = vmatprep.mubr.f32.mxu1 %v2754_v45  ;;  %v2942_v34 = vrot.slane %v2933_v26, %v814_v25 }
 0x191   : > { %1227 = vmatmul.mubr.f32.gmra.mrb[34].mxu0 %v2556_v38  ;;  %1275 = vmatmul.mubr.f32.gmra.mrb[34].mxu1 %v2767_v27  ;;  %v2946_v38 = vrot.slane %v2933_v26, %v2484_v54 }
 0x192   : > { %1232 = vmatprep.mubr.f32.mxu0 %v2572_v3  ;;  %1280 = vmatprep.mubr.f32.mxu1 %v2780_v22  ;;  %v2949_v3 = vrot.slane %v2933_v26, %v818_v14 }
 0x195   : > { %1233 = vmatmul.mubr.f32.gmra.mrb[36].mxu0 %v2585_v0  ;;  %1281 = vmatmul.mubr.f32.gmra.mrb[36].mxu1 %v2793_v55 }
 0x196   : > { %1238 = vmatprep.mubr.f32.mxu0 %v2598_v24  ;;  %1286 = vmatprep.mubr.f32.mxu1 %v2806_v35 }
 0x199   : > { %1239 = vmatmul.mubr.f32.gmra.mrb[38].mxu0 %v2611_v58  ;;  %1287 = vmatmul.mubr.f32.gmra.mrb[38].mxu1 %v2819_v29 }
 0x19a   : > { %1244 = vmatprep.mubr.f32.mxu0 %v2624_v32  ;;  %1292 = vmatprep.mubr.f32.mxu1 %v2832_v5 }
 0x19d   : > { %1245 = vmatmul.mubr.f32.gmra.mrb[40].mxu0 %v2637_v20  ;;  %1293 = vmatmul.mubr.f32.gmra.mrb[40].mxu1 %v2845_v56 }
 0x19e   : > { %1250 = vmatprep.mubr.f32.mxu0 %v2650_v6  ;;  %1298 = vmatprep.mubr.f32.mxu1 %v2858_v41 }
 0x1a1   : > { %1251 = vmatmul.mubr.f32.gmra.mrb[42].mxu0 %v2663_v39  ;;  %1299 = vmatmul.mubr.f32.gmra.mrb[42].mxu1 %v2871_v11 }
 0x1a2   : > { %1256 = vmatprep.mubr.f32.mxu0 %v2676_v33  ;;  %1304 = vmatprep.mubr.f32.mxu1 %v607_v7 }
 0x1a5   : > { %1257 = vmatmul.mubr.f32.gmra.mrb[44].mxu0 %v2689_v21  ;;  %1305 = vmatmul.mubr.f32.gmra.mrb[44].mxu1 %v606_v37 }
 0x1a6   : > { %1262 = vmatprep.mubr.f32.mxu0 %v2702_v9  ;;  %1310 = vmatprep.mubr.f32.mxu1 %v609_v57 }
 0x1a9   : > { %1263 = vmatmul.mubr.f32.gmra.mrb[46].mxu0 %v2715_v40  ;;  %1311 = vmatmul.mubr.f32.gmra.mrb[46].mxu1 %v608_v44 }
 0x220   : > { %v900_v63 = vpop.f32.mrb[0].mxu0  ;;  %v1061_v0 = vpop.f32.mrb[0].mxu1 }
 0x221   : > { %v901_v24 = vadd.f32 %v900_v63, %v2939_v15  ;;  %v1062_v58 = vadd.f32 %v1061_v0, %v2942_v34  ;;  %v902_v54 = vpop.f32.mrb[1].mxu0  ;;  %v1063_v32 = vpop.f32.mrb[1].mxu1 }
 0x222   : > { %v903_v20 = vadd.f32 %v902_v54, %v2946_v38  ;;  %v1064_v6 = vadd.f32 %v1063_v32, %v2949_v3 }
 0x223   : > { %1317 = vst [vmem:[%s2954_s27] sm:$0xff] %v901_v24  ;;  %1319 = vst [vmem:[%s2954_s27 + $0x10] sm:$0xff] %v1062_v58 }
 0x224   : > { %1318 = vst [vmem:[%s2954_s27 + $0x8] sm:$0xff] %v903_v20  ;;  %1320 = vst [vmem:[%s2954_s27 + $0x18] sm:$0xff] %v1064_v6  ;;  %v906_v39 = vpop.f32.mrb[2].mxu0  ;;  %v1067_v33 = vpop.f32.mrb[2].mxu1 }
 0x225   : > { %v907_v21 = vadd.f32 %v906_v39, %v2939_v15  ;;  %v1068_v9 = vadd.f32 %v1067_v33, %v2942_v34  ;;  %v908_v40 = vpop.f32.mrb[3].mxu0  ;;  %v1069_v51 = vpop.f32.mrb[3].mxu1 }
 0x226   : > { %v909_v19 = vadd.f32 %v908_v40, %v2946_v38  ;;  %v1070_v45 = vadd.f32 %v1069_v51, %v2949_v3 }
 0x227   : > { %1323 = vst [vmem:[%s2954_s27 + $0x30] sm:$0xff] %v907_v21  ;;  %1325 = vst [vmem:[%s2954_s27 + $0x40] sm:$0xff] %v1068_v9 }
 0x228   : > { %1324 = vst [vmem:[%s2954_s27 + $0x38] sm:$0xff] %v909_v19  ;;  %1326 = vst [vmem:[%s2954_s27 + $0x48] sm:$0xff] %v1070_v45  ;;  %v912_v27 = vpop.f32.mrb[4].mxu0  ;;  %v1073_v22 = vpop.f32.mrb[4].mxu1 }
 0x229   : > { %v913_v55 = vadd.f32 %v912_v27, %v2939_v15  ;;  %v1074_v35 = vadd.f32 %v1073_v22, %v2942_v34  ;;  %v914_v29 = vpop.f32.mrb[5].mxu0  ;;  %v1075_v5 = vpop.f32.mrb[5].mxu1 }
 0x22a   : > { %v915_v31 = vadd.f32 %v914_v29, %v2946_v38  ;;  %v1076_v46 = vadd.f32 %v1075_v5, %v2949_v3 }
 0x22b   : > { %1329 = vst [vmem:[%s2954_s27 + $0x60] sm:$0xff] %v913_v55  ;;  %1331 = vst [vmem:[%s2954_s27 + $0x70] sm:$0xff] %v1074_v35 }
 0x22c   : > { %1330 = vst [vmem:[%s2954_s27 + $0x68] sm:$0xff] %v915_v31  ;;  %1332 = vst [vmem:[%s2954_s27 + $0x78] sm:$0xff] %v1076_v46  ;;  %v918_v60 = vpop.f32.mrb[6].mxu0  ;;  %v1079_v56 = vpop.f32.mrb[6].mxu1 }
 0x22d   : > { %v919_v50 = vadd.f32 %v918_v60, %v2939_v15  ;;  %v1080_v30 = vadd.f32 %v1079_v56, %v2942_v34  ;;  %v920_v62 = vpop.f32.mrb[7].mxu0  ;;  %v1081_v12 = vpop.f32.mrb[7].mxu1 }
 0x22e   : > { %v921_v13 = vadd.f32 %v920_v62, %v2946_v38  ;;  %v1082_v41 = vadd.f32 %v1081_v12, %v2949_v3 }
 0x22f   : > { %1335 = vst [vmem:[%s2954_s27 + $0x90] sm:$0xff] %v919_v50  ;;  %1337 = vst [vmem:[%s2954_s27 + $0xa0] sm:$0xff] %v1080_v30 }
 0x230   : > { %1336 = vst [vmem:[%s2954_s27 + $0x98] sm:$0xff] %v921_v13  ;;  %1338 = vst [vmem:[%s2954_s27 + $0xa8] sm:$0xff] %v1082_v41  ;;  %v924_v17 = vpop.f32.mrb[8].mxu0  ;;  %v1085_v16 = vpop.f32.mrb[8].mxu1 }
 0x231   : > { %v925_v61 = vadd.f32 %v924_v17, %v2939_v15  ;;  %v1086_v23 = vadd.f32 %v1085_v16, %v2942_v34  ;;  %v926_v18 = vpop.f32.mrb[9].mxu0  ;;  %v1087_v11 = vpop.f32.mrb[9].mxu1 }
 0x232   : > { %v927_v53 = vadd.f32 %v926_v18, %v2946_v38  ;;  %v1088_v48 = vadd.f32 %v1087_v11, %v2949_v3 }
 0x233   : > { %1341 = vst [vmem:[%s2954_s27 + $0xc0] sm:$0xff] %v925_v61  ;;  %1343 = vst [vmem:[%s2954_s27 + $0xd0] sm:$0xff] %v1086_v23 }
 0x234   : > { %1342 = vst [vmem:[%s2954_s27 + $0xc8] sm:$0xff] %v927_v53  ;;  %1344 = vst [vmem:[%s2954_s27 + $0xd8] sm:$0xff] %v1088_v48  ;;  %v930_v43 = vpop.f32.mrb[10].mxu0  ;;  %v1091_v10 = vpop.f32.mrb[10].mxu1 }
 0x235   : > { %v931_v2 = vadd.f32 %v930_v43, %v2939_v15  ;;  %v1092_v7 = vadd.f32 %v1091_v10, %v2942_v34  ;;  %v932_v4 = vpop.f32.mrb[11].mxu0  ;;  %v1093_v59 = vpop.f32.mrb[11].mxu1 }
 0x236   : > { %v933_v47 = vadd.f32 %v932_v4, %v2946_v38  ;;  %v1094_v42 = vadd.f32 %v1093_v59, %v2949_v3 }
 0x237   : > { %1347 = vst [vmem:[%s2954_s27 + $0xf0] sm:$0xff] %v931_v2  ;;  %1349 = vst [vmem:[%s2954_s27 + $0x100] sm:$0xff] %v1092_v7 }
 0x238   : > { %1348 = vst [vmem:[%s2954_s27 + $0xf8] sm:$0xff] %v933_v47  ;;  %1350 = vst [vmem:[%s2954_s27 + $0x108] sm:$0xff] %v1094_v42  ;;  %v936_v37 = vpop.f32.mrb[12].mxu0  ;;  %v1097_v52 = vpop.f32.mrb[12].mxu1 }
 0x239   : > { %v937_v28 = vadd.f32 %v936_v37, %v2939_v15  ;;  %v1098_v1 = vadd.f32 %v1097_v52, %v2942_v34  ;;  %v938_v8 = vpop.f32.mrb[13].mxu0  ;;  %v1099_v57 = vpop.f32.mrb[13].mxu1 }
 0x23a   : > { %v939_v36 = vadd.f32 %v938_v8, %v2946_v38  ;;  %v1100_v44 = vadd.f32 %v1099_v57, %v2949_v3 }
 0x23b   : > { %1353 = vst [vmem:[%s2954_s27 + $0x120] sm:$0xff] %v937_v28  ;;  %1355 = vst [vmem:[%s2954_s27 + $0x130] sm:$0xff] %v1098_v1 }
 0x23c   : > { %1354 = vst [vmem:[%s2954_s27 + $0x128] sm:$0xff] %v939_v36  ;;  %1356 = vst [vmem:[%s2954_s27 + $0x138] sm:$0xff] %v1100_v44  ;;  %v942_v25 = vpop.f32.mrb[14].mxu0  ;;  %v1103_v14 = vpop.f32.mrb[14].mxu1 }
 0x23d   : > { %v943_v63 = vadd.f32 %v942_v25, %v2939_v15  ;;  %v1104_v0 = vadd.f32 %v1103_v14, %v2942_v34  ;;  %v944_v24 = vpop.f32.mrb[15].mxu0  ;;  %v1105_v58 = vpop.f32.mrb[15].mxu1 }
 0x23e   : > { %v945_v54 = vadd.f32 %v944_v24, %v2946_v38  ;;  %v1106_v32 = vadd.f32 %v1105_v58, %v2949_v3  ;;  %v822_v24 = vsub.s32 4, %v2481_v49 }
 0x23f   : > { %1359 = vst [vmem:[%s2954_s27 + $0x150] sm:$0xff] %v943_v63  ;;  %1361 = vst [vmem:[%s2954_s27 + $0x160] sm:$0xff] %v1104_v0 }
 0x240   : > { %1360 = vst [vmem:[%s2954_s27 + $0x158] sm:$0xff] %v945_v54  ;;  %1362 = vst [vmem:[%s2954_s27 + $0x168] sm:$0xff] %v1106_v32  ;;  %v948_v20 = vpop.f32.mrb[16].mxu0  ;;  %v1109_v6 = vpop.f32.mrb[16].mxu1  ;;  %v826_v32 = vsub.s32 5, %v2481_v49 }
 0x241   : > { %v949_v39 = vadd.f32 %v948_v20, %v2939_v15  ;;  %v1110_v33 = vadd.f32 %v1109_v6, %v2942_v34  ;;  %v950_v21 = vpop.f32.mrb[17].mxu0  ;;  %v1111_v9 = vpop.f32.mrb[17].mxu1 }
 0x242   : > { %v951_v40 = vadd.f32 %v950_v21, %v2946_v38  ;;  %v1112_v51 = vadd.f32 %v1111_v9, %v2949_v3 }
 0x243   : > { %1365 = vst [vmem:[%s2954_s27 + $0x180] sm:$0xff] %v949_v39  ;;  %1367 = vst [vmem:[%s2954_s27 + $0x190] sm:$0xff] %v1110_v33 }
 0x244   : > { %1366 = vst [vmem:[%s2954_s27 + $0x188] sm:$0xff] %v951_v40  ;;  %1368 = vst [vmem:[%s2954_s27 + $0x198] sm:$0xff] %v1112_v51  ;;  %v954_v19 = vpop.f32.mrb[18].mxu0  ;;  %v1115_v45 = vpop.f32.mrb[18].mxu1  ;;  %v3081_v40 = vrot.slane %v2933_v26, %v822_v24 }
 0x245   : > { %v955_v27 = vadd.f32 %v954_v19, %v2939_v15  ;;  %v1116_v22 = vadd.f32 %v1115_v45, %v2942_v34  ;;  %v956_v55 = vpop.f32.mrb[19].mxu0  ;;  %v1117_v35 = vpop.f32.mrb[19].mxu1  ;;  %v3086_v19 = vrot.slane %v2933_v26, %v826_v32 }
 0x246   : > { %v957_v29 = vadd.f32 %v956_v55, %v2946_v38  ;;  %v1118_v5 = vadd.f32 %v1117_v35, %v2949_v3 }
 0x247   : > { %1371 = vst [vmem:[%s2954_s27 + $0x1b0] sm:$0xff] %v955_v27  ;;  %1373 = vst [vmem:[%s2954_s27 + $0x1c0] sm:$0xff] %v1116_v22 }
 0x248   : > { %1372 = vst [vmem:[%s2954_s27 + $0x1b8] sm:$0xff] %v957_v29  ;;  %1374 = vst [vmem:[%s2954_s27 + $0x1c8] sm:$0xff] %v1118_v5  ;;  %v960_v31 = vpop.f32.mrb[20].mxu0  ;;  %v1121_v46 = vpop.f32.mrb[20].mxu1 }
 0x249   : > { %v961_v60 = vadd.f32 %v960_v31, %v2939_v15  ;;  %v1122_v56 = vadd.f32 %v1121_v46, %v2942_v34  ;;  %v962_v50 = vpop.f32.mrb[21].mxu0  ;;  %v1123_v30 = vpop.f32.mrb[21].mxu1 }
 0x24a   : > { %v963_v62 = vadd.f32 %v962_v50, %v2946_v38  ;;  %v1124_v12 = vadd.f32 %v1123_v30, %v2949_v3 }
 0x24b   : > { %1377 = vst [vmem:[%s2954_s27 + $0x1e0] sm:$0xff] %v961_v60  ;;  %1379 = vst [vmem:[%s2954_s27 + $0x1f0] sm:$0xff] %v1122_v56 }
 0x24c   : > { %1378 = vst [vmem:[%s2954_s27 + $0x1e8] sm:$0xff] %v963_v62  ;;  %1380 = vst [vmem:[%s2954_s27 + $0x1f8] sm:$0xff] %v1124_v12  ;;  %v966_v13 = vpop.f32.mrb[22].mxu0  ;;  %v1127_v41 = vpop.f32.mrb[22].mxu1 }
 0x24d   : > { %v967_v17 = vadd.f32 %v966_v13, %v2939_v15  ;;  %v1128_v16 = vadd.f32 %v1127_v41, %v2942_v34  ;;  %v968_v61 = vpop.f32.mrb[23].mxu0  ;;  %v1129_v23 = vpop.f32.mrb[23].mxu1 }
 0x24e   : > { %v969_v18 = vadd.f32 %v968_v61, %v2946_v38  ;;  %v1130_v11 = vadd.f32 %v1129_v23, %v2949_v3 }
 0x24f   : > { %1383 = vst [vmem:[%s2954_s27 + $0x210] sm:$0xff] %v967_v17  ;;  %1385 = vst [vmem:[%s2954_s27 + $0x220] sm:$0xff] %v1128_v16 }
 0x250   : > { %1384 = vst [vmem:[%s2954_s27 + $0x218] sm:$0xff] %v969_v18  ;;  %1386 = vst [vmem:[%s2954_s27 + $0x228] sm:$0xff] %v1130_v11  ;;  %v972_v53 = vpop.f32.mrb[24].mxu0  ;;  %v1133_v48 = vpop.f32.mrb[24].mxu1 }
 0x251   : > { %v973_v43 = vadd.f32 %v972_v53, %v2939_v15  ;;  %v1134_v10 = vadd.f32 %v1133_v48, %v2942_v34  ;;  %v974_v2 = vpop.f32.mrb[25].mxu0  ;;  %v1135_v7 = vpop.f32.mrb[25].mxu1 }
 0x252   : > { %v975_v4 = vadd.f32 %v974_v2, %v2946_v38  ;;  %v1136_v59 = vadd.f32 %v1135_v7, %v2949_v3 }
 0x253   : > { %1389 = vst [vmem:[%s2954_s27 + $0x240] sm:$0xff] %v973_v43  ;;  %1391 = vst [vmem:[%s2954_s27 + $0x250] sm:$0xff] %v1134_v10 }
 0x254   : > { %1390 = vst [vmem:[%s2954_s27 + $0x248] sm:$0xff] %v975_v4  ;;  %1392 = vst [vmem:[%s2954_s27 + $0x258] sm:$0xff] %v1136_v59  ;;  %v978_v47 = vpop.f32.mrb[26].mxu0  ;;  %v1139_v42 = vpop.f32.mrb[26].mxu1 }
 0x255   : > { %v979_v37 = vadd.f32 %v978_v47, %v2939_v15  ;;  %v1140_v52 = vadd.f32 %v1139_v42, %v2942_v34  ;;  %v980_v28 = vpop.f32.mrb[27].mxu0  ;;  %v1141_v1 = vpop.f32.mrb[27].mxu1 }
 0x256   : > { %v981_v8 = vadd.f32 %v980_v28, %v2946_v38  ;;  %v1142_v57 = vadd.f32 %v1141_v1, %v2949_v3 }
 0x257   : > { %1395 = vst [vmem:[%s2954_s27 + $0x270] sm:$0xff] %v979_v37  ;;  %1397 = vst [vmem:[%s2954_s27 + $0x280] sm:$0xff] %v1140_v52 }
 0x258   : > { %1396 = vst [vmem:[%s2954_s27 + $0x278] sm:$0xff] %v981_v8  ;;  %1398 = vst [vmem:[%s2954_s27 + $0x288] sm:$0xff] %v1142_v57  ;;  %v984_v36 = vpop.f32.mrb[28].mxu0  ;;  %v1145_v44 = vpop.f32.mrb[28].mxu1 }
 0x259   : > { %v985_v25 = vadd.f32 %v984_v36, %v2939_v15  ;;  %v1146_v14 = vadd.f32 %v1145_v44, %v2942_v34  ;;  %v986_v63 = vpop.f32.mrb[29].mxu0  ;;  %v1147_v0 = vpop.f32.mrb[29].mxu1 }
 0x25a   : > { %v987_v58 = vadd.f32 %v986_v63, %v2946_v38  ;;  %v1148_v54 = vadd.f32 %v1147_v0, %v2949_v3 }
 0x25b   : > { %1401 = vst [vmem:[%s2954_s27 + $0x2a0] sm:$0xff] %v985_v25  ;;  %1403 = vst [vmem:[%s2954_s27 + $0x2b0] sm:$0xff] %v1146_v14 }
 0x25c   : > { %1402 = vst [vmem:[%s2954_s27 + $0x2a8] sm:$0xff] %v987_v58  ;;  %1404 = vst [vmem:[%s2954_s27 + $0x2b8] sm:$0xff] %v1148_v54  ;;  %v990_v20 = vpop.f32.mrb[30].mxu0  ;;  %v1151_v6 = vpop.f32.mrb[30].mxu1 }
 0x25d   : > { %v991_v39 = vadd.f32 %v990_v20, %v2939_v15  ;;  %v1152_v33 = vadd.f32 %v1151_v6, %v2942_v34  ;;  %v992_v21 = vpop.f32.mrb[31].mxu0  ;;  %v1153_v9 = vpop.f32.mrb[31].mxu1 }
 0x25e   : > { %v993_v49 = vadd.f32 %v992_v21, %v2946_v38  ;;  %v1154_v51 = vadd.f32 %v1153_v9, %v2949_v3 }
 0x25f   : > { %1407 = vst [vmem:[%s2954_s27 + $0x2d0] sm:$0xff] %v991_v39  ;;  %1409 = vst [vmem:[%s2954_s27 + $0x2e0] sm:$0xff] %v1152_v33 }
 0x260   : > { %1408 = vst [vmem:[%s2954_s27 + $0x2d8] sm:$0xff] %v993_v49  ;;  %1410 = vst [vmem:[%s2954_s27 + $0x2e8] sm:$0xff] %v1154_v51  ;;  %v1222_v15 = vpop.f32.mrb[32].mxu0  ;;  %v1270_v34 = vpop.f32.mrb[32].mxu1 }
 0x261   : > { %v1223_v45 = vadd.f32 %v1222_v15, %v3081_v40  ;;  %v1271_v27 = vadd.f32 %v1270_v34, %v3081_v40  ;;  %v1224_v22 = vpop.f32.mrb[33].mxu0  ;;  %v1272_v38 = vpop.f32.mrb[33].mxu1 }
 0x262   : > { %v1225_v3 = vadd.f32 %v1224_v22, %v3086_v19  ;;  %v1273_v26 = vadd.f32 %v1272_v38, %v3086_v19 }
 0x263   : > { %1321 = vst [vmem:[%s2954_s27 + $0x20] sm:$0xff] %v1223_v45  ;;  %1369 = vst [vmem:[%s2954_s27 + $0x1a0] sm:$0xff] %v1271_v27 }
 0x264   : > { %1322 = vst [vmem:[%s2954_s27 + $0x28] sm:$0xff] %v1225_v3  ;;  %1370 = vst [vmem:[%s2954_s27 + $0x1a8] sm:$0xff] %v1273_v26  ;;  %v1228_v55 = vpop.f32.mrb[34].mxu0  ;;  %v1276_v35 = vpop.f32.mrb[34].mxu1 }
 0x265   : > { %v1229_v29 = vadd.f32 %v1228_v55, %v3081_v40  ;;  %v1277_v5 = vadd.f32 %v1276_v35, %v3081_v40  ;;  %v1230_v31 = vpop.f32.mrb[35].mxu0  ;;  %v1278_v46 = vpop.f32.mrb[35].mxu1 }
 0x266   : > { %v1231_v60 = vadd.f32 %v1230_v31, %v3086_v19  ;;  %v1279_v56 = vadd.f32 %v1278_v46, %v3086_v19 }
 0x267   : > { %1327 = vst [vmem:[%s2954_s27 + $0x50] sm:$0xff] %v1229_v29  ;;  %1375 = vst [vmem:[%s2954_s27 + $0x1d0] sm:$0xff] %v1277_v5 }
 0x268   : > { %1328 = vst [vmem:[%s2954_s27 + $0x58] sm:$0xff] %v1231_v60  ;;  %1376 = vst [vmem:[%s2954_s27 + $0x1d8] sm:$0xff] %v1279_v56  ;;  %v1234_v50 = vpop.f32.mrb[36].mxu0  ;;  %v1282_v30 = vpop.f32.mrb[36].mxu1 }
 0x269   : > { %v1235_v62 = vadd.f32 %v1234_v50, %v3081_v40  ;;  %v1283_v12 = vadd.f32 %v1282_v30, %v3081_v40  ;;  %v1236_v13 = vpop.f32.mrb[37].mxu0  ;;  %v1284_v41 = vpop.f32.mrb[37].mxu1 }
 0x26a   : > { %v1237_v17 = vadd.f32 %v1236_v13, %v3086_v19  ;;  %v1285_v16 = vadd.f32 %v1284_v41, %v3086_v19 }
 0x26b   : > { %1333 = vst [vmem:[%s2954_s27 + $0x80] sm:$0xff] %v1235_v62  ;;  %1381 = vst [vmem:[%s2954_s27 + $0x200] sm:$0xff] %v1283_v12 }
 0x26c   : > { %1334 = vst [vmem:[%s2954_s27 + $0x88] sm:$0xff] %v1237_v17  ;;  %1382 = vst [vmem:[%s2954_s27 + $0x208] sm:$0xff] %v1285_v16  ;;  %v1240_v61 = vpop.f32.mrb[38].mxu0  ;;  %v1288_v23 = vpop.f32.mrb[38].mxu1 }
 0x26d   : > { %v1241_v18 = vadd.f32 %v1240_v61, %v3081_v40  ;;  %v1289_v11 = vadd.f32 %v1288_v23, %v3081_v40  ;;  %v1242_v53 = vpop.f32.mrb[39].mxu0  ;;  %v1290_v48 = vpop.f32.mrb[39].mxu1 }
 0x26e   : > { %v1243_v43 = vadd.f32 %v1242_v53, %v3086_v19  ;;  %v1291_v10 = vadd.f32 %v1290_v48, %v3086_v19 }
 0x26f   : > { %1339 = vst [vmem:[%s2954_s27 + $0xb0] sm:$0xff] %v1241_v18  ;;  %1387 = vst [vmem:[%s2954_s27 + $0x230] sm:$0xff] %v1289_v11 }
 0x270   : > { %1340 = vst [vmem:[%s2954_s27 + $0xb8] sm:$0xff] %v1243_v43  ;;  %1388 = vst [vmem:[%s2954_s27 + $0x238] sm:$0xff] %v1291_v10  ;;  %v1246_v2 = vpop.f32.mrb[40].mxu0  ;;  %v1294_v7 = vpop.f32.mrb[40].mxu1 }
 0x271   : > { %v1247_v4 = vadd.f32 %v1246_v2, %v3081_v40  ;;  %v1295_v59 = vadd.f32 %v1294_v7, %v3081_v40  ;;  %v1248_v47 = vpop.f32.mrb[41].mxu0  ;;  %v1296_v42 = vpop.f32.mrb[41].mxu1 }
 0x272   : > { %v1249_v37 = vadd.f32 %v1248_v47, %v3086_v19  ;;  %v1297_v52 = vadd.f32 %v1296_v42, %v3086_v19 }
 0x273   : > { %1345 = vst [vmem:[%s2954_s27 + $0xe0] sm:$0xff] %v1247_v4  ;;  %1393 = vst [vmem:[%s2954_s27 + $0x260] sm:$0xff] %v1295_v59 }
 0x274   : > { %1346 = vst [vmem:[%s2954_s27 + $0xe8] sm:$0xff] %v1249_v37  ;;  %1394 = vst [vmem:[%s2954_s27 + $0x268] sm:$0xff] %v1297_v52  ;;  %v1252_v28 = vpop.f32.mrb[42].mxu0  ;;  %v1300_v1 = vpop.f32.mrb[42].mxu1 }
 0x275   : > { %v1253_v8 = vadd.f32 %v1252_v28, %v3081_v40  ;;  %v1301_v57 = vadd.f32 %v1300_v1, %v3081_v40  ;;  %v1254_v36 = vpop.f32.mrb[43].mxu0  ;;  %v1302_v44 = vpop.f32.mrb[43].mxu1 }
 0x276   : > { %v1255_v25 = vadd.f32 %v1254_v36, %v3086_v19  ;;  %v1303_v14 = vadd.f32 %v1302_v44, %v3086_v19 }
 0x277   : > { %1351 = vst [vmem:[%s2954_s27 + $0x110] sm:$0xff] %v1253_v8  ;;  %1399 = vst [vmem:[%s2954_s27 + $0x290] sm:$0xff] %v1301_v57 }
 0x278   : > { %1352 = vst [vmem:[%s2954_s27 + $0x118] sm:$0xff] %v1255_v25  ;;  %1400 = vst [vmem:[%s2954_s27 + $0x298] sm:$0xff] %v1303_v14  ;;  %v1258_v63 = vpop.f32.mrb[44].mxu0  ;;  %v1306_v0 = vpop.f32.mrb[44].mxu1 }
 0x279   : > { %v1259_v24 = vadd.f32 %v1258_v63, %v3081_v40  ;;  %v1307_v58 = vadd.f32 %v1306_v0, %v3081_v40  ;;  %v1260_v54 = vpop.f32.mrb[45].mxu0  ;;  %v1308_v32 = vpop.f32.mrb[45].mxu1 }
 0x27a   : > { %v1261_v20 = vadd.f32 %v1260_v54, %v3086_v19  ;;  %v1309_v6 = vadd.f32 %v1308_v32, %v3086_v19 }
 0x27b   : > { %1357 = vst [vmem:[%s2954_s27 + $0x140] sm:$0xff] %v1259_v24  ;;  %1405 = vst [vmem:[%s2954_s27 + $0x2c0] sm:$0xff] %v1307_v58 }
 0x27c   : > { %1358 = vst [vmem:[%s2954_s27 + $0x148] sm:$0xff] %v1261_v20  ;;  %1406 = vst [vmem:[%s2954_s27 + $0x2c8] sm:$0xff] %v1309_v6  ;;  %v1264_v39 = vpop.f32.mrb[46].mxu0  ;;  %v1312_v33 = vpop.f32.mrb[46].mxu1 }
 0x27d   : > { %v1265_v21 = vadd.f32 %v1264_v39, %v3081_v40  ;;  %v1313_v9 = vadd.f32 %v1312_v33, %v3081_v40  ;;  %v1266_v49 = vpop.f32.mrb[47].mxu0  ;;  %v1314_v51 = vpop.f32.mrb[47].mxu1 }
 0x27e   : > { %v1267_v15 = vadd.f32 %v1266_v49, %v3086_v19  ;;  %v1315_v34 = vadd.f32 %v1314_v51, %v3086_v19 }
 0x27f   : > { %1363 = vst [vmem:[%s2954_s27 + $0x170] sm:$0xff] %v1265_v21  ;;  %1411 = vst [vmem:[%s2954_s27 + $0x2f0] sm:$0xff] %v1313_v9 }
 0x280   : > { %1364 = vst [vmem:[%s2954_s27 + $0x178] sm:$0xff] %v1267_v15  ;;  %1412 = vst [vmem:[%s2954_s27 + $0x2f8] sm:$0xff] %v1315_v34 }
 0x281 PF: > { %s15_s18 = sadd.s32 1, %s1755_s18  }
 0x282   : > { %p12_p4 = scmp.ge.s32.totalorder %s15_s18, 4  }
 0x284   :  { %14 = sbr.rel (!%p12_p4) target bundleno = 1 (0x1), region = 70 }

// kernel: multi_headed_self_attention.6
= control target key start
LH: loop header
LB: loop body
LE: loop exit
PB: predicated region body
PF: predicated region fallthrough
CT: control target
= control target key end

     0   :  { %s6760_s0 = inlined_call_operand.vmem [shape: f32[2,128,768], index: 0, kind: input, shape index: {}, may-alias: {0,1,2}]   ;;  %s6761_s1 = inlined_call_operand.vmem [shape: f32[2,128,768], index: 1, kind: input, shape index: {}, may-alias: {0,1,2}]   ;;  %s6762_s2 = inlined_call_operand.vmem [shape: f32[2,128,768], index: 2, kind: input, shape index: {}, may-alias: {0,1,2}]   ;;  %s6763_s3 = inlined_call_operand.vmem [shape: f32[128,256], index: 3, kind: input, shape index: {}]   ;;  %s6764_s4 = inlined_call_operand.vmem [shape: f32[2,2,64], index: 4, kind: input, shape index: {}]   ;;  %s6765_s5 = inlined_call_operand.vmem [shape: f32[2,2,64], index: 5, kind: input, shape index: {}]   ;;  %s6766_s6 = inlined_call_operand.vmem [shape: f32[2,128,256], index: 6, kind: output, shape index: {}]  }
   0x1   :  { %6844 = sst [smem:[#allocation62_spill]] %s6760_s0 }
   0x2   :  { %6845 = sst [smem:[#allocation63_spill]] %s6764_s4 }
   0x3   :  { %6846 = sst [smem:[#allocation64_spill]] %s6765_s5 }
   0x4   :  { %6847 = sst [smem:[#allocation65_spill]] %s6766_s6 }
   0x5   :  { %s4807_s21 = smov 0   ;;  %s4809_s22 = smov 0  }
   0x6   :  { %s4811_s23 = smov 0   ;;  %s4813_s24 = smov 0  }
   0x7   :  { %s4815_s25 = smov 0   ;;  %s4817_s26 = smov 0  }
   0x8   :  { %s4819_s27 = smov 0   ;;  %s4821_s28 = smov 0  }
   0x9   :  { %s4823_s29 = smov 0   ;;  %s4825_s30 = smov 0  }
   0xa   :  { %s4827_s7 = smov 0   ;;  %s4829_s8 = smov 0  }
   0xb   :  { %s4831_s9 = smov 0  }
   0xc LB: > { %6848 = sst [smem:[#allocation7_spill]] %s4721_s25  ;;  %s25_s11 = sadd.s32 1, %s4745_s7  ;;  %s4753_s9 = sphi %s4831_s9, %s16_s9   ;;  %s4749_s8 = sphi %s4829_s8, %s7014_s8   ;;  %s4745_s7 = sphi %s4827_s7, %s7013_s7   ;;  %s4741_s30 = sphi %s4825_s30, %s7012_s30   ;;  %s4737_s29 = sphi %s4823_s29, %s7011_s29   ;;  %s4733_s28 = sphi %s4821_s28, %s7010_s28   ;;  %s4729_s27 = sphi %s4819_s27, %s7009_s27   ;;  %s4725_s26 = sphi %s4817_s26, %s7008_s26   ;;  %s4721_s25 = sphi %s4815_s25, %s7007_s25   ;;  %s4717_s24 = sphi %s4813_s24, %s7006_s24   ;;  %s4713_s23 = sphi %s4811_s23, %s7005_s23   ;;  %s4709_s22 = sphi %s4809_s22, %s7004_s22   ;;  %s4705_s21 = sphi %s4807_s21, %s7003_s21  }
   0xd   : > { %6849 = sst [smem:[#allocation8_spill]] %s4737_s29  ;;  %p26_p0 = scmp.ge.s32.totalorder %s25_s11, 2 }
   0xe   : > { %s28_s12 = sadd.s32 1, %s4749_s8  ;;  %s37_s13 = sadd.s32 1, %s4733_s28 }
   0xf   : > { %p44_p1 = scmp.ne.s32.totalorder %s4733_s28, %s4729_s27  ;;  %s7016_s11 = smov (%p26_p0, %s25_s11), 0 }
  0x10   : > { %6850 = sst [smem:[#allocation9_spill]] %s7016_s11  ;;  %s7018_s12 = smov (!%p26_p0, %s28_s12), %s4749_s8 }
  0x11   : > { %s32_s14 = ssub.s32 %s4745_s7, %s7016_s11  ;;  %p45_p2 = scmp.eq.s32.totalorder %s4753_s9, 0 }
  0x12   : > { %p30_p3 = scmp.ge.s32.totalorder %s7018_s12, 2  ;;  %s60_s15 = sadd.s32 2, %s4749_s8 }
  0x13   : > { %p4890_p4 = por %p45_p2, %p44_p1  ;;  %s67_s17 = sadd.s32 1, %s4725_s26 }
  0x14   : > { %s7020_s12 = smov (%p30_p3, %s7018_s12), 0  ;;  %p74_p5 = scmp.ne.s32.totalorder %s4725_s26, %s4721_s25 }
  0x15   : > { %6852 = sst [smem:[#allocation10_spill]] %s7020_s12  ;;  %s90_s18 = sadd.s32 4, %s4749_s8 }
  0x16   : > { %s33_s19 = ssub.s32 %s4749_s8, %s7020_s12  ;;  %s61_s20 = sadd.s32 2, %s7020_s12 }
  0x17   : > { %s34_s10 = sor.u32 %s33_s19, %s32_s14  ;;  %s63_s11 = ssub.s32 %s60_s15, %s61_s20 }
  0x18   : > { %p35_p6 = scmp.eq.s32.totalorder %s34_s10, 0  ;;  %s64_s6 = sor.u32 %s63_s11, %s32_s14 }
  0x19   : > { %p65_p7 = scmp.eq.s32.totalorder %s64_s6, 0  ;;  %p4905_p8 = por %p74_p5, %p45_p2 }
  0x1a   : > { %s4910_s4 = scalar_select %p35_p6, %s4733_s28, %s37_s13  }
  0x1b   : > { %s4913_s5 = scalar_select %p65_p7, %s4725_s26, %s67_s17  }
  0x1c   : > { %6854 = sst [smem:[#allocation11_spill]] %s4910_s4  ;;  %s91_s15 = sadd.s32 4, %s7020_s12 }
  0x1d   : > { %s97_s20 = sadd.s32 1, %s4717_s24  ;;  %s93_s10 = ssub.s32 %s90_s18, %s91_s15 }
  0x1e   : > { %p104_p9 = scmp.ne.s32.totalorder %s4717_s24, %s4713_s23  ;;  %s94_s11 = sor.u32 %s93_s10, %s32_s14 }
  0x1f   : > { %p121_p10 = scmp.eq.s32.totalorder %s33_s19, 0  ;;  %p95_p11 = scmp.eq.s32.totalorder %s94_s11, 0 }
  0x20   : > { %p4921_p12 = por %p104_p9, %p45_p2  ;;  %s123_s25 = sadd.s32 1, %s4709_s22 }
  0x21   : > { %p130_p13 = scmp.ne.s32.totalorder %s4709_s22, %s4705_s21  ;;  %s6857_s18 = sadd.s32 4294967295, %s4753_s9  }
  0x22   : > { %s4929_s13 = scalar_select %p95_p11, %s4717_s24, %s97_s20  }
  0x23   : > { %s4932_s4 = scalar_select %p121_p10, %s4709_s22, %s123_s25  }
  0x24   : > { %p4936_p0 = por %p130_p13, %p45_p2  ;;  %p214_p3 = scmp.eq.s32.totalorder %s6857_s18, 3 }
  0x25   : > { %p3307_p6 = scmp.ge.s32.totalorder %s4753_s9, 4 }
  0x26   : > { %p4945_p5 = por %p214_p3, %p44_p1 }
  0x27   : > { %236 = sbr.rel (%p3307_p6) target bundleno = 106 (0x6a), region = 16 }
  0x2e   : > { %239 = sbr.rel (!%p4890_p4) target bundleno = 64 (0x40), region = 20  ;;  %s241_s25 = sand.u32 (%p4890_p4), 1, %s4733_s28  }
  0x2f   : > { %s4273_s19 = smul.u32 (%p4890_p4), 96, %s4745_s7  ;;  %s3308_s15 = sshll.u32 (%p4890_p4), %s241_s25, 7 }
  0x30   : > { %s6859_s0 = sld [smem:[#allocation62_spill]] (%p4890_p4)  ;;  %s243_s16 = scalar_lea.vmem (%p4890_p4), [#allocation2], %s3308_s15 }
  0x31   : > { %s245_s20 = sadd.s32 (%p4890_p4), %s4749_s8, %s4273_s19 }
  0x32   : > { %s3309_s10 = sshll.u32 (%p4890_p4), %s245_s20, 3 }
  0x36   : > { %s4958_s12 = scalar_lea.vmem %s6859_s0, %s3309_s10 }
  0x37   : > { %v305_v0 = vld [vmem:[%s4958_s12] sm:$0xff]  ;;  %v307_v1 = vld [vmem:[%s4958_s12 + $0x30] sm:$0xff] }
  0x38   : > { %v309_v2 = vld [vmem:[%s4958_s12 + $0x60] sm:$0xff]  ;;  %306 = vst [vmem:[%s243_s16] sm:$0xff] %v305_v0  ;;  %308 = vst [vmem:[%s243_s16 + $0x8] sm:$0xff] %v307_v1  ;;  %v311_v3 = vld [vmem:[%s4958_s12 + $0x90] sm:$0xff] }
  0x39   : > { %310 = vst [vmem:[%s243_s16 + $0x10] sm:$0xff] %v309_v2  ;;  %v313_v4 = vld [vmem:[%s4958_s12 + $0xc0] sm:$0xff]  ;;  %v315_v5 = vld [vmem:[%s4958_s12 + $0xf0] sm:$0xff]  ;;  %312 = vst [vmem:[%s243_s16 + $0x18] sm:$0xff] %v311_v3 }
  0x3a   : > { %314 = vst [vmem:[%s243_s16 + $0x20] sm:$0xff] %v313_v4  ;;  %316 = vst [vmem:[%s243_s16 + $0x28] sm:$0xff] %v315_v5  ;;  %v317_v6 = vld [vmem:[%s4958_s12 + $0x120] sm:$0xff]  ;;  %v319_v7 = vld [vmem:[%s4958_s12 + $0x150] sm:$0xff] }
  0x3b   : > { %v321_v8 = vld [vmem:[%s4958_s12 + $0x180] sm:$0xff]  ;;  %318 = vst [vmem:[%s243_s16 + $0x30] sm:$0xff] %v317_v6  ;;  %320 = vst [vmem:[%s243_s16 + $0x38] sm:$0xff] %v319_v7  ;;  %v323_v9 = vld [vmem:[%s4958_s12 + $0x1b0] sm:$0xff] }
  0x3c   : > { %322 = vst [vmem:[%s243_s16 + $0x40] sm:$0xff] %v321_v8  ;;  %v325_v10 = vld [vmem:[%s4958_s12 + $0x1e0] sm:$0xff]  ;;  %v327_v11 = vld [vmem:[%s4958_s12 + $0x210] sm:$0xff]  ;;  %324 = vst [vmem:[%s243_s16 + $0x48] sm:$0xff] %v323_v9 }
  0x3d   : > { %326 = vst [vmem:[%s243_s16 + $0x50] sm:$0xff] %v325_v10  ;;  %328 = vst [vmem:[%s243_s16 + $0x58] sm:$0xff] %v327_v11  ;;  %v329_v12 = vld [vmem:[%s4958_s12 + $0x240] sm:$0xff]  ;;  %v331_v13 = vld [vmem:[%s4958_s12 + $0x270] sm:$0xff] }
  0x3e   : > { %v333_v14 = vld [vmem:[%s4958_s12 + $0x2a0] sm:$0xff]  ;;  %330 = vst [vmem:[%s243_s16 + $0x60] sm:$0xff] %v329_v12  ;;  %332 = vst [vmem:[%s243_s16 + $0x68] sm:$0xff] %v331_v13  ;;  %v335_v15 = vld [vmem:[%s4958_s12 + $0x2d0] sm:$0xff] }
  0x3f   : > { %334 = vst [vmem:[%s243_s16 + $0x70] sm:$0xff] %v333_v14  ;;  %336 = vst [vmem:[%s243_s16 + $0x78] sm:$0xff] %v335_v15 }
  0x40 PF: > { %342 = sbr.rel (!%p4905_p8) target bundleno = 79 (0x4f), region = 58  ;;  %s344_s25 = sand.u32 (%p4905_p8), 1, %s4725_s26  }
  0x41   : > { %s3168_s19 = smul.u32 (%p4905_p8), 96, %s4745_s7  ;;  %s3310_s15 = sshll.u32 (%p4905_p8), %s344_s25, 7 }
  0x42   : > { %s346_s29 = scalar_lea.vmem (%p4905_p8), [#allocation3], %s3310_s15 }
  0x43   : > { %s3169_s20 = sadd.s32 (%p4905_p8), %s4749_s8, %s3168_s19 }
  0x44   : > { %s3311_s10 = sshll.u32 (%p4905_p8), %s3169_s20, 3 }
  0x45   : > { %s4984_s0 = scalar_lea.vmem (%p4905_p8), %s6761_s1, %s3311_s10 }
  0x46   : > { %v3312_v16 = vld [vmem:[%s4984_s0 + $0x10] sm:$0xff] (%p4905_p8)  ;;  %v3313_v17 = vld [vmem:[%s4984_s0 + $0x40] sm:$0xff] (%p4905_p8) }
  0x47   : > { %v3314_v18 = vld [vmem:[%s4984_s0 + $0x70] sm:$0xff]  ;;  %410 = vst [vmem:[%s346_s29] sm:$0xff] %v3312_v16  ;;  %412 = vst [vmem:[%s346_s29 + $0x8] sm:$0xff] %v3313_v17  ;;  %v3315_v19 = vld [vmem:[%s4984_s0 + $0xa0] sm:$0xff] }
  0x48   : > { %414 = vst [vmem:[%s346_s29 + $0x10] sm:$0xff] %v3314_v18  ;;  %v3316_v20 = vld [vmem:[%s4984_s0 + $0xd0] sm:$0xff]  ;;  %v3317_v21 = vld [vmem:[%s4984_s0 + $0x100] sm:$0xff]  ;;  %416 = vst [vmem:[%s346_s29 + $0x18] sm:$0xff] %v3315_v19 }
  0x49   : > { %418 = vst [vmem:[%s346_s29 + $0x20] sm:$0xff] %v3316_v20  ;;  %420 = vst [vmem:[%s346_s29 + $0x28] sm:$0xff] %v3317_v21  ;;  %v3318_v22 = vld [vmem:[%s4984_s0 + $0x130] sm:$0xff]  ;;  %v3319_v23 = vld [vmem:[%s4984_s0 + $0x160] sm:$0xff] }
  0x4a   : > { %v3320_v24 = vld [vmem:[%s4984_s0 + $0x190] sm:$0xff]  ;;  %422 = vst [vmem:[%s346_s29 + $0x30] sm:$0xff] %v3318_v22  ;;  %424 = vst [vmem:[%s346_s29 + $0x38] sm:$0xff] %v3319_v23  ;;  %v3321_v25 = vld [vmem:[%s4984_s0 + $0x1c0] sm:$0xff] }
  0x4b   : > { %426 = vst [vmem:[%s346_s29 + $0x40] sm:$0xff] %v3320_v24  ;;  %v3322_v26 = vld [vmem:[%s4984_s0 + $0x1f0] sm:$0xff]  ;;  %v3323_v27 = vld [vmem:[%s4984_s0 + $0x220] sm:$0xff]  ;;  %428 = vst [vmem:[%s346_s29 + $0x48] sm:$0xff] %v3321_v25 }
  0x4c   : > { %430 = vst [vmem:[%s346_s29 + $0x50] sm:$0xff] %v3322_v26  ;;  %432 = vst [vmem:[%s346_s29 + $0x58] sm:$0xff] %v3323_v27  ;;  %v3324_v28 = vld [vmem:[%s4984_s0 + $0x250] sm:$0xff]  ;;  %v3325_v29 = vld [vmem:[%s4984_s0 + $0x280] sm:$0xff] }
  0x4d   : > { %v3326_v30 = vld [vmem:[%s4984_s0 + $0x2b0] sm:$0xff]  ;;  %434 = vst [vmem:[%s346_s29 + $0x60] sm:$0xff] %v3324_v28  ;;  %436 = vst [vmem:[%s346_s29 + $0x68] sm:$0xff] %v3325_v29  ;;  %v3327_v31 = vld [vmem:[%s4984_s0 + $0x2e0] sm:$0xff] }
  0x4e   : > { %438 = vst [vmem:[%s346_s29 + $0x70] sm:$0xff] %v3326_v30  ;;  %440 = vst [vmem:[%s346_s29 + $0x78] sm:$0xff] %v3327_v31 }
  0x4f PF: > { %446 = sbr.rel (!%p4921_p12) target bundleno = 94 (0x5e), region = 96  ;;  %s448_s12 = sand.u32 (%p4921_p12), 1, %s4717_s24  }
  0x50   : > { %s3175_s16 = smul.u32 (%p4921_p12), 96, %s4745_s7  ;;  %s3328_s25 = sshll.u32 (%p4921_p12), %s448_s12, 7 }
  0x51   : > { %s450_s0 = scalar_lea.vmem (%p4921_p12), [#allocation4], %s3328_s25 }
  0x52   : > { %s3176_s19 = sadd.s32 (%p4921_p12), %s4749_s8, %s3175_s16 }
  0x53   : > { %s3329_s15 = sshll.u32 (%p4921_p12), %s3176_s19, 3 }
  0x54   : > { %s5010_s11 = scalar_lea.vmem (%p4921_p12), %s6762_s2, %s3329_s15 }
  0x55   : > { %v3330_v32 = vld [vmem:[%s5010_s11 + $0x20] sm:$0xff] (%p4921_p12)  ;;  %v3331_v33 = vld [vmem:[%s5010_s11 + $0x50] sm:$0xff] (%p4921_p12) }
  0x56   : > { %v3332_v34 = vld [vmem:[%s5010_s11 + $0x80] sm:$0xff]  ;;  %514 = vst [vmem:[%s450_s0] sm:$0xff] %v3330_v32  ;;  %516 = vst [vmem:[%s450_s0 + $0x8] sm:$0xff] %v3331_v33  ;;  %v3333_v35 = vld [vmem:[%s5010_s11 + $0xb0] sm:$0xff] }
  0x57   : > { %518 = vst [vmem:[%s450_s0 + $0x10] sm:$0xff] %v3332_v34  ;;  %v3334_v36 = vld [vmem:[%s5010_s11 + $0xe0] sm:$0xff]  ;;  %v3335_v37 = vld [vmem:[%s5010_s11 + $0x110] sm:$0xff]  ;;  %520 = vst [vmem:[%s450_s0 + $0x18] sm:$0xff] %v3333_v35 }
  0x58   : > { %522 = vst [vmem:[%s450_s0 + $0x20] sm:$0xff] %v3334_v36  ;;  %524 = vst [vmem:[%s450_s0 + $0x28] sm:$0xff] %v3335_v37  ;;  %v3336_v38 = vld [vmem:[%s5010_s11 + $0x140] sm:$0xff]  ;;  %v3337_v39 = vld [vmem:[%s5010_s11 + $0x170] sm:$0xff] }
  0x59   : > { %v3338_v40 = vld [vmem:[%s5010_s11 + $0x1a0] sm:$0xff]  ;;  %526 = vst [vmem:[%s450_s0 + $0x30] sm:$0xff] %v3336_v38  ;;  %528 = vst [vmem:[%s450_s0 + $0x38] sm:$0xff] %v3337_v39  ;;  %v3339_v41 = vld [vmem:[%s5010_s11 + $0x1d0] sm:$0xff] }
  0x5a   : > { %530 = vst [vmem:[%s450_s0 + $0x40] sm:$0xff] %v3338_v40  ;;  %v3340_v42 = vld [vmem:[%s5010_s11 + $0x200] sm:$0xff]  ;;  %v3341_v43 = vld [vmem:[%s5010_s11 + $0x230] sm:$0xff]  ;;  %532 = vst [vmem:[%s450_s0 + $0x48] sm:$0xff] %v3339_v41 }
  0x5b   : > { %534 = vst [vmem:[%s450_s0 + $0x50] sm:$0xff] %v3340_v42  ;;  %536 = vst [vmem:[%s450_s0 + $0x58] sm:$0xff] %v3341_v43  ;;  %v3342_v44 = vld [vmem:[%s5010_s11 + $0x260] sm:$0xff]  ;;  %v3343_v45 = vld [vmem:[%s5010_s11 + $0x290] sm:$0xff] }
  0x5c   : > { %v3344_v46 = vld [vmem:[%s5010_s11 + $0x2c0] sm:$0xff]  ;;  %538 = vst [vmem:[%s450_s0 + $0x60] sm:$0xff] %v3342_v44  ;;  %540 = vst [vmem:[%s450_s0 + $0x68] sm:$0xff] %v3343_v45  ;;  %v3345_v47 = vld [vmem:[%s5010_s11 + $0x2f0] sm:$0xff] }
  0x5d   : > { %542 = vst [vmem:[%s450_s0 + $0x70] sm:$0xff] %v3344_v46  ;;  %544 = vst [vmem:[%s450_s0 + $0x78] sm:$0xff] %v3345_v47 }
  0x5e PF: > { %550 = sbr.rel (!%p4936_p0) target bundleno = 106 (0x6a), region = 134  ;;  %s552_s6 = sand.u32 (%p4936_p0), 1, %s4709_s22  }
  0x5f   : > { %s3347_s18 = sshll.u32 (%p4936_p0), %s4749_s8, 3  ;;  %s3346_s29 = sshll.u32 (%p4936_p0), %s552_s6, 7 }
  0x60   : > { %s5035_s25 = scalar_lea.vmem (%p4936_p0), %s6763_s3, %s3347_s18  ;;  %s554_s17 = scalar_lea.vmem (%p4936_p0), [#allocation5], %s3346_s29 }
  0x61   : > { %v614_v48 = vld [vmem:[%s5035_s25] sm:$0xff] (%p4936_p0)  ;;  %v616_v49 = vld [vmem:[%s5035_s25 + $0x10] sm:$0xff] (%p4936_p0) }
  0x62   : > { %v618_v50 = vld [vmem:[%s5035_s25 + $0x20] sm:$0xff] (%p4936_p0)  ;;  %615 = vst [vmem:[%s554_s17] sm:$0xff] (%p4936_p0), %v614_v48  ;;  %617 = vst [vmem:[%s554_s17 + $0x8] sm:$0xff] (%p4936_p0), %v616_v49  ;;  %v620_v51 = vld [vmem:[%s5035_s25 + $0x30] sm:$0xff] (%p4936_p0) }
  0x63   : > { %619 = vst [vmem:[%s554_s17 + $0x10] sm:$0xff] (%p4936_p0), %v618_v50  ;;  %v622_v52 = vld [vmem:[%s5035_s25 + $0x40] sm:$0xff] (%p4936_p0)  ;;  %v624_v53 = vld [vmem:[%s5035_s25 + $0x50] sm:$0xff] (%p4936_p0)  ;;  %621 = vst [vmem:[%s554_s17 + $0x18] sm:$0xff] (%p4936_p0), %v620_v51 }
  0x64   : > { %623 = vst [vmem:[%s554_s17 + $0x20] sm:$0xff] (%p4936_p0), %v622_v52  ;;  %625 = vst [vmem:[%s554_s17 + $0x28] sm:$0xff] (%p4936_p0), %v624_v53  ;;  %v626_v54 = vld [vmem:[%s5035_s25 + $0x60] sm:$0xff] (%p4936_p0)  ;;  %v628_v55 = vld [vmem:[%s5035_s25 + $0x70] sm:$0xff] (%p4936_p0) }
  0x65   : > { %v630_v56 = vld [vmem:[%s5035_s25 + $0x80] sm:$0xff]  ;;  %627 = vst [vmem:[%s554_s17 + $0x30] sm:$0xff] %v626_v54  ;;  %629 = vst [vmem:[%s554_s17 + $0x38] sm:$0xff] %v628_v55  ;;  %v632_v57 = vld [vmem:[%s5035_s25 + $0x90] sm:$0xff] }
  0x66   : > { %631 = vst [vmem:[%s554_s17 + $0x40] sm:$0xff] %v630_v56  ;;  %v634_v58 = vld [vmem:[%s5035_s25 + $0xa0] sm:$0xff]  ;;  %v636_v59 = vld [vmem:[%s5035_s25 + $0xb0] sm:$0xff]  ;;  %633 = vst [vmem:[%s554_s17 + $0x48] sm:$0xff] %v632_v57 }
  0x67   : > { %635 = vst [vmem:[%s554_s17 + $0x50] sm:$0xff] %v634_v58  ;;  %637 = vst [vmem:[%s554_s17 + $0x58] sm:$0xff] %v636_v59  ;;  %v638_v60 = vld [vmem:[%s5035_s25 + $0xc0] sm:$0xff]  ;;  %v640_v61 = vld [vmem:[%s5035_s25 + $0xd0] sm:$0xff] }
  0x68   : > { %v642_v62 = vld [vmem:[%s5035_s25 + $0xe0] sm:$0xff]  ;;  %639 = vst [vmem:[%s554_s17 + $0x60] sm:$0xff] %v638_v60  ;;  %641 = vst [vmem:[%s554_s17 + $0x68] sm:$0xff] %v640_v61  ;;  %v644_v63 = vld [vmem:[%s5035_s25 + $0xf0] sm:$0xff] }
  0x69   : > { %643 = vst [vmem:[%s554_s17 + $0x70] sm:$0xff] %v642_v62  ;;  %645 = vst [vmem:[%s554_s17 + $0x78] sm:$0xff] %v644_v63 }
  0x6a PF: > { %p3348_p1 = scmp.ge.s32.totalorder %s4753_s9, 1  ;;  %p664_p2 = scmp.lt.s32.totalorder %s4753_s9, 5 }
  0x6c   : > { %p665_p4 = pnand %p3348_p1, %p664_p2 }
  0x6e   : > { %668 = sbr.rel (%p665_p4) target bundleno = 1873 (0x751), region = 180 }
  0x75   : > { %s6860_s19 = sld [smem:[#allocation7_spill]]  ;;  %s692_s15 = sand.u32 1, %s4705_s21   ;;  %vm893_vm0 = vcmask 523264   ;;  %v834_v0 = vlaneseq  ;;  %v6861_v1 = vmov 0 }
  0x76   : > { %s671_s20 = sand.u32 1, %s4729_s27   ;;  %s3352_s10 = sshll.u32 %s692_s15, 7  ;;  %vm5061_vm1 = vmpackc.low %vm893_vm0, %vm893_vm0 }
  0x77   : > { %s5057_s11 = sshll.u32 %s671_s20, 7  ;;  %v6862_v1 = vsel %vm5061_vm1, 4294967295, %v6861_v1  ;;  %s5065_s0 = scalar_lea.vmem [#allocation5], %s3352_s10  ;;  %v5075_v7 = vshrl.u32 %v834_v0, 7 }
  0x78   : > { %6863 = vst [vmem:[#allocation12_spill] sm:$0xff] %v6862_v1  ;;  %v814_v2 = vld [vmem:[%s5065_s0] sm:$0xff]  ;;  %v815_v3 = vld [vmem:[%s5065_s0 + $0x8] sm:$0xff]  ;;  %v5070_v4 = vld [vmem:[%s5065_s0 + $0x10] sm:$0xff]  ;;  %p742_p7 = scmp.lt.s32.totalorder %s4741_s30, 1  ;;  %s4755_s6 = smov 64  }
  0x79   : > { %v4017_v5 = vpack.c.bf16 %v815_v3, %v814_v2  ;;  %v817_v6 = vld [vmem:[%s5065_s0 + $0x18] sm:$0xff]  ;;  %v4395_v8 = vpack.i.bf16 %v815_v3, %v814_v2  ;;  %v818_v10 = vld [vmem:[%s5065_s0 + $0x20] sm:$0xff]  ;;  %v819_v11 = vld [vmem:[%s5065_s0 + $0x28] sm:$0xff]  ;;  %s6864_s16 = sld [smem:[#allocation64_spill]]  ;;  %s5098_s17 = scalar_lea.vmem [#allocation2], %s5057_s11  ;;  %v855_v14 = vsub.s32 0, %v5075_v7 }
  0x7a   : > { %v4023_v9 = vpack.c.bf16 %v817_v6, %v5070_v4  ;;  %s5082_s27 = scalar_select %p742_p7, %s4741_s30, 1  ;;  %v4405_v12 = vpack.i.bf16 %v819_v11, %v818_v10  ;;  %v750_v13 = vld [vmem:[%s5098_s17] sm:$0xff]  ;;  %v823_v16 = vld [vmem:[%s5065_s0 + $0x48] sm:$0xff]  ;;  %v1844_v18 = vsub.s32 1, %v5075_v7  ;;  %v4029_v22 = vpack.c.bf16 %v819_v11, %v818_v10  ;;  %v824_v24 = vld [vmem:[%s5065_s0 + $0x50] sm:$0xff] }
  0x7b   : > { %s678_s21 = sand.u32 1, %s6860_s19   ;;  %4019 = vmatprep.subr.msk.bf16.mxu0 %vm5061_vm1, %v4017_v5  ;;  %4396 = vrot.lane.b32.xlu1 %v4395_v8, %s4755_s6  ;;  %v822_v15 = vld [vmem:[%s5065_s0 + $0x40] sm:$0xff]  ;;  %v5105_v19 = vmul.f32 0.0625, %v750_v13  ;;  %v825_v25 = vld [vmem:[%s5065_s0 + $0x58] sm:$0xff]  ;;  %v820_v33 = vld [vmem:[%s5065_s0 + $0x30] sm:$0xff]  ;;  %v4400_v37 = vpack.i.bf16 %v817_v6, %v5070_v4  ;;  %s4757_s12 = smov 257  }
  0x7c   : > { %4022 = vmatpush3.bf16.xpose.msk.msra.mxu0 %vm5061_vm1, %v4017_v5  ;;  %s3354_s18 = sshll.u32 %s5082_s27, 1  ;;  %s3350_s19 = sshll.u32 %s678_s21, 7  ;;  %v4415_v21 = vpack.i.bf16 %v823_v16, %v822_v15  ;;  %v4420_v29 = vpack.i.bf16 %v825_v25, %v824_v24  ;;  %v821_v34 = vld [vmem:[%s5065_s0 + $0x38] sm:$0xff]  ;;  %v828_v35 = vld [vmem:[%s5065_s0 + $0x70] sm:$0xff]  ;;  %v826_v50 = vld [vmem:[%s5065_s0 + $0x60] sm:$0xff]  ;;  %v4041_v56 = vpack.c.bf16 %v823_v16, %v822_v15  ;;  %v4047_v61 = vpack.c.bf16 %v825_v25, %v824_v24 }
  0x7d   : > { %4025 = vmatprep.subr.msk.bf16.mxu0 %vm5061_vm1, %v4023_v9  ;;  %s5114_s15 = scalar_lea.vmem [#allocation3], %s3350_s19  ;;  %s6865_s21 = sld [smem:[#allocation63_spill]]  ;;  %v829_v36 = vld [vmem:[%s5065_s0 + $0x78] sm:$0xff]  ;;  %v4035_v42 = vpack.c.bf16 %v821_v34, %v820_v33  ;;  %v4410_v46 = vpack.i.bf16 %v821_v34, %v820_v33  ;;  %v827_v51 = vld [vmem:[%s5065_s0 + $0x68] sm:$0xff]  ;;  %v752_v13 = vld [vmem:[%s5098_s17 + $0x10] sm:$0xff]  ;;  %vm1215_vm2 = vcmp.lt.s32.totalorder %v5075_v7, 7 }
  0x7e   : > { %v782_v28 = vld [vmem:[%s5114_s15] sm:$0xff]  ;;  %v783_v30 = vld [vmem:[%s5114_s15 + $0x8] sm:$0xff]  ;;  %v784_v31 = vld [vmem:[%s5114_s15 + $0x10] sm:$0xff]  ;;  %v4430_v40 = vpack.i.bf16 %v829_v36, %v828_v35  ;;  %v4425_v53 = vpack.i.bf16 %v827_v51, %v826_v50  ;;  %v4053_v3 = vpack.c.bf16 %v827_v51, %v826_v50  ;;  %v4059_v8 = vpack.c.bf16 %v829_v36, %v828_v35  ;;  %s685_s0 = sand.u32 1, %s4713_s23   ;;  %s4756_s23 = smov 265  }
  0x7f   : > { %s749_s25 = scalar_lea.vmem %s6864_s16, %s3354_s18  ;;  %4406 = vrot.lane.b32.xlu1 %v4405_v12, %s4755_s6  ;;  %v785_v32 = vld [vmem:[%s5114_s15 + $0x18] sm:$0xff]  ;;  %v4065_v38 = vpack.c.bf16 %v783_v30, %v782_v28  ;;  %v5143_v43 = vld [vmem:[%s5114_s15 + $0x20] sm:$0xff]  ;;  %v5146_v44 = vld [vmem:[%s5114_s15 + $0x28] sm:$0xff]  ;;  %v4435_v47 = vpack.i.bf16 %v783_v30, %v782_v28  ;;  %v5228_v15 = vmul.f32 0.0625, %v752_v13  ;;  %s3351_s27 = sshll.u32 %s685_s0, 7 }
  0x80   : > { %v832_v17 = vld [vmem:[%s749_s25] sm:$0x3]  ;;  %v4071_v39 = vpack.c.bf16 %v785_v32, %v784_v31  ;;  %v4445_v48 = vpack.i.bf16 %v5146_v44, %v5143_v43  ;;  %v4077_v54 = vpack.c.bf16 %v5146_v44, %v5143_v43  ;;  %v4440_v55 = vpack.i.bf16 %v785_v32, %v784_v31  ;;  %v5178_v58 = vld [vmem:[%s5114_s15 + $0x30] sm:$0xff]  ;;  %v5181_v59 = vld [vmem:[%s5114_s15 + $0x38] sm:$0xff]  ;;  %s4758_s16 = smov 281   ;;  %s4759_s25 = smov 273  }
  0x81   : > { %v833_v20 = vmul.f32 0.0625, %v832_v17  ;;  %4067 = vmatprep.subr.msk.bf16.mxu1 %vm5061_vm1, %v4065_v38  ;;  %v4083_v60 = vpack.c.bf16 %v5181_v59, %v5178_v58  ;;  %v790_v62 = vld [vmem:[%s5114_s15 + $0x40] sm:$0xff]  ;;  %v791_v63 = vld [vmem:[%s5114_s15 + $0x48] sm:$0xff]  ;;  %v792_v4 = vld [vmem:[%s5114_s15 + $0x50] sm:$0xff]  ;;  %s4761_s19 = smov 305   ;;  %s4762_s20 = smov 321  }
  0x82   : > { %4070 = vmatpush3.bf16.xpose.msk.msra.mxu1 %vm5061_vm1, %v4065_v38  ;;  %v4089_v2 = vpack.c.bf16 %v791_v63, %v790_v62  ;;  %v793_v5 = vld [vmem:[%s5114_s15 + $0x58] sm:$0xff]  ;;  %v795_v10 = vld [vmem:[%s5114_s15 + $0x68] sm:$0xff]  ;;  %v796_v17 = vld [vmem:[%s5114_s15 + $0x70] sm:$0xff]  ;;  %s4763_s10 = smov 297   ;;  %s6771_s0 = smov 353  }
  0x83   : > { %v5108_v23 = vrot.slane %v833_v20, %v855_v14  ;;  %v1869_v26 = vrot.slane %v833_v20, %v1844_v18  ;;  %4416 = vrot.lane.b32.xlu1 %v4415_v21, %s4755_s6  ;;  %s745_s29 = scalar_lea.vmem %s6865_s21, %s3354_s18  ;;  %4073 = vmatprep.subr.msk.bf16.mxu1 %vm5061_vm1, %v4071_v39  ;;  %v4095_v6 = vpack.c.bf16 %v793_v5, %v792_v4  ;;  %v751_v12 = vld [vmem:[%s5098_s17 + $0x8] sm:$0xff]  ;;  %v753_v16 = vld [vmem:[%s5098_s17 + $0x18] sm:$0xff]  ;;  %v754_v20 = vld [vmem:[%s5098_s17 + $0x20] sm:$0xff]  ;;  %s5437_s18 = scalar_lea.vmem [#allocation4], %s3351_s27 }
  0x84   : > { %4028 = vmatpush3.bf16.xpose.msk.msra.mxu0 %vm5061_vm1, %v4023_v9  ;;  %v830_v41 = vld [vmem:[%s745_s29] sm:$0x3]  ;;  %v756_v28 = vld [vmem:[%s5098_s17 + $0x30] sm:$0xff]  ;;  %v757_v33 = vld [vmem:[%s5098_s17 + $0x38] sm:$0xff]  ;;  %s6770_s21 = smov 337   ;;  %s4765_s29 = smov 313  }
  0x85   : > { %v877_v27 = vadd.f32 %v5108_v23, %v5105_v19  ;;  %4031 = vmatprep.subr.msk.bf16.mxu0 %vm5061_vm1, %v4029_v22  ;;  %1871 = vrot.lane.b32.xlu0 %v1869_v26, %s4755_s6  ;;  %v831_v45 = vmul.f32 0.0625, %v830_v41  ;;  %v794_v9 = vld [vmem:[%s5114_s15 + $0x60] sm:$0xff]  ;;  %v879_v25 = vadd.f32 %v5108_v23, %v5228_v15  ;;  %v5240_v26 = vmul.f32 0.0625, %v754_v20  ;;  %v765_v5 = vld [vmem:[%s5098_s17 + $0x78] sm:$0xff]  ;;  %s6772_s27 = smov 329  }
  0x86   : > { %v4101_v11 = vpack.c.bf16 %v795_v10, %v794_v9  ;;  %v5256_v32 = vmul.f32 0.0625, %v756_v28  ;;  %v758_v34 = vld [vmem:[%s5098_s17 + $0x40] sm:$0xff]  ;;  %v5263_v36 = vmul.f32 0.0625, %v757_v33  ;;  %v5328_v10 = vmul.f32 0.0625, %v765_v5 }
  0x87   : > { %3713 = vmatprep.mubr.msk.f32.mxu0 %vm893_vm0, %v877_v27  ;;  %4421 = vrot.lane.b32.xlu1 %v4420_v29, %s4755_s6  ;;  %v5156_v49 = vrot.slane %v831_v45, %v855_v14  ;;  %v1845_v57 = vrot.slane %v831_v45, %v1844_v18  ;;  %v5222_v14 = vmul.f32 0.0625, %v751_v12  ;;  %v797_v18 = vld [vmem:[%s5114_s15 + $0x78] sm:$0xff]  ;;  %v755_v27 = vld [vmem:[%s5098_s17 + $0x28] sm:$0xff]  ;;  %v881_v31 = vadd.f32 %v5108_v23, %v5240_v26  ;;  %v762_v50 = vld [vmem:[%s5098_s17 + $0x60] sm:$0xff] }
  0x88   : > { %v4107_v24 = vpack.c.bf16 %v797_v18, %v796_v17  ;;  %v5249_v30 = vmul.f32 0.0625, %v755_v27  ;;  %v5268_v38 = vmul.f32 0.0625, %v758_v34  ;;  %v884_v41 = vadd.f32 %v5108_v23, %v5263_v36 }
  0x89   : > { %4401 = vrot.lane.b32.xlu0 %v4400_v37, %s4755_s6  ;;  %v857_v52 = vadd.f32 %v5156_v49, %v5105_v19  ;;  %v878_v21 = vadd.f32 %v5108_v23, %v5222_v14  ;;  %v883_v37 = vadd.f32 %v5108_v23, %v5256_v32  ;;  %v858_v51 = vadd.f32 %v5156_v49, %v5222_v14 }
  0x8a   : > { %4076 = vmatpush3.bf16.xpose.msk.msra.mxu1 %vm5061_vm1, %v4071_v39  ;;  %v882_v35 = vadd.f32 %v5108_v23, %v5249_v30  ;;  %v759_v39 = vld [vmem:[%s5098_s17 + $0x48] sm:$0xff]  ;;  %v885_v45 = vadd.f32 %v5108_v23, %v5268_v38  ;;  %v861_v62 = vadd.f32 %v5156_v49, %v5240_v26  ;;  %v864_v12 = vadd.f32 %v5156_v49, %v5263_v36 }
  0x8b   : > { %4431 = vrot.lane.b32.xlu1 %v4430_v40, %s4755_s6  ;;  %3769 = vmatprep.mubr.msk.f32.mxu1 %vm893_vm0, %v857_v52  ;;  %v760_v40 = vld [vmem:[%s5098_s17 + $0x50] sm:$0xff]  ;;  %v859_v52 = vadd.f32 %v5156_v49, %v5228_v15  ;;  %v865_v13 = vadd.f32 %v5156_v49, %v5268_v38 }
  0x8c   : > { %4034 = vmatpush3.bf16.xpose.msk.msra.mxu0 %vm5061_vm1, %v4029_v22  ;;  %4079 = vmatprep.subr.msk.bf16.mxu1 %vm5061_vm1, %v4077_v54  ;;  %v5236_v22 = vmul.f32 0.0625, %v753_v16  ;;  %v892_v16 = vadd.f32 %v5108_v23, %v5328_v10 }
  0x8d   : > { %4037 = vmatprep.subr.msk.bf16.mxu0 %vm5061_vm1, %v4035_v42  ;;  %4411 = vrot.lane.b32.xlu0 %v4410_v46, %s4755_s6  ;;  %v5282_v46 = vmul.f32 0.0625, %v760_v40 }
  0x8e   : > { %v880_v29 = vadd.f32 %v5108_v23, %v5236_v22 }
  0x8f   : > { %4436 = vrot.lane.b32.xlu1 %v4435_v47, %s4755_s6  ;;  %v761_v47 = vld [vmem:[%s5098_s17 + $0x58] sm:$0xff]  ;;  %v867_v18 = vadd.f32 %v5156_v49, %v5282_v46 }
  0x91   : > { %4426 = vrot.lane.b32.xlu0 %v4425_v53, %s4755_s6 }
  0x92   : > { %4082 = vmatpush3.bf16.xpose.msk.msra.mxu1 %vm5061_vm1, %v4077_v54  ;;  %v5293_v54 = vmul.f32 0.0625, %v761_v47 }
  0x93   : > { %4441 = vrot.lane.b32.xlu1 %v4440_v55, %s4755_s6  ;;  %4085 = vmatprep.subr.msk.bf16.mxu1 %vm5061_vm1, %v4083_v60  ;;  %v887_v55 = vadd.f32 %v5108_v23, %v5282_v46 }
  0x94   : > { %4040 = vmatpush3.bf16.xpose.msk.msra.mxu0 %vm5061_vm1, %v4035_v42  ;;  %v5277_v42 = vmul.f32 0.0625, %v759_v39  ;;  %v888_v63 = vadd.f32 %v5108_v23, %v5293_v54  ;;  %v868_v20 = vadd.f32 %v5156_v49, %v5293_v54 }
  0x95   : > { %4043 = vmatprep.subr.msk.bf16.mxu0 %vm5061_vm1, %v4041_v56  ;;  %1847 = vrot.lane.b32.xlu0 %v1845_v57, %s4755_s6  ;;  %v763_v57 = vld [vmem:[%s5098_s17 + $0x68] sm:$0xff] }
  0x96   : > { %v886_v53 = vadd.f32 %v5108_v23, %v5277_v42  ;;  %v866_v17 = vadd.f32 %v5156_v49, %v5277_v42 }
  0x9a   : > { %4088 = vmatpush3.bf16.xpose.msk.msra.mxu1 %vm5061_vm1, %v4083_v60  ;;  %v764_v60 = vld [vmem:[%s5098_s17 + $0x70] sm:$0xff]  ;;  %s4760_s17 = smov 289  }
  0x9b   : > { %4091 = vmatprep.subr.msk.bf16.mxu1 %vm5061_vm1, %v4089_v2  ;;  %v5316_v4 = vmul.f32 0.0625, %v764_v60 }
  0x9c   : > { %4046 = vmatpush3.bf16.xpose.msk.msra.mxu0 %vm5061_vm1, %v4041_v56  ;;  %v5298_v56 = vmul.f32 0.0625, %v762_v50 }
  0x9d   : > { %4049 = vmatprep.subr.msk.bf16.mxu0 %vm5061_vm1, %v4047_v61 }
  0xa2   : > { %4094 = vmatpush3.bf16.xpose.msk.msra.mxu1 %vm5061_vm1, %v4089_v2  ;;  %v5311_v2 = vmul.f32 0.0625, %v763_v57 }
  0xa3   : > { %4097 = vmatprep.subr.msk.bf16.mxu1 %vm5061_vm1, %v4095_v6 }
  0xa4   : > { %4052 = vmatpush3.bf16.xpose.msk.msra.mxu0 %vm5061_vm1, %v4047_v61  ;;  %v860_v61 = vadd.f32 %v5156_v49, %v5236_v22  ;;  %v890_v9 = vadd.f32 %v5108_v23, %v5311_v2 }
  0xa5   : > { %4055 = vmatprep.subr.msk.bf16.mxu0 %vm5061_vm1, %v4053_v3 }
  0xaa   : > { %4100 = vmatpush3.bf16.xpose.msk.msra.mxu1 %vm5061_vm1, %v4095_v6  ;;  %v862_v6 = vadd.f32 %v5156_v49, %v5249_v30 }
  0xab   : > { %4103 = vmatprep.subr.msk.bf16.mxu1 %vm5061_vm1, %v4101_v11 }
  0xac   : > { %4058 = vmatpush3.bf16.xpose.msk.msra.mxu0 %vm5061_vm1, %v4053_v3  ;;  %v889_v3 = vadd.f32 %v5108_v23, %v5298_v56 }
  0xad   : > { %4061 = vmatprep.subr.msk.bf16.mxu0 %vm5061_vm1, %v4059_v8 }
  0xb2   : > { %4106 = vmatpush3.bf16.xpose.msk.msra.mxu1 %vm5061_vm1, %v4101_v11  ;;  %v891_v11 = vadd.f32 %v5108_v23, %v5316_v4  ;;  %v869_v23 = vadd.f32 %v5156_v49, %v5298_v56 }
  0xb3   : > { %4109 = vmatprep.subr.msk.bf16.mxu1 %vm5061_vm1, %v4107_v24 }
  0xb4   : > { %4064 = vmatpush3.bf16.xpose.msk.msra.mxu0 %vm5061_vm1, %v4059_v8  ;;  %v863_v8 = vadd.f32 %v5156_v49, %v5256_v32 }
  0xba   : > { %4112 = vmatpush3.bf16.xpose.msk.msra.mxu1 %vm5061_vm1, %v4107_v24  ;;  %v871_v24 = vadd.f32 %v5156_v49, %v5316_v4 }
  0xbb   : > { %3714 = vmatmul.mubr.msk.f32.vlgmr.msra.gmra.mrb[0].mxu0 %vm893_vm0, %v878_v21  ;;  %v870_v21 = vadd.f32 %v5156_v49, %v5311_v2 }
  0xbc   : > { %3716 = vmatprep.mubr.msk.f32.mxu0 %vm893_vm0, %v879_v25  ;;  %v872_v25 = vadd.f32 %v5156_v49, %v5328_v10 }
  0xbf   : > { %3717 = vmatmul.mubr.msk.f32.gmra.mrb[2].mxu0 %vm893_vm0, %v880_v29 }
  0xc0   : > { %3719 = vmatprep.mubr.msk.f32.mxu0 %vm893_vm0, %v881_v31 }
  0xc1   : > { %3770 = vmatmul.mubr.msk.f32.vlgmr.msra.gmra.mrb[0].mxu1 %vm893_vm0, %v858_v51 }
  0xc2   : > { %3772 = vmatprep.mubr.msk.f32.mxu1 %vm893_vm0, %v859_v52 }
  0xc3   : > { %3720 = vmatmul.mubr.msk.f32.gmra.mrb[4].mxu0 %vm893_vm0, %v882_v35 }
  0xc4   : > { %3722 = vmatprep.mubr.msk.f32.mxu0 %vm893_vm0, %v883_v37 }
  0xc5   : > { %3773 = vmatmul.mubr.msk.f32.gmra.mrb[2].mxu1 %vm893_vm0, %v860_v61 }
  0xc6   : > { %3775 = vmatprep.mubr.msk.f32.mxu1 %vm893_vm0, %v861_v62 }
  0xc7   : > { %3723 = vmatmul.mubr.msk.f32.gmra.mrb[6].mxu0 %vm893_vm0, %v884_v41 }
  0xc8   : > { %3725 = vmatprep.mubr.msk.f32.mxu0 %vm893_vm0, %v885_v45 }
  0xc9   : > { %3776 = vmatmul.mubr.msk.f32.gmra.mrb[4].mxu1 %vm893_vm0, %v862_v6 }
  0xca   : > { %3778 = vmatprep.mubr.msk.f32.mxu1 %vm893_vm0, %v863_v8 }
  0xcb   : > { %3726 = vmatmul.mubr.msk.f32.gmra.mrb[8].mxu0 %vm893_vm0, %v886_v53 }
  0xcc   : > { %3728 = vmatprep.mubr.msk.f32.mxu0 %vm893_vm0, %v887_v55 }
  0xcd   : > { %3779 = vmatmul.mubr.msk.f32.gmra.mrb[6].mxu1 %vm893_vm0, %v864_v12 }
  0xce   : > { %3781 = vmatprep.mubr.msk.f32.mxu1 %vm893_vm0, %v865_v13 }
  0xcf   : > { %3729 = vmatmul.mubr.msk.f32.gmra.mrb[10].mxu0 %vm893_vm0, %v888_v63 }
  0xd0   : > { %3731 = vmatprep.mubr.msk.f32.mxu0 %vm893_vm0, %v889_v3 }
  0xd1   : > { %3782 = vmatmul.mubr.msk.f32.gmra.mrb[8].mxu1 %vm893_vm0, %v866_v17 }
  0xd2   : > { %3784 = vmatprep.mubr.msk.f32.mxu1 %vm893_vm0, %v867_v18 }
  0xd3   : > { %3732 = vmatmul.mubr.msk.f32.gmra.mrb[12].mxu0 %vm893_vm0, %v890_v9 }
  0xd4   : > { %3734 = vmatprep.mubr.msk.f32.mxu0 %vm893_vm0, %v891_v11 }
  0xd5   : > { %3785 = vmatmul.mubr.msk.f32.gmra.mrb[10].mxu1 %vm893_vm0, %v868_v20 }
  0xd6   : > { %3787 = vmatprep.mubr.msk.f32.mxu1 %vm893_vm0, %v869_v23 }
  0xd7   : > { %3735 = vmatmul.mubr.msk.f32.gmra.mrb[14].mxu0 %vm893_vm0, %v892_v16 }
  0xd9   : > { %3788 = vmatmul.mubr.msk.f32.gmra.mrb[12].mxu1 %vm893_vm0, %v870_v21 }
  0xda   : > { %3790 = vmatprep.mubr.msk.f32.mxu1 %vm893_vm0, %v871_v24 }
  0xdd   : > { %3791 = vmatmul.mubr.msk.f32.gmra.mrb[14].mxu1 %vm893_vm0, %v872_v25 }
  0xed   : > { %v4397_v47 = vpop.permute.xlu1 %4396 }
  0xee   : > { %v4399_v50 = vunpack.i.h.bf16 %v4397_v47  ;;  %v4398_v51 = vunpack.i.l.bf16 %v4397_v47  ;;  %v5468_v47 = vld [vmem:[%s5437_s18 + $0x30] sm:$0xff] }
  0xef   : > { %6872 = vst [vmem:[#allocation19_spill] sm:$0xff] %v5468_v47 }
  0xf0   : > { %v4145_v52 = vpack.c.bf16 %v4399_v50, %v4398_v51  ;;  %v5471_v50 = vld [vmem:[%s5437_s18 + $0x38] sm:$0xff]  ;;  %v5474_v51 = vld [vmem:[%s5437_s18 + $0x40] sm:$0xff] }
  0xf1   : > { %v4407_v57 = vpop.permute.xlu1 %4406  ;;  %6873 = vst [vmem:[#allocation20_spill] sm:$0xff] %v5471_v50  ;;  %6874 = vst [vmem:[#allocation21_spill] sm:$0xff] %v5474_v51 }
  0xf2   : > { %4147 = vmatprep.subr.msk.bf16.mxu1 %vm5061_vm1, %v4145_v52  ;;  %v4409_v60 = vunpack.i.h.bf16 %v4407_v57  ;;  %v4408_v61 = vunpack.i.l.bf16 %v4407_v57  ;;  %v5612_v57 = vadd.s32 8, %v5075_v7 }
  0xf3   : > { %4150 = vmatpush3.bf16.xpose.msk.msra.mxu1 %vm5061_vm1, %v4145_v52  ;;  %v5618_v52 = vand.u32 127, %v834_v0  ;;  %v5636_v0 = vadd.s32 24, %v5075_v7 }
  0xf4   : > { %v4157_v62 = vpack.c.bf16 %v4409_v60, %v4408_v61  ;;  %v5494_v61 = vld [vmem:[%s5437_s18 + $0x60] sm:$0xff]  ;;  %6884 = vst [vmem:[#allocation31_spill] sm:$0xff] %v5612_v57 }
  0xf5   : > { %v4417_v8 = vpop.permute.xlu1 %4416  ;;  %6878 = vst [vmem:[#allocation25_spill] sm:$0xff] %v5494_v61  ;;  %6889 = vst [vmem:[#allocation36_spill] sm:$0xff] %v5636_v0  ;;  %vm1232_vm4 = vcmp.le.s32.totalorder %v5618_v52, %v5075_v7  ;;  %vm1233_vm7 = vcmp.le.s32.totalorder %v5618_v52, %v5612_v57  ;;  %vm6802_vm10 = vcmp.le.s32.totalorder %v5618_v52, %v5636_v0 }
  0xf6   : > { %v4419_v9 = vunpack.i.h.bf16 %v4417_v8  ;;  %v4418_v11 = vunpack.i.l.bf16 %v4417_v8 }
  0xf7   : > { %v5367_v27 = vpop.permute.xlu0 %1871 }
  0xf8   : > { %v1875_v28 = vadd.f32 %v5367_v27, %v5222_v14  ;;  %v1874_v29 = vadd.f32 %v5367_v27, %v5105_v19  ;;  %v1876_v31 = vadd.f32 %v5367_v27, %v5228_v15  ;;  %v1877_v49 = vadd.f32 %v5367_v27, %v5236_v22 }
  0xf9   : > { %v1879_v33 = vadd.f32 %v5367_v27, %v5249_v30  ;;  %v1878_v34 = vadd.f32 %v5367_v27, %v5240_v26  ;;  %v1880_v35 = vadd.f32 %v5367_v27, %v5256_v32  ;;  %v1881_v37 = vadd.f32 %v5367_v27, %v5263_v36  ;;  %v4422_v13 = vpop.permute.xlu1 %4421 }
  0xfa   : > { %1908 = vrot.lane.b32.xlu0 %v1875_v28, %s4755_s6  ;;  %1906 = vrot.lane.b32.xlu1 %v1874_v29, %s4755_s6  ;;  %v1882_v39 = vadd.f32 %v5367_v27, %v5268_v38  ;;  %v1883_v40 = vadd.f32 %v5367_v27, %v5277_v42  ;;  %v1885_v41 = vadd.f32 %v5367_v27, %v5293_v54  ;;  %v4424_v16 = vunpack.i.h.bf16 %v4422_v13 }
  0xfb   : > { %v1884_v45 = vadd.f32 %v5367_v27, %v5282_v46  ;;  %v1886_v53 = vadd.f32 %v5367_v27, %v5298_v56  ;;  %v4402_v43 = vpop.permute.xlu0 %4401  ;;  %v4169_v12 = vpack.c.bf16 %v4419_v9, %v4418_v11  ;;  %v4423_v17 = vunpack.i.l.bf16 %v4422_v13 }
  0xfc   : > { %v4404_v44 = vunpack.i.h.bf16 %v4402_v43  ;;  %v4125_v9 = vpack.c.bf16 %v5471_v50, %v5468_v47 }
  0xfd   : > { %v4175_v18 = vpack.c.bf16 %v4424_v16, %v4423_v17  ;;  %v4432_v23 = vpop.permute.xlu1 %4431 }
  0xfe   : > { %1910 = vrot.lane.b32.xlu0 %v1876_v31, %s4755_s6  ;;  %1912 = vrot.lane.b32.xlu1 %v1877_v49, %s4755_s6  ;;  %v4434_v28 = vunpack.i.h.bf16 %v4432_v23  ;;  %v4433_v29 = vunpack.i.l.bf16 %v4432_v23  ;;  %v5440_v31 = vld [vmem:[%s5437_s18] sm:$0xff]  ;;  %v5443_v49 = vld [vmem:[%s5437_s18 + $0x8] sm:$0xff] }
  0xff   : > { %v4412_v63 = vpop.permute.xlu0 %4411  ;;  %6866 = vst [vmem:[#allocation13_spill] sm:$0xff] %v5440_v31  ;;  %6867 = vst [vmem:[#allocation14_spill] sm:$0xff] %v5443_v49 }
 0x100   : > { %v4414_v3 = vunpack.i.h.bf16 %v4412_v63  ;;  %v4413_v5 = vunpack.i.l.bf16 %v4412_v63 }
 0x101   : > { %v4437_v16 = vpop.permute.xlu1 %4436 }
 0x102   : > { %1916 = vrot.lane.b32.xlu0 %v1879_v33, %s4755_s6  ;;  %1914 = vrot.lane.b32.xlu1 %v1878_v34, %s4755_s6  ;;  %v4163_v6 = vpack.c.bf16 %v4414_v3, %v4413_v5  ;;  %v5446_v33 = vld [vmem:[%s5437_s18 + $0x10] sm:$0xff]  ;;  %v4439_v17 = vunpack.i.h.bf16 %v4437_v16 }
 0x103   : > { %v4427_v20 = vpop.permute.xlu0 %4426  ;;  %6868 = vst [vmem:[#allocation15_spill] sm:$0xff] %v5446_v33  ;;  %v5504_v5 = vld [vmem:[%s5437_s18 + $0x70] sm:$0xff] }
 0x104   : > { %v4429_v21 = vunpack.i.h.bf16 %v4427_v20  ;;  %v4428_v24 = vunpack.i.l.bf16 %v4427_v20  ;;  %6880 = vst [vmem:[#allocation27_spill] sm:$0xff] %v5504_v5 }
 0x106   : > { %1918 = vrot.lane.b32.xlu0 %v1880_v35, %s4755_s6  ;;  %1920 = vrot.lane.b32.xlu1 %v1881_v37, %s4755_s6  ;;  %v4181_v25 = vpack.c.bf16 %v4429_v21, %v4428_v24  ;;  %v4113_v35 = vpack.c.bf16 %v5443_v49, %v5440_v31  ;;  %v5453_v37 = vld [vmem:[%s5437_s18 + $0x18] sm:$0xff]  ;;  %v5534_v24 = vpop.permute.xlu1 %4441 }
 0x107   : > { %6869 = vst [vmem:[#allocation16_spill] sm:$0xff] %v5453_v37  ;;  %v5532_v21 = vpop.permute.xlu0 %1847 }
 0x108   : > { %4114 = vmatprep.subr.bf16.mxu0 %v4113_v35 }
 0x109   : > { %4116 = vmatpush3.bf16.msra.mxu0 %v4113_v35 }
 0x10a   : > { %1922 = vrot.lane.b32.xlu0 %v1882_v39, %s4755_s6  ;;  %1924 = vrot.lane.b32.xlu1 %v1883_v40, %s4755_s6  ;;  %v5456_v39 = vld [vmem:[%s5437_s18 + $0x20] sm:$0xff]  ;;  %v5459_v40 = vld [vmem:[%s5437_s18 + $0x28] sm:$0xff] }
 0x10b   : > { %6870 = vst [vmem:[#allocation17_spill] sm:$0xff] %v5456_v39  ;;  %6871 = vst [vmem:[#allocation18_spill] sm:$0xff] %v5459_v40  ;;  %v4121_v63 = vpack.c.bf16 %v5459_v40, %v5456_v39 }
 0x10e   : > { %4446 = vrot.lane.b32.xlu0 %v4445_v48, %s4755_s6  ;;  %1928 = vrot.lane.b32.xlu1 %v1885_v41, %s4755_s6  ;;  %v4403_v48 = vunpack.i.l.bf16 %v4402_v43  ;;  %v5481_v43 = vld [vmem:[%s5437_s18 + $0x48] sm:$0xff] }
 0x10f   : > { %6875 = vst [vmem:[#allocation22_spill] sm:$0xff] %v5481_v43  ;;  %v4129_v11 = vpack.c.bf16 %v5481_v43, %v5474_v51 }
 0x110   : > { %v4151_v55 = vpack.c.bf16 %v4404_v44, %v4403_v48  ;;  %v5484_v44 = vld [vmem:[%s5437_s18 + $0x50] sm:$0xff]  ;;  %v5487_v48 = vld [vmem:[%s5437_s18 + $0x58] sm:$0xff] }
 0x111   : > { %6876 = vst [vmem:[#allocation23_spill] sm:$0xff] %v5484_v44  ;;  %6877 = vst [vmem:[#allocation24_spill] sm:$0xff] %v5487_v48 }
 0x112   : > { %1926 = vrot.lane.b32.xlu0 %v1884_v45, %s4755_s6  ;;  %4153 = vmatprep.subr.msk.bf16.mxu1 %vm5061_vm1, %v4151_v55  ;;  %v4117_v45 = vpack.c.bf16 %v5453_v37, %v5446_v33  ;;  %v5766_v33 = vadd.s32 88, %v5075_v7 }
 0x113   : > { %4156 = vmatpush3.bf16.xpose.msk.msra.mxu1 %vm5061_vm1, %v4151_v55  ;;  %v4187_v55 = vpack.c.bf16 %v4434_v28, %v4433_v29 }
 0x114   : > { %4159 = vmatprep.subr.msk.bf16.mxu1 %vm5061_vm1, %v4157_v62  ;;  %4118 = vmatprep.subr.bf16.mxu0 %v4117_v45  ;;  %6902 = vst [vmem:[#allocation49_spill] sm:$0xff] %v5766_v33 }
 0x115   : > { %4120 = vmatpush3.bf16.msra.mxu0 %v4117_v45 }
 0x116   : > { %1930 = vrot.lane.b32.xlu0 %v1886_v53, %s4755_s6  ;;  %4122 = vmatprep.subr.bf16.mxu0 %v4121_v63  ;;  %v5621_v53 = vadd.s32 1, %v5075_v7 }
 0x118   : > { %6886 = vst [vmem:[#allocation33_spill] sm:$0xff] %v5621_v53  ;;  %vm1264_vm3 = vcmp.eq.s32.totalorder %v5618_v52, %v5621_v53 }
 0x119   : > { %4124 = vmatpush3.bf16.msra.mxu0 %v4121_v63 }
 0x11a   : > { %4126 = vmatprep.subr.bf16.mxu0 %v4125_v9 }
 0x11b   : > { %4162 = vmatpush3.bf16.xpose.msk.msra.mxu1 %vm5061_vm1, %v4157_v62  ;;  %v5497_v62 = vld [vmem:[%s5437_s18 + $0x68] sm:$0xff] }
 0x11c   : > { %4165 = vmatprep.subr.msk.bf16.mxu1 %vm5061_vm1, %v4163_v6  ;;  %6879 = vst [vmem:[#allocation26_spill] sm:$0xff] %v5497_v62  ;;  %v4137_v13 = vpack.c.bf16 %v5497_v62, %v5494_v61 }
 0x11d   : > { %4128 = vmatpush3.bf16.msra.mxu0 %v4125_v9 }
 0x11e   : > { %4130 = vmatprep.subr.bf16.mxu0 %v4129_v11 }
 0x121   : > { %4132 = vmatpush3.bf16.msra.mxu0 %v4129_v11 }
 0x123   : > { %4168 = vmatpush3.bf16.xpose.msk.msra.mxu1 %vm5061_vm1, %v4163_v6  ;;  %v5507_v6 = vld [vmem:[%s5437_s18 + $0x78] sm:$0xff]  ;;  %s4768_s18 = smov 369  }
 0x124   : > { %4171 = vmatprep.subr.msk.bf16.mxu1 %vm5061_vm1, %v4169_v12  ;;  %6881 = vst [vmem:[#allocation28_spill] sm:$0xff] %v5507_v6  ;;  %v4141_v20 = vpack.c.bf16 %v5507_v6, %v5504_v5 }
 0x12b   : > { %4174 = vmatpush3.bf16.xpose.msk.msra.mxu1 %vm5061_vm1, %v4169_v12  ;;  %v4133_v12 = vpack.c.bf16 %v5487_v48, %v5484_v44 }
 0x12c   : > { %4177 = vmatprep.subr.msk.bf16.mxu1 %vm5061_vm1, %v4175_v18 }
 0x12d   : > { %4134 = vmatprep.subr.bf16.mxu0 %v4133_v12 }
 0x12e   : > { %4136 = vmatpush3.bf16.msra.mxu0 %v4133_v12 }
 0x12f   : > { %4138 = vmatprep.subr.bf16.mxu0 %v4137_v13 }
 0x132   : > { %4140 = vmatpush3.bf16.msra.mxu0 %v4137_v13 }
 0x133   : > { %4180 = vmatpush3.bf16.xpose.msk.msra.mxu1 %vm5061_vm1, %v4175_v18  ;;  %v4438_v18 = vunpack.i.l.bf16 %v4437_v16  ;;  %4142 = vmatprep.subr.bf16.mxu0 %v4141_v20 }
 0x134   : > { %4183 = vmatprep.subr.msk.bf16.mxu1 %vm5061_vm1, %v4181_v25 }
 0x135   : > { %v5527_v23 = vpack.c.bf16 %v4439_v17, %v4438_v18 }
 0x136   : > { %4144 = vmatpush3.bf16.msra.mxu0 %v4141_v20 }
 0x137   : > { %6882 = vst [vmem:[#allocation29_spill] sm:$0xff] %v5527_v23  ;;  %4195 = vmatprep.subr.msk.bf16.mxu0 %vm5061_vm1, %v5527_v23 }
 0x13b   : > { %4186 = vmatpush3.bf16.xpose.msk.msra.mxu1 %vm5061_vm1, %v4181_v25 }
 0x13c   : > { %4189 = vmatprep.subr.msk.bf16.mxu1 %vm5061_vm1, %v4187_v55 }
 0x143   : > { %4192 = vmatpush3.bf16.xpose.msk.msra.mxu1 %vm5061_vm1, %v4187_v55 }
 0x16c   : > { %v1909_v25 = vpop.permute.xlu0 %1908  ;;  %v1907_v28 = vpop.permute.xlu1 %1906 }
 0x16d   : > { %3881 = vmatprep.mubr.msk.f32.mxu1 %vm893_vm0, %v1907_v28 }
 0x16e   : > { %3882 = vmatmul.mubr.msk.f32.vlgmr.msra.gmra.mrb[16].mxu1 %vm893_vm0, %v1909_v25 }
 0x170   : > { %v1911_v29 = vpop.permute.xlu0 %1910  ;;  %v1913_v35 = vpop.permute.xlu1 %1912 }
 0x171   : > { %3884 = vmatprep.mubr.msk.f32.mxu1 %vm893_vm0, %v1911_v29 }
 0x172   : > { %3885 = vmatmul.mubr.msk.f32.gmra.mrb[18].mxu1 %vm893_vm0, %v1913_v35  ;;  %v1888_v35 = vadd.f32 %v5367_v27, %v5316_v4 }
 0x174   : > { %v1917_v45 = vpop.permute.xlu0 %1916  ;;  %v1915_v55 = vpop.permute.xlu1 %1914 }
 0x175   : > { %3887 = vmatprep.mubr.msk.f32.mxu1 %vm893_vm0, %v1915_v55 }
 0x176   : > { %3888 = vmatmul.mubr.msk.f32.gmra.mrb[20].mxu1 %vm893_vm0, %v1917_v45 }
 0x178   : > { %v1919_v63 = vpop.permute.xlu0 %1918  ;;  %v1921_v9 = vpop.permute.xlu1 %1920 }
 0x179   : > { %3890 = vmatprep.mubr.msk.f32.mxu1 %vm893_vm0, %v1919_v63  ;;  %v1887_v63 = vadd.f32 %v5367_v27, %v5311_v2 }
 0x17a   : > { %3891 = vmatmul.mubr.msk.f32.gmra.mrb[22].mxu1 %vm893_vm0, %v1921_v9 }
 0x17c   : > { %v1923_v11 = vpop.permute.xlu0 %1922  ;;  %v1925_v12 = vpop.permute.xlu1 %1924 }
 0x17d   : > { %3893 = vmatprep.mubr.msk.f32.mxu1 %vm893_vm0, %v1923_v11  ;;  %v4450_v11 = vpack.i.bf16 %v5181_v59, %v5178_v58 }
 0x17e   : > { %3894 = vmatmul.mubr.msk.f32.gmra.mrb[24].mxu1 %vm893_vm0, %v1925_v12 }
 0x180   : > { %v5546_v13 = vpop.permute.xlu0 %4446  ;;  %v1929_v16 = vpop.permute.xlu1 %1928 }
 0x181   : > { %6883 = vst [vmem:[#allocation30_spill] sm:$0xff] %v5546_v13 }
 0x184   : > { %v1927_v17 = vpop.permute.xlu0 %1926 }
 0x185   : > { %3896 = vmatprep.mubr.msk.f32.mxu1 %vm893_vm0, %v1927_v17 }
 0x186   : > { %3897 = vmatmul.mubr.msk.f32.gmra.mrb[26].mxu1 %vm893_vm0, %v1929_v16 }
 0x188   : > { %v1931_v18 = vpop.permute.xlu0 %1930 }
 0x189   : > { %3899 = vmatprep.mubr.msk.f32.mxu1 %vm893_vm0, %v1931_v18 }
 0x18e   : > { %v3715_v20 = vpop.f32.mrb[0].mxu0 }
 0x18f   : > { %1141 = vrot.lane.b32.xlu0 %v3715_v20, %s4756_s23  ;;  %v1056_v25 = vpop.f32.mrb[1].mxu0 }
 0x192   : > { %v3718_v28 = vpop.f32.mrb[2].mxu0 }
 0x193   : > { %1137 = vrot.lane.b32.xlu0 %v1056_v25, %s4757_s12  ;;  %1149 = vrot.lane.b32.xlu1 %v3718_v28, %s4758_s16  ;;  %v1066_v29 = vpop.f32.mrb[3].mxu0  ;;  %v1889_v28 = vadd.f32 %v5367_v27, %v5328_v10 }
 0x194   : > { %v5564_v16 = vpop.f32.mrb[0].mxu1 }
 0x195   : > { %v5566_v17 = vpop.f32.mrb[1].mxu1 }
 0x196   : > { %v3721_v45 = vpop.f32.mrb[4].mxu0 }
 0x197   : > { %1934 = vrot.lane.b32.xlu0 %v1888_v35, %s4755_s6  ;;  %1145 = vrot.lane.b32.xlu1 %v1066_v29, %s4759_s25  ;;  %v1076_v55 = vpop.f32.mrb[5].mxu0 }
 0x198   : > { %v5570_v25 = vpop.f32.mrb[2].mxu1 }
 0x199   : > { %v5574_v29 = vpop.f32.mrb[3].mxu1 }
 0x19a   : > { %v3724_v9 = vpop.f32.mrb[6].mxu0 }
 0x19b   : > { %1932 = vrot.lane.b32.xlu1 %v1887_v63, %s4755_s6  ;;  %1153 = vrot.lane.b32.xlu0 %v1076_v55, %s4760_s17  ;;  %v1086_v12 = vpop.f32.mrb[7].mxu0 }
 0x19c   : > { %v5578_v35 = vpop.f32.mrb[4].mxu1 }
 0x19d   : > { %v5580_v55 = vpop.f32.mrb[5].mxu1 }
 0x19e   : > { %v3727_v18 = vpop.f32.mrb[8].mxu0 }
 0x19f   : > { %4451 = vrot.lane.b32.xlu1 %v4450_v11, %s4755_s6  ;;  %1161 = vrot.lane.b32.xlu0 %v1086_v12, %s4761_s19  ;;  %v1096_v20 = vpop.f32.mrb[9].mxu0 }
 0x1a0   : > { %v5584_v11 = vpop.f32.mrb[6].mxu1 }
 0x1a1   : > { %v5586_v12 = vpop.f32.mrb[7].mxu1 }
 0x1a2   : > { %v3730_v58 = vpop.f32.mrb[10].mxu0 }
 0x1a3   : > { %1936 = vrot.lane.b32.xlu1 %v1889_v28, %s4755_s6  ;;  %1169 = vrot.lane.b32.xlu0 %v1096_v20, %s4762_s20  ;;  %v1106_v59 = vpop.f32.mrb[11].mxu0 }
 0x1a4   : > { %v5590_v8 = vpop.f32.mrb[8].mxu1 }
 0x1a5   : > { %v5592_v3 = vpop.f32.mrb[9].mxu1 }
 0x1a6   : > { %v3733_v63 = vpop.f32.mrb[12].mxu0 }
 0x1a7   : > { %1157 = vrot.lane.b32.xlu1 %v3721_v45, %s4763_s10  ;;  %1177 = vrot.lane.b32.xlu0 %v1106_v59, %s6770_s21  ;;  %v1116_v27 = vpop.f32.mrb[13].mxu0  ;;  %s4769_s21 = smov 345  }
 0x1a8   : > { %v5596_v45 = vpop.f32.mrb[10].mxu1 }
 0x1a9   : > { %v5598_v59 = vpop.f32.mrb[11].mxu1 }
 0x1aa   : > { %v3736_v28 = vpop.f32.mrb[14].mxu0 }
 0x1ab   : > { %1165 = vrot.lane.b32.xlu1 %v3724_v9, %s4765_s29  ;;  %1185 = vrot.lane.b32.xlu0 %v1116_v27, %s6771_s0  ;;  %v1126_v20 = vpop.f32.mrb[15].mxu0  ;;  %s4770_s0 = smov 361  }
 0x1ac   : > { %v5601_v9 = vpop.f32.mrb[12].mxu1 }
 0x1ad   : > { %v5603_v27 = vpop.f32.mrb[13].mxu1 }
 0x1af   : > { %1173 = vrot.lane.b32.xlu1 %v3727_v18, %s6772_s27  ;;  %1193 = vrot.lane.b32.xlu0 %v1126_v20, %s4768_s18  ;;  %s4771_s27 = smov 377  }
 0x1b0   : > { %v5606_v60 = vpop.f32.mrb[14].mxu1 }
 0x1b1   : > { %v5608_v18 = vpop.f32.mrb[15].mxu1 }
 0x1b3   : > { %1181 = vrot.lane.b32.xlu1 %v3730_v58, %s4769_s21  ;;  %v5615_v58 = vadd.s32 16, %v5075_v7 }
 0x1b5   : > { %6885 = vst [vmem:[#allocation32_spill] sm:$0xff] %v5615_v58  ;;  %v5630_v41 = vadd.s32 1, %v5615_v58  ;;  %vm6792_vm8 = vcmp.le.s32.totalorder %v5618_v52, %v5615_v58 }
 0x1b7   : > { %1189 = vrot.lane.b32.xlu1 %v3733_v63, %s4770_s0  ;;  %6888 = vst [vmem:[#allocation35_spill] sm:$0xff] %v5630_v41  ;;  %vm1266_vm6 = vcmp.eq.s32.totalorder %v5618_v52, %v5630_v41 }
 0x1bb   : > { %1197 = vrot.lane.b32.xlu1 %v3736_v28, %s4771_s27  ;;  %v5627_v28 = vadd.s32 1, %v5612_v57 }
 0x1bd   : > { %6887 = vst [vmem:[#allocation34_spill] sm:$0xff] %v5627_v28  ;;  %vm1265_vm5 = vcmp.eq.s32.totalorder %v5618_v52, %v5627_v28 }
 0x201   : > { %v1142_v20 = vpop.permute.xlu0 %1141 }
 0x202   : > { %v1200_v5 = vrot.slane %v1142_v20, 1 }
 0x205   : > { %v5623_v63 = vpop.permute.xlu0 %1137  ;;  %v1150_v34 = vpop.permute.xlu1 %1149 }
 0x206   : > { %v6782_v6 = vrot.slane %v5623_v63, 1  ;;  %v1202_v51 = vrot.slane %v1150_v34, 1 }
 0x208   : > { %v1230_v61 = vsel %vm1215_vm2, %v6782_v6, %v1200_v5  ;;  %v5656_v6 = vadd.s32 1, %v5636_v0 }
 0x209   : > { %v1935_v62 = vpop.permute.xlu0 %1934  ;;  %v1146_v44 = vpop.permute.xlu1 %1145  ;;  %v1280_v48 = vsel %vm1264_vm3, 0.0, %v1230_v61 }
 0x20a   : > { %v1201_v43 = vrot.slane %v1146_v44, 1  ;;  %v1296_v39 = vsel %vm1232_vm4, %v5623_v63, %v1280_v48  ;;  %6890 = vst [vmem:[#allocation37_spill] sm:$0xff] %v5656_v6  ;;  %vm1267_vm9 = vcmp.eq.s32.totalorder %v5618_v52, %v5656_v6  ;;  %v5741_v6 = vadd.s32 64, %v5075_v7 }
 0x20b   : > { %v5661_v40 = vadd.f32 %v5566_v17, %v1296_v39 }
 0x20c   : > { %v1229_v61 = vsel %vm1215_vm2, %v1200_v5, %v1201_v43  ;;  %v1228_v53 = vsel %vm1215_vm2, %v1201_v43, %v1202_v51  ;;  %6900 = vst [vmem:[#allocation47_spill] sm:$0xff] %v5741_v6  ;;  %v5777_v23 = vadd.s32 1, %v5741_v6 }
 0x20d   : > { %v1281_v48 = vsel %vm1265_vm5, 0.0, %v1229_v61  ;;  %v1933_v47 = vpop.permute.xlu1 %1932  ;;  %v1154_v50 = vpop.permute.xlu0 %1153  ;;  %1553 = vmax.xlane.f32.xlu0 %v5661_v40  ;;  %v1282_v39 = vsel %vm1266_vm6, 0.0, %v1228_v53 }
 0x20e   : > { %v1297_v17 = vsel %vm1233_vm7, %v1142_v20, %v1281_v48  ;;  %v1203_v5 = vrot.slane %v1154_v50, 1  ;;  %v1298_v43 = vsel %vm6792_vm8, %v1146_v44, %v1282_v39  ;;  %3900 = vmatmul.mubr.msk.f32.gmra.mrb[28].mxu1 %vm893_vm0, %v1933_v47  ;;  %v5716_v39 = vadd.s32 56, %v5075_v7  ;;  %6903 = vst [vmem:[#allocation50_spill] sm:$0xff] %v5777_v23 }
 0x20f   : > { %v5686_v61 = vadd.f32 %v5564_v16, %v1297_v17  ;;  %v5691_v53 = vadd.f32 %v5574_v29, %v1298_v43  ;;  %3902 = vmatprep.mubr.msk.f32.mxu1 %vm893_vm0, %v1935_v62  ;;  %v5707_v62 = vadd.s32 40, %v5075_v7 }
 0x210   : > { %v1227_v20 = vsel %vm1215_vm2, %v1202_v51, %v1203_v5  ;;  %v5710_v51 = vadd.s32 32, %v5075_v7  ;;  %6893 = vst [vmem:[#allocation40_spill] sm:$0xff] %v5716_v39  ;;  %vm6813_vm15 = vcmp.le.s32.totalorder %v5618_v52, %v5716_v39 }
 0x211   : > { %v1283_v44 = vsel %vm1267_vm9, 0.0, %v1227_v20  ;;  %v5699_v48 = vpop.permute.xlu1 %4451  ;;  %1555 = vmax.xlane.f32.xlu1 %v5686_v61  ;;  %1557 = vmax.xlane.f32.xlu0 %v5691_v53  ;;  %v1162_v47 = vpop.permute.xlu0 %1161  ;;  %v5722_v20 = vadd.s32 48, %v5075_v7  ;;  %vm6807_vm11 = vcmp.le.s32.totalorder %v5618_v52, %v5707_v62 }
 0x212   : > { %6891 = vst [vmem:[#allocation38_spill] sm:$0xff] %v5699_v48  ;;  %v1299_v16 = vsel %vm6802_vm10, %v1150_v34, %v1283_v44  ;;  %6892 = vst [vmem:[#allocation39_spill] sm:$0xff] %v5710_v51  ;;  %v5726_v34 = vadd.s32 1, %v5707_v62  ;;  %v5729_v44 = vadd.s32 1, %v5710_v51  ;;  %v1205_v58 = vrot.slane %v1162_v47, 1 }
 0x213   : > { %v5713_v29 = vadd.f32 %v5570_v25, %v1299_v16  ;;  %6894 = vst [vmem:[#allocation41_spill] sm:$0xff] %v5722_v20  ;;  %v5732_v25 = vadd.s32 1, %v5716_v39  ;;  %v5735_v16 = vadd.s32 72, %v5075_v7  ;;  %v5738_v41 = vadd.s32 1, %v5722_v20  ;;  %v4648_v39 = vld [vmem:[%s5114_s15 + $0x68] sm:$0xff] }
 0x214   : > { %6895 = vst [vmem:[#allocation42_spill] sm:$0xff] %v5726_v34  ;;  %6896 = vst [vmem:[#allocation43_spill] sm:$0xff] %v5729_v44  ;;  %vm1269_vm12 = vcmp.eq.s32.totalorder %v5618_v52, %v5726_v34  ;;  %vm6806_vm13 = vcmp.eq.s32.totalorder %v5618_v52, %v5729_v44  ;;  %vm6808_vm14 = vcmp.le.s32.totalorder %v5618_v52, %v5710_v51  ;;  %v5786_v34 = vadd.s32 80, %v5075_v7 }
 0x215   : > { %v1937_v17 = vpop.permute.xlu1 %1936  ;;  %1559 = vmax.xlane.f32.xlu0 %v5713_v29  ;;  %v5719_v43 = vpop.permute.xlu0 %1169  ;;  %6897 = vst [vmem:[#allocation44_spill] sm:$0xff] %v5732_v25  ;;  %6898 = vst [vmem:[#allocation45_spill] sm:$0xff] %v5735_v16  ;;  %vm6818_vm8 = vcmp.eq.s32.totalorder %v5618_v52, %v5732_v25  ;;  %v5758_v28 = vadd.s32 1, %v5735_v16  ;;  %vm6812_vm10 = vcmp.eq.s32.totalorder %v5618_v52, %v5738_v41 }
 0x216   : > { %3903 = vmatmul.mubr.msk.f32.gmra.mrb[30].mxu1 %vm893_vm0, %v1937_v17  ;;  %6899 = vst [vmem:[#allocation46_spill] sm:$0xff] %v5738_v41  ;;  %v1207_v31 = vrot.slane %v5719_v43, 1  ;;  %6904 = vst [vmem:[#allocation51_spill] sm:$0xff] %v5786_v34  ;;  %v5826_v41 = vadd.s32 1, %v5786_v34 }
 0x217   : > { %6901 = vst [vmem:[#allocation48_spill] sm:$0xff] %v5758_v28 }
 0x218   : > { %6907 = vst [vmem:[#allocation54_spill] sm:$0xff] %v5826_v41 }
 0x219   : > { %v1158_v0 = vpop.permute.xlu1 %1157  ;;  %v5751_v57 = vpop.permute.xlu0 %1177 }
 0x21a   : > { %v1204_v17 = vrot.slane %v1158_v0, 1 }
 0x21c   : > { %v1225_v49 = vsel %vm1215_vm2, %v1204_v17, %v1205_v58  ;;  %v1226_v48 = vsel %vm1215_vm2, %v1203_v5, %v1204_v17 }
 0x21d   : > { %v1285_v37 = vsel %vm1269_vm12, 0.0, %v1225_v49  ;;  %v1166_v13 = vpop.permute.xlu1 %1165  ;;  %v1284_v1 = vsel %vm6806_vm13, 0.0, %v1226_v48  ;;  %vm6814_vm13 = vcmp.le.s32.totalorder %v5618_v52, %v5722_v20 }
 0x21e   : > { %v1301_v5 = vsel %vm6807_vm11, %v1158_v0, %v1285_v37  ;;  %v1206_v17 = vrot.slane %v1166_v13, 1  ;;  %v1300_v49 = vsel %vm6808_vm14, %v1154_v50, %v1284_v1  ;;  %vm6815_vm11 = vcmp.eq.s32.totalorder %v5618_v52, %v5758_v28 }
 0x21f   : > { %v5789_v48 = vadd.f32 %v5578_v35, %v1301_v5  ;;  %v5792_v44 = vadd.f32 %v5580_v55, %v1300_v49  ;;  %v1209_v37 = vrot.slane %v5751_v57, 1  ;;  %v5804_v35 = vadd.s32 1, %v5766_v33  ;;  %v1186_v49 = vpop.permute.xlu0 %1185 }
 0x220   : > { %v1223_v1 = vsel %vm1215_vm2, %v1206_v17, %v1207_v31  ;;  %v1224_v50 = vsel %vm1215_vm2, %v1205_v58, %v1206_v17  ;;  %vm6817_vm14 = vcmp.eq.s32.totalorder %v5618_v52, %v5777_v23  ;;  %v5817_v58 = vadd.s32 96, %v5075_v7 }
 0x221   : > { %6905 = vst [vmem:[#allocation52_spill] sm:$0xff] %v5804_v35  ;;  %v1287_v55 = vsel %vm6818_vm8, 0.0, %v1223_v1  ;;  %v1174_v0 = vpop.permute.xlu1 %1173  ;;  %v1286_v5 = vsel %vm6812_vm10, 0.0, %v1224_v50  ;;  %1561 = vmax.xlane.f32.xlu1 %v5792_v44  ;;  %1563 = vmax.xlane.f32.xlu0 %v5789_v48  ;;  %vm6832_vm10 = vcmp.le.s32.totalorder %v5618_v52, %v5735_v16  ;;  %vm6828_vm8 = vcmp.le.s32.totalorder %v5618_v52, %v5786_v34  ;;  %v4647_v34 = vld [vmem:[%s5114_s15 + $0x60] sm:$0xff] }
 0x222   : > { %6906 = vst [vmem:[#allocation53_spill] sm:$0xff] %v5817_v58  ;;  %v1303_v17 = vsel %vm6813_vm15, %v1166_v13, %v1287_v55  ;;  %v1208_v1 = vrot.slane %v1174_v0, 1  ;;  %v1302_v50 = vsel %vm6814_vm13, %v1162_v47, %v1286_v5  ;;  %vm6821_vm15 = vcmp.le.s32.totalorder %v5618_v52, %v5741_v6 }
 0x223   : > { %v5829_v25 = vadd.f32 %v5584_v11, %v1303_v17  ;;  %v5832_v51 = vadd.f32 %v5586_v12, %v1302_v50  ;;  %v1211_v13 = vrot.slane %v1186_v49, 1  ;;  %vm6830_vm13 = vcmp.eq.s32.totalorder %v5618_v52, %v5804_v35  ;;  %v1194_v23 = vpop.permute.xlu0 %1193 }
 0x224   : > { %v1221_v55 = vsel %vm1215_vm2, %v1208_v1, %v1209_v37  ;;  %v1222_v47 = vsel %vm1215_vm2, %v1207_v31, %v1208_v1  ;;  %v5853_v17 = vadd.s32 104, %v5075_v7  ;;  %v5856_v31 = vadd.s32 1, %v5817_v58 }
 0x225   : > { %v1289_v11 = vsel %vm6815_vm11, 0.0, %v1221_v55  ;;  %v1182_v12 = vpop.permute.xlu1 %1181  ;;  %v1288_v5 = vsel %vm6817_vm14, 0.0, %v1222_v47  ;;  %1565 = vmax.xlane.f32.xlu1 %v5832_v51  ;;  %1567 = vmax.xlane.f32.xlu0 %v5829_v25  ;;  %vm6829_vm11 = vcmp.eq.s32.totalorder %v5618_v52, %v5826_v41  ;;  %v5865_v55 = vadd.s32 120, %v5075_v7 }
 0x226   : > { %6908 = vst [vmem:[#allocation55_spill] sm:$0xff] %v5853_v17  ;;  %6909 = vst [vmem:[#allocation56_spill] sm:$0xff] %v5856_v31  ;;  %v1210_v1 = vrot.slane %v1182_v12, 1  ;;  %v1304_v50 = vsel %vm6821_vm15, %v5719_v43, %v1288_v5  ;;  %vm6827_vm14 = vcmp.le.s32.totalorder %v5618_v52, %v5766_v33  ;;  %v1305_v43 = vsel %vm6832_vm10, %v1174_v0, %v1289_v11 }
 0x227   : > { %6910 = vst [vmem:[#allocation57_spill] sm:$0xff] %v5865_v55  ;;  %v5868_v47 = vadd.f32 %v5592_v3, %v1304_v50  ;;  %v5882_v3 = vadd.s32 112, %v5075_v7  ;;  %v5892_v11 = vadd.s32 1, %v5853_v17  ;;  %vm6831_vm15 = vcmp.eq.s32.totalorder %v5618_v52, %v5856_v31 }
 0x228   : > { %v1219_v5 = vsel %vm1215_vm2, %v1210_v1, %v1211_v13  ;;  %v1220_v6 = vsel %vm1215_vm2, %v1209_v37, %v1210_v1  ;;  %v1213_v1 = vrot.slane %v1194_v23, 1  ;;  %v5903_v35 = vadd.f32 %v5590_v8, %v1305_v43 }
 0x229   : > { %6911 = vst [vmem:[#allocation58_spill] sm:$0xff] %v5882_v3  ;;  %v1190_v50 = vpop.permute.xlu1 %1189  ;;  %v1291_v28 = vsel %vm6830_vm13, 0.0, %v1219_v5  ;;  %1569 = vmax.xlane.f32.xlu0 %v5868_v47  ;;  %v1290_v0 = vsel %vm6829_vm11, 0.0, %v1220_v6  ;;  %6912 = vst [vmem:[#allocation59_spill] sm:$0xff] %v5892_v11  ;;  %v5900_v5 = vadd.s32 1, %v5865_v55  ;;  %v5915_v33 = vadd.s32 1, %v5882_v3 }
 0x22a   : > { %v1212_v37 = vrot.slane %v1190_v50, 1  ;;  %v1307_v16 = vsel %vm6827_vm14, %v1182_v12, %v1291_v28  ;;  %v1306_v41 = vsel %vm6828_vm8, %v5751_v57, %v1290_v0  ;;  %vm1244_vm14 = vcmp.le.s32.totalorder %v5618_v52, %v5817_v58 }
 0x22b   : > { %6913 = vst [vmem:[#allocation60_spill] sm:$0xff] %v5900_v5  ;;  %v5906_v6 = vadd.f32 %v5596_v45, %v1307_v16  ;;  %6914 = vst [vmem:[#allocation61_spill] sm:$0xff] %v5915_v33  ;;  %vm6833_vm8 = vcmp.eq.s32.totalorder %v5618_v52, %v5892_v11  ;;  %vm1279_vm11 = vcmp.eq.s32.totalorder %v5618_v52, %v5900_v5 }
 0x22c   : > { %v1218_v20 = vsel %vm1215_vm2, %v1211_v13, %v1212_v37  ;;  %v1217_v57 = vsel %vm1215_vm2, %v1212_v37, %v1213_v1  ;;  %v5931_v16 = vadd.f32 %v5598_v59, %v1306_v41  ;;  %vm1247_vm13 = vcmp.le.s32.totalorder %v5618_v52, %v5865_v55 }
 0x22d   : > { %v1198_v28 = vpop.permute.xlu1 %1197  ;;  %1575 = vmax.xlane.f32.xlu1 %v5906_v6  ;;  %1571 = vmax.xlane.f32.xlu0 %v5903_v35  ;;  %v1292_v8 = vsel %vm6831_vm15, 0.0, %v1218_v20  ;;  %v6915_v13 = vrot.slane %v5623_v63, 1  ;;  %vm1278_vm15 = vcmp.eq.s32.totalorder %v5618_v52, %v5915_v33  ;;  %vm1245_vm10 = vcmp.le.s32.totalorder %v5618_v52, %v5853_v17 }
 0x22e   : > { %v1214_v45 = vrot.slane %v1198_v28, 1  ;;  %v1308_v20 = vsel %vm1244_vm14, %v1186_v49, %v1292_v8  ;;  %v1293_v41 = vsel %vm6833_vm8, 0.0, %v1217_v57  ;;  %vm1246_vm8 = vcmp.le.s32.totalorder %v5618_v52, %v5882_v3  ;;  %v4643_v57 = vld [vmem:[%s5114_s15 + $0x40] sm:$0xff] }
 0x22f   : > { %v5959_v49 = vadd.f32 %v5603_v27, %v1308_v20  ;;  %v4644_v20 = vld [vmem:[%s5114_s15 + $0x48] sm:$0xff] }
 0x230   : > { %v1231_v12 = vsel %vm1215_vm2, %v1214_v45, %v6915_v13  ;;  %v1216_v43 = vsel %vm1215_vm2, %v1213_v1, %v1214_v45  ;;  %v1309_v1 = vsel %vm1245_vm10, %v1190_v50, %v1293_v41  ;;  %v4455_v13 = vpack.i.bf16 %v4644_v20, %v4643_v57 }
 0x231   : > { %1573 = vmax.xlane.f32.xlu0 %v5931_v16  ;;  %v1295_v59 = vsel %vm1279_vm11, 0.0, %v1231_v12  ;;  %v1294_v37 = vsel %vm1278_vm15, 0.0, %v1216_v43  ;;  %v5978_v27 = vadd.f32 %v5601_v9, %v1309_v1  ;;  %v4645_v9 = vld [vmem:[%s5114_s15 + $0x50] sm:$0xff]  ;;  %v4646_v12 = vld [vmem:[%s5114_s15 + $0x58] sm:$0xff] }
 0x232   : > { %v1311_v63 = vsel %vm1247_vm13, %v1198_v28, %v1295_v59  ;;  %v4460_v43 = vpack.i.bf16 %v4646_v12, %v4645_v9 }
 0x233   : > { %v5962_v0 = vadd.f32 %v5606_v60, %v1311_v63  ;;  %v1310_v60 = vsel %vm1246_vm8, %v1194_v23, %v1294_v37 }
 0x234   : > { %v5982_v28 = vadd.f32 %v5608_v18, %v1310_v60 }
 0x235   : > { %1583 = vmax.xlane.f32.xlu1 %v5962_v0  ;;  %1577 = vmax.xlane.f32.xlu0 %v5959_v49 }
 0x239   : > { %1579 = vmax.xlane.f32.xlu1 %v5978_v27 }
 0x23d   : > { %1581 = vmax.xlane.f32.xlu1 %v5982_v28 }
 0x241   : > { %v5985_v50 = vpop.f32.mrb[16].mxu1 }
 0x242   : > { %v5987_v8 = vpop.f32.mrb[17].mxu1 }
 0x245   : > { %v5989_v45 = vpop.f32.mrb[18].mxu1 }
 0x246   : > { %v5993_v23 = vpop.f32.mrb[19].mxu1 }
 0x249   : > { %v5997_v41 = vpop.f32.mrb[20].mxu1 }
 0x24a   : > { %v6000_v18 = vpop.f32.mrb[21].mxu1 }
 0x24b   : > { %4456 = vrot.lane.b32.xlu0 %v4455_v13, %s4755_s6 }
 0x24d   : > { %v6003_v59 = vpop.f32.mrb[22].mxu1 }
 0x24e   : > { %4461 = vrot.lane.b32.xlu1 %v4460_v43, %s4755_s6  ;;  %v6005_v63 = vpop.f32.mrb[23].mxu1 }
 0x251   : > { %v6007_v37 = vpop.f32.mrb[24].mxu1 }
 0x252   : > { %v6009_v1 = vpop.f32.mrb[25].mxu1 }
 0x259   : > { %v6011_v60 = vpop.f32.mrb[26].mxu1 }
 0x25a   : > { %v6013_v57 = vpop.f32.mrb[27].mxu1 }
 0x29a   : > { %v1554_v20 = vpop.xlane.xlu0 %1553 }
 0x29b   : > { %v1585_v9 = vsub.f32 %v5661_v40, %v1554_v20 }
 0x29d   : > { %v1601_v13 = vmul.f32 1.442695, %v1585_v9 }
 0x29e   : > { %v1556_v12 = vpop.xlane.xlu1 %1555  ;;  %v1558_v3 = vpop.xlane.xlu0 %1557 }
 0x29f   : > { %4515 = vpow2.f32 %v1601_v13  ;;  %v1586_v43 = vsub.f32 %v5686_v61, %v1556_v12 }
 0x2a1   : > { %v1603_v55 = vmul.f32 1.442695, %v1586_v43 }
 0x2a2   : > { %v1560_v33 = vpop.xlane.xlu0 %1559 }
 0x2a3   : > { %4517 = vpow2.f32 %v1603_v55  ;;  %v1588_v5 = vsub.f32 %v5713_v29, %v1560_v33 }
 0x2a5   : > { %v1607_v17 = vmul.f32 1.442695, %v1588_v5 }
 0x2a7   : > { %4519 = vpow2.f32 %v1607_v17 }
 0x2a9   : > { %v6018_v11 = vpop.eup %4515 }
 0x2aa   : > { %1633 = vadd.xlane.f32.xlu1 %v6018_v11 }
 0x2ad   : > { %v6021_v58 = vpop.eup %4517 }
 0x2ae   : > { %v1562_v40 = vpop.xlane.xlu1 %1561  ;;  %1635 = vadd.xlane.f32.xlu0 %v6021_v58  ;;  %v1564_v20 = vpop.xlane.xlu0 %1563 }
 0x2af   : > { %v1590_v9 = vsub.f32 %v5789_v48, %v1564_v20 }
 0x2b1   : > { %v6025_v61 = vpop.eup %4519  ;;  %v1611_v13 = vmul.f32 1.442695, %v1590_v9 }
 0x2b2   : > { %v1566_v55 = vpop.xlane.xlu1 %1565  ;;  %1639 = vadd.xlane.f32.xlu1 %v6025_v61  ;;  %v1568_v33 = vpop.xlane.xlu0 %1567 }
 0x2b3   : > { %v1591_v29 = vsub.f32 %v5832_v51, %v1566_v55  ;;  %4521 = vpow2.f32 %v1611_v13  ;;  %v4465_v51 = vpack.i.bf16 %v4648_v39, %v4647_v34 }
 0x2b5   : > { %v1613_v17 = vmul.f32 1.442695, %v1591_v29  ;;  %v1589_v29 = vsub.f32 %v5792_v44, %v1562_v40 }
 0x2b6   : > { %v1570_v5 = vpop.xlane.xlu0 %1569 }
 0x2b7   : > { %4523 = vpow2.f32 %v1613_v17  ;;  %v1593_v12 = vsub.f32 %v5868_v47, %v1570_v5  ;;  %v1609_v34 = vmul.f32 1.442695, %v1589_v29  ;;  %v1592_v17 = vsub.f32 %v5829_v25, %v1568_v33 }
 0x2b8   : > { %v1851_v5 = vadd.f32 %v5532_v21, %v5222_v14 }
 0x2b9   : > { %v1617_v43 = vmul.f32 1.442695, %v1593_v12 }
 0x2ba   : > { %v1576_v31 = vpop.xlane.xlu1 %1575  ;;  %v1572_v39 = vpop.xlane.xlu0 %1571 }
 0x2bb   : > { %4525 = vpow2.f32 %v1617_v43  ;;  %v1596_v48 = vsub.f32 %v5906_v6, %v1576_v31  ;;  %v1587_v6 = vsub.f32 %v5691_v53, %v1558_v3  ;;  %v1615_v43 = vmul.f32 1.442695, %v1592_v17 }
 0x2bd   : > { %v1623_v20 = vmul.f32 1.442695, %v1596_v48  ;;  %v6031_v9 = vpop.eup %4521  ;;  %v1605_v55 = vmul.f32 1.442695, %v1587_v6  ;;  %v1594_v48 = vsub.f32 %v5903_v35, %v1572_v39 }
 0x2be   : > { %1643 = vadd.xlane.f32.xlu1 %v6031_v9  ;;  %v1574_v12 = vpop.xlane.xlu0 %1573 }
 0x2bf   : > { %4527 = vpow2.f32 %v1623_v20  ;;  %v1619_v53 = vmul.f32 1.442695, %v1594_v48  ;;  %v1595_v3 = vsub.f32 %v5931_v16, %v1574_v12 }
 0x2c0   : > { %4529 = vpow2.f32 %v1605_v55 }
 0x2c1   : > { %v6036_v13 = vpop.eup %4523  ;;  %4531 = vpow2.f32 %v1609_v34  ;;  %v1621_v14 = vmul.f32 1.442695, %v1595_v3 }
 0x2c2   : > { %1645 = vadd.xlane.f32.xlu1 %v6036_v13  ;;  %4533 = vpow2.f32 %v1615_v43  ;;  %v1578_v44 = vpop.xlane.xlu0 %1577 }
 0x2c3   : > { %4535 = vpow2.f32 %v1619_v53  ;;  %v1597_v33 = vsub.f32 %v5959_v49, %v1578_v44 }
 0x2c4   : > { %4466 = vrot.lane.b32.xlu0 %v4465_v51, %s4755_s6  ;;  %v1584_v51 = vpop.xlane.xlu1 %1583  ;;  %4537 = vpow2.f32 %v1621_v14 }
 0x2c5   : > { %v6040_v47 = vpop.eup %4525  ;;  %v1625_v16 = vmul.f32 1.442695, %v1597_v33  ;;  %v1600_v34 = vsub.f32 %v5962_v0, %v1584_v51  ;;  %v4650_v33 = vld [vmem:[%s5114_s15 + $0x78] sm:$0xff] }
 0x2c6   : > { %1649 = vadd.xlane.f32.xlu1 %v6040_v47 }
 0x2c7   : > { %4539 = vpow2.f32 %v1625_v16  ;;  %v1631_v17 = vmul.f32 1.442695, %v1600_v34  ;;  %v1850_v16 = vadd.f32 %v5532_v21, %v5105_v19  ;;  %v1853_v34 = vadd.f32 %v5532_v21, %v5236_v22 }
 0x2c8   : > { %v1580_v39 = vpop.xlane.xlu1 %1579  ;;  %v1855_v19 = vadd.f32 %v5532_v21, %v5249_v30  ;;  %v1858_v22 = vadd.f32 %v5532_v21, %v5268_v38  ;;  %v1860_v30 = vadd.f32 %v5532_v21, %v5282_v46  ;;  %v1863_v38 = vadd.f32 %v5532_v21, %v5311_v2 }
 0x2c9   : > { %v6043_v31 = vpop.eup %4527  ;;  %4541 = vpow2.f32 %v1631_v17  ;;  %v1854_v17 = vadd.f32 %v5532_v21, %v5240_v26  ;;  %v1859_v26 = vadd.f32 %v5532_v21, %v5277_v42  ;;  %v1864_v42 = vadd.f32 %v5532_v21, %v5316_v4 }
 0x2ca   : > { %1655 = vadd.xlane.f32.xlu1 %v6043_v31  ;;  %v6056_v20 = vpop.eup %4529  ;;  %v1865_v46 = vadd.f32 %v5532_v21, %v5328_v10 }
 0x2cb   : > { %v6062_v35 = vpop.eup %4531 }
 0x2cc   : > { %v6067_v55 = vpop.eup %4533  ;;  %v1582_v43 = vpop.xlane.xlu1 %1581 }
 0x2cd   : > { %v6073_v49 = vpop.eup %4535  ;;  %v1599_v53 = vsub.f32 %v5982_v28, %v1582_v43  ;;  %v4649_v28 = vld [vmem:[%s5114_s15 + $0x70] sm:$0xff]  ;;  %s6916_s15 = smov 329   ;;  %v6927_v43 = vld [vmem:[#allocation13_spill] sm:$0xff] }
 0x2ce   : > { %v6077_v12 = vpop.eup %4537  ;;  %v4470_v51 = vpack.i.bf16 %v4650_v33, %v4649_v28  ;;  %v6932_v33 = vld [vmem:[#allocation18_spill] sm:$0xff] }
 0x2cf   : > { %v1629_v0 = vmul.f32 1.442695, %v1599_v53  ;;  %v6930_v53 = vld [vmem:[#allocation19_spill] sm:$0xff] }
 0x2d1   : > { %v6081_v3 = vpop.eup %4539 }
 0x2d3   : > { %v6084_v44 = vpop.eup %4541 }
 0x2db   : > { %2325 = vrot.lane.b32.xlu1 %v1851_v5, %s4755_s6  ;;  %v1598_v5 = vsub.f32 %v5978_v27, %v1580_v39  ;;  %v1852_v39 = vadd.f32 %v5532_v21, %v5228_v15  ;;  %v1857_v15 = vadd.f32 %v5532_v21, %v5263_v36  ;;  %v1862_v36 = vadd.f32 %v5532_v21, %v5298_v56  ;;  %v4457_v56 = vpop.permute.xlu0 %4456 }
 0x2dd   : > { %v1627_v48 = vmul.f32 1.442695, %v1598_v5  ;;  %v1856_v5 = vadd.f32 %v5532_v21, %v5256_v32  ;;  %v1861_v32 = vadd.f32 %v5532_v21, %v5293_v54  ;;  %v4462_v54 = vpop.permute.xlu1 %4461 }
 0x2df   : > { %4543 = vpow2.f32 %v1627_v48 }
 0x2e0   : > { %4545 = vpow2.f32 %v1629_v0 }
 0x2e1   : > { %v6054_v40 = vpop.f32.mrb[28].mxu1 }
 0x2e2   : > { %v6058_v25 = vpop.f32.mrb[29].mxu1 }
 0x2e3   : > { %1637 = vadd.xlane.f32.xlu0 %v6056_v20 }
 0x2e7   : > { %1641 = vadd.xlane.f32.xlu0 %v6062_v35 }
 0x2e9   : > { %v6065_v6 = vpop.f32.mrb[30].mxu1  ;;  %v6087_v27 = vpop.eup %4543 }
 0x2ea   : > { %v6069_v29 = vpop.f32.mrb[31].mxu1  ;;  %v6090_v14 = vpop.eup %4545 }
 0x2eb   : > { %1647 = vadd.xlane.f32.xlu0 %v6067_v55 }
 0x2ef   : > { %1651 = vadd.xlane.f32.xlu0 %v6073_v49 }
 0x2f3   : > { %1653 = vadd.xlane.f32.xlu0 %v6077_v12 }
 0x2f7   : > { %1657 = vadd.xlane.f32.xlu0 %v6081_v3 }
 0x2ff   : > { %1663 = vadd.xlane.f32.xlu1 %v6084_v44 }
 0x303   : > { %1659 = vadd.xlane.f32.xlu1 %v6087_v27 }
 0x307   : > { %1661 = vadd.xlane.f32.xlu1 %v6090_v14 }
 0x30d   : > { %4471 = vrot.lane.b32.xlu0 %v4470_v51, %s4755_s6  ;;  %v6933_v51 = vld [vmem:[#allocation17_spill] sm:$0xff] }
 0x311   : > { %2323 = vrot.lane.b32.xlu0 %v1850_v16, %s4755_s6  ;;  %v6934_v16 = vpack.i.bf16 %v6932_v33, %v6933_v51 }
 0x315   : > { %2327 = vrot.lane.b32.xlu0 %v1852_v39, %s4755_s6  ;;  %v4459_v39 = vunpack.i.h.bf16 %v4457_v56 }
 0x318   : > { %2329 = vrot.lane.b32.xlu1 %v1853_v34, %s4755_s6  ;;  %v4458_v34 = vunpack.i.l.bf16 %v4457_v56 }
 0x319   : > { %2331 = vrot.lane.b32.xlu0 %v1854_v17, %s4755_s6  ;;  %v6935_v17 = vld [vmem:[#allocation22_spill] sm:$0xff] }
 0x31c   : > { %2333 = vrot.lane.b32.xlu1 %v1855_v19, %s4755_s6  ;;  %v6936_v19 = vld [vmem:[#allocation21_spill] sm:$0xff] }
 0x31d   : > { %2335 = vrot.lane.b32.xlu0 %v1856_v5, %s4755_s6  ;;  %v6937_v5 = vpack.i.bf16 %v6935_v17, %v6936_v19 }
 0x320   : > { %2337 = vrot.lane.b32.xlu1 %v1857_v15, %s4755_s6  ;;  %v4217_v15 = vpack.c.bf16 %v4459_v39, %v4458_v34 }
 0x321   : > { %2339 = vrot.lane.b32.xlu0 %v1858_v22, %s4755_s6  ;;  %v4464_v22 = vunpack.i.h.bf16 %v4462_v54 }
 0x324   : > { %2341 = vrot.lane.b32.xlu1 %v1859_v26, %s4755_s6  ;;  %v4463_v26 = vunpack.i.l.bf16 %v4462_v54 }
 0x325   : > { %2343 = vrot.lane.b32.xlu0 %v1860_v30, %s4755_s6 }
 0x328   : > { %2345 = vrot.lane.b32.xlu1 %v1861_v32, %s4755_s6  ;;  %v4223_v32 = vpack.c.bf16 %v4464_v22, %v4463_v26 }
 0x329   : > { %2347 = vrot.lane.b32.xlu0 %v1862_v36, %s4755_s6 }
 0x32c   : > { %2349 = vrot.lane.b32.xlu1 %v1863_v38, %s4755_s6 }
 0x32d   : > { %2351 = vrot.lane.b32.xlu0 %v1864_v42, %s4755_s6 }
 0x330   : > { %2353 = vrot.lane.b32.xlu1 %v1865_v46, %s4755_s6 }
 0x331   : > { %2181 = vrot.lane.b32.xlu0 %v5987_v8, %s4757_s12  ;;  %v4443_v8 = vunpack.i.l.bf16 %v5534_v24  ;;  %s6918_s12 = smov 353  }
 0x334   : > { %2185 = vrot.lane.b32.xlu1 %v5985_v50, %s4756_s23  ;;  %v4444_v50 = vunpack.i.h.bf16 %v5534_v24  ;;  %s6917_s23 = smov 337  }
 0x335   : > { %2189 = vrot.lane.b32.xlu0 %v5993_v23, %s4759_s25 }
 0x337   : > { %v1634_v2 = vpop.xlane.xlu1 %1633 }
 0x338   : > { %4547 = vrcp.f32 %v1634_v2  ;;  %2193 = vrot.lane.b32.xlu1 %v5989_v45, %s4758_s16  ;;  %s6644_s16 = scalar_lea.vmem [#allocation6], %s5057_s11  ;;  %s6996_s11 = sld [smem:[#allocation8_spill]] (%p4945_p5) }
 0x339   : > { %2197 = vrot.lane.b32.xlu0 %v6000_v18, %s4760_s17  ;;  %v6921_v18 = vld [vmem:[#allocation30_spill] sm:$0xff] }
 0x33b   : > { %v1636_v4 = vpop.xlane.xlu0 %1635 }
 0x33c   : > { %4549 = vrcp.f32 %v1636_v4  ;;  %2201 = vrot.lane.b32.xlu1 %v5997_v41, %s4763_s10  ;;  %v4199_v41 = vpack.c.bf16 %v4444_v50, %v4443_v8 }
 0x33d   : > { %2205 = vrot.lane.b32.xlu0 %v6005_v63, %s4761_s19  ;;  %v4448_v63 = vunpack.i.l.bf16 %v6921_v18 }
 0x33f   : > { %v1640_v30 = vpop.xlane.xlu1 %1639  ;;  %v4467_v38 = vpop.permute.xlu0 %4466 }
 0x340   : > { %2209 = vrot.lane.b32.xlu1 %v6003_v59, %s4765_s29  ;;  %v4449_v59 = vunpack.i.h.bf16 %v6921_v18  ;;  %v4469_v42 = vunpack.i.h.bf16 %v4467_v38  ;;  %v4468_v46 = vunpack.i.l.bf16 %v4467_v38  ;;  %4551 = vrcp.f32 %v1640_v30 }
 0x341   : > { %2213 = vrot.lane.b32.xlu0 %v6009_v1, %s4762_s20  ;;  %v6923_v1 = vld [vmem:[#allocation15_spill] sm:$0xff]  ;;  %s6997_s20 = sld [smem:[#allocation65_spill]] (%p4945_p5) }
 0x342   : > { %v4548_v10 = vpop.eup %4547  ;;  %v4229_v4 = vpack.c.bf16 %v4469_v42, %v4468_v46 }
 0x343   : > { %v1681_v21 = vmul.f32 %v4548_v10, %v6018_v11  ;;  %v6919_v11 = vld [vmem:[#allocation29_spill] sm:$0xff] }
 0x344   : > { %2217 = vrot.lane.b32.xlu1 %v6007_v37, %s6916_s15  ;;  %v6922_v37 = vld [vmem:[#allocation16_spill] sm:$0xff] }
 0x345   : > { %3825 = vmatprep.mubr.f32.mxu0 %v1681_v21  ;;  %2221 = vrot.lane.b32.xlu0 %v6013_v57, %s6917_s23  ;;  %v6925_v57 = vld [vmem:[#allocation38_spill] sm:$0xff] }
 0x346   : > { %v4550_v45 = vpop.eup %4549 }
 0x347   : > { %v1682_v23 = vmul.f32 %v4550_v45, %v6021_v58  ;;  %v4205_v58 = vpack.c.bf16 %v4449_v59, %v4448_v63 }
 0x348   : > { %2225 = vrot.lane.b32.xlu1 %v6011_v60, %s4769_s21  ;;  %v6924_v60 = vpack.i.bf16 %v6922_v37, %v6923_v1 }
 0x349   : > { %3826 = vmatmul.mubr.f32.vlgmr.msra.gmra.mrb[16].mxu0 %v1682_v23  ;;  %2229 = vrot.lane.b32.xlu0 %v6058_v25, %s6918_s12  ;;  %v4453_v25 = vunpack.i.l.bf16 %v6925_v57 }
 0x34a   : > { %4198 = vmatpush3.bf16.xpose.msk.msra.mxu0 %vm5061_vm1, %v6919_v11  ;;  %v4552_v50 = vpop.eup %4551 }
 0x34b   : > { %4201 = vmatprep.subr.msk.bf16.mxu0 %vm5061_vm1, %v4199_v41  ;;  %v1644_v36 = vpop.xlane.xlu1 %1643  ;;  %v1684_v18 = vmul.f32 %v4552_v50, %v6025_v61 }
 0x34c   : > { %2233 = vrot.lane.b32.xlu1 %v6054_v40, %s4770_s0  ;;  %v4454_v40 = vunpack.i.h.bf16 %v6925_v57 }
 0x34d   : > { %2237 = vrot.lane.b32.xlu0 %v6069_v29, %s4768_s18  ;;  %v6926_v29 = vld [vmem:[#allocation14_spill] sm:$0xff] }
 0x34e   : > { %v6928_v48 = vpack.i.bf16 %v6926_v29, %v6927_v43  ;;  %v4211_v28 = vpack.c.bf16 %v4454_v40, %v4453_v25 }
 0x34f   : > { %v1646_v56 = vpop.xlane.xlu1 %1645 }
 0x350   : > { %2241 = vrot.lane.b32.xlu1 %v6065_v6, %s4771_s27  ;;  %v6929_v6 = vld [vmem:[#allocation20_spill] sm:$0xff] }
 0x351   : > { %4481 = vrot.lane.b32.xlu0 %v6924_v60, %s4755_s6  ;;  %v6931_v0 = vpack.i.bf16 %v6929_v6, %v6930_v53 }
 0x352   : > { %4204 = vmatpush3.bf16.xpose.msk.msra.mxu0 %vm5061_vm1, %v4199_v41 }
 0x353   : > { %4207 = vmatprep.subr.msk.bf16.mxu0 %vm5061_vm1, %v4205_v58  ;;  %v1650_v10 = vpop.xlane.xlu1 %1649 }
 0x354   : > { %4476 = vrot.lane.b32.xlu1 %v6928_v48, %s4755_s6 }
 0x355   : > { %4491 = vrot.lane.b32.xlu0 %v6931_v0, %s4755_s6 }
 0x357   : > { %v1656_v11 = vpop.xlane.xlu1 %1655 }
 0x358   : > { %4486 = vrot.lane.b32.xlu1 %v6934_v16, %s4755_s6 }
 0x35a   : > { %4210 = vmatpush3.bf16.xpose.msk.msra.mxu0 %vm5061_vm1, %v4205_v58 }
 0x35b   : > { %4213 = vmatprep.subr.msk.bf16.mxu0 %vm5061_vm1, %v4211_v28 }
 0x35c   : > { %4496 = vrot.lane.b32.xlu1 %v6937_v5, %s4755_s6 }
 0x362   : > { %4216 = vmatpush3.bf16.xpose.msk.msra.mxu0 %vm5061_vm1, %v4211_v28 }
 0x363   : > { %4219 = vmatprep.subr.msk.bf16.mxu0 %vm5061_vm1, %v4217_v15 }
 0x36a   : > { %4222 = vmatpush3.bf16.xpose.msk.msra.mxu0 %vm5061_vm1, %v4217_v15 }
 0x36b   : > { %4225 = vmatprep.subr.msk.bf16.mxu0 %vm5061_vm1, %v4223_v32 }
 0x370   : > { %v1638_v2 = vpop.xlane.xlu0 %1637 }
 0x371   : > { %4553 = vrcp.f32 %v1638_v2 }
 0x372   : > { %4228 = vmatpush3.bf16.xpose.msk.msra.mxu0 %vm5061_vm1, %v4223_v32  ;;  %4555 = vrcp.f32 %v1644_v36 }
 0x373   : > { %4231 = vmatprep.subr.msk.bf16.mxu0 %vm5061_vm1, %v4229_v4  ;;  %4557 = vrcp.f32 %v1646_v56 }
 0x374   : > { %v1642_v54 = vpop.xlane.xlu0 %1641 }
 0x375   : > { %4559 = vrcp.f32 %v1642_v54 }
 0x376   : > { %4561 = vrcp.f32 %v1650_v10 }
 0x378   : > { %v1648_v21 = vpop.xlane.xlu0 %1647 }
 0x379   : > { %4563 = vrcp.f32 %v1648_v21 }
 0x37a   : > { %4234 = vmatpush3.bf16.xpose.msk.msra.mxu0 %vm5061_vm1, %v4229_v4 }
 0x37b   : > { %v4554_v8 = vpop.eup %4553 }
 0x37c   : > { %v1652_v45 = vpop.xlane.xlu0 %1651  ;;  %v1683_v23 = vmul.f32 %v4554_v8, %v6056_v20  ;;  %v4556_v41 = vpop.eup %4555 }
 0x37d   : > { %4565 = vrcp.f32 %v1652_v45  ;;  %v4558_v59 = vpop.eup %4557  ;;  %v1686_v1 = vmul.f32 %v4556_v41, %v6031_v9  ;;  %v2326_v9 = vpop.permute.xlu1 %2325 }
 0x37e   : > { %3828 = vmatprep.mubr.f32.mxu0 %v1683_v23  ;;  %4567 = vrcp.f32 %v1656_v11  ;;  %v1687_v20 = vmul.f32 %v4558_v59, %v6036_v13 }
 0x37f   : > { %v4560_v63 = vpop.eup %4559  ;;  %3829 = vmatmul.mubr.f32.gmra.mrb[18].mxu0 %v1684_v18 }
 0x380   : > { %v1654_v58 = vpop.xlane.xlu0 %1653  ;;  %v1685_v37 = vmul.f32 %v4560_v63, %v6062_v35  ;;  %v4562_v60 = vpop.eup %4561 }
 0x381   : > { %4569 = vrcp.f32 %v1654_v58  ;;  %v1689_v25 = vmul.f32 %v4562_v60, %v6040_v47 }
 0x382   : > { %3831 = vmatprep.mubr.f32.mxu0 %v1685_v37 }
 0x383   : > { %v4564_v57 = vpop.eup %4563  ;;  %3832 = vmatmul.mubr.f32.gmra.mrb[20].mxu0 %v1686_v1  ;;  %v6969_v1 = vld [vmem:[#allocation52_spill] sm:$0xff] }
 0x384   : > { %3834 = vmatprep.mubr.f32.mxu0 %v1687_v20  ;;  %v1658_v40 = vpop.xlane.xlu0 %1657  ;;  %v1688_v61 = vmul.f32 %v4564_v57, %v6067_v55 }
 0x385   : > { %4571 = vrcp.f32 %v1658_v40 }
 0x387   : > { %v4566_v29 = vpop.eup %4565  ;;  %3835 = vmatmul.mubr.f32.gmra.mrb[22].mxu0 %v1688_v61 }
 0x388   : > { %3837 = vmatprep.mubr.f32.mxu0 %v1689_v25  ;;  %v4472_v35 = vpop.permute.xlu0 %4471  ;;  %v1690_v43 = vmul.f32 %v4566_v29, %v6073_v49  ;;  %v4568_v53 = vpop.eup %4567 }
 0x389   : > { %v4474_v48 = vunpack.i.h.bf16 %v4472_v35  ;;  %v4473_v6 = vunpack.i.l.bf16 %v4472_v35  ;;  %v1692_v51 = vmul.f32 %v4568_v53, %v6043_v31  ;;  %v6943_v53 = vld [vmem:[#allocation36_spill] sm:$0xff] }
 0x38b   : > { %v4570_v13 = vpop.eup %4569  ;;  %v4235_v0 = vpack.c.bf16 %v4474_v48, %v4473_v6  ;;  %3838 = vmatmul.mubr.f32.gmra.mrb[24].mxu0 %v1690_v43  ;;  %v6975_v43 = vld [vmem:[#allocation51_spill] sm:$0xff] }
 0x38c   : > { %v2324_v28 = vpop.permute.xlu0 %2323  ;;  %v1691_v33 = vmul.f32 %v4570_v13, %v6077_v12  ;;  %v1664_v55 = vpop.xlane.xlu1 %1663 }
 0x38d   : > { %4237 = vmatprep.subr.msk.bf16.mxu0 %vm5061_vm1, %v4235_v0 }
 0x38e   : > { %3840 = vmatprep.mubr.f32.mxu0 %v1691_v33  ;;  %4240 = vmatpush3.bf16.xpose.msk.msra.mxu0 %vm5061_vm1, %v4235_v0  ;;  %vm6944_vm1 = vcmp.le.s32.totalorder %v5618_v52, %v6943_v53  ;;  %v6945_v0 = vld [vmem:[#allocation32_spill] sm:$0xff] }
 0x38f   : > { %v4572_v47 = vpop.eup %4571  ;;  %3841 = vmatmul.mubr.f32.gmra.mrb[26].mxu0 %v1692_v51 }
 0x390   : > { %v2328_v49 = vpop.permute.xlu0 %2327  ;;  %v1693_v16 = vmul.f32 %v4572_v47, %v6081_v3  ;;  %v1660_v39 = vpop.xlane.xlu1 %1659 }
 0x391   : > { %4573 = vrcp.f32 %v1660_v39  ;;  %v6948_v39 = vld [vmem:[#allocation43_spill] sm:$0xff] }
 0x392   : > { %3843 = vmatprep.mubr.f32.mxu0 %v1693_v16  ;;  %4575 = vrcp.f32 %v1664_v55 }
 0x394   : > { %v2332_v34 = vpop.permute.xlu0 %2331  ;;  %v1662_v12 = vpop.xlane.xlu1 %1661 }
 0x395   : > { %4577 = vrcp.f32 %v1662_v12 }
 0x398   : > { %v2336_v31 = vpop.permute.xlu0 %2335  ;;  %v2330_v17 = vpop.permute.xlu1 %2329 }
 0x39b   : > { %v4574_v19 = vpop.eup %4573 }
 0x39c   : > { %v2340_v5 = vpop.permute.xlu0 %2339  ;;  %v2334_v15 = vpop.permute.xlu1 %2333  ;;  %v1694_v24 = vmul.f32 %v4574_v19, %v6087_v27  ;;  %v6951_v19 = vld [vmem:[#allocation39_spill] sm:$0xff] }
 0x39d   : > { %v4576_v22 = vpop.eup %4575 }
 0x39e   : > { %3844 = vmatmul.mubr.f32.gmra.mrb[28].mxu0 %v1694_v24  ;;  %v1696_v36 = vmul.f32 %v4576_v22, %v6084_v44 }
 0x39f   : > { %v4578_v26 = vpop.eup %4577 }
 0x3a0   : > { %v2344_v30 = vpop.permute.xlu0 %2343  ;;  %v2338_v32 = vpop.permute.xlu1 %2337  ;;  %v1695_v3 = vmul.f32 %v4578_v26, %v6090_v14  ;;  %v6953_v26 = vld [vmem:[#allocation44_spill] sm:$0xff] }
 0x3a2   : > { %3846 = vmatprep.mubr.f32.mxu0 %v1695_v3 }
 0x3a3   : > { %3847 = vmatmul.mubr.f32.gmra.mrb[30].mxu0 %v1696_v36 }
 0x3a4   : > { %v2348_v38 = vpop.permute.xlu0 %2347  ;;  %v2342_v42 = vpop.permute.xlu1 %2341  ;;  %3937 = vmatprep.mubr.msk.f32.mxu0 %vm893_vm0, %v2324_v28 }
 0x3a7   : > { %3938 = vmatmul.mubr.msk.f32.vlgmr.msra.gmra.mrb[32].mxu0 %vm893_vm0, %v2326_v9 }
 0x3a8   : > { %v2352_v46 = vpop.permute.xlu0 %2351  ;;  %v2346_v56 = vpop.permute.xlu1 %2345  ;;  %3940 = vmatprep.mubr.msk.f32.mxu0 %vm893_vm0, %v2328_v49 }
 0x3ab   : > { %3941 = vmatmul.mubr.msk.f32.gmra.mrb[34].mxu0 %vm893_vm0, %v2330_v17 }
 0x3ac   : > { %v6250_v27 = vpop.permute.xlu0 %2181  ;;  %v2350_v2 = vpop.permute.xlu1 %2349  ;;  %3943 = vmatprep.mubr.msk.f32.mxu0 %vm893_vm0, %v2332_v34 }
 0x3ad   : > { %v2243_v10 = vrot.slane %v6250_v27, 1 }
 0x3af   : > { %3944 = vmatmul.mubr.msk.f32.gmra.mrb[36].mxu0 %vm893_vm0, %v2334_v15 }
 0x3b0   : > { %v2190_v44 = vpop.permute.xlu0 %2189  ;;  %v2354_v14 = vpop.permute.xlu1 %2353  ;;  %3946 = vmatprep.mubr.msk.f32.mxu0 %vm893_vm0, %v2336_v31 }
 0x3b1   : > { %v2245_v21 = vrot.slane %v2190_v44, 1 }
 0x3b3   : > { %3947 = vmatmul.mubr.msk.f32.gmra.mrb[38].mxu0 %vm893_vm0, %v2338_v32 }
 0x3b4   : > { %v2198_v4 = vpop.permute.xlu0 %2197  ;;  %v2186_v54 = vpop.permute.xlu1 %2185  ;;  %3949 = vmatprep.mubr.msk.f32.mxu0 %vm893_vm0, %v2340_v5 }
 0x3b5   : > { %v2244_v50 = vrot.slane %v2186_v54, 1  ;;  %v2247_v58 = vrot.slane %v2198_v4, 1 }
 0x3b7   : > { %3950 = vmatmul.mubr.msk.f32.gmra.mrb[40].mxu0 %vm893_vm0, %v2342_v42  ;;  %v2272_v45 = vsel %vm1215_vm2, %v2244_v50, %v2245_v21  ;;  %v2273_v23 = vsel %vm1215_vm2, %v2243_v10, %v2244_v50  ;;  %v6963_v50 = vld [vmem:[#allocation50_spill] sm:$0xff] }
 0x3b8   : > { %v2206_v8 = vpop.permute.xlu0 %2205  ;;  %v2194_v41 = vpop.permute.xlu1 %2193  ;;  %3952 = vmatprep.mubr.msk.f32.mxu0 %vm893_vm0, %v2344_v30  ;;  %v2276_v18 = vsel %vm1265_vm5, 0.0, %v2272_v45  ;;  %v2275_v63 = vsel %vm1264_vm3, 0.0, %v2273_v23  ;;  %vm6946_vm3 = vcmp.le.s32.totalorder %v5618_v52, %v6945_v0  ;;  %vm6950_vm5 = vcmp.le.s32.totalorder %v5618_v52, %v5707_v62  ;;  %v6955_v30 = vld [vmem:[#allocation46_spill] sm:$0xff] }
 0x3b9   : > { %v2246_v37 = vrot.slane %v2194_v41, 1  ;;  %v6275_v60 = vsel %vm1233_vm7, %v2186_v54, %v2276_v18  ;;  %v6281_v20 = vsel %vm1232_vm4, %v6250_v27, %v2275_v63  ;;  %v2249_v48 = vrot.slane %v2206_v8, 1  ;;  %v6961_v54 = vld [vmem:[#allocation48_spill] sm:$0xff]  ;;  %v6967_v18 = vld [vmem:[#allocation47_spill] sm:$0xff] }
 0x3ba   : > { %vm6949_vm4 = vcmp.eq.s32.totalorder %v5618_v52, %v6948_v39  ;;  %vm6954_vm7 = vcmp.eq.s32.totalorder %v5618_v52, %v6953_v26 }
 0x3bb   : > { %3953 = vmatmul.mubr.msk.f32.gmra.mrb[42].mxu0 %vm893_vm0, %v2346_v56  ;;  %v2270_v40 = vsel %vm1215_vm2, %v2246_v37, %v2247_v58  ;;  %v2271_v61 = vsel %vm1215_vm2, %v2245_v21, %v2246_v37 }
 0x3bc   : > { %v2214_v57 = vpop.permute.xlu0 %2213  ;;  %v2202_v25 = vpop.permute.xlu1 %2201  ;;  %3955 = vmatprep.mubr.msk.f32.mxu0 %vm893_vm0, %v2348_v38  ;;  %v2278_v35 = vsel %vm1267_vm9, 0.0, %v2270_v40  ;;  %v2277_v9 = vsel %vm1266_vm6, 0.0, %v2271_v61  ;;  %vm6952_vm6 = vcmp.le.s32.totalorder %v5618_v52, %v6951_v19  ;;  %vm6956_vm9 = vcmp.eq.s32.totalorder %v5618_v52, %v6955_v30  ;;  %v6957_v38 = vld [vmem:[#allocation40_spill] sm:$0xff]  ;;  %v6971_v61 = vld [vmem:[#allocation54_spill] sm:$0xff] }
 0x3bd   : > { %v2248_v6 = vrot.slane %v2202_v25, 1  ;;  %v6298_v13 = vsel %vm6944_vm1, %v2194_v41, %v2278_v35  ;;  %v6303_v28 = vsel %vm6946_vm3, %v2190_v44, %v2277_v9  ;;  %v2251_v12 = vrot.slane %v2214_v57, 1 }
 0x3be   : > { %vm6962_vm3 = vcmp.eq.s32.totalorder %v5618_v52, %v6961_v54 }
 0x3bf   : > { %3956 = vmatmul.mubr.msk.f32.gmra.mrb[44].mxu0 %vm893_vm0, %v2350_v2  ;;  %v2268_v33 = vsel %vm1215_vm2, %v2248_v6, %v2249_v48  ;;  %v2269_v55 = vsel %vm1215_vm2, %v2247_v58, %v2248_v6  ;;  %v6977_v6 = vld [vmem:[#allocation56_spill] sm:$0xff] }
 0x3c0   : > { %v2210_v51 = vpop.permute.xlu1 %2209  ;;  %v2222_v47 = vpop.permute.xlu0 %2221  ;;  %3958 = vmatprep.mubr.msk.f32.mxu0 %vm893_vm0, %v2352_v46  ;;  %v2280_v16 = vsel %vm1269_vm12, 0.0, %v2268_v33  ;;  %v2279_v34 = vsel %vm6949_vm4, 0.0, %v2269_v55  ;;  %vm6958_vm12 = vcmp.le.s32.totalorder %v5618_v52, %v6957_v38  ;;  %v6959_v46 = vld [vmem:[#allocation41_spill] sm:$0xff]  ;;  %vm6964_vm4 = vcmp.eq.s32.totalorder %v5618_v52, %v6963_v50 }
 0x3c1   : > { %v2250_v31 = vrot.slane %v2210_v51, 1  ;;  %v6320_v17 = vsel %vm6950_vm5, %v2202_v25, %v2280_v16  ;;  %v6325_v5 = vsel %vm6952_vm6, %v2198_v4, %v2279_v34  ;;  %v2253_v3 = vrot.slane %v2222_v47, 1 }
 0x3c2   : > { %vm6960_vm1 = vcmp.le.s32.totalorder %v5618_v52, %v6959_v46  ;;  %vm6968_vm6 = vcmp.le.s32.totalorder %v5618_v52, %v6967_v18 }
 0x3c3   : > { %3959 = vmatmul.mubr.msk.f32.gmra.mrb[46].mxu0 %vm893_vm0, %v2354_v14  ;;  %v2266_v15 = vsel %vm1215_vm2, %v2250_v31, %v2251_v12  ;;  %v2267_v24 = vsel %vm1215_vm2, %v2249_v48, %v2250_v31 }
 0x3c4   : > { %v2218_v22 = vpop.permute.xlu1 %2217  ;;  %v2282_v62 = vsel %vm6954_vm7, 0.0, %v2266_v15  ;;  %v2281_v32 = vsel %vm6956_vm9, 0.0, %v2267_v24  ;;  %v2230_v2 = vpop.permute.xlu0 %2229  ;;  %vm6970_vm7 = vcmp.eq.s32.totalorder %v5618_v52, %v6969_v1  ;;  %vm6972_vm9 = vcmp.eq.s32.totalorder %v5618_v52, %v6971_v61 }
 0x3c5   : > { %v2252_v36 = vrot.slane %v2218_v22, 1  ;;  %v6341_v42 = vsel %vm6958_vm12, %v2210_v51, %v2282_v62  ;;  %v6346_v56 = vsel %vm6960_vm1, %v2206_v8, %v2281_v32  ;;  %v2255_v23 = vrot.slane %v2230_v2, 1  ;;  %v6965_v8 = vld [vmem:[#allocation45_spill] sm:$0xff] }
 0x3c6   : > { %vm6966_vm5 = vcmp.le.s32.totalorder %v5618_v52, %v6965_v8  ;;  %vm6976_vm1 = vcmp.le.s32.totalorder %v5618_v52, %v6975_v43 }
 0x3c7   : > { %v2264_v44 = vsel %vm1215_vm2, %v2252_v36, %v2253_v3  ;;  %v2265_v14 = vsel %vm1215_vm2, %v2251_v12, %v2252_v36 }
 0x3c8   : > { %v2226_v4 = vpop.permute.xlu1 %2225  ;;  %v2284_v21 = vsel %vm6962_vm3, 0.0, %v2264_v44  ;;  %v2283_v45 = vsel %vm6964_vm4, 0.0, %v2265_v14  ;;  %vm6978_vm3 = vcmp.eq.s32.totalorder %v5618_v52, %v6977_v6  ;;  %v6403_v55 = vpop.permute.xlu0 %2237 }
 0x3c9   : > { %v2254_v41 = vrot.slane %v2226_v4, 1  ;;  %v6361_v11 = vsel %vm6966_vm5, %v2218_v22, %v2284_v21  ;;  %v6366_v59 = vsel %vm6968_vm6, %v2214_v57, %v2283_v45  ;;  %v6973_v57 = vld [vmem:[#allocation49_spill] sm:$0xff] }
 0x3ca   : > { %vm6974_vm12 = vcmp.le.s32.totalorder %v5618_v52, %v6973_v57 }
 0x3cb   : > { %v2262_v63 = vsel %vm1215_vm2, %v2254_v41, %v2255_v23  ;;  %v2263_v58 = vsel %vm1215_vm2, %v2253_v3, %v2254_v41 }
 0x3cc   : > { %v6372_v37 = vpop.permute.xlu1 %2233  ;;  %v2286_v40 = vsel %vm6970_vm7, 0.0, %v2262_v63  ;;  %v2285_v25 = vsel %vm6972_vm9, 0.0, %v2263_v58  ;;  %v4482_v39 = vpop.permute.xlu0 %4481 }
 0x3cd   : > { %v2256_v29 = vrot.slane %v6372_v37, 1  ;;  %v6384_v35 = vsel %vm6974_vm12, %v2226_v4, %v2286_v40  ;;  %v6389_v9 = vsel %vm6976_vm1, %v2222_v47, %v2285_v25  ;;  %v4484_v31 = vunpack.i.h.bf16 %v4482_v39 }
 0x3ce   : > { %v4483_v19 = vunpack.i.l.bf16 %v4482_v39 }
 0x3cf   : > { %v2261_v48 = vsel %vm1215_vm2, %v2255_v23, %v2256_v29 }
 0x3d0   : > { %v2287_v53 = vsel %vm6978_vm3, 0.0, %v2261_v48  ;;  %v6405_v51 = vpop.permute.xlu1 %2241  ;;  %v4245_v24 = vpack.c.bf16 %v4484_v31, %v4483_v19  ;;  %v4492_v26 = vpop.permute.xlu0 %4491  ;;  %v2257_v19 = vrot.slane %v6403_v55, 1 }
 0x3d1   : > { %v6401_v33 = vsel %vm1244_vm14, %v2230_v2, %v2287_v53  ;;  %v4494_v3 = vunpack.i.h.bf16 %v4492_v26  ;;  %v4493_v36 = vunpack.i.l.bf16 %v4492_v26 }
 0x3d3   : > { %v4253_v46 = vpack.c.bf16 %v4494_v3, %v4493_v36 }
 0x3d4   : > { %v4477_v16 = vpop.permute.xlu1 %4476 }
 0x3d5   : > { %v4479_v34 = vunpack.i.h.bf16 %v4477_v16  ;;  %v4478_v12 = vunpack.i.l.bf16 %v4477_v16 }
 0x3d7   : > { %v4241_v15 = vpack.c.bf16 %v4479_v34, %v4478_v12 }
 0x3d8   : > { %v4487_v22 = vpop.permute.xlu1 %4486 }
 0x3d9   : > { %4242 = vmatprep.subr.bf16.mxu1 %v4241_v15  ;;  %v4489_v62 = vunpack.i.h.bf16 %v4487_v22  ;;  %v4488_v30 = vunpack.i.l.bf16 %v4487_v22 }
 0x3da   : > { %4244 = vmatpush3.bf16.msra.mxu1 %v4241_v15 }
 0x3db   : > { %v4249_v32 = vpack.c.bf16 %v4489_v62, %v4488_v30  ;;  %4246 = vmatprep.subr.bf16.mxu1 %v4245_v24  ;;  %v6980_v62 = vld [vmem:[#allocation59_spill] sm:$0xff] }
 0x3dc   : > { %v4497_v38 = vpop.permute.xlu1 %4496  ;;  %vm6981_vm14 = vcmp.eq.s32.totalorder %v5618_v52, %v6980_v62 }
 0x3dd   : > { %v4499_v2 = vunpack.i.h.bf16 %v4497_v38  ;;  %v4498_v44 = vunpack.i.l.bf16 %v4497_v38 }
 0x3de   : > { %4248 = vmatpush3.bf16.msra.mxu1 %v4245_v24  ;;  %v2258_v24 = vrot.slane %v6405_v51, 1 }
 0x3df   : > { %4250 = vmatprep.subr.bf16.mxu1 %v4249_v32  ;;  %v4257_v14 = vpack.c.bf16 %v4499_v2, %v4498_v44 }
 0x3e2   : > { %4252 = vmatpush3.bf16.msra.mxu1 %v4249_v32  ;;  %v2259_v32 = vsel %vm1215_vm2, %v2257_v19, %v2258_v24 }
 0x3e3   : > { %4254 = vmatprep.subr.bf16.mxu1 %v4253_v46  ;;  %v2289_v2 = vsel %vm1278_vm15, 0.0, %v2259_v32 }
 0x3e6   : > { %4256 = vmatpush3.bf16.msra.mxu1 %v4253_v46 }
 0x3e7   : > { %4258 = vmatprep.subr.bf16.mxu1 %v4257_v14 }
 0x3ea   : > { %4260 = vmatpush3.bf16.msra.mxu1 %v4257_v14 }
 0x41c   : > { %v6407_v47 = vpop.f32.mrb[16].mxu0 }
 0x41d   : > { %v6409_v49 = vpop.f32.mrb[17].mxu0 }
 0x452   : > { %v6411_v4 = vpop.f32.mrb[18].mxu0 }
 0x453   : > { %v6413_v54 = vpop.f32.mrb[19].mxu0 }
 0x456   : > { %v6415_v21 = vpop.f32.mrb[20].mxu0 }
 0x457   : > { %v6417_v50 = vpop.f32.mrb[21].mxu0 }
 0x45a   : > { %v6419_v45 = vpop.f32.mrb[22].mxu0 }
 0x45b   : > { %v6421_v23 = vpop.f32.mrb[23].mxu0 }
 0x45e   : > { %v6423_v41 = vpop.f32.mrb[24].mxu0 }
 0x45f   : > { %v6425_v8 = vpop.f32.mrb[25].mxu0 }
 0x462   : > { %v6427_v18 = vpop.f32.mrb[26].mxu0 }
 0x463   : > { %v6429_v63 = vpop.f32.mrb[27].mxu0 }
 0x471   : > { %v6431_v58 = vpop.f32.mrb[28].mxu0 }
 0x472   : > { %v6433_v1 = vpop.f32.mrb[29].mxu0 }
 0x476   : > { %v6435_v40 = vpop.f32.mrb[30].mxu0 }
 0x477   : > { %v6437_v61 = vpop.f32.mrb[31].mxu0 }
 0x47a   : > { %v3939_v25 = vpop.f32.mrb[32].mxu0 }
 0x47b   : > { %v6440_v57 = vadd.f32 %v3939_v25, %v6275_v60  ;;  %v2517_v43 = vpop.f32.mrb[33].mxu0 }
 0x47c   : > { %v6443_v48 = vadd.f32 %v2517_v43, %v6281_v20  ;;  %v2305_v43 = vsel %vm1246_vm8, %v6403_v55, %v2289_v2 }
 0x47d   : > { %2598 = vmax.xlane.f32.xlu1 %v6440_v57 }
 0x47e   : > { %v3942_v6 = vpop.f32.mrb[34].mxu0  ;;  %2596 = vmax.xlane.f32.xlu0 %v6443_v48 }
 0x47f   : > { %v6448_v53 = vadd.f32 %v3942_v6, %v6298_v13  ;;  %v2527_v0 = vpop.f32.mrb[35].mxu0 }
 0x480   : > { %v6451_v16 = vadd.f32 %v2527_v0, %v6303_v28 }
 0x482   : > { %v3945_v39 = vpop.f32.mrb[36].mxu0  ;;  %2602 = vmax.xlane.f32.xlu0 %v6448_v53 }
 0x483   : > { %v6455_v60 = vadd.f32 %v3945_v39, %v6320_v17  ;;  %v2537_v20 = vpop.f32.mrb[37].mxu0  ;;  %v6988_v39 = vld [vmem:[#allocation23_spill] sm:$0xff] }
 0x484   : > { %v6458_v34 = vadd.f32 %v2537_v20, %v6325_v5 }
 0x486   : > { %v3948_v12 = vpop.f32.mrb[38].mxu0  ;;  %2604 = vmax.xlane.f32.xlu1 %v6458_v34  ;;  %2600 = vmax.xlane.f32.xlu0 %v6451_v16 }
 0x487   : > { %v6463_v13 = vadd.f32 %v3948_v12, %v6341_v42  ;;  %v2547_v28 = vpop.f32.mrb[39].mxu0  ;;  %v6990_v12 = vld [vmem:[#allocation26_spill] sm:$0xff] }
 0x488   : > { %v6466_v31 = vadd.f32 %v2547_v28, %v6346_v56  ;;  %v2260_v56 = vsel %vm1215_vm2, %v2256_v29, %v2257_v19  ;;  %v2274_v29 = vsel %vm1215_vm2, %v2258_v24, %v2243_v10  ;;  %v6991_v28 = vld [vmem:[#allocation25_spill] sm:$0xff] }
 0x489   : > { %v2288_v30 = vsel %vm6981_vm14, 0.0, %v2260_v56  ;;  %v2290_v10 = vsel %vm1279_vm11, 0.0, %v2274_v29  ;;  %v6992_v19 = vpack.i.bf16 %v6990_v12, %v6991_v28 }
 0x48a   : > { %v3951_v17 = vpop.f32.mrb[40].mxu0  ;;  %2608 = vmax.xlane.f32.xlu1 %v6466_v31  ;;  %2606 = vmax.xlane.f32.xlu0 %v6455_v60  ;;  %v2304_v3 = vsel %vm1245_vm10, %v6372_v37, %v2288_v30  ;;  %v2306_v44 = vsel %vm1247_vm13, %v6405_v51, %v2290_v10  ;;  %v6987_v51 = vld [vmem:[#allocation24_spill] sm:$0xff] }
 0x48b   : > { %v6472_v5 = vadd.f32 %v3951_v17, %v6361_v11  ;;  %v2557_v15 = vpop.f32.mrb[41].mxu0  ;;  %v6989_v20 = vpack.i.bf16 %v6987_v51, %v6988_v39 }
 0x48c   : > { %v6476_v42 = vadd.f32 %v2557_v15, %v6366_v59 }
 0x48e   : > { %v3954_v22 = vpop.f32.mrb[42].mxu0  ;;  %2612 = vmax.xlane.f32.xlu1 %v6476_v42  ;;  %2610 = vmax.xlane.f32.xlu0 %v6463_v13 }
 0x48f   : > { %v6485_v26 = vadd.f32 %v3954_v22, %v6384_v35  ;;  %v2567_v11 = vpop.f32.mrb[43].mxu0 }
 0x490   : > { %v6491_v59 = vadd.f32 %v2567_v11, %v6389_v9 }
 0x492   : > { %v3957_v36 = vpop.f32.mrb[44].mxu0  ;;  %2616 = vmax.xlane.f32.xlu1 %v6491_v59  ;;  %2614 = vmax.xlane.f32.xlu0 %v6472_v5 }
 0x493   : > { %v6505_v9 = vadd.f32 %v3957_v36, %v2304_v3  ;;  %v2577_v38 = vpop.f32.mrb[45].mxu0 }
 0x494   : > { %v6511_v7 = vadd.f32 %v2577_v38, %v6401_v33 }
 0x496   : > { %v3960_v14 = vpop.f32.mrb[46].mxu0  ;;  %2620 = vmax.xlane.f32.xlu1 %v6511_v7  ;;  %2618 = vmax.xlane.f32.xlu0 %v6485_v26 }
 0x497   : > { %v6522_v25 = vadd.f32 %v3960_v14, %v2306_v44  ;;  %v2587_v6 = vpop.f32.mrb[47].mxu0 }
 0x498   : > { %v6528_v0 = vadd.f32 %v2587_v6, %v2305_v43 }
 0x49a   : > { %2624 = vmax.xlane.f32.xlu1 %v6528_v0  ;;  %2622 = vmax.xlane.f32.xlu0 %v6505_v9 }
 0x49e   : > { %2626 = vmax.xlane.f32.xlu0 %v6522_v25 }
 0x4ab   : > { %4501 = vrot.lane.b32.xlu1 %v6989_v20, %s4755_s6 }
 0x4b4   : > { %4506 = vrot.lane.b32.xlu0 %v6992_v19, %s4755_s6 }
 0x50a   : > { %v2599_v52 = vpop.xlane.xlu1 %2598 }
 0x50b   : > { %v2629_v55 = vsub.f32 %v6440_v57, %v2599_v52  ;;  %v2597_v17 = vpop.xlane.xlu0 %2596 }
 0x50c   : > { %v2628_v15 = vsub.f32 %v6443_v48, %v2597_v17 }
 0x50d   : > { %v2646_v24 = vmul.f32 1.442695, %v2629_v55 }
 0x50e   : > { %v2644_v56 = vmul.f32 1.442695, %v2628_v15 }
 0x50f   : > { %4579 = vpow2.f32 %v2646_v24  ;;  %v2603_v22 = vpop.xlane.xlu0 %2602 }
 0x510   : > { %4581 = vpow2.f32 %v2644_v56  ;;  %v2631_v11 = vsub.f32 %v6448_v53, %v2603_v22 }
 0x512   : > { %v2650_v62 = vmul.f32 1.442695, %v2631_v11 }
 0x513   : > { %v2605_v30 = vpop.xlane.xlu1 %2604  ;;  %v2601_v29 = vpop.xlane.xlu0 %2600 }
 0x514   : > { %4583 = vpow2.f32 %v2650_v62  ;;  %v2632_v32 = vsub.f32 %v6458_v34, %v2605_v30  ;;  %v2630_v35 = vsub.f32 %v6451_v16, %v2601_v29 }
 0x516   : > { %v2652_v3 = vmul.f32 1.442695, %v2632_v32  ;;  %v2648_v57 = vmul.f32 1.442695, %v2630_v35 }
 0x517   : > { %v2609_v36 = vpop.xlane.xlu1 %2608  ;;  %v2607_v38 = vpop.xlane.xlu0 %2606 }
 0x518   : > { %4585 = vpow2.f32 %v2652_v3  ;;  %v2633_v48 = vsub.f32 %v6455_v60, %v2607_v38  ;;  %v2634_v2 = vsub.f32 %v6466_v31, %v2609_v36  ;;  %v6994_v36 = vld [vmem:[#allocation27_spill] sm:$0xff] }
 0x519   : > { %v6547_v27 = vpop.eup %4579  ;;  %4587 = vpow2.f32 %v2648_v57 }
 0x51a   : > { %v6549_v10 = vpop.eup %4581  ;;  %v2654_v53 = vmul.f32 1.442695, %v2633_v48  ;;  %2678 = vadd.xlane.f32.xlu0 %v6547_v27  ;;  %v2656_v33 = vmul.f32 1.442695, %v2634_v2 }
 0x51b   : > { %v2613_v46 = vpop.xlane.xlu1 %2612  ;;  %2676 = vadd.xlane.f32.xlu1 %v6549_v10  ;;  %v2611_v34 = vpop.xlane.xlu0 %2610 }
 0x51c   : > { %v2635_v16 = vsub.f32 %v6463_v13, %v2611_v34  ;;  %4589 = vpow2.f32 %v2654_v53  ;;  %v2636_v43 = vsub.f32 %v6476_v42, %v2613_v46 }
 0x51e   : > { %v6555_v37 = vpop.eup %4583  ;;  %v2658_v60 = vmul.f32 1.442695, %v2635_v16  ;;  %v2660_v31 = vmul.f32 1.442695, %v2636_v43 }
 0x51f   : > { %v2617_v44 = vpop.xlane.xlu1 %2616  ;;  %2682 = vadd.xlane.f32.xlu0 %v6555_v37  ;;  %v2615_v14 = vpop.xlane.xlu0 %2614 }
 0x520   : > { %4591 = vpow2.f32 %v2658_v60  ;;  %v2638_v20 = vsub.f32 %v6491_v59, %v2617_v44  ;;  %v2637_v16 = vsub.f32 %v6472_v5, %v2615_v14 }
 0x521   : > { %4593 = vpow2.f32 %v2656_v33 }
 0x522   : > { %v6559_v6 = vpop.eup %4585  ;;  %4595 = vpow2.f32 %v2660_v31  ;;  %v2664_v42 = vmul.f32 1.442695, %v2638_v20  ;;  %v2662_v2 = vmul.f32 1.442695, %v2637_v16 }
 0x523   : > { %v6561_v51 = vpop.eup %4587  ;;  %v2621_v39 = vpop.xlane.xlu1 %2620  ;;  %2684 = vadd.xlane.f32.xlu1 %v6559_v6 }
 0x524   : > { %v2619_v13 = vpop.xlane.xlu0 %2618  ;;  %2680 = vadd.xlane.f32.xlu0 %v6561_v51  ;;  %v2640_v52 = vsub.f32 %v6511_v7, %v2621_v39  ;;  %4597 = vpow2.f32 %v2664_v42 }
 0x525   : > { %v2639_v60 = vsub.f32 %v6485_v26, %v2619_v13 }
 0x526   : > { %v6566_v12 = vpop.eup %4589  ;;  %v2668_v59 = vmul.f32 1.442695, %v2640_v52 }
 0x527   : > { %v2625_v28 = vpop.xlane.xlu1 %2624  ;;  %v2666_v44 = vmul.f32 1.442695, %v2639_v60 }
 0x528   : > { %v2623_v19 = vpop.xlane.xlu0 %2622  ;;  %2686 = vadd.xlane.f32.xlu0 %v6566_v12  ;;  %v2642_v22 = vsub.f32 %v6528_v0, %v2625_v28  ;;  %4599 = vpow2.f32 %v2668_v59  ;;  %v6993_v0 = vld [vmem:[#allocation28_spill] sm:$0xff] }
 0x529   : > { %v6995_v38 = vpack.i.bf16 %v6993_v0, %v6994_v36  ;;  %v2641_v33 = vsub.f32 %v6505_v9, %v2623_v19 }
 0x52a   : > { %v6570_v55 = vpop.eup %4591  ;;  %v2672_v32 = vmul.f32 1.442695, %v2642_v22 }
 0x52b   : > { %v4502_v15 = vpop.permute.xlu1 %4501  ;;  %v6574_v62 = vpop.eup %4593  ;;  %v2670_v43 = vmul.f32 1.442695, %v2641_v33 }
 0x52c   : > { %v2627_v17 = vpop.xlane.xlu0 %2626  ;;  %2690 = vadd.xlane.f32.xlu0 %v6570_v55  ;;  %v4504_v24 = vunpack.i.h.bf16 %v4502_v15  ;;  %v4503_v56 = vunpack.i.l.bf16 %v4502_v15  ;;  %v6578_v57 = vpop.eup %4595  ;;  %4601 = vpow2.f32 %v2672_v32 }
 0x52d   : > { %v2643_v35 = vsub.f32 %v6522_v25, %v2627_v17 }
 0x52e   : > { %v4261_v11 = vpack.c.bf16 %v4504_v24, %v4503_v56  ;;  %v6585_v53 = vpop.eup %4597 }
 0x52f   : > { %v2674_v48 = vmul.f32 1.442695, %v2643_v35 }
 0x530   : > { %v4507_v30 = vpop.permute.xlu0 %4506  ;;  %2688 = vadd.xlane.f32.xlu0 %v6574_v62  ;;  %4262 = vmatprep.subr.bf16.mxu1 %v4261_v11 }
 0x531   : > { %v4509_v7 = vunpack.i.h.bf16 %v4507_v30  ;;  %v4508_v29 = vunpack.i.l.bf16 %v4507_v30  ;;  %4264 = vmatpush3.bf16.msra.mxu1 %v4261_v11  ;;  %4603 = vpow2.f32 %v2674_v48 }
 0x532   : > { %v6588_v25 = vpop.eup %4599  ;;  %4605 = vpow2.f32 %v2662_v2 }
 0x533   : > { %v4265_v3 = vpack.c.bf16 %v4509_v7, %v4508_v29  ;;  %4607 = vpow2.f32 %v2666_v44 }
 0x534   : > { %2692 = vadd.xlane.f32.xlu0 %v6578_v57  ;;  %4511 = vrot.lane.b32.xlu1 %v6995_v38, %s4755_s6  ;;  %4609 = vpow2.f32 %v2670_v43 }
 0x535   : > { %4266 = vmatprep.subr.bf16.mxu1 %v4265_v3 }
 0x536   : > { %4268 = vmatpush3.bf16.msra.mxu1 %v4265_v3  ;;  %v6591_v46 = vpop.eup %4601 }
 0x538   : > { %2696 = vadd.xlane.f32.xlu0 %v6585_v53 }
 0x53b   : > { %v6594_v34 = vpop.eup %4603 }
 0x53c   : > { %2700 = vadd.xlane.f32.xlu0 %v6588_v25  ;;  %v6600_v39 = vpop.eup %4605 }
 0x53d   : > { %v6603_v31 = vpop.eup %4607 }
 0x53e   : > { %v6606_v20 = vpop.eup %4609 }
 0x540   : > { %2704 = vadd.xlane.f32.xlu0 %v6591_v46 }
 0x544   : > { %2706 = vadd.xlane.f32.xlu0 %v6594_v34 }
 0x558   : > { %2694 = vadd.xlane.f32.xlu1 %v6600_v39 }
 0x55c   : > { %2698 = vadd.xlane.f32.xlu1 %v6603_v31 }
 0x560   : > { %2702 = vadd.xlane.f32.xlu1 %v6606_v20 }
 0x5a7   : > { %v2679_v5 = vpop.xlane.xlu0 %2678 }
 0x5a8   : > { %v2677_v26 = vpop.xlane.xlu1 %2676 }
 0x5a9   : > { %4611 = vrcp.f32 %v2677_v26 }
 0x5aa   : > { %4613 = vrcp.f32 %v2679_v5 }
 0x5ac   : > { %v2683_v14 = vpop.xlane.xlu0 %2682 }
 0x5ad   : > { %4615 = vrcp.f32 %v2683_v14 }
 0x5b0   : > { %v2685_v9 = vpop.xlane.xlu1 %2684 }
 0x5b1   : > { %v2681_v13 = vpop.xlane.xlu0 %2680 }
 0x5b2   : > { %4617 = vrcp.f32 %v2681_v13 }
 0x5b3   : > { %v4612_v28 = vpop.eup %4611  ;;  %4619 = vrcp.f32 %v2685_v9 }
 0x5b4   : > { %v4512_v19 = vpop.permute.xlu1 %4511  ;;  %v2724_v42 = vmul.f32 %v4612_v28, %v6549_v10  ;;  %v4614_v56 = vpop.eup %4613 }
 0x5b5   : > { %v4514_v52 = vunpack.i.h.bf16 %v4512_v19  ;;  %v4513_v17 = vunpack.i.l.bf16 %v4512_v19  ;;  %v2687_v15 = vpop.xlane.xlu0 %2686  ;;  %v2725_v11 = vmul.f32 %v4614_v56, %v6547_v27 }
 0x5b6   : > { %4621 = vrcp.f32 %v2687_v15  ;;  %3993 = vmatprep.mubr.f32.mxu1 %v2724_v42 }
 0x5b7   : > { %v4269_v24 = vpack.c.bf16 %v4514_v52, %v4513_v17  ;;  %v4616_v22 = vpop.eup %4615 }
 0x5b8   : > { %v2727_v32 = vmul.f32 %v4616_v22, %v6555_v37 }
 0x5b9   : > { %v2691_v59 = vpop.xlane.xlu0 %2690  ;;  %4270 = vmatprep.subr.bf16.mxu1 %v4269_v24 }
 0x5ba   : > { %4272 = vmatpush3.bf16.msra.mxu1 %v4269_v24  ;;  %4623 = vrcp.f32 %v2691_v59 }
 0x5bc   : > { %v4618_v30 = vpop.eup %4617 }
 0x5bd   : > { %v4620_v7 = vpop.eup %4619  ;;  %v2689_v29 = vpop.xlane.xlu0 %2688  ;;  %3994 = vmatmul.mubr.f32.vlgmr.msra.gmra.mrb[32].mxu1 %v2725_v11  ;;  %v2726_v10 = vmul.f32 %v4618_v30, %v6561_v51 }
 0x5be   : > { %4625 = vrcp.f32 %v2689_v29  ;;  %v2728_v3 = vmul.f32 %v4620_v7, %v6559_v6 }
 0x5bf   : > { %3996 = vmatprep.mubr.f32.mxu1 %v2726_v10 }
 0x5c0   : > { %v4622_v35 = vpop.eup %4621 }
 0x5c1   : > { %v2693_v0 = vpop.xlane.xlu0 %2692  ;;  %3997 = vmatmul.mubr.f32.gmra.mrb[34].mxu1 %v2727_v32  ;;  %v2729_v27 = vmul.f32 %v4622_v35, %v6566_v12 }
 0x5c2   : > { %4627 = vrcp.f32 %v2693_v0  ;;  %3999 = vmatprep.mubr.f32.mxu1 %v2728_v3 }
 0x5c4   : > { %v4624_v36 = vpop.eup %4623 }
 0x5c5   : > { %4000 = vmatmul.mubr.f32.gmra.mrb[36].mxu1 %v2729_v27  ;;  %v2731_v51 = vmul.f32 %v4624_v36, %v6570_v55  ;;  %v2697_v6 = vpop.xlane.xlu0 %2696 }
 0x5c6   : > { %4629 = vrcp.f32 %v2697_v6 }
 0x5c8   : > { %v4626_v38 = vpop.eup %4625 }
 0x5c9   : > { %v2730_v48 = vmul.f32 %v4626_v38, %v6574_v62  ;;  %v2701_v2 = vpop.xlane.xlu0 %2700 }
 0x5cb   : > { %4002 = vmatprep.mubr.f32.mxu1 %v2730_v48 }
 0x5cc   : > { %v4628_v16 = vpop.eup %4627  ;;  %4003 = vmatmul.mubr.f32.gmra.mrb[38].mxu1 %v2731_v51 }
 0x5cd   : > { %v2732_v37 = vmul.f32 %v4628_v16, %v6578_v57  ;;  %v2705_v44 = vpop.xlane.xlu0 %2704 }
 0x5cf   : > { %4005 = vmatprep.mubr.f32.mxu1 %v2732_v37 }
 0x5d0   : > { %v4630_v55 = vpop.eup %4629 }
 0x5d1   : > { %v2707_v33 = vpop.xlane.xlu0 %2706  ;;  %v2734_v57 = vmul.f32 %v4630_v55, %v6585_v53 }
 0x5e5   : > { %v2695_v60 = vpop.xlane.xlu1 %2694 }
 0x5e6   : > { %4631 = vrcp.f32 %v2695_v60 }
 0x5e7   : > { %4633 = vrcp.f32 %v2701_v2 }
 0x5e9   : > { %v2699_v12 = vpop.xlane.xlu1 %2698 }
 0x5ea   : > { %4635 = vrcp.f32 %v2699_v12 }
 0x5eb   : > { %4637 = vrcp.f32 %v2705_v44 }
 0x5ed   : > { %v2703_v62 = vpop.xlane.xlu1 %2702 }
 0x5ee   : > { %4639 = vrcp.f32 %v2703_v62 }
 0x5ef   : > { %4641 = vrcp.f32 %v2707_v33 }
 0x5f0   : > { %v4632_v43 = vpop.eup %4631 }
 0x5f1   : > { %v2733_v5 = vmul.f32 %v4632_v43, %v6600_v39  ;;  %v4634_v26 = vpop.eup %4633 }
 0x5f2   : > { %v2736_v13 = vmul.f32 %v4634_v26, %v6588_v25 }
 0x5f3   : > { %4006 = vmatmul.mubr.f32.gmra.mrb[40].mxu1 %v2733_v5 }
 0x5f4   : > { %v4636_v14 = vpop.eup %4635  ;;  %4008 = vmatprep.mubr.f32.mxu1 %v2734_v57 }
 0x5f5   : > { %v2735_v9 = vmul.f32 %v4636_v14, %v6603_v31  ;;  %v4638_v28 = vpop.eup %4637 }
 0x5f6   : > { %v2738_v17 = vmul.f32 %v4638_v28, %v6591_v46 }
 0x5f7   : > { %4009 = vmatmul.mubr.f32.gmra.mrb[42].mxu1 %v2735_v9 }
 0x5f8   : > { %v4640_v19 = vpop.eup %4639  ;;  %4011 = vmatprep.mubr.f32.mxu1 %v2736_v13 }
 0x5f9   : > { %v2737_v42 = vmul.f32 %v4640_v19, %v6606_v20  ;;  %v4642_v52 = vpop.eup %4641 }
 0x5fa   : > { %v2739_v53 = vmul.f32 %v4642_v52, %v6594_v34 }
 0x5fb   : > { %4012 = vmatmul.mubr.f32.gmra.mrb[44].mxu1 %v2737_v42 }
 0x5fc   : > { %4014 = vmatprep.mubr.f32.mxu1 %v2738_v17 }
 0x5ff   : > { %4015 = vmatmul.mubr.f32.gmra.mrb[46].mxu1 %v2739_v53 }
 0x690   : > { %v3995_v39 = vpop.f32.mrb[32].mxu1 }
 0x691   : > { %2967 = vrot.lane.b32.xlu0 %v3995_v39, %s4755_s6  ;;  %v2870_v31 = vpop.f32.mrb[33].mxu1 }
 0x694   : > { %v3998_v15 = vpop.f32.mrb[34].mxu1 }
 0x695   : > { %2965 = vrot.lane.b32.xlu0 %v2870_v31, %s4755_s6  ;;  %2971 = vrot.lane.b32.xlu1 %v3998_v15, %s4755_s6  ;;  %v2880_v25 = vpop.f32.mrb[35].mxu1 }
 0x698   : > { %v4001_v24 = vpop.f32.mrb[36].mxu1 }
 0x699   : > { %2969 = vrot.lane.b32.xlu0 %v2880_v25, %s4755_s6  ;;  %v2890_v20 = vpop.f32.mrb[37].mxu1 }
 0x69d   : > { %2975 = vrot.lane.b32.xlu0 %v4001_v24, %s4755_s6 }
 0x69f   : > { %v4004_v46 = vpop.f32.mrb[38].mxu1 }
 0x6a0   : > { %v2900_v56 = vpop.f32.mrb[39].mxu1 }
 0x6a1   : > { %2973 = vrot.lane.b32.xlu0 %v2890_v20, %s4755_s6 }
 0x6a5   : > { %2979 = vrot.lane.b32.xlu0 %v4004_v46, %s4755_s6 }
 0x6a9   : > { %2977 = vrot.lane.b32.xlu0 %v2900_v56, %s4755_s6 }
 0x6c6   : > { %v4007_v34 = vpop.f32.mrb[40].mxu1 }
 0x6c7   : > { %2983 = vrot.lane.b32.xlu0 %v4007_v34, %s4755_s6  ;;  %v2910_v59 = vpop.f32.mrb[41].mxu1 }
 0x6c8   : > { %2981 = vrot.lane.b32.xlu1 %v2910_v59, %s4755_s6 }
 0x6ca   : > { %v4010_v22 = vpop.f32.mrb[42].mxu1 }
 0x6cb   : > { %2987 = vrot.lane.b32.xlu0 %v4010_v22, %s4755_s6  ;;  %v2920_v11 = vpop.f32.mrb[43].mxu1 }
 0x6cc   : > { %2985 = vrot.lane.b32.xlu1 %v2920_v11, %s4755_s6 }
 0x6ce   : > { %v4013_v30 = vpop.f32.mrb[44].mxu1 }
 0x6cf   : > { %2991 = vrot.lane.b32.xlu0 %v4013_v30, %s4755_s6  ;;  %v2930_v7 = vpop.f32.mrb[45].mxu1 }
 0x6d0   : > { %2989 = vrot.lane.b32.xlu1 %v2930_v7, %s4755_s6 }
 0x6d2   : > { %v4016_v29 = vpop.f32.mrb[46].mxu1 }
 0x6d3   : > { %2995 = vrot.lane.b32.xlu0 %v4016_v29, %s4755_s6  ;;  %v2940_v10 = vpop.f32.mrb[47].mxu1 }
 0x6d4   : > { %2993 = vrot.lane.b32.xlu1 %v2940_v10, %s4755_s6  ;;  %s3485_s6 = sshll.u32 (%p4945_p5), %s6996_s11, 5 }
 0x6d5   : > { %s3053_s14 = sadd.s32 (%p4945_p5), %s4741_s30, %s3485_s6 }
 0x6d6   : > { %s3486_s25 = sshll.u32 (%p4945_p5), %s3053_s14, 3 }
 0x6d7   : > { %s3055_s10 = scalar_lea.vmem (%p4945_p5), %s6997_s20, %s3486_s25 }
 0x703   : > { %v2968_v32 = vpop.permute.xlu0 %2967 }
 0x704   : > { %v3014_v35 = vsel %vm893_vm0, %v6407_v47, %v2968_v32 }
 0x705   : > { %3030 = vst [vmem:[%s6644_s16 + $0x8] sm:$0xff] %v3014_v35 }
 0x707   : > { %v2966_v3 = vpop.permute.xlu0 %2965  ;;  %v2972_v0 = vpop.permute.xlu1 %2971 }
 0x708   : > { %v3013_v27 = vsel %vm893_vm0, %v6409_v49, %v2966_v3  ;;  %v3016_v36 = vsel %vm893_vm0, %v6411_v4, %v2972_v0 }
 0x709   : > { %3029 = vst [vmem:[%s6644_s16] sm:$0xff] %v3013_v27  ;;  %3032 = vst [vmem:[%s6644_s16 + $0x18] sm:$0xff] %v3016_v36 }
 0x70b   : > { %v2970_v47 = vpop.permute.xlu0 %2969 }
 0x70c   : > { %v3015_v38 = vsel %vm893_vm0, %v6413_v54, %v2970_v47 }
 0x70d   : > { %3031 = vst [vmem:[%s6644_s16 + $0x10] sm:$0xff] %v3015_v38 }
 0x70f   : > { %v2976_v48 = vpop.permute.xlu0 %2975 }
 0x710   : > { %v3018_v51 = vsel %vm893_vm0, %v6415_v21, %v2976_v48 }
 0x711   : > { %3034 = vst [vmem:[%s6644_s16 + $0x28] sm:$0xff] %v3018_v51 }
 0x713   : > { %v2974_v16 = vpop.permute.xlu0 %2973 }
 0x714   : > { %v3017_v49 = vsel %vm893_vm0, %v6417_v50, %v2974_v16 }
 0x715   : > { %3033 = vst [vmem:[%s6644_s16 + $0x20] sm:$0xff] %v3017_v49 }
 0x717   : > { %v2980_v4 = vpop.permute.xlu0 %2979 }
 0x718   : > { %v3020_v37 = vsel %vm893_vm0, %v6419_v45, %v2980_v4  ;;  %v3123_v57 = vld [vmem:[%s6644_s16 + $0x28] sm:$0xff] (%p4945_p5) }
 0x719   : > { %3036 = vst [vmem:[%s6644_s16 + $0x38] sm:$0xff] %v3020_v37  ;;  %3124 = vst [vmem:[%s3055_s10 + $0x50] sm:$0xff] (%p4945_p5), %v3123_v57 }
 0x71b   : > { %v2978_v54 = vpop.permute.xlu0 %2977 }
 0x71c   : > { %v3019_v6 = vsel %vm893_vm0, %v6421_v23, %v2978_v54  ;;  %v3121_v5 = vld [vmem:[%s6644_s16 + $0x20] sm:$0xff] (%p4945_p5) }
 0x71d   : > { %3035 = vst [vmem:[%s6644_s16 + $0x30] sm:$0xff] %v3019_v6  ;;  %3122 = vst [vmem:[%s3055_s10 + $0x40] sm:$0xff] (%p4945_p5), %v3121_v5 }
 0x720   : > { %v3127_v14 = vld [vmem:[%s6644_s16 + $0x38] sm:$0xff] (%p4945_p5) }
 0x721   : > { %3128 = vst [vmem:[%s3055_s10 + $0x70] sm:$0xff] (%p4945_p5), %v3127_v14 }
 0x724   : > { %v3125_v26 = vld [vmem:[%s6644_s16 + $0x30] sm:$0xff] (%p4945_p5) }
 0x725   : > { %3126 = vst [vmem:[%s3055_s10 + $0x60] sm:$0xff] (%p4945_p5), %v3125_v26 }
 0x739   : > { %v2984_v21 = vpop.permute.xlu0 %2983 }
 0x73a   : > { %v3022_v2 = vsel %vm893_vm0, %v6423_v41, %v2984_v21  ;;  %v2982_v50 = vpop.permute.xlu1 %2981 }
 0x73b   : > { %3038 = vst [vmem:[%s6644_s16 + $0x48] sm:$0xff] %v3022_v2  ;;  %v3021_v60 = vsel %vm893_vm0, %v6425_v8, %v2982_v50 }
 0x73c   : > { %3037 = vst [vmem:[%s6644_s16 + $0x40] sm:$0xff] %v3021_v60 }
 0x73d   : > { %v2988_v45 = vpop.permute.xlu0 %2987 }
 0x73e   : > { %v3024_v44 = vsel %vm893_vm0, %v6427_v18, %v2988_v45  ;;  %v2986_v23 = vpop.permute.xlu1 %2985 }
 0x73f   : > { %3040 = vst [vmem:[%s6644_s16 + $0x58] sm:$0xff] %v3024_v44  ;;  %v3023_v12 = vsel %vm893_vm0, %v6429_v63, %v2986_v23 }
 0x740   : > { %3039 = vst [vmem:[%s6644_s16 + $0x50] sm:$0xff] %v3023_v12 }
 0x741   : > { %v2992_v41 = vpop.permute.xlu0 %2991 }
 0x742   : > { %v3026_v33 = vsel %vm893_vm0, %v6431_v58, %v2992_v41  ;;  %v2990_v62 = vpop.permute.xlu1 %2989  ;;  %3051 = sbr.rel (!%p4945_p5) target bundleno = 1873 (0x751), region = 200  ;;  %v3113_v58 = vld [vmem:[%s6644_s16] sm:$0xff] (%p4945_p5)  ;;  %v3131_v13 = vld [vmem:[%s6644_s16 + $0x48] sm:$0xff] (%p4945_p5) }
 0x743   : > { %3042 = vst [vmem:[%s6644_s16 + $0x68] sm:$0xff] %v3026_v33  ;;  %v3025_v8 = vsel %vm893_vm0, %v6433_v1, %v2990_v62  ;;  %v3115_v1 = vld [vmem:[%s6644_s16 + $0x8] sm:$0xff] (%p4945_p5)  ;;  %v3129_v9 = vld [vmem:[%s6644_s16 + $0x40] sm:$0xff] (%p4945_p5)  ;;  %3114 = vst [vmem:[%s3055_s10] sm:$0xff] (%p4945_p5), %v3113_v58 }
 0x744   : > { %3041 = vst [vmem:[%s6644_s16 + $0x60] sm:$0xff] %v3025_v8  ;;  %3116 = vst [vmem:[%s3055_s10 + $0x10] sm:$0xff] (%p4945_p5), %v3115_v1 }
 0x745   : > { %v2996_v55 = vpop.permute.xlu0 %2995  ;;  %3130 = vst [vmem:[%s3055_s10 + $0x80] sm:$0xff] (%p4945_p5), %v3129_v9  ;;  %3132 = vst [vmem:[%s3055_s10 + $0x90] sm:$0xff] (%p4945_p5), %v3131_v13 }
 0x746   : > { %v3028_v18 = vsel %vm893_vm0, %v6435_v40, %v2996_v55  ;;  %v2994_v43 = vpop.permute.xlu1 %2993  ;;  %v3117_v40 = vld [vmem:[%s6644_s16 + $0x10] sm:$0xff] (%p4945_p5)  ;;  %v3135_v19 = vld [vmem:[%s6644_s16 + $0x58] sm:$0xff] (%p4945_p5) }
 0x747   : > { %3044 = vst [vmem:[%s6644_s16 + $0x78] sm:$0xff] %v3028_v18  ;;  %v3027_v63 = vsel %vm893_vm0, %v6437_v61, %v2994_v43  ;;  %v3119_v61 = vld [vmem:[%s6644_s16 + $0x18] sm:$0xff] (%p4945_p5)  ;;  %v3133_v28 = vld [vmem:[%s6644_s16 + $0x50] sm:$0xff] (%p4945_p5)  ;;  %3118 = vst [vmem:[%s3055_s10 + $0x20] sm:$0xff] (%p4945_p5), %v3117_v40 }
 0x748   : > { %3043 = vst [vmem:[%s6644_s16 + $0x70] sm:$0xff] %v3027_v63  ;;  %3120 = vst [vmem:[%s3055_s10 + $0x30] sm:$0xff] (%p4945_p5), %v3119_v61 }
 0x749   : > { %3134 = vst [vmem:[%s3055_s10 + $0xa0] sm:$0xff] %v3133_v28  ;;  %3136 = vst [vmem:[%s3055_s10 + $0xb0] sm:$0xff] %v3135_v19 }
 0x74a   : > { %v3139_v52 = vld [vmem:[%s6644_s16 + $0x68] sm:$0xff] }
 0x74b   : > { %v3137_v42 = vld [vmem:[%s6644_s16 + $0x60] sm:$0xff]  ;;  %3140 = vst [vmem:[%s3055_s10 + $0xd0] sm:$0xff] %v3139_v52 }
 0x74c   : > { %3138 = vst [vmem:[%s3055_s10 + $0xc0] sm:$0xff] %v3137_v42 }
 0x74e   : > { %v3143_v53 = vld [vmem:[%s6644_s16 + $0x78] sm:$0xff] }
 0x74f   : > { %v3141_v17 = vld [vmem:[%s6644_s16 + $0x70] sm:$0xff]  ;;  %3144 = vst [vmem:[%s3055_s10 + $0xf0] sm:$0xff] %v3143_v53 }
 0x750   : > { %3142 = vst [vmem:[%s3055_s10 + $0xe0] sm:$0xff] %v3141_v17 }
 0x751 PF: > { %s16_s9 = sadd.s32 1, %s4753_s9   ;;  %s6999_s29 = sld [smem:[#allocation11_spill]] }
 0x752   : > { %p6716_p8 = scmp.ge.s32.totalorder %s16_s9, 6   ;;  %s7000_s0 = sld [smem:[#allocation9_spill]] }
 0x753   : > { %s7001_s18 = sld [smem:[#allocation10_spill]]  ;;  %s7003_s21 = smov %s4709_s22 }
 0x754   : > { %s7004_s22 = smov %s4932_s4  ;;  %s7005_s23 = smov %s4717_s24 }
 0x755   : > { %s7006_s24 = smov %s4929_s13  ;;  %s7007_s25 = smov %s4725_s26 }
 0x756   : > { %s7008_s26 = smov %s4913_s5  ;;  %s7009_s27 = smov %s4733_s28 }
 0x757   : > { %s7010_s28 = smov %s6999_s29  ;;  %s7011_s29 = smov %s4745_s7 }
 0x758   : > { %s7012_s30 = smov %s4749_s8  ;;  %s7013_s7 = smov %s7000_s0 }
 0x759   : > { %s7014_s8 = smov %s7001_s18  ;;  %15 = sbr.rel (!%p6716_p8) target bundleno = 12 (0xc), region = 299 }

</bundles_post_ra>
